<compile_context>
chip_gen: v7x
topology: tpu7x:2x2x1
jax: 0.10.0
libtpu: 0.0.40
codegen_flags: <defaults>
</compile_context>

<pallas_src>
import functools

import jax
import jax.numpy as jnp
from jax import lax
from jax.experimental import pallas as pl
from jax.experimental.pallas import tpu as pltpu

EPS = 1e-5                      # BatchNorm2d default eps
LANE = 128                      # channel padding target (lane width)
VMEM_LIMIT = 64 * 1024 * 1024   # explicit scoped-VMEM limit (<= physical on v5e/v6e/v7x)
ACC_TILE_BYTES = 128 * 1024     # target size of one f32 accumulator M-tile


def _round_up(x, m):
    return -(-x // m) * m


def _pick_bh(ho, wo, cop):
    """Largest divisor of ho whose (bh*wo, cop) f32 accumulator tile stays small."""
    best = 1
    for d in range(1, ho + 1):
        if ho % d == 0 and d * wo * cop * 4 <= ACC_TILE_BYTES:
            best = d
    return best


# ---------------------------------------------------------------------------
# Kernel A: conv1 (3x3, stride s, pad 1) [+ fused 1x1 downsample conv] plus
#           per-image BN batch-stat partial sums.  One image per grid step.
#           Input block: bf16, channel lane-padded, +1 spatial zero halo.
#           conv1 output is written into a (+1)-padded buffer (zeroed halo) so
#           conv2 needs no host-side pad.
# ---------------------------------------------------------------------------
def _conv1_ds_kernel(*refs, stride, ho, wo, bh, has_down):
    if has_down:
        (x_ref, w1_ref, wd_ref,
         y1p_ref, s1_ref, q1_ref, yd_ref, sd_ref, qd_ref) = refs
    else:
        x_ref, w1_ref, y1p_ref, s1_ref, q1_ref = refs
        wd_ref = yd_ref = sd_ref = qd_ref = None

    cinp = x_ref.shape[-1]
    cop = y1p_ref.shape[-1]
    out_dt = y1p_ref.dtype

    # Zero the padded output tile once, then overwrite the (ho, wo) centre.
    # (Halo-only stores would save ~one output-sized VMEM vst per image.)
    y1p_ref[0] = jnp.zeros((ho + 2, wo + 2, cop), out_dt)

    def load(r0, c0):
        # Taps read straight from the bf16 input block (identity BN fold ->
        # no affine prologue, no scratch).
        if stride == 1:
            return x_ref[0, r0:r0 + bh, c0:c0 + wo, :]
        return x_ref[0, pl.ds(r0, bh, stride=stride),
                     pl.ds(c0, wo, stride=stride), :]

    s1 = jnp.zeros((1, cop), jnp.float32)
    q1 = jnp.zeros((1, cop), jnp.float32)
    sd = jnp.zeros((1, cop), jnp.float32)
    qd = jnp.zeros((1, cop), jnp.float32)

    # Static M-tile loop over blocks of output rows (taps inner) bounds the
    # carried f32 accumulator.  bh always divides ho.
    for rb in range(ho // bh):
        row0 = rb * bh * stride
        acc = jnp.zeros((bh * wo, cop), jnp.float32)
        for kh in range(3):
            for kw in range(3):
                # 3x3 pad-1 conv: the +1 physical halo cancels the conv pad.
                tap = load(row0 + kh, kw)
                acc = acc + jnp.dot(tap.reshape(bh * wo, cinp),
                                    w1_ref[kh, kw],
                                    preferred_element_type=jnp.float32)
        s1 = s1 + jnp.sum(acc, axis=0, keepdims=True)
        q1 = q1 + jnp.sum(acc * acc, axis=0, keepdims=True)
        y1p_ref[0, 1 + rb * bh:1 + (rb + 1) * bh, 1:1 + wo, :] = (
            acc.reshape(bh, wo, cop).astype(out_dt))

        if has_down:
            # Fused 1x1 conv (pad 0, same stride): centre tap at offset (+1,+1).
            tap = load(row0 + 1, 1)
            accd = jnp.dot(tap.reshape(bh * wo, cinp), wd_ref[0, 0],
                           preferred_element_type=jnp.float32)
            sd = sd + jnp.sum(accd, axis=0, keepdims=True)
            qd = qd + jnp.sum(accd * accd, axis=0, keepdims=True)
            yd_ref[0, rb * bh:(rb + 1) * bh, :, :] = (
                accd.reshape(bh, wo, cop).astype(yd_ref.dtype))

    s1_ref[0] = s1
    q1_ref[0] = q1
    if has_down:
        sd_ref[0] = sd
        qd_ref[0] = qd


def _conv1_downsample(xp, w1, wd, *, stride, ho, wo):
    n, hp, wp, cinp = xp.shape
    cop = w1.shape[-1]
    bh = _pick_bh(ho, wo, cop)
    has_down = wd is not None

    in_specs = [pl.BlockSpec((1, hp, wp, cinp), lambda i: (i, 0, 0, 0)),
                pl.BlockSpec((3, 3, cinp, cop), lambda i: (0, 0, 0, 0))]
    args = [xp, w1]
    out_shape = [jax.ShapeDtypeStruct((n, ho + 2, wo + 2, cop), jnp.bfloat16),
                 jax.ShapeDtypeStruct((n, 1, cop), jnp.float32),
                 jax.ShapeDtypeStruct((n, 1, cop), jnp.float32)]
    out_specs = [pl.BlockSpec((1, ho + 2, wo + 2, cop), lambda i: (i, 0, 0, 0)),
                 pl.BlockSpec((1, 1, cop), lambda i: (i, 0, 0)),
                 pl.BlockSpec((1, 1, cop), lambda i: (i, 0, 0))]
    flops = 2 * n * ho * wo * 9 * cinp * cop
    bytes_accessed = (xp.size * 2 + w1.size * 2
                      + n * (ho + 2) * (wo + 2) * cop * 2 + 2 * n * cop * 4)
    if has_down:
        in_specs.append(pl.BlockSpec((1, 1, cinp, cop), lambda i: (0, 0, 0, 0)))
        args.append(wd)
        out_shape += [jax.ShapeDtypeStruct((n, ho, wo, cop), jnp.bfloat16),
                      jax.ShapeDtypeStruct((n, 1, cop), jnp.float32),
                      jax.ShapeDtypeStruct((n, 1, cop), jnp.float32)]
        out_specs += [pl.BlockSpec((1, ho, wo, cop), lambda i: (i, 0, 0, 0)),
                      pl.BlockSpec((1, 1, cop), lambda i: (i, 0, 0)),
                      pl.BlockSpec((1, 1, cop), lambda i: (i, 0, 0))]
        flops += 2 * n * ho * wo * cinp * cop
        bytes_accessed += wd.size * 2 + n * ho * wo * cop * 2 + 2 * n * cop * 4

    kern = functools.partial(_conv1_ds_kernel, stride=stride, ho=ho, wo=wo,
                             bh=bh, has_down=has_down)
    return pl.pallas_call(
        kern,
        out_shape=tuple(out_shape),
        grid_spec=pltpu.PrefetchScalarGridSpec(
            num_scalar_prefetch=0, grid=(n,),
            in_specs=in_specs, out_specs=out_specs),
        compiler_params=pltpu.CompilerParams(
            dimension_semantics=("parallel",),
            vmem_limit_bytes=VMEM_LIMIT),
        cost_estimate=pl.CostEstimate(flops=flops, transcendentals=0,
                                      bytes_accessed=bytes_accessed),
    )(*args)


# ---------------------------------------------------------------------------
# Kernel B: conv2 (3x3, stride 1, pad 1) with the BN1 affine folded into the
#           LHS.  The affine runs once per image in f32 and is stored into a
#           *bf16* scratch (halo re-zeroed: the conv's zero padding lives in
#           normalized space).  Emits bf16 y2 + BN2 batch-stat partial sums.
# ---------------------------------------------------------------------------
def _conv2_kernel(y1p_ref, w_ref, sc_ref, sh_ref, y2_ref, s_ref, q_ref, xs_ref,
                  *, ho, wo, bh):
    cop = y2_ref.shape[-1]
    hp, wp, _ = xs_ref.shape            # ho + 2, wo + 2, cop

    xv = y1p_ref[0].astype(jnp.float32) * sc_ref[0] + sh_ref[0]
    r = lax.broadcasted_iota(jnp.int32, (hp, wp, 1), 0)
    c = lax.broadcasted_iota(jnp.int32, (hp, wp, 1), 1)
    valid = (r >= 1) & (r <= ho) & (c >= 1) & (c <= wo)
    xs_ref[...] = jnp.where(valid, xv, 0.0).astype(xs_ref.dtype)

    s = jnp.zeros((1, cop), jnp.float32)
    q = jnp.zeros((1, cop), jnp.float32)
    for rb in range(ho // bh):
        row0 = rb * bh
        acc = jnp.zeros((bh * wo, cop), jnp.float32)
        for kh in range(3):
            for kw in range(3):
                tap = xs_ref[row0 + kh:row0 + kh + bh, kw:kw + wo, :]
                acc = acc + jnp.dot(tap.reshape(bh * wo, cop), w_ref[kh, kw],
                                    preferred_element_type=jnp.float32)
        s = s + jnp.sum(acc, axis=0, keepdims=True)
        q = q + jnp.sum(acc * acc, axis=0, keepdims=True)
        y2_ref[0, row0:row0 + bh, :, :] = (
            acc.reshape(bh, wo, cop).astype(y2_ref.dtype))
    s_ref[0] = s
    q_ref[0] = q


def _conv2(y1p, w2, scale1, shift1, *, ho, wo):
    n = y1p.shape[0]
    cop = w2.shape[-1]
    bh = _pick_bh(ho, wo, cop)
    kern = functools.partial(_conv2_kernel, ho=ho, wo=wo, bh=bh)
    flops = 2 * n * ho * wo * 9 * cop * cop
    bytes_accessed = (y1p.size * 2 + w2.size * 2
                      + n * ho * wo * cop * 2 + 2 * n * cop * 4)
    return pl.pallas_call(
        kern,
        out_shape=(jax.ShapeDtypeStruct((n, ho, wo, cop), jnp.bfloat16),
                   jax.ShapeDtypeStruct((n, 1, cop), jnp.float32),
                   jax.ShapeDtypeStruct((n, 1, cop), jnp.float32)),
        grid_spec=pltpu.PrefetchScalarGridSpec(
            num_scalar_prefetch=0, grid=(n,),
            in_specs=[pl.BlockSpec((1, ho + 2, wo + 2, cop),
                                   lambda i: (i, 0, 0, 0)),
                      pl.BlockSpec((3, 3, cop, cop), lambda i: (0, 0, 0, 0)),
                      pl.BlockSpec((1, cop), lambda i: (0, 0)),
                      pl.BlockSpec((1, cop), lambda i: (0, 0))],
            out_specs=[pl.BlockSpec((1, ho, wo, cop), lambda i: (i, 0, 0, 0)),
                       pl.BlockSpec((1, 1, cop), lambda i: (i, 0, 0)),
                       pl.BlockSpec((1, 1, cop), lambda i: (i, 0, 0))],
            scratch_shapes=[pltpu.VMEM((ho + 2, wo + 2, cop), jnp.bfloat16)]),
        compiler_params=pltpu.CompilerParams(
            dimension_semantics=("parallel",),
            vmem_limit_bytes=VMEM_LIMIT),
        cost_estimate=pl.CostEstimate(flops=flops, transcendentals=0,
                                      bytes_accessed=bytes_accessed),
    )(y1p, w2, scale1, shift1)


# ---------------------------------------------------------------------------
# Kernel C: fused BN2 + BN_residual + residual add + ReLU (bf16 in, f32 out)
# ---------------------------------------------------------------------------
def _bn_add_relu_kernel(y_ref, r_ref, s2_ref, h2_ref, sr_ref, hr_ref, o_ref):
    y = y_ref[0].astype(jnp.float32) * s2_ref[0] + h2_ref[0]
    r = r_ref[0].astype(jnp.float32) * sr_ref[0] + hr_ref[0]
    o_ref[0] = jnp.maximum(y + r, 0.0)


def _bn_add_relu(y2, res, s2, h2, sr, hr):
    n, ho, wo, cop = y2.shape
    bytes_accessed = y2.size * 2 + res.size * 2 + n * ho * wo * cop * 4 + 4 * cop * 4
    return pl.pallas_call(
        _bn_add_relu_kernel,
        out_shape=jax.ShapeDtypeStruct((n, ho, wo, cop), jnp.float32),
        grid_spec=pltpu.PrefetchScalarGridSpec(
            num_scalar_prefetch=0, grid=(n,),
            in_specs=[pl.BlockSpec((1, ho, wo, cop), lambda i: (i, 0, 0, 0)),
                      pl.BlockSpec((1, ho, wo, cop), lambda i: (i, 0, 0, 0)),
                      pl.BlockSpec((1, cop), lambda i: (0, 0)),
                      pl.BlockSpec((1, cop), lambda i: (0, 0)),
                      pl.BlockSpec((1, cop), lambda i: (0, 0)),
                      pl.BlockSpec((1, cop), lambda i: (0, 0))],
            out_specs=pl.BlockSpec((1, ho, wo, cop), lambda i: (i, 0, 0, 0))),
        compiler_params=pltpu.CompilerParams(
            dimension_semantics=("parallel",),
            vmem_limit_bytes=VMEM_LIMIT),
        cost_estimate=pl.CostEstimate(flops=4 * n * ho * wo * cop,
                                      transcendentals=0,
                                      bytes_accessed=bytes_accessed),
    )(y2, res, s2, h2, sr, hr)


# ---------------------------------------------------------------------------
# Glue: parameter packing, BN scale/shift folding, forward pass
# ---------------------------------------------------------------------------
def _prep_weight(w, cinp, cop):
    """torch (Co, Ci, kh, kw) -> bf16 (kh, kw, Cin_pad, Cout_pad), zero-padded."""
    co, ci, kh, kw = w.shape
    wt = jnp.transpose(w, (2, 3, 1, 0))
    wt = jnp.pad(wt, ((0, 0), (0, 0), (0, cinp - ci), (0, cop - co)))
    return wt.astype(jnp.bfloat16)


def _pad_vec(v, cop):
    return jnp.pad(v, (0, cop - v.shape[0])).reshape(1, cop)


def _bn_fold(ssum, ssq, gamma_p, beta_p, count):
    """Training-mode BN (biased batch variance) -> per-channel scale/shift."""
    s = jnp.sum(ssum, axis=0)                        # (1, cop)
    q = jnp.sum(ssq, axis=0)
    mean = s / count
    var = jnp.maximum(q / count - mean * mean, 0.0)  # clamp: avoid rsqrt(<0)
    scale = gamma_p * lax.rsqrt(var + EPS)
    shift = beta_p - mean * scale
    return scale, shift


@functools.partial(jax.jit, static_argnames=("c_in", "c_out", "is_downsample"))
def basic_block_forward(x_nchw, p, *, c_in, c_out, is_downsample):
    has_down = is_downsample or (c_in != c_out)
    s1 = 2 if is_downsample else 1
    n, _, h, w = x_nchw.shape
    cinp = _round_up(c_in, LANE)
    cop = _round_up(c_out, LANE)

    # NHWC, lane-pad channels, cast to bf16 on the host (half the input DMA),
    # +1 spatial halo of exact zeros (serves the 3x3 pad and 1x1 centre tap).
    x = jnp.transpose(x_nchw, (0, 2, 3, 1))
    x_bf = jnp.pad(x, ((0, 0), (0, 0), (0, 0), (0, cinp - c_in))).astype(jnp.bfloat16)
    xp = jnp.pad(x_bf, ((0, 0), (1, 1), (1, 1), (0, 0)))

    ho = (h + 2 - 3) // s1 + 1
    wo = (w + 2 - 3) // s1 + 1
    m = float(n * ho * wo)

    w1 = _prep_weight(p['w1'], cinp, cop)
    w2 = _prep_weight(p['w2'], cop, cop)
    wd = _prep_weight(p['wd'], cinp, cop) if has_down else None

    # conv1 (+ fused 1x1 downsample) + BN batch stats.  LeakyReLU(True) has
    # negative_slope == 1.0 (identity) -> no activation after bn1.
    outs = _conv1_downsample(xp, w1, wd, stride=s1, ho=ho, wo=wo)
    if has_down:
        y1p, s1s, s1q, yd, sds, sdq = outs
        scaled, shiftd = _bn_fold(sds, sdq, _pad_vec(p['gd'], cop),
                                  _pad_vec(p['bd'], cop), m)
        res = yd
    else:
        y1p, s1s, s1q = outs
        res = x_bf                                    # identity residual
        scaled = jnp.ones((1, cop), jnp.float32)
        shiftd = jnp.zeros((1, cop), jnp.float32)

    scale1, shift1 = _bn_fold(s1s, s1q, _pad_vec(p['g1'], cop),
                              _pad_vec(p['b1'], cop), m)

    # conv2 with BN1 folded into its LHS load; emits bf16 y2 + BN2 stats.
    y2, s2s, s2q = _conv2(y1p, w2, scale1, shift1, ho=ho, wo=wo)
    scale2, shift2 = _bn_fold(s2s, s2q, _pad_vec(p['g2'], cop),
                              _pad_vec(p['b2'], cop), m)

    # Fused BN2 + BN_downsample + residual add + ReLU.
    out = _bn_add_relu(y2, res, scale2, shift2, scaled, shiftd)

    # Interface glue only (the module returns NCHW with c_out channels); a
    # fused multi-block network would keep the lane-padded NHWC layout here.
    out = out[:, :, :, :c_out]
    return jnp.transpose(out, (0, 3, 1, 2))


# ---------------------------------------------------------------------------
# Deterministic parameter init + pure-JAX f32 reference
# ---------------------------------------------------------------------------
def init_params(key, c_in, c_out, is_downsample):
    ks = jax.random.split(key, 8)
    p = {
        'w1': 0.2 * jax.random.normal(ks[0], (c_out, c_in, 3, 3), jnp.float32),
        'g1': 1.0 + 0.1 * jax.random.normal(ks[1], (c_out,), jnp.float32),
        'b1': 0.1 * jax.random.normal(ks[2], (c_out,), jnp.float32),
        'w2': 0.2 * jax.random.normal(ks[3], (c_out, c_out, 3, 3), jnp.float32),
        'g2': 1.0 + 0.1 * jax.random.normal(ks[4], (c_out,), jnp.float32),
        'b2': 0.1 * jax.random.normal(ks[5], (c_out,), jnp.float32),
    }
    if is_downsample or c_in != c_out:
        p['wd'] = 0.2 * jax.random.normal(ks[6], (c_out, c_in, 1, 1), jnp.float32)
        p['gd'] = 1.0 + 0.05 * jax.random.normal(ks[7], (c_out,), jnp.float32)
        p['bd'] = jnp.full((c_out,), 0.05, jnp.float32)
    return p


def _ref_conv(x_nhwc, w, stride, pad):
    return lax.conv_general_dilated(
        x_nhwc, jnp.transpose(w, (2, 3, 1, 0)),
        window_strides=(stride, stride),
        padding=[(pad, pad), (pad, pad)],
        dimension_numbers=('NHWC', 'HWIO', 'NHWC'))


def _ref_bn(y, g, b):
    mean = jnp.mean(y, axis=(0, 1, 2), keepdims=True)
    var = jnp.mean((y - mean) ** 2, axis=(0, 1, 2), keepdims=True)
    return (y - mean) * lax.rsqrt(var + EPS) * g + b


def ref_forward(x_nchw, p, c_in, c_out, is_downsample):
    has_down = is_downsample or (c_in != c_out)
    s1 = 2 if is_downsample else 1
    x = jnp.transpose(x_nchw, (0, 2, 3, 1)).astype(jnp.float32)
    y = _ref_bn(_ref_conv(x, p['w1'], s1, 1), p['g1'], p['b1'])  # leaky(1.0)=id
    y = _ref_bn(_ref_conv(y, p['w2'], 1, 1), p['g2'], p['b2'])
    xd = _ref_bn(_ref_conv(x, p['wd'], s1, 0), p['gd'], p['bd']) if has_down else x
    out = jnp.maximum(xd + y, 0.0)
    return jnp.transpose(out, (0, 3, 1, 2))


# ---------------------------------------------------------------------------
if __name__ == "__main__":
    N, C_IN, C_OUT, H, W = 2, 4, 8, 16, 16
    IS_DOWNSAMPLE = False      # c_in != c_out -> the 1x1 downsample path is active

    key = jax.random.PRNGKey(0)
    kx, kp = jax.random.split(key)
    x = jax.random.normal(kx, (N, C_IN, H, W), jnp.float32)
    params = init_params(kp, C_IN, C_OUT, IS_DOWNSAMPLE)

    out = basic_block_forward(x, params, c_in=C_IN, c_out=C_OUT,
                              is_downsample=IS_DOWNSAMPLE)
    out = jax.block_until_ready(out)

    ref = ref_forward(x, params, C_IN, C_OUT, IS_DOWNSAMPLE)
    err = float(jnp.max(jnp.abs(out - ref)))
    assert out.shape == (N, C_OUT, H, W), out.shape
    # bf16 activations end-to-end (MXU inputs + stored conv outputs), with f32
    # accumulation / BN statistics -> ~1e-1 absolute tolerance at these
    # activation magnitudes (outputs span ~0..5).
    assert err < 1e-1, f"max abs diff vs reference: {err}"
    print("KERNEL_OK")
</pallas_src>

<mosaic_0001>
module attributes {stable_mosaic.version = 11 : i64} {
  func.func @_conv1_ds_kernel(%arg0: i32, %arg1: memref<1x18x18x128xbf16, #tpu.memory_space<vmem>>, %arg2: memref<3x3x128x128xbf16, #tpu.memory_space<vmem>>, %arg3: memref<1x1x128x128xbf16, #tpu.memory_space<vmem>>, %arg4: memref<1x18x18x128xbf16, #tpu.memory_space<vmem>>, %arg5: memref<1x1x128xf32, #tpu.memory_space<vmem>>, %arg6: memref<1x1x128xf32, #tpu.memory_space<vmem>>, %arg7: memref<1x16x16x128xbf16, #tpu.memory_space<vmem>>, %arg8: memref<1x1x128xf32, #tpu.memory_space<vmem>>, %arg9: memref<1x1x128xf32, #tpu.memory_space<vmem>>) attributes {dimension_semantics = [#tpu.dimension_semantics<parallel>], iteration_bounds = array<i64: 2>, scalar_prefetch = 0 : i64, scratch_operands = 0 : i64, tpu.core_type = #tpu.core_type<tc>, window_params = [{transform_indices = @transform_0, window_bounds = array<i64: 1, 18, 18, 128>}, {pipeline_mode = #tpu.pipeline_mode<synchronous>, transform_indices = @transform_1, window_bounds = array<i64: 3, 3, 128, 128>}, {pipeline_mode = #tpu.pipeline_mode<synchronous>, transform_indices = @transform_2, window_bounds = array<i64: 1, 1, 128, 128>}, {transform_indices = @transform_3, window_bounds = array<i64: 1, 18, 18, 128>}, {transform_indices = @transform_4, window_bounds = array<i64: 1, 1, 128>}, {transform_indices = @transform_5, window_bounds = array<i64: 1, 1, 128>}, {transform_indices = @transform_6, window_bounds = array<i64: 1, 16, 16, 128>}, {transform_indices = @transform_7, window_bounds = array<i64: 1, 1, 128>}, {transform_indices = @transform_8, window_bounds = array<i64: 1, 1, 128>}]} {
    %cst = arith.constant 0.000000e+00 : bf16
    %0 = vector.broadcast %cst : bf16 to vector<18x18x128xbf16>
    %c0 = arith.constant 0 : index
    %c0_0 = arith.constant 0 : index
    %c0_1 = arith.constant 0 : index
    %c0_2 = arith.constant 0 : index
    %1 = vector.load %arg4[%c0, %c0_0, %c0_1, %c0_2] : memref<1x18x18x128xbf16, #tpu.memory_space<vmem>>, vector<1x18x18x128xbf16>
    %2 = vector.shape_cast %1 : vector<1x18x18x128xbf16> to vector<18x18x128xbf16>
    %3 = vector.shape_cast %0 : vector<18x18x128xbf16> to vector<1x18x18x128xbf16>
    tpu.vector_store %arg4[%c0, %c0_0, %c0_1, %c0_2], %3 {strides = array<i32>} : memref<1x18x18x128xbf16, #tpu.memory_space<vmem>>, vector<1x18x18x128xbf16>,
    %cst_3 = arith.constant 0.000000e+00 : f32
    %4 = vector.broadcast %cst_3 : f32 to vector<1x128xf32>
    %cst_4 = arith.constant 0.000000e+00 : f32
    %5 = vector.broadcast %cst_4 : f32 to vector<1x128xf32>
    %cst_5 = arith.constant 0.000000e+00 : f32
    %6 = vector.broadcast %cst_5 : f32 to vector<1x128xf32>
    %cst_6 = arith.constant 0.000000e+00 : f32
    %7 = vector.broadcast %cst_6 : f32 to vector<1x128xf32>
    %cst_7 = arith.constant 0.000000e+00 : f32
    %8 = vector.broadcast %cst_7 : f32 to vector<256x128xf32>
    %c0_8 = arith.constant 0 : index
    %c0_9 = arith.constant 0 : index
    %c0_10 = arith.constant 0 : index
    %c0_11 = arith.constant 0 : index
    %9 = vector.load %arg1[%c0_8, %c0_9, %c0_10, %c0_11] : memref<1x18x18x128xbf16, #tpu.memory_space<vmem>>, vector<1x16x16x128xbf16>
    %10 = vector.shape_cast %9 : vector<1x16x16x128xbf16> to vector<16x16x128xbf16>
    %11 = vector.shape_cast %10 : vector<16x16x128xbf16> to vector<256x128xbf16>
    %c0_12 = arith.constant 0 : index
    %c0_13 = arith.constant 0 : index
    %c0_14 = arith.constant 0 : index
    %c0_15 = arith.constant 0 : index
    %12 = vector.load %arg2[%c0_12, %c0_13, %c0_14, %c0_15] : memref<3x3x128x128xbf16, #tpu.memory_space<vmem>>, vector<1x1x128x128xbf16>
    %13 = vector.shape_cast %12 : vector<1x1x128x128xbf16> to vector<128x128xbf16>
    %cst_16 = arith.constant dense<0.000000e+00> : vector<256x128xf32>
    %14 = tpu.matmul %11, %13, %cst_16 {dimension_numbers = #tpu.dot_dimension_numbers<[1], [0], [0], [1], [0, 0, 1, 1], [], []>} : vector<256x128xbf16>, vector<128x128xbf16>, vector<256x128xf32> -> vector<256x128xf32>
    %15 = arith.addf %8, %14 : vector<256x128xf32>
    %c0_17 = arith.constant 0 : index
    %c0_18 = arith.constant 0 : index
    %c1 = arith.constant 1 : index
    %c0_19 = arith.constant 0 : index
    %16 = vector.load %arg1[%c0_17, %c0_18, %c1, %c0_19] : memref<1x18x18x128xbf16, #tpu.memory_space<vmem>>, vector<1x16x16x128xbf16>
    %17 = vector.shape_cast %16 : vector<1x16x16x128xbf16> to vector<16x16x128xbf16>
    %18 = vector.shape_cast %17 : vector<16x16x128xbf16> to vector<256x128xbf16>
    %c0_20 = arith.constant 0 : index
    %c1_21 = arith.constant 1 : index
    %c0_22 = arith.constant 0 : index
    %c0_23 = arith.constant 0 : index
    %19 = vector.load %arg2[%c0_20, %c1_21, %c0_22, %c0_23] : memref<3x3x128x128xbf16, #tpu.memory_space<vmem>>, vector<1x1x128x128xbf16>
    %20 = vector.shape_cast %19 : vector<1x1x128x128xbf16> to vector<128x128xbf16>
    %cst_24 = arith.constant dense<0.000000e+00> : vector<256x128xf32>
    %21 = tpu.matmul %18, %20, %cst_24 {dimension_numbers = #tpu.dot_dimension_numbers<[1], [0], [0], [1], [0, 0, 1, 1], [], []>} : vector<256x128xbf16>, vector<128x128xbf16>, vector<256x128xf32> -> vector<256x128xf32>
    %22 = arith.addf %15, %21 : vector<256x128xf32>
    %c0_25 = arith.constant 0 : index
    %c0_26 = arith.constant 0 : index
    %c2 = arith.constant 2 : index
    %c0_27 = arith.constant 0 : index
    %23 = vector.load %arg1[%c0_25, %c0_26, %c2, %c0_27] : memref<1x18x18x128xbf16, #tpu.memory_space<vmem>>, vector<1x16x16x128xbf16>
    %24 = vector.shape_cast %23 : vector<1x16x16x128xbf16> to vector<16x16x128xbf16>
    %25 = vector.shape_cast %24 : vector<16x16x128xbf16> to vector<256x128xbf16>
    %c0_28 = arith.constant 0 : index
    %c2_29 = arith.constant 2 : index
    %c0_30 = arith.constant 0 : index
    %c0_31 = arith.constant 0 : index
    %26 = vector.load %arg2[%c0_28, %c2_29, %c0_30, %c0_31] : memref<3x3x128x128xbf16, #tpu.memory_space<vmem>>, vector<1x1x128x128xbf16>
    %27 = vector.shape_cast %26 : vector<1x1x128x128xbf16> to vector<128x128xbf16>
    %cst_32 = arith.constant dense<0.000000e+00> : vector<256x128xf32>
    %28 = tpu.matmul %25, %27, %cst_32 {dimension_numbers = #tpu.dot_dimension_numbers<[1], [0], [0], [1], [0, 0, 1, 1], [], []>} : vector<256x128xbf16>, vector<128x128xbf16>, vector<256x128xf32> -> vector<256x128xf32>
    %29 = arith.addf %22, %28 : vector<256x128xf32>
    %c0_33 = arith.constant 0 : index
    %c1_34 = arith.constant 1 : index
    %c0_35 = arith.constant 0 : index
    %c0_36 = arith.constant 0 : index
    %30 = vector.load %arg1[%c0_33, %c1_34, %c0_35, %c0_36] : memref<1x18x18x128xbf16, #tpu.memory_space<vmem>>, vector<1x16x16x128xbf16>
    %31 = vector.shape_cast %30 : vector<1x16x16x128xbf16> to vector<16x16x128xbf16>
    %32 = vector.shape_cast %31 : vector<16x16x128xbf16> to vector<256x128xbf16>
    %c1_37 = arith.constant 1 : index
    %c0_38 = arith.constant 0 : index
    %c0_39 = arith.constant 0 : index
    %c0_40 = arith.constant 0 : index
    %33 = vector.load %arg2[%c1_37, %c0_38, %c0_39, %c0_40] : memref<3x3x128x128xbf16, #tpu.memory_space<vmem>>, vector<1x1x128x128xbf16>
    %34 = vector.shape_cast %33 : vector<1x1x128x128xbf16> to vector<128x128xbf16>
    %cst_41 = arith.constant dense<0.000000e+00> : vector<256x128xf32>
    %35 = tpu.matmul %32, %34, %cst_41 {dimension_numbers = #tpu.dot_dimension_numbers<[1], [0], [0], [1], [0, 0, 1, 1], [], []>} : vector<256x128xbf16>, vector<128x128xbf16>, vector<256x128xf32> -> vector<256x128xf32>
    %36 = arith.addf %29, %35 : vector<256x128xf32>
    %c0_42 = arith.constant 0 : index
    %c1_43 = arith.constant 1 : index
    %c1_44 = arith.constant 1 : index
    %c0_45 = arith.constant 0 : index
    %37 = vector.load %arg1[%c0_42, %c1_43, %c1_44, %c0_45] : memref<1x18x18x128xbf16, #tpu.memory_space<vmem>>, vector<1x16x16x128xbf16>
    %38 = vector.shape_cast %37 : vector<1x16x16x128xbf16> to vector<16x16x128xbf16>
    %39 = vector.shape_cast %38 : vector<16x16x128xbf16> to vector<256x128xbf16>
    %c1_46 = arith.constant 1 : index
    %c1_47 = arith.constant 1 : index
    %c0_48 = arith.constant 0 : index
    %c0_49 = arith.constant 0 : index
    %40 = vector.load %arg2[%c1_46, %c1_47, %c0_48, %c0_49] : memref<3x3x128x128xbf16, #tpu.memory_space<vmem>>, vector<1x1x128x128xbf16>
    %41 = vector.shape_cast %40 : vector<1x1x128x128xbf16> to vector<128x128xbf16>
    %cst_50 = arith.constant dense<0.000000e+00> : vector<256x128xf32>
    %42 = tpu.matmul %39, %41, %cst_50 {dimension_numbers = #tpu.dot_dimension_numbers<[1], [0], [0], [1], [0, 0, 1, 1], [], []>} : vector<256x128xbf16>, vector<128x128xbf16>, vector<256x128xf32> -> vector<256x128xf32>
    %43 = arith.addf %36, %42 : vector<256x128xf32>
    %c0_51 = arith.constant 0 : index
    %c1_52 = arith.constant 1 : index
    %c2_53 = arith.constant 2 : index
    %c0_54 = arith.constant 0 : index
    %44 = vector.load %arg1[%c0_51, %c1_52, %c2_53, %c0_54] : memref<1x18x18x128xbf16, #tpu.memory_space<vmem>>, vector<1x16x16x128xbf16>
    %45 = vector.shape_cast %44 : vector<1x16x16x128xbf16> to vector<16x16x128xbf16>
    %46 = vector.shape_cast %45 : vector<16x16x128xbf16> to vector<256x128xbf16>
    %c1_55 = arith.constant 1 : index
    %c2_56 = arith.constant 2 : index
    %c0_57 = arith.constant 0 : index
    %c0_58 = arith.constant 0 : index
    %47 = vector.load %arg2[%c1_55, %c2_56, %c0_57, %c0_58] : memref<3x3x128x128xbf16, #tpu.memory_space<vmem>>, vector<1x1x128x128xbf16>
    %48 = vector.shape_cast %47 : vector<1x1x128x128xbf16> to vector<128x128xbf16>
    %cst_59 = arith.constant dense<0.000000e+00> : vector<256x128xf32>
    %49 = tpu.matmul %46, %48, %cst_59 {dimension_numbers = #tpu.dot_dimension_numbers<[1], [0], [0], [1], [0, 0, 1, 1], [], []>} : vector<256x128xbf16>, vector<128x128xbf16>, vector<256x128xf32> -> vector<256x128xf32>
    %50 = arith.addf %43, %49 : vector<256x128xf32>
    %c0_60 = arith.constant 0 : index
    %c2_61 = arith.constant 2 : index
    %c0_62 = arith.constant 0 : index
    %c0_63 = arith.constant 0 : index
    %51 = vector.load %arg1[%c0_60, %c2_61, %c0_62, %c0_63] : memref<1x18x18x128xbf16, #tpu.memory_space<vmem>>, vector<1x16x16x128xbf16>
    %52 = vector.shape_cast %51 : vector<1x16x16x128xbf16> to vector<16x16x128xbf16>
    %53 = vector.shape_cast %52 : vector<16x16x128xbf16> to vector<256x128xbf16>
    %c2_64 = arith.constant 2 : index
    %c0_65 = arith.constant 0 : index
    %c0_66 = arith.constant 0 : index
    %c0_67 = arith.constant 0 : index
    %54 = vector.load %arg2[%c2_64, %c0_65, %c0_66, %c0_67] : memref<3x3x128x128xbf16, #tpu.memory_space<vmem>>, vector<1x1x128x128xbf16>
    %55 = vector.shape_cast %54 : vector<1x1x128x128xbf16> to vector<128x128xbf16>
    %cst_68 = arith.constant dense<0.000000e+00> : vector<256x128xf32>
    %56 = tpu.matmul %53, %55, %cst_68 {dimension_numbers = #tpu.dot_dimension_numbers<[1], [0], [0], [1], [0, 0, 1, 1], [], []>} : vector<256x128xbf16>, vector<128x128xbf16>, vector<256x128xf32> -> vector<256x128xf32>
    %57 = arith.addf %50, %56 : vector<256x128xf32>
    %c0_69 = arith.constant 0 : index
    %c2_70 = arith.constant 2 : index
    %c1_71 = arith.constant 1 : index
    %c0_72 = arith.constant 0 : index
    %58 = vector.load %arg1[%c0_69, %c2_70, %c1_71, %c0_72] : memref<1x18x18x128xbf16, #tpu.memory_space<vmem>>, vector<1x16x16x128xbf16>
    %59 = vector.shape_cast %58 : vector<1x16x16x128xbf16> to vector<16x16x128xbf16>
    %60 = vector.shape_cast %59 : vector<16x16x128xbf16> to vector<256x128xbf16>
    %c2_73 = arith.constant 2 : index
    %c1_74 = arith.constant 1 : index
    %c0_75 = arith.constant 0 : index
    %c0_76 = arith.constant 0 : index
    %61 = vector.load %arg2[%c2_73, %c1_74, %c0_75, %c0_76] : memref<3x3x128x128xbf16, #tpu.memory_space<vmem>>, vector<1x1x128x128xbf16>
    %62 = vector.shape_cast %61 : vector<1x1x128x128xbf16> to vector<128x128xbf16>
    %cst_77 = arith.constant dense<0.000000e+00> : vector<256x128xf32>
    %63 = tpu.matmul %60, %62, %cst_77 {dimension_numbers = #tpu.dot_dimension_numbers<[1], [0], [0], [1], [0, 0, 1, 1], [], []>} : vector<256x128xbf16>, vector<128x128xbf16>, vector<256x128xf32> -> vector<256x128xf32>
    %64 = arith.addf %57, %63 : vector<256x128xf32>
    %c0_78 = arith.constant 0 : index
    %c2_79 = arith.constant 2 : index
    %c2_80 = arith.constant 2 : index
    %c0_81 = arith.constant 0 : index
    %65 = vector.load %arg1[%c0_78, %c2_79, %c2_80, %c0_81] : memref<1x18x18x128xbf16, #tpu.memory_space<vmem>>, vector<1x16x16x128xbf16>
    %66 = vector.shape_cast %65 : vector<1x16x16x128xbf16> to vector<16x16x128xbf16>
    %67 = vector.shape_cast %66 : vector<16x16x128xbf16> to vector<256x128xbf16>
    %c2_82 = arith.constant 2 : index
    %c2_83 = arith.constant 2 : index
    %c0_84 = arith.constant 0 : index
    %c0_85 = arith.constant 0 : index
    %68 = vector.load %arg2[%c2_82, %c2_83, %c0_84, %c0_85] : memref<3x3x128x128xbf16, #tpu.memory_space<vmem>>, vector<1x1x128x128xbf16>
    %69 = vector.shape_cast %68 : vector<1x1x128x128xbf16> to vector<128x128xbf16>
    %cst_86 = arith.constant dense<0.000000e+00> : vector<256x128xf32>
    %70 = tpu.matmul %67, %69, %cst_86 {dimension_numbers = #tpu.dot_dimension_numbers<[1], [0], [0], [1], [0, 0, 1, 1], [], []>} : vector<256x128xbf16>, vector<128x128xbf16>, vector<256x128xf32> -> vector<256x128xf32>
    %71 = arith.addf %64, %70 : vector<256x128xf32>
    %cst_87 = arith.constant dense<0.000000e+00> : vector<128xf32>
    %72 = vector.multi_reduction <add>, %71, %cst_87 [0] : vector<256x128xf32> to vector<128xf32>
    %73 = vector.shape_cast %72 : vector<128xf32> to vector<1x128xf32>
    %74 = arith.addf %4, %73 : vector<1x128xf32>
    %75 = arith.mulf %71, %71 : vector<256x128xf32>
    %cst_88 = arith.constant dense<0.000000e+00> : vector<128xf32>
    %76 = vector.multi_reduction <add>, %75, %cst_88 [0] : vector<256x128xf32> to vector<128xf32>
    %77 = vector.shape_cast %76 : vector<128xf32> to vector<1x128xf32>
    %78 = arith.addf %5, %77 : vector<1x128xf32>
    %79 = vector.shape_cast %71 : vector<256x128xf32> to vector<16x16x128xf32>
    %80 = arith.truncf %79 : vector<16x16x128xf32> to vector<16x16x128xbf16>
    %c0_89 = arith.constant 0 : index
    %c1_90 = arith.constant 1 : index
    %c1_91 = arith.constant 1 : index
    %c0_92 = arith.constant 0 : index
    %81 = vector.load %arg4[%c0_89, %c1_90, %c1_91, %c0_92] : memref<1x18x18x128xbf16, #tpu.memory_space<vmem>>, vector<1x16x16x128xbf16>
    %82 = vector.shape_cast %81 : vector<1x16x16x128xbf16> to vector<16x16x128xbf16>
    %83 = vector.shape_cast %80 : vector<16x16x128xbf16> to vector<1x16x16x128xbf16>
    tpu.vector_store %arg4[%c0_89, %c1_90, %c1_91, %c0_92], %83 {strides = array<i32>} : memref<1x18x18x128xbf16, #tpu.memory_space<vmem>>, vector<1x16x16x128xbf16>,
    %c0_93 = arith.constant 0 : index
    %c1_94 = arith.constant 1 : index
    %c1_95 = arith.constant 1 : index
    %c0_96 = arith.constant 0 : index
    %84 = vector.load %arg1[%c0_93, %c1_94, %c1_95, %c0_96] : memref<1x18x18x128xbf16, #tpu.memory_space<vmem>>, vector<1x16x16x128xbf16>
    %85 = vector.shape_cast %84 : vector<1x16x16x128xbf16> to vector<16x16x128xbf16>
    %86 = vector.shape_cast %85 : vector<16x16x128xbf16> to vector<256x128xbf16>
    %c0_97 = arith.constant 0 : index
    %c0_98 = arith.constant 0 : index
    %c0_99 = arith.constant 0 : index
    %c0_100 = arith.constant 0 : index
    %87 = vector.load %arg3[%c0_97, %c0_98, %c0_99, %c0_100] : memref<1x1x128x128xbf16, #tpu.memory_space<vmem>>, vector<1x1x128x128xbf16>
    %88 = vector.shape_cast %87 : vector<1x1x128x128xbf16> to vector<128x128xbf16>
    %cst_101 = arith.constant dense<0.000000e+00> : vector<256x128xf32>
    %89 = tpu.matmul %86, %88, %cst_101 {dimension_numbers = #tpu.dot_dimension_numbers<[1], [0], [0], [1], [0, 0, 1, 1], [], []>} : vector<256x128xbf16>, vector<128x128xbf16>, vector<256x128xf32> -> vector<256x128xf32>
    %cst_102 = arith.constant dense<0.000000e+00> : vector<128xf32>
    %90 = vector.multi_reduction <add>, %89, %cst_102 [0] : vector<256x128xf32> to vector<128xf32>
    %91 = vector.shape_cast %90 : vector<128xf32> to vector<1x128xf32>
    %92 = arith.addf %6, %91 : vector<1x128xf32>
    %93 = arith.mulf %89, %89 : vector<256x128xf32>
    %cst_103 = arith.constant dense<0.000000e+00> : vector<128xf32>
    %94 = vector.multi_reduction <add>, %93, %cst_103 [0] : vector<256x128xf32> to vector<128xf32>
    %95 = vector.shape_cast %94 : vector<128xf32> to vector<1x128xf32>
    %96 = arith.addf %7, %95 : vector<1x128xf32>
    %97 = vector.shape_cast %89 : vector<256x128xf32> to vector<16x16x128xf32>
    %98 = arith.truncf %97 : vector<16x16x128xf32> to vector<16x16x128xbf16>
    %c0_104 = arith.constant 0 : index
    %c0_105 = arith.constant 0 : index
    %c0_106 = arith.constant 0 : index
    %c0_107 = arith.constant 0 : index
    %99 = vector.load %arg7[%c0_104, %c0_105, %c0_106, %c0_107] : memref<1x16x16x128xbf16, #tpu.memory_space<vmem>>, vector<1x16x16x128xbf16>
    %100 = vector.shape_cast %99 : vector<1x16x16x128xbf16> to vector<16x16x128xbf16>
    %101 = vector.shape_cast %98 : vector<16x16x128xbf16> to vector<1x16x16x128xbf16>
    tpu.vector_store %arg7[%c0_104, %c0_105, %c0_106, %c0_107], %101 {strides = array<i32>} : memref<1x16x16x128xbf16, #tpu.memory_space<vmem>>, vector<1x16x16x128xbf16>,
    %c0_108 = arith.constant 0 : index
    %c0_109 = arith.constant 0 : index
    %c0_110 = arith.constant 0 : index
    %102 = vector.load %arg5[%c0_108, %c0_109, %c0_110] : memref<1x1x128xf32, #tpu.memory_space<vmem>>, vector<1x1x128xf32>
    %103 = vector.shape_cast %102 : vector<1x1x128xf32> to vector<1x128xf32>
    %104 = vector.shape_cast %74 : vector<1x128xf32> to vector<1x1x128xf32>
    tpu.vector_store %arg5[%c0_108, %c0_109, %c0_110], %104 {strides = array<i32>} : memref<1x1x128xf32, #tpu.memory_space<vmem>>, vector<1x1x128xf32>,
    %c0_111 = arith.constant 0 : index
    %c0_112 = arith.constant 0 : index
    %c0_113 = arith.constant 0 : index
    %105 = vector.load %arg6[%c0_111, %c0_112, %c0_113] : memref<1x1x128xf32, #tpu.memory_space<vmem>>, vector<1x1x128xf32>
    %106 = vector.shape_cast %105 : vector<1x1x128xf32> to vector<1x128xf32>
    %107 = vector.shape_cast %78 : vector<1x128xf32> to vector<1x1x128xf32>
    tpu.vector_store %arg6[%c0_111, %c0_112, %c0_113], %107 {strides = array<i32>} : memref<1x1x128xf32, #tpu.memory_space<vmem>>, vector<1x1x128xf32>,
    %c0_114 = arith.constant 0 : index
    %c0_115 = arith.constant 0 : index
    %c0_116 = arith.constant 0 : index
    %108 = vector.load %arg8[%c0_114, %c0_115, %c0_116] : memref<1x1x128xf32, #tpu.memory_space<vmem>>, vector<1x1x128xf32>
    %109 = vector.shape_cast %108 : vector<1x1x128xf32> to vector<1x128xf32>
    %110 = vector.shape_cast %92 : vector<1x128xf32> to vector<1x1x128xf32>
    tpu.vector_store %arg8[%c0_114, %c0_115, %c0_116], %110 {strides = array<i32>} : memref<1x1x128xf32, #tpu.memory_space<vmem>>, vector<1x1x128xf32>,
    %c0_117 = arith.constant 0 : index
    %c0_118 = arith.constant 0 : index
    %c0_119 = arith.constant 0 : index
    %111 = vector.load %arg9[%c0_117, %c0_118, %c0_119] : memref<1x1x128xf32, #tpu.memory_space<vmem>>, vector<1x1x128xf32>
    %112 = vector.shape_cast %111 : vector<1x1x128xf32> to vector<1x128xf32>
    %113 = vector.shape_cast %96 : vector<1x128xf32> to vector<1x1x128xf32>
    tpu.vector_store %arg9[%c0_117, %c0_118, %c0_119], %113 {strides = array<i32>} : memref<1x1x128xf32, #tpu.memory_space<vmem>>, vector<1x1x128xf32>,
    return
  }
  func.func @transform_0(%arg0: i32) -> (i32, i32, i32, i32) {
    %c0_i32 = arith.constant 0 : i32
    %c0_i32_0 = arith.constant 0 : i32
    %c0_i32_1 = arith.constant 0 : i32
    %c0_i32_2 = arith.constant 0 : i32
    return %arg0, %c0_i32, %c0_i32_0, %c0_i32_1 : i32, i32, i32, i32
  }
  func.func @transform_1(%arg0: i32) -> (i32, i32, i32, i32) {
    %c0_i32 = arith.constant 0 : i32
    %c0_i32_0 = arith.constant 0 : i32
    %c0_i32_1 = arith.constant 0 : i32
    %c0_i32_2 = arith.constant 0 : i32
    %c0_i32_3 = arith.constant 0 : i32
    return %c0_i32, %c0_i32_0, %c0_i32_1, %c0_i32_2 : i32, i32, i32, i32
  }
  func.func @transform_2(%arg0: i32) -> (i32, i32, i32, i32) {
    %c0_i32 = arith.constant 0 : i32
    %c0_i32_0 = arith.constant 0 : i32
    %c0_i32_1 = arith.constant 0 : i32
    %c0_i32_2 = arith.constant 0 : i32
    %c0_i32_3 = arith.constant 0 : i32
    return %c0_i32, %c0_i32_0, %c0_i32_1, %c0_i32_2 : i32, i32, i32, i32
  }
  func.func @transform_3(%arg0: i32) -> (i32, i32, i32, i32) {
    %c0_i32 = arith.constant 0 : i32
    %c0_i32_0 = arith.constant 0 : i32
    %c0_i32_1 = arith.constant 0 : i32
    %c0_i32_2 = arith.constant 0 : i32
    return %arg0, %c0_i32, %c0_i32_0, %c0_i32_1 : i32, i32, i32, i32
  }
  func.func @transform_4(%arg0: i32) -> (i32, i32, i32) {
    %c0_i32 = arith.constant 0 : i32
    %c0_i32_0 = arith.constant 0 : i32
    %c0_i32_1 = arith.constant 0 : i32
    return %arg0, %c0_i32, %c0_i32_0 : i32, i32, i32
  }
  func.func @transform_5(%arg0: i32) -> (i32, i32, i32) {
    %c0_i32 = arith.constant 0 : i32
    %c0_i32_0 = arith.constant 0 : i32
    %c0_i32_1 = arith.constant 0 : i32
    return %arg0, %c0_i32, %c0_i32_0 : i32, i32, i32
  }
  func.func @transform_6(%arg0: i32) -> (i32, i32, i32, i32) {
    %c0_i32 = arith.constant 0 : i32
    %c0_i32_0 = arith.constant 0 : i32
    %c0_i32_1 = arith.constant 0 : i32
    %c0_i32_2 = arith.constant 0 : i32
    return %arg0, %c0_i32, %c0_i32_0, %c0_i32_1 : i32, i32, i32, i32
  }
  func.func @transform_7(%arg0: i32) -> (i32, i32, i32) {
    %c0_i32 = arith.constant 0 : i32
    %c0_i32_0 = arith.constant 0 : i32
    %c0_i32_1 = arith.constant 0 : i32
    return %arg0, %c0_i32, %c0_i32_0 : i32, i32, i32
  }
  func.func @transform_8(%arg0: i32) -> (i32, i32, i32) {
    %c0_i32 = arith.constant 0 : i32
    %c0_i32_0 = arith.constant 0 : i32
    %c0_i32_1 = arith.constant 0 : i32
    return %arg0, %c0_i32, %c0_i32_0 : i32, i32, i32
  }
}

module attributes {stable_mosaic.version = 11 : i64} {
  func.func @_conv2_kernel(%arg0: i32, %arg1: memref<1x18x18x128xbf16, #tpu.memory_space<vmem>>, %arg2: memref<3x3x128x128xbf16, #tpu.memory_space<vmem>>, %arg3: memref<1x128xf32, #tpu.memory_space<vmem>>, %arg4: memref<1x128xf32, #tpu.memory_space<vmem>>, %arg5: memref<1x16x16x128xbf16, #tpu.memory_space<vmem>>, %arg6: memref<1x1x128xf32, #tpu.memory_space<vmem>>, %arg7: memref<1x1x128xf32, #tpu.memory_space<vmem>>, %arg8: memref<18x18x128xbf16, #tpu.memory_space<vmem>>) attributes {dimension_semantics = [#tpu.dimension_semantics<parallel>], iteration_bounds = array<i64: 2>, scalar_prefetch = 0 : i64, scratch_operands = 1 : i64, tpu.core_type = #tpu.core_type<tc>, window_params = [{transform_indices = @transform_0, window_bounds = array<i64: 1, 18, 18, 128>}, {pipeline_mode = #tpu.pipeline_mode<synchronous>, transform_indices = @transform_1, window_bounds = array<i64: 3, 3, 128, 128>}, {pipeline_mode = #tpu.pipeline_mode<synchronous>, transform_indices = @transform_2, window_bounds = array<i64: 1, 128>}, {pipeline_mode = #tpu.pipeline_mode<synchronous>, transform_indices = @transform_3, window_bounds = array<i64: 1, 128>}, {transform_indices = @transform_4, window_bounds = array<i64: 1, 16, 16, 128>}, {transform_indices = @transform_5, window_bounds = array<i64: 1, 1, 128>}, {transform_indices = @transform_6, window_bounds = array<i64: 1, 1, 128>}]} {
    %c0 = arith.constant 0 : index
    %c0_0 = arith.constant 0 : index
    %c0_1 = arith.constant 0 : index
    %c0_2 = arith.constant 0 : index
    %0 = vector.load %arg1[%c0, %c0_0, %c0_1, %c0_2] : memref<1x18x18x128xbf16, #tpu.memory_space<vmem>>, vector<1x18x18x128xbf16>
    %1 = vector.shape_cast %0 : vector<1x18x18x128xbf16> to vector<18x18x128xbf16>
    %2 = arith.extf %1 : vector<18x18x128xbf16> to vector<18x18x128xf32>
    %c0_3 = arith.constant 0 : index
    %c0_4 = arith.constant 0 : index
    %3 = vector.load %arg3[%c0_3, %c0_4] : memref<1x128xf32, #tpu.memory_space<vmem>>, vector<1x128xf32>
    %4 = vector.shape_cast %3 : vector<1x128xf32> to vector<128xf32>
    %5 = vector.shape_cast %4 : vector<128xf32> to vector<1x1x128xf32>
    %6 = vector.broadcast %5 : vector<1x1x128xf32> to vector<18x18x128xf32>
    %7 = arith.mulf %2, %6 : vector<18x18x128xf32>
    %c0_5 = arith.constant 0 : index
    %c0_6 = arith.constant 0 : index
    %8 = vector.load %arg4[%c0_5, %c0_6] : memref<1x128xf32, #tpu.memory_space<vmem>>, vector<1x128xf32>
    %9 = vector.shape_cast %8 : vector<1x128xf32> to vector<128xf32>
    %10 = vector.shape_cast %9 : vector<128xf32> to vector<1x1x128xf32>
    %11 = vector.broadcast %10 : vector<1x1x128xf32> to vector<18x18x128xf32>
    %12 = arith.addf %7, %11 : vector<18x18x128xf32>
    %13 = tpu.iota {dimensions = array<i32: 0>} : vector<18x18x1xi32>
    %14 = tpu.iota {dimensions = array<i32: 1>} : vector<18x18x1xi32>
    %c1_i32 = arith.constant 1 : i32
    %15 = vector.broadcast %c1_i32 : i32 to vector<18x18x1xi32>
    %16 = arith.cmpi sge, %13, %15 : vector<18x18x1xi32>
    %c16_i32 = arith.constant 16 : i32
    %17 = vector.broadcast %c16_i32 : i32 to vector<18x18x1xi32>
    %18 = arith.cmpi sle, %13, %17 : vector<18x18x1xi32>
    %19 = arith.andi %16, %18 : vector<18x18x1xi1>
    %c1_i32_7 = arith.constant 1 : i32
    %20 = vector.broadcast %c1_i32_7 : i32 to vector<18x18x1xi32>
    %21 = arith.cmpi sge, %14, %20 : vector<18x18x1xi32>
    %22 = arith.andi %19, %21 : vector<18x18x1xi1>
    %c16_i32_8 = arith.constant 16 : i32
    %23 = vector.broadcast %c16_i32_8 : i32 to vector<18x18x1xi32>
    %24 = arith.cmpi sle, %14, %23 : vector<18x18x1xi32>
    %25 = arith.andi %22, %24 : vector<18x18x1xi1>
    %cst = arith.constant 0.000000e+00 : f32
    %26 = vector.shape_cast %25 : vector<18x18x1xi1> to vector<18x18x1xi1>
    %27 = vector.broadcast %26 : vector<18x18x1xi1> to vector<18x18x128xi1>
    %28 = vector.broadcast %cst : f32 to vector<18x18x128xf32>
    %29 = arith.select %27, %12, %28 : vector<18x18x128xi1>, vector<18x18x128xf32>
    %30 = arith.truncf %29 : vector<18x18x128xf32> to vector<18x18x128xbf16>
    %c0_9 = arith.constant 0 : index
    %c0_10 = arith.constant 0 : index
    %c0_11 = arith.constant 0 : index
    %31 = vector.load %arg8[%c0_9, %c0_10, %c0_11] : memref<18x18x128xbf16, #tpu.memory_space<vmem>>, vector<18x18x128xbf16>
    tpu.vector_store %arg8[%c0_9, %c0_10, %c0_11], %30 {strides = array<i32>} : memref<18x18x128xbf16, #tpu.memory_space<vmem>>, vector<18x18x128xbf16>,
    %cst_12 = arith.constant 0.000000e+00 : f32
    %32 = vector.broadcast %cst_12 : f32 to vector<1x128xf32>
    %cst_13 = arith.constant 0.000000e+00 : f32
    %33 = vector.broadcast %cst_13 : f32 to vector<1x128xf32>
    %cst_14 = arith.constant 0.000000e+00 : f32
    %34 = vector.broadcast %cst_14 : f32 to vector<256x128xf32>
    %c0_15 = arith.constant 0 : index
    %c0_16 = arith.constant 0 : index
    %c0_17 = arith.constant 0 : index
    %35 = vector.load %arg8[%c0_15, %c0_16, %c0_17] : memref<18x18x128xbf16, #tpu.memory_space<vmem>>, vector<16x16x128xbf16>
    %36 = vector.shape_cast %35 : vector<16x16x128xbf16> to vector<256x128xbf16>
    %c0_18 = arith.constant 0 : index
    %c0_19 = arith.constant 0 : index
    %c0_20 = arith.constant 0 : index
    %c0_21 = arith.constant 0 : index
    %37 = vector.load %arg2[%c0_18, %c0_19, %c0_20, %c0_21] : memref<3x3x128x128xbf16, #tpu.memory_space<vmem>>, vector<1x1x128x128xbf16>
    %38 = vector.shape_cast %37 : vector<1x1x128x128xbf16> to vector<128x128xbf16>
    %cst_22 = arith.constant dense<0.000000e+00> : vector<256x128xf32>
    %39 = tpu.matmul %36, %38, %cst_22 {dimension_numbers = #tpu.dot_dimension_numbers<[1], [0], [0], [1], [0, 0, 1, 1], [], []>} : vector<256x128xbf16>, vector<128x128xbf16>, vector<256x128xf32> -> vector<256x128xf32>
    %40 = arith.addf %34, %39 : vector<256x128xf32>
    %c0_23 = arith.constant 0 : index
    %c1 = arith.constant 1 : index
    %c0_24 = arith.constant 0 : index
    %41 = vector.load %arg8[%c0_23, %c1, %c0_24] : memref<18x18x128xbf16, #tpu.memory_space<vmem>>, vector<16x16x128xbf16>
    %42 = vector.shape_cast %41 : vector<16x16x128xbf16> to vector<256x128xbf16>
    %c0_25 = arith.constant 0 : index
    %c1_26 = arith.constant 1 : index
    %c0_27 = arith.constant 0 : index
    %c0_28 = arith.constant 0 : index
    %43 = vector.load %arg2[%c0_25, %c1_26, %c0_27, %c0_28] : memref<3x3x128x128xbf16, #tpu.memory_space<vmem>>, vector<1x1x128x128xbf16>
    %44 = vector.shape_cast %43 : vector<1x1x128x128xbf16> to vector<128x128xbf16>
    %cst_29 = arith.constant dense<0.000000e+00> : vector<256x128xf32>
    %45 = tpu.matmul %42, %44, %cst_29 {dimension_numbers = #tpu.dot_dimension_numbers<[1], [0], [0], [1], [0, 0, 1, 1], [], []>} : vector<256x128xbf16>, vector<128x128xbf16>, vector<256x128xf32> -> vector<256x128xf32>
    %46 = arith.addf %40, %45 : vector<256x128xf32>
    %c0_30 = arith.constant 0 : index
    %c2 = arith.constant 2 : index
    %c0_31 = arith.constant 0 : index
    %47 = vector.load %arg8[%c0_30, %c2, %c0_31] : memref<18x18x128xbf16, #tpu.memory_space<vmem>>, vector<16x16x128xbf16>
    %48 = vector.shape_cast %47 : vector<16x16x128xbf16> to vector<256x128xbf16>
    %c0_32 = arith.constant 0 : index
    %c2_33 = arith.constant 2 : index
    %c0_34 = arith.constant 0 : index
    %c0_35 = arith.constant 0 : index
    %49 = vector.load %arg2[%c0_32, %c2_33, %c0_34, %c0_35] : memref<3x3x128x128xbf16, #tpu.memory_space<vmem>>, vector<1x1x128x128xbf16>
    %50 = vector.shape_cast %49 : vector<1x1x128x128xbf16> to vector<128x128xbf16>
    %cst_36 = arith.constant dense<0.000000e+00> : vector<256x128xf32>
    %51 = tpu.matmul %48, %50, %cst_36 {dimension_numbers = #tpu.dot_dimension_numbers<[1], [0], [0], [1], [0, 0, 1, 1], [], []>} : vector<256x128xbf16>, vector<128x128xbf16>, vector<256x128xf32> -> vector<256x128xf32>
    %52 = arith.addf %46, %51 : vector<256x128xf32>
    %c1_37 = arith.constant 1 : index
    %c0_38 = arith.constant 0 : index
    %c0_39 = arith.constant 0 : index
    %53 = vector.load %arg8[%c1_37, %c0_38, %c0_39] : memref<18x18x128xbf16, #tpu.memory_space<vmem>>, vector<16x16x128xbf16>
    %54 = vector.shape_cast %53 : vector<16x16x128xbf16> to vector<256x128xbf16>
    %c1_40 = arith.constant 1 : index
    %c0_41 = arith.constant 0 : index
    %c0_42 = arith.constant 0 : index
    %c0_43 = arith.constant 0 : index
    %55 = vector.load %arg2[%c1_40, %c0_41, %c0_42, %c0_43] : memref<3x3x128x128xbf16, #tpu.memory_space<vmem>>, vector<1x1x128x128xbf16>
    %56 = vector.shape_cast %55 : vector<1x1x128x128xbf16> to vector<128x128xbf16>
    %cst_44 = arith.constant dense<0.000000e+00> : vector<256x128xf32>
    %57 = tpu.matmul %54, %56, %cst_44 {dimension_numbers = #tpu.dot_dimension_numbers<[1], [0], [0], [1], [0, 0, 1, 1], [], []>} : vector<256x128xbf16>, vector<128x128xbf16>, vector<256x128xf32> -> vector<256x128xf32>
    %58 = arith.addf %52, %57 : vector<256x128xf32>
    %c1_45 = arith.constant 1 : index
    %c1_46 = arith.constant 1 : index
    %c0_47 = arith.constant 0 : index
    %59 = vector.load %arg8[%c1_45, %c1_46, %c0_47] : memref<18x18x128xbf16, #tpu.memory_space<vmem>>, vector<16x16x128xbf16>
    %60 = vector.shape_cast %59 : vector<16x16x128xbf16> to vector<256x128xbf16>
    %c1_48 = arith.constant 1 : index
    %c1_49 = arith.constant 1 : index
    %c0_50 = arith.constant 0 : index
    %c0_51 = arith.constant 0 : index
    %61 = vector.load %arg2[%c1_48, %c1_49, %c0_50, %c0_51] : memref<3x3x128x128xbf16, #tpu.memory_space<vmem>>, vector<1x1x128x128xbf16>
    %62 = vector.shape_cast %61 : vector<1x1x128x128xbf16> to vector<128x128xbf16>
    %cst_52 = arith.constant dense<0.000000e+00> : vector<256x128xf32>
    %63 = tpu.matmul %60, %62, %cst_52 {dimension_numbers = #tpu.dot_dimension_numbers<[1], [0], [0], [1], [0, 0, 1, 1], [], []>} : vector<256x128xbf16>, vector<128x128xbf16>, vector<256x128xf32> -> vector<256x128xf32>
    %64 = arith.addf %58, %63 : vector<256x128xf32>
    %c1_53 = arith.constant 1 : index
    %c2_54 = arith.constant 2 : index
    %c0_55 = arith.constant 0 : index
    %65 = vector.load %arg8[%c1_53, %c2_54, %c0_55] : memref<18x18x128xbf16, #tpu.memory_space<vmem>>, vector<16x16x128xbf16>
    %66 = vector.shape_cast %65 : vector<16x16x128xbf16> to vector<256x128xbf16>
    %c1_56 = arith.constant 1 : index
    %c2_57 = arith.constant 2 : index
    %c0_58 = arith.constant 0 : index
    %c0_59 = arith.constant 0 : index
    %67 = vector.load %arg2[%c1_56, %c2_57, %c0_58, %c0_59] : memref<3x3x128x128xbf16, #tpu.memory_space<vmem>>, vector<1x1x128x128xbf16>
    %68 = vector.shape_cast %67 : vector<1x1x128x128xbf16> to vector<128x128xbf16>
    %cst_60 = arith.constant dense<0.000000e+00> : vector<256x128xf32>
    %69 = tpu.matmul %66, %68, %cst_60 {dimension_numbers = #tpu.dot_dimension_numbers<[1], [0], [0], [1], [0, 0, 1, 1], [], []>} : vector<256x128xbf16>, vector<128x128xbf16>, vector<256x128xf32> -> vector<256x128xf32>
    %70 = arith.addf %64, %69 : vector<256x128xf32>
    %c2_61 = arith.constant 2 : index
    %c0_62 = arith.constant 0 : index
    %c0_63 = arith.constant 0 : index
    %71 = vector.load %arg8[%c2_61, %c0_62, %c0_63] : memref<18x18x128xbf16, #tpu.memory_space<vmem>>, vector<16x16x128xbf16>
    %72 = vector.shape_cast %71 : vector<16x16x128xbf16> to vector<256x128xbf16>
    %c2_64 = arith.constant 2 : index
    %c0_65 = arith.constant 0 : index
    %c0_66 = arith.constant 0 : index
    %c0_67 = arith.constant 0 : index
    %73 = vector.load %arg2[%c2_64, %c0_65, %c0_66, %c0_67] : memref<3x3x128x128xbf16, #tpu.memory_space<vmem>>, vector<1x1x128x128xbf16>
    %74 = vector.shape_cast %73 : vector<1x1x128x128xbf16> to vector<128x128xbf16>
    %cst_68 = arith.constant dense<0.000000e+00> : vector<256x128xf32>
    %75 = tpu.matmul %72, %74, %cst_68 {dimension_numbers = #tpu.dot_dimension_numbers<[1], [0], [0], [1], [0, 0, 1, 1], [], []>} : vector<256x128xbf16>, vector<128x128xbf16>, vector<256x128xf32> -> vector<256x128xf32>
    %76 = arith.addf %70, %75 : vector<256x128xf32>
    %c2_69 = arith.constant 2 : index
    %c1_70 = arith.constant 1 : index
    %c0_71 = arith.constant 0 : index
    %77 = vector.load %arg8[%c2_69, %c1_70, %c0_71] : memref<18x18x128xbf16, #tpu.memory_space<vmem>>, vector<16x16x128xbf16>
    %78 = vector.shape_cast %77 : vector<16x16x128xbf16> to vector<256x128xbf16>
    %c2_72 = arith.constant 2 : index
    %c1_73 = arith.constant 1 : index
    %c0_74 = arith.constant 0 : index
    %c0_75 = arith.constant 0 : index
    %79 = vector.load %arg2[%c2_72, %c1_73, %c0_74, %c0_75] : memref<3x3x128x128xbf16, #tpu.memory_space<vmem>>, vector<1x1x128x128xbf16>
    %80 = vector.shape_cast %79 : vector<1x1x128x128xbf16> to vector<128x128xbf16>
    %cst_76 = arith.constant dense<0.000000e+00> : vector<256x128xf32>
    %81 = tpu.matmul %78, %80, %cst_76 {dimension_numbers = #tpu.dot_dimension_numbers<[1], [0], [0], [1], [0, 0, 1, 1], [], []>} : vector<256x128xbf16>, vector<128x128xbf16>, vector<256x128xf32> -> vector<256x128xf32>
    %82 = arith.addf %76, %81 : vector<256x128xf32>
    %c2_77 = arith.constant 2 : index
    %c2_78 = arith.constant 2 : index
    %c0_79 = arith.constant 0 : index
    %83 = vector.load %arg8[%c2_77, %c2_78, %c0_79] : memref<18x18x128xbf16, #tpu.memory_space<vmem>>, vector<16x16x128xbf16>
    %84 = vector.shape_cast %83 : vector<16x16x128xbf16> to vector<256x128xbf16>
    %c2_80 = arith.constant 2 : index
    %c2_81 = arith.constant 2 : index
    %c0_82 = arith.constant 0 : index
    %c0_83 = arith.constant 0 : index
    %85 = vector.load %arg2[%c2_80, %c2_81, %c0_82, %c0_83] : memref<3x3x128x128xbf16, #tpu.memory_space<vmem>>, vector<1x1x128x128xbf16>
    %86 = vector.shape_cast %85 : vector<1x1x128x128xbf16> to vector<128x128xbf16>
    %cst_84 = arith.constant dense<0.000000e+00> : vector<256x128xf32>
    %87 = tpu.matmul %84, %86, %cst_84 {dimension_numbers = #tpu.dot_dimension_numbers<[1], [0], [0], [1], [0, 0, 1, 1], [], []>} : vector<256x128xbf16>, vector<128x128xbf16>, vector<256x128xf32> -> vector<256x128xf32>
    %88 = arith.addf %82, %87 : vector<256x128xf32>
    %cst_85 = arith.constant dense<0.000000e+00> : vector<128xf32>
    %89 = vector.multi_reduction <add>, %88, %cst_85 [0] : vector<256x128xf32> to vector<128xf32>
    %90 = vector.shape_cast %89 : vector<128xf32> to vector<1x128xf32>
    %91 = arith.addf %32, %90 : vector<1x128xf32>
    %92 = arith.mulf %88, %88 : vector<256x128xf32>
    %cst_86 = arith.constant dense<0.000000e+00> : vector<128xf32>
    %93 = vector.multi_reduction <add>, %92, %cst_86 [0] : vector<256x128xf32> to vector<128xf32>
    %94 = vector.shape_cast %93 : vector<128xf32> to vector<1x128xf32>
    %95 = arith.addf %33, %94 : vector<1x128xf32>
    %96 = vector.shape_cast %88 : vector<256x128xf32> to vector<16x16x128xf32>
    %97 = arith.truncf %96 : vector<16x16x128xf32> to vector<16x16x128xbf16>
    %c0_87 = arith.constant 0 : index
    %c0_88 = arith.constant 0 : index
    %c0_89 = arith.constant 0 : index
    %c0_90 = arith.constant 0 : index
    %98 = vector.load %arg5[%c0_87, %c0_88, %c0_89, %c0_90] : memref<1x16x16x128xbf16, #tpu.memory_space<vmem>>, vector<1x16x16x128xbf16>
    %99 = vector.shape_cast %98 : vector<1x16x16x128xbf16> to vector<16x16x128xbf16>
    %100 = vector.shape_cast %97 : vector<16x16x128xbf16> to vector<1x16x16x128xbf16>
    tpu.vector_store %arg5[%c0_87, %c0_88, %c0_89, %c0_90], %100 {strides = array<i32>} : memref<1x16x16x128xbf16, #tpu.memory_space<vmem>>, vector<1x16x16x128xbf16>,
    %c0_91 = arith.constant 0 : index
    %c0_92 = arith.constant 0 : index
    %c0_93 = arith.constant 0 : index
    %101 = vector.load %arg6[%c0_91, %c0_92, %c0_93] : memref<1x1x128xf32, #tpu.memory_space<vmem>>, vector<1x1x128xf32>
    %102 = vector.shape_cast %101 : vector<1x1x128xf32> to vector<1x128xf32>
    %103 = vector.shape_cast %91 : vector<1x128xf32> to vector<1x1x128xf32>
    tpu.vector_store %arg6[%c0_91, %c0_92, %c0_93], %103 {strides = array<i32>} : memref<1x1x128xf32, #tpu.memory_space<vmem>>, vector<1x1x128xf32>,
    %c0_94 = arith.constant 0 : index
    %c0_95 = arith.constant 0 : index
    %c0_96 = arith.constant 0 : index
    %104 = vector.load %arg7[%c0_94, %c0_95, %c0_96] : memref<1x1x128xf32, #tpu.memory_space<vmem>>, vector<1x1x128xf32>
    %105 = vector.shape_cast %104 : vector<1x1x128xf32> to vector<1x128xf32>
    %106 = vector.shape_cast %95 : vector<1x128xf32> to vector<1x1x128xf32>
    tpu.vector_store %arg7[%c0_94, %c0_95, %c0_96], %106 {strides = array<i32>} : memref<1x1x128xf32, #tpu.memory_space<vmem>>, vector<1x1x128xf32>,
    return
  }
  func.func @transform_0(%arg0: i32) -> (i32, i32, i32, i32) {
    %c0_i32 = arith.constant 0 : i32
    %c0_i32_0 = arith.constant 0 : i32
    %c0_i32_1 = arith.constant 0 : i32
    %c0_i32_2 = arith.constant 0 : i32
    return %arg0, %c0_i32, %c0_i32_0, %c0_i32_1 : i32, i32, i32, i32
  }
  func.func @transform_1(%arg0: i32) -> (i32, i32, i32, i32) {
    %c0_i32 = arith.constant 0 : i32
    %c0_i32_0 = arith.constant 0 : i32
    %c0_i32_1 = arith.constant 0 : i32
    %c0_i32_2 = arith.constant 0 : i32
    %c0_i32_3 = arith.constant 0 : i32
    return %c0_i32, %c0_i32_0, %c0_i32_1, %c0_i32_2 : i32, i32, i32, i32
  }
  func.func @transform_2(%arg0: i32) -> (i32, i32) {
    %c0_i32 = arith.constant 0 : i32
    %c0_i32_0 = arith.constant 0 : i32
    %c0_i32_1 = arith.constant 0 : i32
    return %c0_i32, %c0_i32_0 : i32, i32
  }
  func.func @transform_3(%arg0: i32) -> (i32, i32) {
    %c0_i32 = arith.constant 0 : i32
    %c0_i32_0 = arith.constant 0 : i32
    %c0_i32_1 = arith.constant 0 : i32
    return %c0_i32, %c0_i32_0 : i32, i32
  }
  func.func @transform_4(%arg0: i32) -> (i32, i32, i32, i32) {
    %c0_i32 = arith.constant 0 : i32
    %c0_i32_0 = arith.constant 0 : i32
    %c0_i32_1 = arith.constant 0 : i32
    %c0_i32_2 = arith.constant 0 : i32
    return %arg0, %c0_i32, %c0_i32_0, %c0_i32_1 : i32, i32, i32, i32
  }
  func.func @transform_5(%arg0: i32) -> (i32, i32, i32) {
    %c0_i32 = arith.constant 0 : i32
    %c0_i32_0 = arith.constant 0 : i32
    %c0_i32_1 = arith.constant 0 : i32
    return %arg0, %c0_i32, %c0_i32_0 : i32, i32, i32
  }
  func.func @transform_6(%arg0: i32) -> (i32, i32, i32) {
    %c0_i32 = arith.constant 0 : i32
    %c0_i32_0 = arith.constant 0 : i32
    %c0_i32_1 = arith.constant 0 : i32
    return %arg0, %c0_i32, %c0_i32_0 : i32, i32, i32
  }
}

module attributes {stable_mosaic.version = 11 : i64} {
  func.func @_bn_add_relu_kernel(%arg0: i32, %arg1: memref<1x16x16x128xbf16, #tpu.memory_space<vmem>>, %arg2: memref<1x16x16x128xbf16, #tpu.memory_space<vmem>>, %arg3: memref<1x128xf32, #tpu.memory_space<vmem>>, %arg4: memref<1x128xf32, #tpu.memory_space<vmem>>, %arg5: memref<1x128xf32, #tpu.memory_space<vmem>>, %arg6: memref<1x128xf32, #tpu.memory_space<vmem>>, %arg7: memref<1x16x16x128xf32, #tpu.memory_space<vmem>>) attributes {dimension_semantics = [#tpu.dimension_semantics<parallel>], iteration_bounds = array<i64: 2>, scalar_prefetch = 0 : i64, scratch_operands = 0 : i64, tpu.core_type = #tpu.core_type<tc>, window_params = [{transform_indices = @transform_0, window_bounds = array<i64: 1, 16, 16, 128>}, {transform_indices = @transform_1, window_bounds = array<i64: 1, 16, 16, 128>}, {pipeline_mode = #tpu.pipeline_mode<synchronous>, transform_indices = @transform_2, window_bounds = array<i64: 1, 128>}, {pipeline_mode = #tpu.pipeline_mode<synchronous>, transform_indices = @transform_3, window_bounds = array<i64: 1, 128>}, {pipeline_mode = #tpu.pipeline_mode<synchronous>, transform_indices = @transform_4, window_bounds = array<i64: 1, 128>}, {pipeline_mode = #tpu.pipeline_mode<synchronous>, transform_indices = @transform_5, window_bounds = array<i64: 1, 128>}, {transform_indices = @transform_6, window_bounds = array<i64: 1, 16, 16, 128>}]} {
    %c0 = arith.constant 0 : index
    %c0_0 = arith.constant 0 : index
    %c0_1 = arith.constant 0 : index
    %c0_2 = arith.constant 0 : index
    %0 = vector.load %arg1[%c0, %c0_0, %c0_1, %c0_2] : memref<1x16x16x128xbf16, #tpu.memory_space<vmem>>, vector<1x16x16x128xbf16>
    %1 = vector.shape_cast %0 : vector<1x16x16x128xbf16> to vector<16x16x128xbf16>
    %2 = arith.extf %1 : vector<16x16x128xbf16> to vector<16x16x128xf32>
    %c0_3 = arith.constant 0 : index
    %c0_4 = arith.constant 0 : index
    %3 = vector.load %arg3[%c0_3, %c0_4] : memref<1x128xf32, #tpu.memory_space<vmem>>, vector<1x128xf32>
    %4 = vector.shape_cast %3 : vector<1x128xf32> to vector<128xf32>
    %5 = vector.shape_cast %4 : vector<128xf32> to vector<1x1x128xf32>
    %6 = vector.broadcast %5 : vector<1x1x128xf32> to vector<16x16x128xf32>
    %7 = arith.mulf %2, %6 : vector<16x16x128xf32>
    %c0_5 = arith.constant 0 : index
    %c0_6 = arith.constant 0 : index
    %8 = vector.load %arg4[%c0_5, %c0_6] : memref<1x128xf32, #tpu.memory_space<vmem>>, vector<1x128xf32>
    %9 = vector.shape_cast %8 : vector<1x128xf32> to vector<128xf32>
    %10 = vector.shape_cast %9 : vector<128xf32> to vector<1x1x128xf32>
    %11 = vector.broadcast %10 : vector<1x1x128xf32> to vector<16x16x128xf32>
    %12 = arith.addf %7, %11 : vector<16x16x128xf32>
    %c0_7 = arith.constant 0 : index
    %c0_8 = arith.constant 0 : index
    %c0_9 = arith.constant 0 : index
    %c0_10 = arith.constant 0 : index
    %13 = vector.load %arg2[%c0_7, %c0_8, %c0_9, %c0_10] : memref<1x16x16x128xbf16, #tpu.memory_space<vmem>>, vector<1x16x16x128xbf16>
    %14 = vector.shape_cast %13 : vector<1x16x16x128xbf16> to vector<16x16x128xbf16>
    %15 = arith.extf %14 : vector<16x16x128xbf16> to vector<16x16x128xf32>
    %c0_11 = arith.constant 0 : index
    %c0_12 = arith.constant 0 : index
    %16 = vector.load %arg5[%c0_11, %c0_12] : memref<1x128xf32, #tpu.memory_space<vmem>>, vector<1x128xf32>
    %17 = vector.shape_cast %16 : vector<1x128xf32> to vector<128xf32>
    %18 = vector.shape_cast %17 : vector<128xf32> to vector<1x1x128xf32>
    %19 = vector.broadcast %18 : vector<1x1x128xf32> to vector<16x16x128xf32>
    %20 = arith.mulf %15, %19 : vector<16x16x128xf32>
    %c0_13 = arith.constant 0 : index
    %c0_14 = arith.constant 0 : index
    %21 = vector.load %arg6[%c0_13, %c0_14] : memref<1x128xf32, #tpu.memory_space<vmem>>, vector<1x128xf32>
    %22 = vector.shape_cast %21 : vector<1x128xf32> to vector<128xf32>
    %23 = vector.shape_cast %22 : vector<128xf32> to vector<1x1x128xf32>
    %24 = vector.broadcast %23 : vector<1x1x128xf32> to vector<16x16x128xf32>
    %25 = arith.addf %20, %24 : vector<16x16x128xf32>
    %26 = arith.addf %12, %25 : vector<16x16x128xf32>
    %cst = arith.constant 0.000000e+00 : f32
    %27 = vector.broadcast %cst : f32 to vector<16x16x128xf32>
    %28 = arith.maximumf %26, %27 : vector<16x16x128xf32>
    %c0_15 = arith.constant 0 : index
    %c0_16 = arith.constant 0 : index
    %c0_17 = arith.constant 0 : index
    %c0_18 = arith.constant 0 : index
    %29 = vector.load %arg7[%c0_15, %c0_16, %c0_17, %c0_18] : memref<1x16x16x128xf32, #tpu.memory_space<vmem>>, vector<1x16x16x128xf32>
    %30 = vector.shape_cast %29 : vector<1x16x16x128xf32> to vector<16x16x128xf32>
    %31 = vector.shape_cast %28 : vector<16x16x128xf32> to vector<1x16x16x128xf32>
    tpu.vector_store %arg7[%c0_15, %c0_16, %c0_17, %c0_18], %31 {strides = array<i32>} : memref<1x16x16x128xf32, #tpu.memory_space<vmem>>, vector<1x16x16x128xf32>,
    return
  }
  func.func @transform_0(%arg0: i32) -> (i32, i32, i32, i32) {
    %c0_i32 = arith.constant 0 : i32
    %c0_i32_0 = arith.constant 0 : i32
    %c0_i32_1 = arith.constant 0 : i32
    %c0_i32_2 = arith.constant 0 : i32
    return %arg0, %c0_i32, %c0_i32_0, %c0_i32_1 : i32, i32, i32, i32
  }
  func.func @transform_1(%arg0: i32) -> (i32, i32, i32, i32) {
    %c0_i32 = arith.constant 0 : i32
    %c0_i32_0 = arith.constant 0 : i32
    %c0_i32_1 = arith.constant 0 : i32
    %c0_i32_2 = arith.constant 0 : i32
    return %arg0, %c0_i32, %c0_i32_0, %c0_i32_1 : i32, i32, i32, i32
  }
  func.func @transform_2(%arg0: i32) -> (i32, i32) {
    %c0_i32 = arith.constant 0 : i32
    %c0_i32_0 = arith.constant 0 : i32
    %c0_i32_1 = arith.constant 0 : i32
    return %c0_i32, %c0_i32_0 : i32, i32
  }
  func.func @transform_3(%arg0: i32) -> (i32, i32) {
    %c0_i32 = arith.constant 0 : i32
    %c0_i32_0 = arith.constant 0 : i32
    %c0_i32_1 = arith.constant 0 : i32
    return %c0_i32, %c0_i32_0 : i32, i32
  }
  func.func @transform_4(%arg0: i32) -> (i32, i32) {
    %c0_i32 = arith.constant 0 : i32
    %c0_i32_0 = arith.constant 0 : i32
    %c0_i32_1 = arith.constant 0 : i32
    return %c0_i32, %c0_i32_0 : i32, i32
  }
  func.func @transform_5(%arg0: i32) -> (i32, i32) {
    %c0_i32 = arith.constant 0 : i32
    %c0_i32_0 = arith.constant 0 : i32
    %c0_i32_1 = arith.constant 0 : i32
    return %c0_i32, %c0_i32_0 : i32, i32
  }
  func.func @transform_6(%arg0: i32) -> (i32, i32, i32, i32) {
    %c0_i32 = arith.constant 0 : i32
    %c0_i32_0 = arith.constant 0 : i32
    %c0_i32_1 = arith.constant 0 : i32
    %c0_i32_2 = arith.constant 0 : i32
    return %arg0, %c0_i32, %c0_i32_0, %c0_i32_1 : i32, i32, i32, i32
  }
}

</mosaic_0001>

<bundles_post_ra>
// kernel: basic_block_forward.5
= control target key start
LH: loop header
LB: loop body
LE: loop exit
PB: predicated region body
PF: predicated region fallthrough
CT: control target
= control target key end

     0   :  { %s2018_s0 = inlined_call_operand.hbm [shape: bf16[2,16,16,128], index: 0, kind: input, shape index: {}]   ;;  %s2019_s1 = inlined_call_operand.hbm [shape: bf16[2,16,16,128], index: 1, kind: input, shape index: {}]   ;;  %s2020_s2 = inlined_call_operand.hbm [shape: f32[1,128], index: 2, kind: input, shape index: {}]   ;;  %s2021_s3 = inlined_call_operand.hbm [shape: f32[1,128], index: 3, kind: input, shape index: {}]   ;;  %s2022_s4 = inlined_call_operand.hbm [shape: f32[1,128], index: 4, kind: input, shape index: {}]   ;;  %s2023_s5 = inlined_call_operand.hbm [shape: f32[1,128], index: 5, kind: input, shape index: {}]   ;;  %s2024_s6 = inlined_call_operand.hbm [shape: f32[2,16,16,128], index: 6, kind: output, shape index: {}]  }
   0x1   :  { %2028 = sst [smem:[#allocation20_spill]] %s2018_s0 }
   0x2   :  { %2029 = sst [smem:[#allocation21_spill]] %s2020_s2 }
   0x3   :  { %2030 = sst [smem:[#allocation22_spill]] %s2021_s3 }
   0x4   :  { %11 = vsyncpa [#allocation3], 0 }
   0x5   :  { %13 = vsyncpa [#allocation3 + $0x1], 0 }
   0x6   :  { %14 = vsyncpa [#allocation6], 0 }
   0x7   :  { %16 = vsyncpa [#allocation6 + $0x1], 0 }
   0x8   :  { %17 = vsyncpa [#allocation9], 0 }
   0x9   :  { %18 = vsyncpa [#allocation12], 0 }
   0xa   :  { %19 = vsyncpa [#allocation4], 0 }
   0xb   :  { %21 = vsyncpa [#allocation4 + $0x1], 0  ;;  %s1477_s21 = smov 0   ;;  %s1479_s22 = smov 0  }
   0xc   :  { %s1481_s23 = smov 0   ;;  %s1483_s24 = smov 0  }
   0xd LB: > { %s1498_s25 = sadd.s32 4294967295, %s1429_s24   ;;  %s888_s26 = sadd.s32 4294967294, %s1429_s24   ;;  %s1429_s24 = sphi %s1483_s24, %s2055_s24   ;;  %s1425_s23 = sphi %s1481_s23, %s2054_s23   ;;  %s1421_s22 = sphi %s1479_s22, %s2053_s22   ;;  %s1417_s21 = sphi %s1477_s21, %s2052_s21  }
   0xe   : > { %p47_p0 = scmp.ne.s32.totalorder %s1421_s22, %s1417_s21  ;;  %p2025_p1 = scmp.eq.s32.totalorder %s1498_s25, 0 }
   0xf   : > { %p187_p3 = scmp.eq.s32.totalorder %s888_s26, 1  ;;  %p889_p5 = scmp.ge.s32.totalorder %s1429_s24, 1 }
  0x10   : > { %p1507_p4 = por %p2025_p1, %p47_p0  ;;  %p194_p7 = scmp.lt.s32.totalorder %s1429_s24, 3 }
  0x11   : > { %p1512_p6 = por %p187_p3, %p47_p0  ;;  %s1431_s30 = smov [#allocation7]  }
  0x12   : > { %s2031_s27 = scalar_select %p1507_p4, 1, 0 }
  0x13   : > { %s2032_s28 = scalar_select %p1512_p6, 1, 0 }
  0x14   : > { %p1517_p8 = pnand %p889_p5, %p194_p7  ;;  %s207_s7 = sshll.u32 %s1431_s30, 4  ;;  %s208_s7 = int_to_ptr.vmem [resolvable:$true] %s207_s7 }
  0x15   : > { %s1432_s8 = smov [#allocation8]   ;;  %s1433_s11 = smov [#allocation10]  }
  0x16   : > { %s2033_s29 = scalar_select %p1517_p8, 1, 0 }
  0x17   : > { %p1101_p10 = pneg %p1517_p8  ;;  %s218_s9 = sshll.u32 %s1432_s8, 4  ;;  %s1530_s9 = int_to_ptr.vmem [resolvable:$true] %s218_s9 }
  0x18   : > { %s229_s12 = sshll.u32 %s1433_s11, 4  ;;  %s2035_s2 = sld [smem:[#allocation21_spill]]  ;;  %s1532_s12 = int_to_ptr.vmem [resolvable:$true] %s229_s12 }
  0x19   : > { %p1526_p11 = pnand %p1101_p10, %p2025_p1 }
  0x1b   : > { %p1542_p13 = pneg %p1526_p11 }
  0x1e   : > { %s1175_s15 = scalar_lea.hbm %s2035_s2, 16 }
  0x1f   : > { %p1176_p12 = scmp.ne.s32.totalorder %s2035_s2, %s1175_s15  ;;  %p1182_p5 = scmp.lt.u32.totalorder %s1175_s15, %s2035_s2 }
  0x21   : > { %p1178_p0 = pnand %p1542_p13, %p1176_p12 }
  0x23   : > { %p1179_p3 = pneg %p1178_p0 }
  0x25   : > { %p1184_p7 = pnand %p1182_p5, %p1179_p3 }
  0x27   : > { %1187 = shalt.err (!%p1184_p7)
}
  0x28   : > { %s1188_s26 = scalar_lea.vmem %s208_s7, 16  ;;  %s1195_s30 = scalar_lea.vmem %s208_s7, 32 }
  0x29   : > { %p1189_p10 = scmp.ne.s32.totalorder %s208_s7, %s1188_s26  ;;  %p1196_p2 = scmp.lt.s32.totalorder %s208_s7, %s208_s7 }
  0x2a   : > { %p1197_p6 = scmp.lt.s32.totalorder %s1195_s30, %s1188_s26 }
  0x2b   : > { %p1191_p9 = pnand %p1189_p10, %p1542_p13 }
  0x2c   : > { %p1198_p4 = por %p1197_p6, %p1196_p2 }
  0x2d   : > { %p1192_p1 = pneg %p1191_p9 }
  0x2f   : > { %p1199_p8 = pnand %p1198_p4, %p1192_p1 }
  0x31   : > { %1202 = shalt.err (!%p1199_p8)
}
  0x32   : > { %1104 = dma.hbm_to_vmem [thread:$0]  (!%p1526_p11), %s2035_s2, 16, %s208_s7, [#allocation6]  }
  0x33   : > { %s2037_s3 = sld [smem:[#allocation22_spill]] }
  0x39   : > { %s1203_s15 = scalar_lea.hbm %s2037_s3, 16 }
  0x3a   : > { %p1204_p9 = scmp.ne.s32.totalorder %s2037_s3, %s1203_s15  ;;  %p1210_p1 = scmp.lt.u32.totalorder %s1203_s15, %s2037_s3 }
  0x3c   : > { %p1206_p12 = pnand %p1204_p9, %p1542_p13 }
  0x3e   : > { %p1207_p2 = pneg %p1206_p12 }
  0x40   : > { %p1212_p4 = pnand %p1210_p1, %p1207_p2 }
  0x42   : > { %1215 = shalt.err (!%p1212_p4)
}
  0x43   : > { %s1216_s7 = scalar_lea.vmem %s1530_s9, 16  ;;  %s1223_s26 = scalar_lea.vmem %s1530_s9, 32 }
  0x44   : > { %p1217_p6 = scmp.ne.s32.totalorder %s1530_s9, %s1216_s7  ;;  %p1224_p3 = scmp.lt.s32.totalorder %s1530_s9, %s1530_s9 }
  0x45   : > { %p1225_p5 = scmp.lt.s32.totalorder %s1223_s26, %s1216_s7 }
  0x46   : > { %p1219_p8 = pnand %p1217_p6, %p1542_p13 }
  0x47   : > { %p1226_p7 = por %p1225_p5, %p1224_p3 }
  0x48   : > { %p1220_p0 = pneg %p1219_p8 }
  0x4a   : > { %p1227_p10 = pnand %p1226_p7, %p1220_p0 }
  0x4c   : > { %1230 = shalt.err (!%p1227_p10)
}
  0x4d   : > { %1107 = dma.hbm_to_vmem [thread:$0]  (!%p1526_p11), %s2037_s3, 16, %s1530_s9, [#allocation9]  }
  0x4e   : > { %s1231_s14 = scalar_lea.hbm %s2022_s4, 16 }
  0x4f   : > { %p1232_p9 = scmp.ne.s32.totalorder %s2022_s4, %s1231_s14  ;;  %p1238_p1 = scmp.lt.u32.totalorder %s1231_s14, %s2022_s4 }
  0x51   : > { %p1234_p12 = pnand %p1232_p9, %p1542_p13 }
  0x53   : > { %p1235_p2 = pneg %p1234_p12 }
  0x55   : > { %p1240_p4 = pnand %p1238_p1, %p1235_p2 }
  0x57   : > { %1243 = shalt.err (!%p1240_p4)
}
  0x58   : > { %s1244_s9 = scalar_lea.vmem %s1532_s12, 16  ;;  %s1251_s20 = scalar_lea.vmem %s1532_s12, 32 }
  0x59   : > { %p1245_p6 = scmp.ne.s32.totalorder %s1532_s12, %s1244_s9  ;;  %p1252_p3 = scmp.lt.s32.totalorder %s1532_s12, %s1532_s12 }
  0x5a   : > { %p1253_p5 = scmp.lt.s32.totalorder %s1251_s20, %s1244_s9 }
  0x5b   : > { %p1247_p8 = pnand %p1245_p6, %p1542_p13 }
  0x5c   : > { %p1254_p7 = por %p1253_p5, %p1252_p3 }
  0x5d   : > { %p1248_p0 = pneg %p1247_p8 }
  0x5f   : > { %p1255_p10 = pnand %p1254_p7, %p1248_p0 }
  0x61   : > { %1258 = shalt.err (!%p1255_p10)
}
  0x62   : > { %1110 = dma.hbm_to_vmem [thread:$0]  (!%p1526_p11), %s2022_s4, 16, %s1532_s12, [#allocation9]  }
  0x63   : > { %s1434_s30 = smov [#allocation11]   ;;  %s1259_s14 = scalar_lea.hbm %s2023_s5, 16 }
  0x64   : > { %s240_s8 = sshll.u32 %s1434_s30, 4  ;;  %p1260_p9 = scmp.ne.s32.totalorder %s2023_s5, %s1259_s14  ;;  %s241_s8 = int_to_ptr.vmem [resolvable:$true] %s240_s8 }
  0x65   : > { %p1266_p1 = scmp.lt.u32.totalorder %s1259_s14, %s2023_s5 }
  0x66   : > { %p1262_p12 = pnand %p1260_p9, %p1542_p13 }
  0x68   : > { %p1263_p2 = pneg %p1262_p12 }
  0x6a   : > { %p1268_p4 = pnand %p1266_p1, %p1263_p2 }
  0x6c   : > { %1271 = shalt.err (!%p1268_p4)
}
  0x6d   : > { %s1272_s12 = scalar_lea.vmem %s241_s8, 16  ;;  %s1279_s9 = scalar_lea.vmem %s241_s8, 32 }
  0x6e   : > { %p1273_p6 = scmp.ne.s32.totalorder %s241_s8, %s1272_s12  ;;  %p1280_p3 = scmp.lt.s32.totalorder %s241_s8, %s241_s8 }
  0x6f   : > { %p1281_p5 = scmp.lt.s32.totalorder %s1279_s9, %s1272_s12 }
  0x70   : > { %p1275_p8 = pnand %p1273_p6, %p1542_p13 }
  0x71   : > { %p1282_p7 = por %p1281_p5, %p1280_p3 }
  0x72   : > { %p1276_p0 = pneg %p1275_p8 }
  0x74   : > { %p1283_p10 = pnand %p1282_p7, %p1276_p0 }
  0x76   : > { %1286 = shalt.err (!%p1283_p10)
}
  0x77   : > { %1113 = dma.hbm_to_vmem [thread:$0]  (!%p1526_p11), %s2023_s5, 16, %s241_s8, [#allocation12]  }
  0x78   : > { %s1625_s18 = sadd.s32 1, %s1429_s24   ;;  %s34_s10 = sadd.s32 1, %s1425_s23 }
  0x79   : > { %s31_s26 = ssub.s32 %s1429_s24, %s1625_s18  ;;  %p41_p13 = scmp.ne.s32.totalorder %s1425_s23, %s1421_s22 }
  0x7a   : > { %p32_p9 = scmp.eq.s32.totalorder %s31_s26, 0  ;;  %p42_p12 = scmp.eq.s32.totalorder %s1429_s24, 0 }
  0x7b   : > { %p2038_p2 = scmp.eq.s32.totalorder %s1498_s25, 1  ;;  %p1129_p4 = scmp.lt.s32.totalorder %s1429_s24, 2 }
  0x7c   : > { %s1641_s11 = scalar_select %p32_p9, %s1425_s23, %s34_s10  }
  0x7d   : > { %p1635_p1 = por %p2038_p2, %p41_p13  ;;  %p43_p6 = por %p42_p12, %p41_p13 }
  0x7e   : > { %s251_s13 = sand.u32 1, %s1425_s23   ;;  %s918_s8 = sshll.u32 %s1429_s24, 11 }
  0x7f   : > { %s1644_s14 = sshll.u32 %s251_s13, 7  ;;  %s2040_s0 = sld [smem:[#allocation20_spill]] }
  0x80   : > { %s255_s19 = scalar_lea.vmem [#allocation2], %s1644_s14  ;;  %p1657_p11 = pnand %p1129_p4, %p43_p6 }
  0x81   : > { %s262_s12 = sshll.u32 %s255_s19, 4  ;;  %s1661_s20 = scalar_lea.sflag [#allocation3], %s251_s13  ;;  %s1655_s12 = int_to_ptr.vmem [resolvable:$true] %s262_s12 }
  0x82   : > { %p1289_p0 = pneg %p1657_p11 }
  0x85   : > { %s1652_s17 = scalar_lea.hbm %s2040_s0, %s918_s8  ;;  %s1292_s15 = scalar_lea.hbm %s2040_s0, 4096 }
  0x86   : > { %s1287_s7 = scalar_lea.hbm %s1652_s17, 2048  ;;  %p1293_p7 = scmp.lt.u32.totalorder %s1652_s17, %s2040_s0 }
  0x87   : > { %p1288_p8 = scmp.ne.s32.totalorder %s1652_s17, %s1287_s7  ;;  %p1294_p10 = scmp.lt.u32.totalorder %s1292_s15, %s1287_s7 }
  0x88   : > { %p1296_p9 = scmp.lt.u32.totalorder %s1287_s7, %s1652_s17 }
  0x89   : > { %p1290_p3 = pnand %p1289_p0, %p1288_p8  ;;  %p1295_p13 = por %p1294_p10, %p1293_p7 }
  0x8b   : > { %p1291_p5 = pneg %p1290_p3  ;;  %p1297_p12 = por %p1296_p9, %p1295_p13 }
  0x8d   : > { %p1298_p2 = pnand %p1297_p12, %p1291_p5 }
  0x8f   : > { %1301 = shalt.err (!%p1298_p2)
}
  0x90   : > { %s1302_s13 = scalar_lea.vmem %s1655_s12, 2048  ;;  %s1435_s10 = smov [#allocation2]  }
  0x91   : > { %p1303_p4 = scmp.ne.s32.totalorder %s1655_s12, %s1302_s13  ;;  %s1307_s26 = sshll.u32 %s1435_s10, 4  ;;  %s1308_s26 = int_to_ptr.vmem [resolvable:$false] %s1307_s26 }
  0x92   : > { %s1309_s16 = scalar_lea.vmem %s1308_s26, 4096  ;;  %p1310_p3 = scmp.lt.s32.totalorder %s1655_s12, %s1308_s26 }
  0x93   : > { %p1305_p6 = pnand %p1303_p4, %p1289_p0  ;;  %p1311_p7 = scmp.lt.s32.totalorder %s1309_s16, %s1302_s13 }
  0x95   : > { %p1306_p8 = pneg %p1305_p6  ;;  %p1312_p10 = por %p1311_p7, %p1310_p3 }
  0x97   : > { %p1313_p13 = pnand %p1312_p10, %p1306_p8 }
  0x99   : > { %1316 = shalt.err (!%p1313_p13)
}
  0x9a   : > { %s1436_s7 = smov 64   ;;  %s1437_s15 = smov 4  }
  0x9b   : > { %1117 = dma.hbm_to_vmem [thread:$0]  (!%p1657_p11), %s1652_s17, 2048, %s1655_s12, %s1661_s20, %s1436_s7, %s1436_s7, %s1437_s15  }
  0x9c   : > { %s1697_s10 = scalar_lea.hbm %s2019_s1, %s918_s8  ;;  %s276_s26 = scalar_lea.vmem [#allocation5], %s1644_s14 }
  0x9d   : > { %s283_s16 = sshll.u32 %s276_s26, 4  ;;  %s272_s0 = sand.u32 1, %s1429_s24   ;;  %s1700_s16 = int_to_ptr.vmem [resolvable:$true] %s283_s16 }
  0x9e   : > { %s1703_s2 = scalar_lea.sflag [#allocation6], %s272_s0  ;;  %s1317_s3 = scalar_lea.hbm %s1697_s10, 2048 }
  0x9f   : > { %p1318_p5 = scmp.ne.s32.totalorder %s1697_s10, %s1317_s3  ;;  %s1322_s12 = scalar_lea.hbm %s2019_s1, 4096 }
  0xa0   : > { %p1323_p2 = scmp.lt.u32.totalorder %s1697_s10, %s2019_s1  ;;  %p1324_p4 = scmp.lt.u32.totalorder %s1322_s12, %s1317_s3 }
  0xa1   : > { %p1320_p9 = pnand %p1318_p5, %p1289_p0  ;;  %p1326_p8 = scmp.lt.u32.totalorder %s1317_s3, %s1697_s10 }
  0xa2   : > { %p1325_p6 = por %p1324_p4, %p1323_p2 }
  0xa3   : > { %p1321_p12 = pneg %p1320_p9 }
  0xa4   : > { %p1327_p3 = por %p1326_p8, %p1325_p6 }
  0xa6   : > { %p1328_p7 = pnand %p1327_p3, %p1321_p12 }
  0xa8   : > { %1331 = shalt.err (!%p1328_p7)
}
  0xa9   : > { %s1332_s0 = scalar_lea.vmem %s1700_s16, 2048  ;;  %s1438_s14 = smov [#allocation5]  }
  0xaa   : > { %p1333_p10 = scmp.ne.s32.totalorder %s1700_s16, %s1332_s0  ;;  %s1337_s13 = sshll.u32 %s1438_s14, 4  ;;  %s1338_s13 = int_to_ptr.vmem [resolvable:$false] %s1337_s13 }
  0xab   : > { %s1339_s26 = scalar_lea.vmem %s1338_s13, 4096  ;;  %p1340_p9 = scmp.lt.s32.totalorder %s1700_s16, %s1338_s13 }
  0xac   : > { %p1335_p13 = pnand %p1333_p10, %p1289_p0  ;;  %p1341_p2 = scmp.lt.s32.totalorder %s1339_s26, %s1332_s0 }
  0xae   : > { %p1336_p5 = pneg %p1335_p13  ;;  %p1342_p4 = por %p1341_p2, %p1340_p9 }
  0xb0   : > { %p1343_p6 = pnand %p1342_p4, %p1336_p5 }
  0xb2   : > { %1346 = shalt.err (!%p1343_p6)
}
  0xb3   : > { %1120 = dma.hbm_to_vmem [thread:$0]  (!%p1657_p11), %s1697_s10, 2048, %s1700_s16, %s1703_s2, %s1436_s7, %s1436_s7, %s1437_s15  }
  0xb4   : > { %p2042_p0 = scmp.ne.s32.totalorder %s2033_s29, 0 }
  0xb5   : > { %s1735_s3 = sand.u32 (!%p2042_p0), 1, %s1421_s22   ;;  %p2043_p12 = scmp.ne.s32.totalorder (!%p2042_p0), %s2031_s27, 0 }
  0xb6   : > { %295 = sbr.rel (%p2042_p0) target bundleno = 290 (0x122), region = 44  ;;  %s902_s17 = sshll.u32 (!%p2042_p0), %s1735_s3, 7 }
  0xb7   : > { %s298_s8 = scalar_lea.sflag (!%p2042_p0), [#allocation3], %s1735_s3  ;;  %s1739_s12 = scalar_lea.vmem (!%p2042_p0), [#allocation2], %s902_s17 }
  0xbd   : > { %1392 = dma.done.wait (%p2043_p12), %s298_s8, 2048  }
  0xbe   : > { %1394 = vsyncadd (%p2043_p12), %s298_s8, 4294965248  ;;  %s306_s2 = sand.u32 1, %s1498_s25   ;;  %s1746_s9 = scalar_lea.vmem [#allocation5], %s902_s17 }
  0xbf   : > { %s307_s29 = scalar_lea.sflag [#allocation6], %s306_s2 }
  0xc0   : > { %1396 = dma.done.wait (%p2043_p12), %s307_s29, 2048  }
  0xc1   : > { %1398 = vsyncadd (%p2043_p12), %s307_s29, 4294965248  ;;  %p2044_p11 = scmp.eq.s32.totalorder %s1498_s25, 0 }
  0xc3   : > { %1400 = dma.done.wait (%p2044_p11), [#allocation6], 16   ;;  %p2045_p8 = pmov %p2044_p11 }
  0xc5   : > { %1402 = vsyncadd (%p2045_p8), [#allocation6], 4294967280  ;;  %p2046_p3 = pmov %p2045_p8 }
  0xc7   : > { %1404 = dma.done.wait (%p2046_p3), [#allocation9], 32   ;;  %p2047_p7 = pmov %p2046_p3 }
  0xc8   : > { %p2048_p10 = pmov %p2046_p3 }
  0xc9   : > { %1406 = vsyncadd (%p2047_p7), [#allocation9], 4294967264 }
  0xca   : > { %1408 = dma.done.wait (%p2048_p10), [#allocation12], 16   ;;  %p2049_p13 = pmov %p2046_p3 }
  0xcb   : > { %v922_v0 = vld [vmem:[%s1739_s12] sm:$0xff]   ;;  %v1049_v9 = vld [vmem:[%s1739_s12 + $0x8] sm:$0xff]   ;;  %v1050_v20 = vld [vmem:[%s1739_s12 + $0x10] sm:$0xff]   ;;  %s908_s27 = sshll.u32 %s1735_s3, 8  ;;  %s920_s15 = sshll.u32 %s1498_s25, 12 }
  0xcc   : > { %1410 = vsyncadd (%p2049_p13), [#allocation12], 4294967280  ;;  %v1765_v1 = vld [vmem:[#allocation7] ss:$0 sm:$0xff]  ;;  %v923_v2 = vunpack.c.l.bf16 %v922_v0  ;;  %v1768_v4 = vld [vmem:[#allocation10] ss:$0 sm:$0xff]  ;;  %v924_v5 = vunpack.c.h.bf16 %v922_v0  ;;  %v927_v14 = vunpack.c.l.bf16 %v1049_v9  ;;  %v928_v18 = vunpack.c.h.bf16 %v1049_v9  ;;  %s1970_s19 = scalar_lea.hbm %s2024_s6, %s920_s15 }
  0xcd   : > { %v986_v3 = vld [vmem:[%s1746_s9] sm:$0xff]   ;;  %v1064_v10 = vld [vmem:[%s1746_s9 + $0x8] sm:$0xff]   ;;  %v1065_v21 = vld [vmem:[%s1746_s9 + $0x10] sm:$0xff]   ;;  %v931_v32 = vunpack.c.l.bf16 %v1050_v20  ;;  %v932_v41 = vunpack.c.h.bf16 %v1050_v20  ;;  %s1803_s7 = scalar_lea.vmem [#allocation13], %s908_s27  ;;  %s741_s0 = scalar_lea.sflag [#allocation4], %s1735_s3 }
  0xce   : > { %v1770_v6 = vld [vmem:[#allocation8] ss:$0 sm:$0xff]  ;;  %v987_v7 = vunpack.c.l.bf16 %v986_v3  ;;  %v988_v8 = vunpack.c.h.bf16 %v986_v3  ;;  %v431_v11 = vmul.f32 %v923_v2, %v1765_v1  ;;  %v1775_v12 = vld [vmem:[#allocation11] ss:$0 sm:$0xff]  ;;  %v432_v13 = vmul.f32 %v924_v5, %v1765_v1  ;;  %v1051_v42 = vld [vmem:[%s1739_s12 + $0x18] sm:$0xff]   ;;  %s754_s10 = sshll.u32 %s1803_s7, 4  ;;  %s1972_s10 = int_to_ptr.vmem [resolvable:$true] %s754_s10 }
  0xcf   : > { %v991_v15 = vunpack.c.l.bf16 %v1064_v10  ;;  %v992_v19 = vunpack.c.h.bf16 %v1064_v10  ;;  %v433_v24 = vmul.f32 %v927_v14, %v1765_v1  ;;  %v434_v28 = vmul.f32 %v928_v18, %v1765_v1  ;;  %v1066_v43 = vld [vmem:[%s1746_s9 + $0x18] sm:$0xff]   ;;  %v1052_v52 = vld [vmem:[%s1739_s12 + $0x20] sm:$0xff]   ;;  %v1053_v14 = vld [vmem:[%s1739_s12 + $0x28] sm:$0xff]   ;;  %s1347_s14 = scalar_lea.vmem %s1972_s10, 4096  ;;  %s1439_s25 = smov [#allocation13]  }
  0xd0   : > { %v573_v16 = vmul.f32 %v987_v7, %v1768_v4  ;;  %v574_v17 = vmul.f32 %v988_v8, %v1768_v4  ;;  %v470_v22 = vadd.f32 %v1770_v6, %v431_v11  ;;  %v471_v23 = vadd.f32 %v1770_v6, %v432_v13  ;;  %v1067_v57 = vld [vmem:[%s1746_s9 + $0x20] sm:$0xff]   ;;  %p1348_p5 = scmp.ne.s32.totalorder %s1972_s10, %s1347_s14  ;;  %s1351_s13 = sshll.u32 %s1439_s25, 4  ;;  %s1352_s13 = int_to_ptr.vmem [resolvable:$false] %s1351_s13 }
  0xd1   : > { %v575_v25 = vmul.f32 %v991_v15, %v1768_v4  ;;  %v576_v29 = vmul.f32 %v992_v19, %v1768_v4  ;;  %v472_v30 = vadd.f32 %v1770_v6, %v433_v24  ;;  %v995_v33 = vunpack.c.l.bf16 %v1065_v21  ;;  %v1068_v19 = vld [vmem:[%s1746_s9 + $0x28] sm:$0xff]   ;;  %s1353_s26 = scalar_lea.vmem %s1352_s13, 8192  ;;  %p1354_p4 = scmp.lt.s32.totalorder %s1972_s10, %s1352_s13 }
  0xd2   : > { %v612_v26 = vadd.f32 %v1775_v12, %v573_v16  ;;  %v613_v27 = vadd.f32 %v1775_v12, %v574_v17  ;;  %v473_v36 = vadd.f32 %v1770_v6, %v434_v28  ;;  %v435_v39 = vmul.f32 %v931_v32, %v1765_v1  ;;  %v1054_v32 = vld [vmem:[%s1739_s12 + $0x30] sm:$0xff]   ;;  %p1349_p9 = pnand %p1348_p5, %p1635_p1  ;;  %p1355_p6 = scmp.lt.s32.totalorder %s1353_s26, %s1347_s14 }
  0xd3   : > { %v614_v31 = vadd.f32 %v1775_v12, %v575_v25  ;;  %v615_v37 = vadd.f32 %v1775_v12, %v576_v29  ;;  %v577_v40 = vmul.f32 %v995_v33, %v1768_v4  ;;  %v996_v47 = vunpack.c.h.bf16 %v1065_v21  ;;  %v1069_v33 = vld [vmem:[%s1746_s9 + $0x30] sm:$0xff]  }
  0xd4   : > { %v644_v34 = vadd.f32 %v612_v26, %v470_v22  ;;  %v645_v35 = vadd.f32 %v613_v27, %v471_v23  ;;  %v474_v49 = vadd.f32 %v1770_v6, %v435_v39  ;;  %v436_v51 = vmul.f32 %v932_v41, %v1765_v1  ;;  %p1350_p2 = pneg %p1349_p9  ;;  %p1356_p0 = por %p1355_p6, %p1354_p4 }
  0xd5   : > { %v646_v38 = vadd.f32 %v614_v31, %v472_v30  ;;  %v647_v46 = vadd.f32 %v615_v37, %v473_v36  ;;  %v616_v50 = vadd.f32 %v1775_v12, %v577_v40  ;;  %v578_v54 = vmul.f32 %v996_v47, %v1768_v4 }
  0xd6   : > { %v676_v44 = vmax.f32 %v644_v34, 0.0  ;;  %v677_v45 = vmax.f32 %v645_v35, 0.0  ;;  %v935_v55 = vunpack.c.l.bf16 %v1051_v42  ;;  %v999_v56 = vunpack.c.l.bf16 %v1066_v43  ;;  %p1357_p12 = pnand %p1356_p0, %p1350_p2 }
  0xd7   : > { %v678_v48 = vmax.f32 %v646_v38, 0.0  ;;  %v679_v53 = vmax.f32 %v647_v46, 0.0  ;;  %v648_v58 = vadd.f32 %v616_v50, %v474_v49  ;;  %v475_v59 = vadd.f32 %v1770_v6, %v436_v51  ;;  %v1055_v46 = vld [vmem:[%s1739_s12 + $0x38] sm:$0xff]  }
  0xd8   : > { %708 = vst [vmem:[%s1803_s7] sm:$0xff] %v676_v44  ;;  %709 = vst [vmem:[%s1803_s7 + $0x8] sm:$0xff] %v677_v45  ;;  %v936_v60 = vunpack.c.h.bf16 %v1051_v42  ;;  %v1000_v61 = vunpack.c.h.bf16 %v1066_v43  ;;  %v617_v62 = vadd.f32 %v1775_v12, %v578_v54  ;;  %v437_v63 = vmul.f32 %v935_v55, %v1765_v1  ;;  %v1070_v55 = vld [vmem:[%s1746_s9 + $0x38] sm:$0xff]  }
  0xd9   : > { %710 = vst [vmem:[%s1803_s7 + $0x10] sm:$0xff] %v678_v48  ;;  %711 = vst [vmem:[%s1803_s7 + $0x18] sm:$0xff] %v679_v53  ;;  %v579_v0 = vmul.f32 %v999_v56, %v1768_v4  ;;  %v939_v2 = vunpack.c.l.bf16 %v1052_v52  ;;  %v680_v3 = vmax.f32 %v648_v58, 0.0  ;;  %v1003_v8 = vunpack.c.l.bf16 %v1067_v57 }
  0xda   : > { %v438_v5 = vmul.f32 %v936_v60, %v1765_v1  ;;  %v580_v7 = vmul.f32 %v1000_v61, %v1768_v4  ;;  %v649_v9 = vadd.f32 %v617_v62, %v475_v59  ;;  %v476_v10 = vadd.f32 %v1770_v6, %v437_v63 }
  0xdb   : > { %v618_v11 = vadd.f32 %v1775_v12, %v579_v0  ;;  %v439_v13 = vmul.f32 %v939_v2, %v1765_v1  ;;  %712 = vst [vmem:[%s1803_s7 + $0x20] sm:$0xff] %v680_v3  ;;  %v581_v17 = vmul.f32 %v1003_v8, %v1768_v4  ;;  %v940_v18 = vunpack.c.h.bf16 %v1052_v52 }
  0xdc   : > { %v477_v15 = vadd.f32 %v1770_v6, %v438_v5  ;;  %v619_v16 = vadd.f32 %v1775_v12, %v580_v7  ;;  %v681_v20 = vmax.f32 %v649_v9, 0.0  ;;  %v1004_v23 = vunpack.c.h.bf16 %v1067_v57  ;;  %v1056_v7 = vld [vmem:[%s1739_s12 + $0x40] sm:$0xff]  }
  0xdd   : > { %v650_v21 = vadd.f32 %v618_v11, %v476_v10  ;;  %v478_v22 = vadd.f32 %v1770_v6, %v439_v13  ;;  %v620_v25 = vadd.f32 %v1775_v12, %v581_v17  ;;  %v440_v26 = vmul.f32 %v940_v18, %v1765_v1  ;;  %v1071_v13 = vld [vmem:[%s1746_s9 + $0x40] sm:$0xff]  }
  0xde   : > { %v651_v24 = vadd.f32 %v619_v16, %v477_v15  ;;  %v943_v27 = vunpack.c.l.bf16 %v1053_v14  ;;  %713 = vst [vmem:[%s1803_s7 + $0x28] sm:$0xff] %v681_v20  ;;  %v582_v29 = vmul.f32 %v1004_v23, %v1768_v4  ;;  %v1007_v30 = vunpack.c.l.bf16 %v1068_v19 }
  0xdf   : > { %v682_v28 = vmax.f32 %v650_v21, 0.0  ;;  %v944_v31 = vunpack.c.h.bf16 %v1053_v14  ;;  %v652_v35 = vadd.f32 %v620_v25, %v478_v22  ;;  %v479_v36 = vadd.f32 %v1770_v6, %v440_v26  ;;  %v1057_v26 = vld [vmem:[%s1739_s12 + $0x48] sm:$0xff]  }
  0xe0   : > { %v683_v34 = vmax.f32 %v651_v24, 0.0  ;;  %v441_v37 = vmul.f32 %v943_v27, %v1765_v1  ;;  %v621_v38 = vadd.f32 %v1775_v12, %v582_v29  ;;  %v583_v39 = vmul.f32 %v1007_v30, %v1768_v4  ;;  %v1072_v27 = vld [vmem:[%s1746_s9 + $0x48] sm:$0xff]  }
  0xe1   : > { %714 = vst [vmem:[%s1803_s7 + $0x30] sm:$0xff] %v682_v28  ;;  %v442_v40 = vmul.f32 %v944_v31, %v1765_v1  ;;  %v1008_v41 = vunpack.c.h.bf16 %v1068_v19  ;;  %v684_v42 = vmax.f32 %v652_v35, 0.0  ;;  %v947_v44 = vunpack.c.l.bf16 %v1054_v32 }
  0xe2   : > { %715 = vst [vmem:[%s1803_s7 + $0x38] sm:$0xff] %v683_v34  ;;  %v480_v43 = vadd.f32 %v1770_v6, %v441_v37  ;;  %v1011_v45 = vunpack.c.l.bf16 %v1069_v33  ;;  %v653_v47 = vadd.f32 %v621_v38, %v479_v36  ;;  %v622_v48 = vadd.f32 %v1775_v12, %v583_v39 }
  0xe3   : > { %v481_v49 = vadd.f32 %v1770_v6, %v442_v40  ;;  %v584_v50 = vmul.f32 %v1008_v41, %v1768_v4  ;;  %716 = vst [vmem:[%s1803_s7 + $0x40] sm:$0xff] %v684_v42  ;;  %v443_v51 = vmul.f32 %v947_v44, %v1765_v1  ;;  %v948_v53 = vunpack.c.h.bf16 %v1054_v32  ;;  %v1058_v40 = vld [vmem:[%s1739_s12 + $0x50] sm:$0xff]  }
  0xe4   : > { %v585_v52 = vmul.f32 %v1011_v45, %v1768_v4  ;;  %v1012_v54 = vunpack.c.h.bf16 %v1069_v33  ;;  %v685_v56 = vmax.f32 %v653_v47, 0.0  ;;  %v654_v57 = vadd.f32 %v622_v48, %v480_v43 }
  0xe5   : > { %v623_v58 = vadd.f32 %v1775_v12, %v584_v50  ;;  %v951_v59 = vunpack.c.l.bf16 %v1055_v46  ;;  %v482_v60 = vadd.f32 %v1770_v6, %v443_v51  ;;  %v444_v62 = vmul.f32 %v948_v53, %v1765_v1 }
  0xe6   : > { %v624_v61 = vadd.f32 %v1775_v12, %v585_v52  ;;  %v586_v63 = vmul.f32 %v1012_v54, %v1768_v4  ;;  %717 = vst [vmem:[%s1803_s7 + $0x48] sm:$0xff] %v685_v56  ;;  %v686_v0 = vmax.f32 %v654_v57, 0.0  ;;  %v1015_v5 = vunpack.c.l.bf16 %v1070_v55 }
  0xe7   : > { %v655_v2 = vadd.f32 %v623_v58, %v481_v49  ;;  %v445_v3 = vmul.f32 %v951_v59, %v1765_v1  ;;  %v483_v9 = vadd.f32 %v1770_v6, %v444_v62  ;;  %v952_v11 = vunpack.c.h.bf16 %v1055_v46  ;;  %v1073_v49 = vld [vmem:[%s1746_s9 + $0x50] sm:$0xff]   ;;  %v1059_v62 = vld [vmem:[%s1739_s12 + $0x58] sm:$0xff]  }
  0xe8   : > { %v656_v8 = vadd.f32 %v624_v61, %v482_v60  ;;  %v625_v10 = vadd.f32 %v1775_v12, %v586_v63  ;;  %718 = vst [vmem:[%s1803_s7 + $0x50] sm:$0xff] %v686_v0  ;;  %v587_v16 = vmul.f32 %v1015_v5, %v1768_v4  ;;  %v1016_v17 = vunpack.c.h.bf16 %v1070_v55  ;;  %v1074_v63 = vld [vmem:[%s1746_s9 + $0x58] sm:$0xff]  }
  0xe9   : > { %v687_v14 = vmax.f32 %v655_v2, 0.0  ;;  %v484_v15 = vadd.f32 %v1770_v6, %v445_v3  ;;  %v446_v20 = vmul.f32 %v952_v11, %v1765_v1  ;;  %v955_v21 = vunpack.c.l.bf16 %v1056_v7 }
  0xea   : > { %v688_v18 = vmax.f32 %v656_v8, 0.0  ;;  %v657_v19 = vadd.f32 %v625_v10, %v483_v9  ;;  %v626_v22 = vadd.f32 %v1775_v12, %v587_v16  ;;  %v588_v23 = vmul.f32 %v1016_v17, %v1768_v4 }
  0xeb   : > { %719 = vst [vmem:[%s1803_s7 + $0x58] sm:$0xff] %v687_v14  ;;  %v1019_v24 = vunpack.c.l.bf16 %v1071_v13  ;;  %v956_v25 = vunpack.c.h.bf16 %v1056_v7  ;;  %v485_v29 = vadd.f32 %v1770_v6, %v446_v20  ;;  %v447_v30 = vmul.f32 %v955_v21, %v1765_v1  ;;  %v1060_v20 = vld [vmem:[%s1739_s12 + $0x60] sm:$0xff]  }
  0xec   : > { %720 = vst [vmem:[%s1803_s7 + $0x60] sm:$0xff] %v688_v18  ;;  %v689_v28 = vmax.f32 %v657_v19, 0.0  ;;  %v1020_v31 = vunpack.c.h.bf16 %v1071_v13  ;;  %v658_v32 = vadd.f32 %v626_v22, %v484_v15  ;;  %v627_v33 = vadd.f32 %v1775_v12, %v588_v23 }
  0xed   : > { %v589_v34 = vmul.f32 %v1019_v24, %v1768_v4  ;;  %v448_v35 = vmul.f32 %v956_v25, %v1765_v1  ;;  %v486_v36 = vadd.f32 %v1770_v6, %v447_v30  ;;  %v959_v38 = vunpack.c.l.bf16 %v1057_v26  ;;  %v1075_v25 = vld [vmem:[%s1746_s9 + $0x60] sm:$0xff]  }
  0xee   : > { %721 = vst [vmem:[%s1803_s7 + $0x68] sm:$0xff] %v689_v28  ;;  %v590_v37 = vmul.f32 %v1020_v31, %v1768_v4  ;;  %v1023_v39 = vunpack.c.l.bf16 %v1072_v27  ;;  %v690_v41 = vmax.f32 %v658_v32, 0.0  ;;  %v659_v42 = vadd.f32 %v627_v33, %v485_v29 }
  0xef   : > { %v628_v43 = vadd.f32 %v1775_v12, %v589_v34  ;;  %v487_v44 = vadd.f32 %v1770_v6, %v448_v35  ;;  %v449_v46 = vmul.f32 %v959_v38, %v1765_v1  ;;  %v960_v48 = vunpack.c.h.bf16 %v1057_v26  ;;  %v1061_v34 = vld [vmem:[%s1739_s12 + $0x68] sm:$0xff]  }
  0xf0   : > { %v629_v45 = vadd.f32 %v1775_v12, %v590_v37  ;;  %v591_v47 = vmul.f32 %v1023_v39, %v1768_v4  ;;  %722 = vst [vmem:[%s1803_s7 + $0x70] sm:$0xff] %v690_v41  ;;  %v691_v50 = vmax.f32 %v659_v42, 0.0  ;;  %v1024_v52 = vunpack.c.h.bf16 %v1072_v27 }
  0xf1   : > { %v660_v51 = vadd.f32 %v628_v43, %v486_v36  ;;  %v963_v53 = vunpack.c.l.bf16 %v1058_v40  ;;  %v488_v55 = vadd.f32 %v1770_v6, %v449_v46  ;;  %v450_v57 = vmul.f32 %v960_v48, %v1765_v1  ;;  %v1076_v43 = vld [vmem:[%s1746_s9 + $0x68] sm:$0xff]  }
  0xf2   : > { %v661_v54 = vadd.f32 %v629_v45, %v487_v44  ;;  %v630_v56 = vadd.f32 %v1775_v12, %v591_v47  ;;  %723 = vst [vmem:[%s1803_s7 + $0x78] sm:$0xff] %v691_v50  ;;  %v592_v59 = vmul.f32 %v1024_v52, %v1768_v4  ;;  %v1027_v61 = vunpack.c.l.bf16 %v1073_v49 }
  0xf3   : > { %v692_v58 = vmax.f32 %v660_v51, 0.0  ;;  %v451_v60 = vmul.f32 %v963_v53, %v1765_v1  ;;  %v489_v3 = vadd.f32 %v1770_v6, %v450_v57  ;;  %v964_v5 = vunpack.c.h.bf16 %v1058_v40  ;;  %v1077_v57 = vld [vmem:[%s1746_s9 + $0x70] sm:$0xff]  }
  0xf4   : > { %v693_v0 = vmax.f32 %v661_v54, 0.0  ;;  %v662_v2 = vadd.f32 %v630_v56, %v488_v55  ;;  %v631_v7 = vadd.f32 %v1775_v12, %v592_v59  ;;  %v593_v9 = vmul.f32 %v1027_v61, %v1768_v4  ;;  %v1062_v56 = vld [vmem:[%s1739_s12 + $0x70] sm:$0xff]  }
  0xf5   : > { %724 = vst [vmem:[%s1803_s7 + $0x80] sm:$0xff] %v692_v58  ;;  %v490_v8 = vadd.f32 %v1770_v6, %v451_v60  ;;  %v1028_v10 = vunpack.c.h.bf16 %v1073_v49  ;;  %v452_v13 = vmul.f32 %v964_v5, %v1765_v1  ;;  %v967_v14 = vunpack.c.l.bf16 %v1059_v62 }
  0xf6   : > { %725 = vst [vmem:[%s1803_s7 + $0x88] sm:$0xff] %v693_v0  ;;  %v694_v11 = vmax.f32 %v662_v2, 0.0  ;;  %v1031_v15 = vunpack.c.l.bf16 %v1074_v63  ;;  %v663_v16 = vadd.f32 %v631_v7, %v489_v3  ;;  %v632_v17 = vadd.f32 %v1775_v12, %v593_v9 }
  0xf7   : > { %v594_v18 = vmul.f32 %v1028_v10, %v1768_v4  ;;  %v968_v19 = vunpack.c.h.bf16 %v1059_v62  ;;  %v491_v21 = vadd.f32 %v1770_v6, %v452_v13  ;;  %v453_v22 = vmul.f32 %v967_v14, %v1765_v1  ;;  %v1063_v14 = vld [vmem:[%s1739_s12 + $0x78] sm:$0xff]  }
  0xf8   : > { %726 = vst [vmem:[%s1803_s7 + $0x90] sm:$0xff] %v694_v11  ;;  %v595_v23 = vmul.f32 %v1031_v15, %v1768_v4  ;;  %v1032_v24 = vunpack.c.h.bf16 %v1074_v63  ;;  %v695_v26 = vmax.f32 %v663_v16, 0.0  ;;  %v664_v27 = vadd.f32 %v632_v17, %v490_v8 }
  0xf9   : > { %v633_v28 = vadd.f32 %v1775_v12, %v594_v18  ;;  %v454_v29 = vmul.f32 %v968_v19, %v1765_v1  ;;  %v492_v30 = vadd.f32 %v1770_v6, %v453_v22  ;;  %v971_v33 = vunpack.c.l.bf16 %v1060_v20  ;;  %v1078_v19 = vld [vmem:[%s1746_s9 + $0x78] sm:$0xff]  }
  0xfa   : > { %v634_v31 = vadd.f32 %v1775_v12, %v595_v23  ;;  %v596_v32 = vmul.f32 %v1032_v24, %v1768_v4  ;;  %727 = vst [vmem:[%s1803_s7 + $0x98] sm:$0xff] %v695_v26  ;;  %v696_v35 = vmax.f32 %v664_v27, 0.0  ;;  %v1035_v38 = vunpack.c.l.bf16 %v1075_v25 }
  0xfb   : > { %v665_v36 = vadd.f32 %v633_v28, %v491_v21  ;;  %v493_v37 = vadd.f32 %v1770_v6, %v454_v29  ;;  %v455_v41 = vmul.f32 %v971_v33, %v1765_v1  ;;  %v972_v42 = vunpack.c.h.bf16 %v1060_v20 }
  0xfc   : > { %v666_v39 = vadd.f32 %v634_v31, %v492_v30  ;;  %v635_v40 = vadd.f32 %v1775_v12, %v596_v32  ;;  %728 = vst [vmem:[%s1803_s7 + $0xa0] sm:$0xff] %v696_v35  ;;  %v597_v45 = vmul.f32 %v1035_v38, %v1768_v4  ;;  %v1036_v46 = vunpack.c.h.bf16 %v1075_v25 }
  0xfd   : > { %v697_v44 = vmax.f32 %v665_v36, 0.0  ;;  %v975_v47 = vunpack.c.l.bf16 %v1061_v34  ;;  %v494_v50 = vadd.f32 %v1770_v6, %v455_v41  ;;  %v456_v51 = vmul.f32 %v972_v42, %v1765_v1 }
  0xfe   : > { %v698_v48 = vmax.f32 %v666_v39, 0.0  ;;  %v667_v49 = vadd.f32 %v635_v40, %v493_v37  ;;  %v636_v52 = vadd.f32 %v1775_v12, %v597_v45  ;;  %v598_v53 = vmul.f32 %v1036_v46, %v1768_v4 }
  0xff   : > { %729 = vst [vmem:[%s1803_s7 + $0xa8] sm:$0xff] %v697_v44  ;;  %v457_v54 = vmul.f32 %v975_v47, %v1765_v1  ;;  %v1039_v55 = vunpack.c.l.bf16 %v1076_v43  ;;  %v495_v59 = vadd.f32 %v1770_v6, %v456_v51  ;;  %v976_v60 = vunpack.c.h.bf16 %v1061_v34 }
 0x100   : > { %730 = vst [vmem:[%s1803_s7 + $0xb0] sm:$0xff] %v698_v48  ;;  %v699_v58 = vmax.f32 %v667_v49, 0.0  ;;  %v1040_v61 = vunpack.c.h.bf16 %v1076_v43  ;;  %v668_v62 = vadd.f32 %v636_v52, %v494_v50  ;;  %v637_v63 = vadd.f32 %v1775_v12, %v598_v53 }
 0x101   : > { %v496_v0 = vadd.f32 %v1770_v6, %v457_v54  ;;  %v599_v2 = vmul.f32 %v1039_v55, %v1768_v4  ;;  %v458_v3 = vmul.f32 %v976_v60, %v1765_v1  ;;  %v979_v7 = vunpack.c.l.bf16 %v1062_v56 }
 0x102   : > { %731 = vst [vmem:[%s1803_s7 + $0xb8] sm:$0xff] %v699_v58  ;;  %v600_v5 = vmul.f32 %v1040_v61, %v1768_v4  ;;  %v1043_v8 = vunpack.c.l.bf16 %v1077_v57  ;;  %v700_v9 = vmax.f32 %v668_v62, 0.0  ;;  %v669_v10 = vadd.f32 %v637_v63, %v495_v59 }
 0x103   : > { %v638_v11 = vadd.f32 %v1775_v12, %v599_v2  ;;  %v980_v13 = vunpack.c.h.bf16 %v1062_v56  ;;  %v497_v15 = vadd.f32 %v1770_v6, %v458_v3  ;;  %v459_v17 = vmul.f32 %v979_v7, %v1765_v1 }
 0x104   : > { %v639_v16 = vadd.f32 %v1775_v12, %v600_v5  ;;  %v601_v18 = vmul.f32 %v1043_v8, %v1768_v4  ;;  %732 = vst [vmem:[%s1803_s7 + $0xc0] sm:$0xff] %v700_v9  ;;  %v701_v20 = vmax.f32 %v669_v10, 0.0  ;;  %v1044_v23 = vunpack.c.h.bf16 %v1077_v57 }
 0x105   : > { %v670_v21 = vadd.f32 %v638_v11, %v496_v0  ;;  %v460_v22 = vmul.f32 %v980_v13, %v1765_v1  ;;  %v498_v25 = vadd.f32 %v1770_v6, %v459_v17  ;;  %v983_v27 = vunpack.c.l.bf16 %v1063_v14 }
 0x106   : > { %v671_v24 = vadd.f32 %v639_v16, %v497_v15  ;;  %v640_v26 = vadd.f32 %v1775_v12, %v601_v18  ;;  %733 = vst [vmem:[%s1803_s7 + $0xc8] sm:$0xff] %v701_v20  ;;  %v602_v30 = vmul.f32 %v1044_v23, %v1768_v4  ;;  %v1047_v31 = vunpack.c.l.bf16 %v1078_v19 }
 0x107   : > { %v702_v28 = vmax.f32 %v670_v21, 0.0  ;;  %v499_v29 = vadd.f32 %v1770_v6, %v460_v22  ;;  %v461_v34 = vmul.f32 %v983_v27, %v1765_v1  ;;  %v984_v35 = vunpack.c.h.bf16 %v1063_v14 }
 0x108   : > { %v703_v32 = vmax.f32 %v671_v24, 0.0  ;;  %v672_v33 = vadd.f32 %v640_v26, %v498_v25  ;;  %v641_v36 = vadd.f32 %v1775_v12, %v602_v30  ;;  %v603_v37 = vmul.f32 %v1047_v31, %v1768_v4 }
 0x109   : > { %734 = vst [vmem:[%s1803_s7 + $0xd0] sm:$0xff] %v702_v28  ;;  %v1048_v38 = vunpack.c.h.bf16 %v1078_v19  ;;  %v500_v40 = vadd.f32 %v1770_v6, %v461_v34  ;;  %v462_v41 = vmul.f32 %v984_v35, %v1765_v1 }
 0x10a   : > { %735 = vst [vmem:[%s1803_s7 + $0xd8] sm:$0xff] %v703_v32  ;;  %v704_v39 = vmax.f32 %v672_v33, 0.0  ;;  %v673_v42 = vadd.f32 %v641_v36, %v499_v29  ;;  %v642_v43 = vadd.f32 %v1775_v12, %v603_v37 }
 0x10b   : > { %v604_v44 = vmul.f32 %v1048_v38, %v1768_v4  ;;  %v501_v45 = vadd.f32 %v1770_v6, %v462_v41 }
 0x10c   : > { %736 = vst [vmem:[%s1803_s7 + $0xe0] sm:$0xff] %v704_v39  ;;  %v705_v46 = vmax.f32 %v673_v42, 0.0  ;;  %v674_v47 = vadd.f32 %v642_v43, %v500_v40 }
 0x10d   : > { %v643_v48 = vadd.f32 %v1775_v12, %v604_v44 }
 0x10e   : > { %737 = vst [vmem:[%s1803_s7 + $0xe8] sm:$0xff] %v705_v46  ;;  %v706_v1 = vmax.f32 %v674_v47, 0.0 }
 0x10f   : > { %v675_v49 = vadd.f32 %v643_v48, %v501_v45 }
 0x110   : > { %738 = vst [vmem:[%s1803_s7 + $0xf0] sm:$0xff] %v706_v1 }
 0x111   : > { %v707_v4 = vmax.f32 %v675_v49, 0.0 }
 0x113   : > { %739 = vst [vmem:[%s1803_s7 + $0xf8] sm:$0xff] %v707_v4 }
 0x114   : > { %1360 = shalt.err (!%p1357_p12)
}
 0x115   : > { %s1361_s17 = scalar_lea.hbm %s1970_s19, 4096  ;;  %s1365_s2 = scalar_lea.hbm %s2024_s6, 8192 }
 0x116   : > { %p1362_p11 = scmp.ne.s32.totalorder %s1970_s19, %s1361_s17  ;;  %p1366_p7 = scmp.lt.u32.totalorder %s1970_s19, %s2024_s6 }
 0x117   : > { %p1367_p10 = scmp.lt.u32.totalorder %s1365_s2, %s1361_s17  ;;  %p1369_p5 = scmp.lt.u32.totalorder %s1361_s17, %s1970_s19 }
 0x118   : > { %p1363_p8 = pnand %p1362_p11, %p1635_p1 }
 0x119   : > { %p1368_p13 = por %p1367_p10, %p1366_p7 }
 0x11a   : > { %p1364_p3 = pneg %p1363_p8 }
 0x11b   : > { %p1370_p9 = por %p1369_p5, %p1368_p13 }
 0x11d   : > { %p1371_p2 = pnand %p1370_p9, %p1364_p3 }
 0x11f   : > { %1374 = shalt.err (!%p1371_p2)
}
 0x120   : > { %s1440_s27 = smov 128   ;;  %s1441_s7 = smov 8  }
 0x121   : > { %1099 = dma.vmem_to_hbm [thread:$0]  (%p1635_p1), %s1972_s10, 4096, %s1970_s19, %s741_s0, %s1440_s27, %s1440_s27, %s1441_s7  }
 0x122 PF: > { %s769_s15 = sand.u32 1, %s1417_s21   ;;  %p2050_p4 = scmp.ne.s32.totalorder %s2032_s28, 0 }
 0x123   : > { %p2051_p6 = scmp.ge.s32.totalorder %s1429_s24, 2  ;;  %s770_s16 = scalar_lea.sflag [#allocation4], %s769_s15 }
 0x125   : > { %p1122_p0 = pnand %p2051_p6, %p2050_p4 }
 0x127   : > { %1412 = dma.done.wait (!%p1122_p0), %s770_s16, 4096  }
 0x128   : > { %1414 = vsyncadd (!%p1122_p0), %s770_s16, 4294963200  ;;  %p24_p12 = scmp.ge.s32.totalorder %s1625_s18, 4   ;;  %s2052_s21 = smov %s1421_s22 }
 0x129   : > { %s2053_s22 = smov %s1425_s23  ;;  %s2054_s23 = smov %s1641_s11 }
 0x12a   : > { %s2055_s24 = smov %s1625_s18  ;;  %26 = sbr.rel (!%p24_p12) target bundleno = 13 (0xd), region = 118 }
 0x131   :  { %775 = vsyncpa [#allocation3], 1 }
 0x132   :  { %777 = vsyncpa [#allocation3 + $0x1], 1 }
 0x133   :  { %778 = vsyncpa [#allocation6], 1 }
 0x134   :  { %780 = vsyncpa [#allocation6 + $0x1], 1 }
 0x135   :  { %781 = vsyncpa [#allocation9], 1 }
 0x136   :  { %782 = vsyncpa [#allocation12], 1 }
 0x137   :  { %783 = vsyncpa [#allocation4], 1 }
 0x138   :  { %785 = vsyncpa [#allocation4 + $0x1], 1 }

// kernel: basic_block_forward.4
= control target key start
LH: loop header
LB: loop body
LE: loop exit
PB: predicated region body
PF: predicated region fallthrough
CT: control target
= control target key end

     0   :  { %12 = vsyncpa [#allocation4], 0  ;;  %s10249_s0 = inlined_call_operand.hbm [shape: bf16[2,18,18,128], index: 0, kind: input, shape index: {}]   ;;  %s10250_s1 = inlined_call_operand.hbm [shape: bf16[3,3,128,128], index: 1, kind: input, shape index: {}]   ;;  %s10251_s2 = inlined_call_operand.hbm [shape: f32[1,128], index: 2, kind: input, shape index: {}]   ;;  %s10252_s3 = inlined_call_operand.hbm [shape: f32[1,128], index: 3, kind: input, shape index: {}]   ;;  %s10253_s4 = inlined_call_operand.hbm [shape: bf16[2,16,16,128], index: 4, kind: output, shape index: {0}]   ;;  %s10254_s5 = inlined_call_operand.hbm [shape: f32[2,1,128], index: 5, kind: output, shape index: {1}]   ;;  %s10255_s6 = inlined_call_operand.hbm [shape: f32[2,1,128], index: 6, kind: output, shape index: {2}]  }
   0x1   :  { %14 = vsyncpa [#allocation4 + $0x1], 0 }
   0x2   :  { %15 = vsyncpa [#allocation7], 0 }
   0x3   :  { %16 = vsyncpa [#allocation10], 0 }
   0x4   :  { %17 = vsyncpa [#allocation5], 0 }
   0x5   :  { %19 = vsyncpa [#allocation5 + $0x1], 0 }
   0x6   :  { %20 = vsyncpa [#allocation13], 0 }
   0x7   :  { %22 = vsyncpa [#allocation13 + $0x1], 0  ;;  %s8359_s21 = smov 0   ;;  %s8361_s22 = smov 0  }
   0x8   :  { %s8363_s23 = smov 0   ;;  %s8365_s24 = smov 0  }
   0x9 LB: > { %s8380_s25 = sadd.s32 4294967295, %s8310_s24   ;;  %s10257_s26 = sadd.s32 4294967294, %s8310_s24   ;;  %s8310_s24 = sphi %s8365_s24, %s10345_s24   ;;  %s8306_s23 = sphi %s8363_s23, %s10344_s23   ;;  %s8302_s22 = sphi %s8361_s22, %s10343_s22   ;;  %s8298_s21 = sphi %s8359_s21, %s10342_s21  }
   0xa   : > { %p48_p0 = scmp.ne.s32.totalorder %s8302_s22, %s8298_s21  ;;  %p10256_p1 = scmp.eq.s32.totalorder %s8380_s25, 0 }
   0xb   : > { %p141_p3 = scmp.eq.s32.totalorder %s10257_s26, 1  ;;  %p6216_p5 = scmp.ge.s32.totalorder %s8310_s24, 1 }
   0xc   : > { %p8391_p4 = por %p10256_p1, %p48_p0  ;;  %p200_p7 = scmp.lt.s32.totalorder %s8310_s24, 3 }
   0xd   : > { %p8396_p6 = por %p141_p3, %p48_p0  ;;  %s8312_s30 = smov [#allocation6]  }
   0xe   : > { %s10273_s27 = scalar_select %p8391_p4, 1, 0 }
   0xf   : > { %s10274_s28 = scalar_select %p8396_p6, 1, 0 }
  0x10   : > { %p8401_p8 = pnand %p6216_p5, %p200_p7  ;;  %s212_s7 = sshll.u32 %s8312_s30, 4  ;;  %s8405_s7 = int_to_ptr.vmem [resolvable:$true] %s212_s7 }
  0x11   : > { %s8313_s9 = smov [#allocation8]   ;;  %s8314_s11 = smov [#allocation9]  }
  0x12   : > { %s10275_s29 = scalar_select %p8401_p8, 1, 0 }
  0x13   : > { %p7793_p9 = pneg %p8401_p8  ;;  %s226_s10 = sshll.u32 %s8313_s9, 4  ;;  %s8416_s10 = int_to_ptr.vmem [resolvable:$true] %s226_s10 }
  0x14   : > { %s8418_s12 = sshll.u32 %s8314_s11, 4  ;;  %s8062_s15 = scalar_lea.hbm %s10250_s1, 9216  ;;  %s238_s12 = int_to_ptr.vmem [resolvable:$true] %s8418_s12 }
  0x15   : > { %p8412_p11 = pnand %p7793_p9, %p10256_p1  ;;  %p8063_p12 = scmp.ne.s32.totalorder %s10250_s1, %s8062_s15 }
  0x16   : > { %p8069_p5 = scmp.lt.u32.totalorder %s8062_s15, %s10250_s1 }
  0x17   : > { %p8428_p13 = pneg %p8412_p11 }
  0x19   : > { %p8065_p0 = pnand %p8428_p13, %p8063_p12 }
  0x1b   : > { %p8066_p3 = pneg %p8065_p0 }
  0x1d   : > { %p8071_p7 = pnand %p8069_p5, %p8066_p3 }
  0x1f   : > { %8074 = shalt.err (!%p8071_p7)
}
  0x20   : > { %s8075_s30 = scalar_lea.vmem %s8405_s7, 9216  ;;  %p8083_p2 = scmp.lt.s32.totalorder %s8405_s7, %s8405_s7 }
  0x21   : > { %p8076_p9 = scmp.ne.s32.totalorder %s8405_s7, %s8075_s30  ;;  %p8084_p6 = scmp.lt.s32.totalorder %s8075_s30, %s8075_s30 }
  0x23   : > { %p8078_p10 = pnand %p8076_p9, %p8428_p13  ;;  %p8085_p12 = por %p8084_p6, %p8083_p2 }
  0x25   : > { %p8079_p1 = pneg %p8078_p10 }
  0x27   : > { %p8086_p0 = pnand %p8085_p12, %p8079_p1 }
  0x29   : > { %8089 = shalt.err (!%p8086_p0)
}
  0x2a   : > { %s10260_s9 = smov 64   ;;  %s10261_s11 = smov 4  }
  0x2b   : > { %7796 = dma.hbm_to_vmem [thread:$0]  (!%p8412_p11), %s10250_s1, 9216, %s8405_s7, [#allocation7], %s10260_s9, %s10260_s9, %s10261_s11  }
  0x2c   : > { %s8090_s17 = scalar_lea.hbm %s10251_s2, 16 }
  0x2d   : > { %p8091_p1 = scmp.ne.s32.totalorder %s10251_s2, %s8090_s17  ;;  %p8097_p10 = scmp.lt.u32.totalorder %s8090_s17, %s10251_s2 }
  0x2f   : > { %p8093_p2 = pnand %p8091_p1, %p8428_p13 }
  0x31   : > { %p8094_p6 = pneg %p8093_p2 }
  0x33   : > { %p8099_p3 = pnand %p8097_p10, %p8094_p6 }
  0x35   : > { %8102 = shalt.err (!%p8099_p3)
}
  0x36   : > { %s8103_s7 = scalar_lea.vmem %s8416_s10, 16  ;;  %s8110_s13 = scalar_lea.vmem %s8416_s10, 32 }
  0x37   : > { %p8104_p5 = scmp.ne.s32.totalorder %s8416_s10, %s8103_s7  ;;  %p8111_p12 = scmp.lt.s32.totalorder %s8416_s10, %s8416_s10 }
  0x38   : > { %p8112_p0 = scmp.lt.s32.totalorder %s8110_s13, %s8103_s7 }
  0x39   : > { %p8106_p7 = pnand %p8104_p5, %p8428_p13 }
  0x3a   : > { %p8113_p1 = por %p8112_p0, %p8111_p12 }
  0x3b   : > { %p8107_p9 = pneg %p8106_p7 }
  0x3d   : > { %p8114_p2 = pnand %p8113_p1, %p8107_p9 }
  0x3f   : > { %8117 = shalt.err (!%p8114_p2)
}
  0x40   : > { %7799 = dma.hbm_to_vmem [thread:$0]  (!%p8412_p11), %s10251_s2, 16, %s8416_s10, [#allocation7]  }
  0x41   : > { %s8118_s17 = scalar_lea.hbm %s10252_s3, 16 }
  0x42   : > { %p8119_p6 = scmp.ne.s32.totalorder %s10252_s3, %s8118_s17  ;;  %p8125_p5 = scmp.lt.u32.totalorder %s8118_s17, %s10252_s3 }
  0x44   : > { %p8121_p10 = pnand %p8119_p6, %p8428_p13 }
  0x46   : > { %p8122_p3 = pneg %p8121_p10 }
  0x48   : > { %p8127_p7 = pnand %p8125_p5, %p8122_p3 }
  0x4a   : > { %8130 = shalt.err (!%p8127_p7)
}
  0x4b   : > { %s8131_s13 = scalar_lea.vmem %s238_s12, 16  ;;  %s8138_s10 = scalar_lea.vmem %s238_s12, 32 }
  0x4c   : > { %p8132_p9 = scmp.ne.s32.totalorder %s238_s12, %s8131_s13  ;;  %p8139_p1 = scmp.lt.s32.totalorder %s238_s12, %s238_s12 }
  0x4d   : > { %p8140_p2 = scmp.lt.s32.totalorder %s8138_s10, %s8131_s13 }
  0x4e   : > { %p8134_p12 = pnand %p8132_p9, %p8428_p13 }
  0x4f   : > { %p8141_p4 = por %p8140_p2, %p8139_p1 }
  0x50   : > { %p8135_p0 = pneg %p8134_p12 }
  0x52   : > { %p8142_p8 = pnand %p8141_p4, %p8135_p0 }
  0x54   : > { %8145 = shalt.err (!%p8142_p8)
}
  0x55   : > { %7802 = dma.hbm_to_vmem [thread:$0]  (!%p8412_p11), %s10252_s3, 16, %s238_s12, [#allocation10]  }
  0x56   : > { %s8496_s18 = sadd.s32 1, %s8310_s24   ;;  %s35_s8 = sadd.s32 1, %s8306_s23 }
  0x57   : > { %s32_s15 = ssub.s32 %s8310_s24, %s8496_s18  ;;  %p42_p8 = scmp.ne.s32.totalorder %s8306_s23, %s8302_s22 }
  0x58   : > { %p33_p4 = scmp.eq.s32.totalorder %s32_s15, 0  ;;  %p43_p13 = scmp.eq.s32.totalorder %s8310_s24, 0 }
  0x59   : > { %p7820_p6 = scmp.lt.s32.totalorder %s8310_s24, 2  ;;  %p10278_p3 = scmp.eq.s32.totalorder %s8380_s25, 1 }
  0x5a   : > { %s8506_s16 = scalar_select %p33_p4, %s8306_s23, %s35_s8  }
  0x5b   : > { %p44_p10 = por %p43_p13, %p42_p8  ;;  %p8510_p5 = por %p10278_p3, %p42_p8 }
  0x5c   : > { %s248_s19 = sand.u32 1, %s8306_s23   ;;  %s7771_s20 = smul.u32 3456, %s8310_s24 }
  0x5d   : > { %s7770_s12 = smul.u32 216, %s248_s19  ;;  %p8516_p11 = pnand %p7820_p6, %p44_p10 }
  0x5e   : > { %s8523_s10 = scalar_lea.hbm %s10249_s0, %s7771_s20  ;;  %s8527_s15 = scalar_lea.sflag [#allocation4], %s248_s19 }
  0x5f   : > { %s252_s26 = scalar_lea.vmem [#allocation3], %s7770_s12  ;;  %s8146_s8 = scalar_lea.hbm %s8523_s10, 3456 }
  0x60   : > { %s259_s14 = sshll.u32 %s252_s26, 4  ;;  %p8147_p7 = scmp.ne.s32.totalorder %s8523_s10, %s8146_s8  ;;  %s8525_s14 = int_to_ptr.vmem [resolvable:$true] %s259_s14 }
  0x61   : > { %p8148_p9 = pneg %p8516_p11  ;;  %s8151_s13 = scalar_lea.hbm %s10249_s0, 6912 }
  0x62   : > { %p8152_p1 = scmp.lt.u32.totalorder %s8523_s10, %s10249_s0  ;;  %p8153_p2 = scmp.lt.u32.totalorder %s8151_s13, %s8146_s8 }
  0x63   : > { %p8149_p12 = pnand %p8148_p9, %p8147_p7  ;;  %p8155_p8 = scmp.lt.u32.totalorder %s8146_s8, %s8523_s10 }
  0x64   : > { %p8154_p4 = por %p8153_p2, %p8152_p1 }
  0x65   : > { %p8150_p0 = pneg %p8149_p12 }
  0x66   : > { %p8156_p13 = por %p8155_p8, %p8154_p4 }
  0x68   : > { %p8157_p6 = pnand %p8156_p13, %p8150_p0 }
  0x6a   : > { %8160 = shalt.err (!%p8157_p6)
}
  0x6b   : > { %s8161_s19 = scalar_lea.vmem %s8525_s14, 3456  ;;  %s8317_s12 = smov [#allocation3]  }
  0x6c   : > { %p8162_p10 = scmp.ne.s32.totalorder %s8525_s14, %s8161_s19  ;;  %s8166_s26 = sshll.u32 %s8317_s12, 4  ;;  %s8167_s26 = int_to_ptr.vmem [resolvable:$false] %s8166_s26 }
  0x6d   : > { %s8168_s9 = scalar_lea.vmem %s8167_s26, 6912  ;;  %p8169_p12 = scmp.lt.s32.totalorder %s8525_s14, %s8167_s26 }
  0x6e   : > { %p8164_p3 = pnand %p8162_p10, %p8148_p9  ;;  %p8170_p1 = scmp.lt.s32.totalorder %s8168_s9, %s8161_s19 }
  0x70   : > { %p8165_p7 = pneg %p8164_p3  ;;  %p8171_p2 = por %p8170_p1, %p8169_p12 }
  0x72   : > { %p8172_p4 = pnand %p8171_p2, %p8165_p7 }
  0x74   : > { %8175 = shalt.err (!%p8172_p4)
}
  0x75   : > { %s10281_s11 = smov 4   ;;  %s10282_s8 = smov 64  }
  0x76   : > { %7806 = dma.hbm_to_vmem [thread:$0]  (!%p8516_p11), %s8523_s10, 3456, %s8525_s14, %s8527_s15, %s10282_s8, %s10282_s8, %s10281_s11  }
  0x77   : > { %p10283_p9 = scmp.ne.s32.totalorder %s10275_s29, 0 }
  0x79   : > { %271 = sbr.rel (%p10283_p9) target bundleno = 835 (0x343), region = 36 }
  0x80   : > { %s8561_s20 = sand.u32 1, %s8302_s22   ;;  %p10284_p0 = scmp.ne.s32.totalorder %s10273_s27, 0 }
  0x81   : > { %s7772_s7 = smul.u32 216, %s8561_s20  ;;  %s274_s13 = scalar_lea.sflag [#allocation4], %s8561_s20 }
  0x83   : > { %s8565_s19 = scalar_lea.vmem [#allocation3], %s7772_s7 }
  0x84   : > { %8277 = dma.done.wait (%p10284_p0), %s274_s13, 3456  }
  0x85   : > { %8279 = vsyncadd (%p10284_p0), %s274_s13, 4294963840  ;;  %p10285_p11 = scmp.eq.s32.totalorder %s8380_s25, 0 }
  0x87   : > { %8281 = dma.done.wait (%p10285_p11), [#allocation7], 9232   ;;  %p10286_p8 = pmov %p10285_p11 }
  0x89   : > { %8283 = vsyncadd (%p10286_p8), [#allocation7], 4294958064  ;;  %p10287_p13 = pmov %p10286_p8 }
  0x8a   : > { %p10288_p6 = pmov %p10286_p8 }
  0x8b   : > { %8285 = dma.done.wait (%p10287_p13), [#allocation10], 16  }
  0x8c   : > { %8287 = vsyncadd (%p10288_p6), [#allocation10], 4294967280  ;;  %v8318_v0 = vmov 0.0|0.0   ;;  %v7865_v3 = vld [vmem:[#allocation6 + $0x40] sm:$0xff]   ;;  %v7867_v5 = vld [vmem:[#allocation6 + $0x48] sm:$0xff]   ;;  %v557_v9 = vlaneseq  ;;  %vm2027_vm5 = vcmask 1042432  }
  0x8d   : > { %v6229_v1 = vcombine.low %v8318_v0, %v8318_v0  ;;  %v6230_v2 = vcombine.high %v8318_v0, %v8318_v0  ;;  %v7866_v4 = vld [vmem:[#allocation6 + $0x100] sm:$0xff]   ;;  %7066 = vmatprep.subr.bf16.mxu1 %v7865_v3  ;;  %v7868_v6 = vld [vmem:[#allocation6 + $0x108] sm:$0xff]   ;;  %v7869_v7 = vld [vmem:[#allocation6 + $0x50] sm:$0xff]   ;;  %vm997_vm0 = vsmask.f32 3328  ;;  %vm2028_vm6 = vcmask 1046532  }
  0x8e   : > { %7258 = vmatprep.subr.bf16.mxu0 %v7866_v4  ;;  %7067 = vmatpush3.bf16.msra.mxu1 %v7865_v3  ;;  %v7870_v8 = vld [vmem:[#allocation6 + $0x110] sm:$0xff]   ;;  %v7871_v10 = vld [vmem:[#allocation6 + $0x58] sm:$0xff]   ;;  %v8579_v12 = vshrl.u32 %v557_v9, 7  ;;  %vm998_vm1 = vsmask.f32 7440  ;;  %v7873_v14 = vld [vmem:[#allocation6 + $0x60] sm:$0xff]  }
  0x8f   : > { %879 = vst [vmem:[#allocation2] sm:$0xf] %v6229_v1  ;;  %880 = vst [vmem:[#allocation2 + $0x4] sm:$0xf] %v6230_v2  ;;  %7259 = vmatpush3.bf16.msra.mxu0 %v7866_v4  ;;  %7068 = vmatprep.subr.bf16.mxu1 %v7867_v5  ;;  %v7872_v11 = vld [vmem:[#allocation6 + $0x118] sm:$0xff]   ;;  %v7874_v15 = vld [vmem:[#allocation6 + $0x120] sm:$0xff]  }
  0x90   : > { %881 = vst [vmem:[#allocation2 + $0x8] sm:$0x1] %v6229_v1  ;;  %930 = vst [vmem:[#allocation2 + $0xcc] sm:$0xf] %v6229_v1  ;;  %7260 = vmatprep.subr.bf16.mxu0 %v7868_v6  ;;  %v8582_v13 = vadd.s32 16, %v8579_v12  ;;  %vm561_vm2 = vcmp.ge.s32.totalorder %v8579_v12, 1 }
  0x91   : > { %931 = vst [vmem:[#allocation2 + $0xd0] sm:$0xf] %v6230_v2  ;;  %932 = vst [vmem:[#allocation2 + $0xd4] sm:$0x1] %v6229_v1  ;;  %v7875_v16 = vld [vmem:[#allocation6 + $0x68] sm:$0xff]   ;;  %v330_v25 = vld [vmem:[%s8565_s19 + $0xc] sm:$0xff]  }
  0x92   : > { %7069 = vmatpush3.bf16.msra.mxu1 %v7867_v5  ;;  %vm572_vm3 = vcmp.le.s32.totalorder %v8582_v13, 16  ;;  %v7876_v20 = vld [vmem:[#allocation6 + $0x128] sm:$0xff]   ;;  %v7877_v26 = vld [vmem:[#allocation6 + $0x70] sm:$0xff]   ;;  %v332_v28 = vld [vmem:[%s8565_s19 + $0x14] sm:$0x1]  ;;  %v384_v29 = vunpack.c.l.bf16 %v330_v25  ;;  %v385_v30 = vunpack.c.h.bf16 %v330_v25  ;;  %s6226_s27 = sshll.u32 %s8561_s20, 7 }
  0x93   : > { %7261 = vmatpush3.bf16.msra.mxu0 %v7868_v6  ;;  %7070 = vmatprep.subr.bf16.mxu1 %v7869_v7  ;;  %v8588_v31 = vld [vmem:[#allocation8] ss:$0 sm:$0xff]  ;;  %v7878_v32 = vld [vmem:[#allocation6 + $0x130] sm:$0xff]   ;;  %v8590_v37 = vld [vmem:[#allocation9] ss:$0 sm:$0xff]  ;;  %v386_v39 = vunpack.c.l.bf16 %v332_v28  ;;  %s10106_s29 = scalar_lea.vmem [#allocation11], %s6226_s27 }
  0x94   : > { %7262 = vmatprep.subr.bf16.mxu0 %v7870_v8  ;;  %v445_v40 = vmul.f32 %v8588_v31, %v384_v29  ;;  %v446_v41 = vmul.f32 %v8588_v31, %v385_v30  ;;  %v6819_v42 = vld [vmem:[%s8565_s19 + $0x18] sm:$0xff]   ;;  %v335_v47 = vld [vmem:[%s8565_s19 + $0x20] sm:$0x1]  ;;  %vm8598_vm4 = vmor %vm997_vm0, %vm998_vm1  ;;  %s6666_s30 = sshll.u32 %s8380_s25, 11  ;;  %s6034_s10 = sshll.u32 %s10106_s29, 4  ;;  %s10133_s10 = int_to_ptr.vmem [resolvable:$true] %s6034_s10 }
  0x95   : > { %v6669_v45 = vunpack.c.l.bf16 %v6819_v42  ;;  %v6670_v46 = vunpack.c.h.bf16 %v6819_v42  ;;  %v447_v49 = vmul.f32 %v8588_v31, %v386_v39  ;;  %v389_v52 = vunpack.c.l.bf16 %v335_v47  ;;  %v7879_v53 = vld [vmem:[#allocation6 + $0x78] sm:$0xff]   ;;  %vm8827_vm7 = vmor %vm2027_vm5, %vm2028_vm6  ;;  %v7920_v12 = vld [vmem:[#allocation6 + $0xa0] sm:$0xff]   ;;  %s10131_s12 = scalar_lea.hbm %s10253_s4, %s6666_s30  ;;  %s6013_s26 = scalar_lea.sflag [#allocation5], %s8561_s20 }
  0x96   : > { %7071 = vmatpush3.bf16.msra.mxu1 %v7869_v7  ;;  %v933_v17 = vld [vmem:[#allocation2] sm:$0xf]  ;;  %v934_v18 = vld [vmem:[#allocation2 + $0x4] sm:$0xf]  ;;  %v506_v50 = vadd.f32 %v8590_v37, %v445_v40  ;;  %v507_v51 = vadd.f32 %v8590_v37, %v446_v41  ;;  %s8176_s9 = scalar_lea.vmem %s10133_s10, 2048  ;;  %s8319_s11 = smov [#allocation11]  }
  0x97   : > { %7263 = vmatpush3.bf16.msra.mxu0 %v7870_v8  ;;  %7072 = vmatprep.subr.bf16.mxu1 %v7871_v10  ;;  %v981_v19 = vld [vmem:[#allocation2 + $0x8] sm:$0x1]  ;;  %v1001_v21 = vshrl.u32 %v933_v17, 16  ;;  %v1004_v22 = vshll.u32 %v933_v17, 16  ;;  %v1010_v23 = vshll.u32 %v934_v18, 16  ;;  %v1014_v24 = vshrl.u32 %v934_v18, 16  ;;  %p8177_p10 = scmp.ne.s32.totalorder %s10133_s10, %s8176_s9 }
  0x98   : > { %7264 = vmatprep.subr.bf16.mxu0 %v7872_v11  ;;  %v1020_v27 = vshll.u32 %v981_v19, 16  ;;  %v7880_v54 = vld [vmem:[#allocation6 + $0x138] sm:$0xff]   ;;  %v448_v57 = vmul.f32 %v6669_v45, %v8588_v31  ;;  %v449_v58 = vmul.f32 %v6670_v46, %v8588_v31  ;;  %v508_v59 = vadd.f32 %v8590_v37, %v447_v49  ;;  %v342_v17 = vld [vmem:[%s8565_s19 + $0x3c] sm:$0xff]   ;;  %s8180_s8 = sshll.u32 %s8319_s11, 4  ;;  %s8181_s8 = int_to_ptr.vmem [resolvable:$false] %s8180_s8 }
  0x99   : > { %v1003_v33 = vrot.slane %v1001_v21, 4  ;;  %v1006_v34 = vrot.slane %v1004_v22, 5  ;;  %v1012_v35 = vrot.slane %v1010_v23, 5  ;;  %v1016_v36 = vrot.slane %v1014_v24, 4  ;;  %v336_v63 = vld [vmem:[%s8565_s19 + $0x24] sm:$0xff]   ;;  %v6820_v5 = vld [vmem:[%s8565_s19 + $0x30] sm:$0xff]   ;;  %p8178_p3 = pnand %p8177_p10, %p8510_p5  ;;  %p8183_p12 = scmp.lt.s32.totalorder %s10133_s10, %s8181_s8 }
  0x9a   : > { %7073 = vmatpush3.bf16.msra.mxu1 %v7871_v10  ;;  %v1022_v38 = vrot.slane %v1020_v27, 5  ;;  %v594_v60 = vsel %vm561_vm2, %v506_v50, 0.0  ;;  %v6587_v61 = vpack.c.bf16 %v507_v51, %v507_v51  ;;  %v450_v62 = vmul.f32 %v8588_v31, %v389_v52  ;;  %v338_v4 = vld [vmem:[%s8565_s19 + $0x2c] sm:$0x1]  ;;  %v8627_v18 = vld [vmem:[#allocation6] sm:$0xff]   ;;  %s8182_s7 = scalar_lea.vmem %s8181_s8, 4096 }
  0x9b   : > { %7265 = vmatpush3.bf16.msra.mxu0 %v7872_v11  ;;  %7074 = vmatprep.subr.bf16.mxu1 %v7873_v14  ;;  %v1007_v43 = vor.u32 %v1006_v34, %v1003_v33  ;;  %v1017_v44 = vor.u32 %v1016_v36, %v1012_v35  ;;  %v6586_v2 = vpack.c.bf16 %v594_v60, %v594_v60  ;;  %v596_v7 = vsel %vm572_vm3, %v508_v59, 0.0  ;;  %v8631_v24 = vld [vmem:[#allocation6 + $0x140] sm:$0xff]   ;;  %p8179_p7 = pneg %p8178_p3  ;;  %p8184_p1 = scmp.lt.s32.totalorder %s8182_s7, %s8176_s9 }
  0x9c   : > { %7266 = vmatprep.subr.bf16.mxu0 %v7874_v15  ;;  %v509_v3 = vadd.f32 %v8590_v37, %v448_v57  ;;  %883 = vst [vmem:[#allocation2 + $0x10] sm:$0xf] %v6587_v61  ;;  %v510_v8 = vadd.f32 %v8590_v37, %v449_v58  ;;  %v511_v9 = vadd.f32 %v8590_v37, %v450_v62  ;;  %v392_v21 = vunpack.c.l.bf16 %v338_v4 }
  0x9d   : > { %v1008_v55 = vrot.slane %v1007_v43, 4  ;;  %v1018_v56 = vrot.slane %v1017_v44, 4  ;;  %v6588_v10 = vpack.c.bf16 %v596_v7, %v596_v7  ;;  %882 = vst [vmem:[#allocation2 + $0xc] sm:$0xf] %v6586_v2  ;;  %v6673_v22 = vunpack.c.l.bf16 %v6820_v5  ;;  %p8185_p2 = por %p8184_p1, %p8183_p12 }
  0x9e   : > { %7075 = vmatpush3.bf16.msra.mxu1 %v7873_v14  ;;  %v597_v11 = vsel %vm561_vm2, %v509_v3, 0.0  ;;  %v390_v14 = vunpack.c.l.bf16 %v336_v63  ;;  %v599_v19 = vsel %vm572_vm3, %v511_v9, 0.0  ;;  %v6674_v27 = vunpack.c.h.bf16 %v6820_v5 }
  0x9f   : > { %7267 = vmatpush3.bf16.msra.mxu0 %v7874_v15  ;;  %7076 = vmatprep.subr.bf16.mxu1 %v7875_v16  ;;  %v1013_v0 = vsel %vm8598_vm4, %v1008_v55, %v1012_v35  ;;  %v1023_v1 = vsel %vm8598_vm4, %v1018_v56, %v1022_v38  ;;  %v391_v15 = vunpack.c.h.bf16 %v336_v63  ;;  %884 = vst [vmem:[#allocation2 + $0x14] sm:$0x1] %v6588_v10  ;;  %v396_v33 = vunpack.c.l.bf16 %v342_v17  ;;  %p8186_p4 = pnand %p8185_p2, %p8179_p7 }
  0xa0   : > { %7268 = vmatprep.subr.bf16.mxu0 %v7876_v20  ;;  %v6283_v6 = vcombine.low %v1013_v0, %v1023_v1  ;;  %v6591_v23 = vpack.c.bf16 %v599_v19, %v599_v19  ;;  %v451_v25 = vmul.f32 %v8588_v31, %v390_v14  ;;  %v453_v28 = vmul.f32 %v8588_v31, %v392_v21 }
  0xa1   : > { %v454_v30 = vmul.f32 %v6673_v22, %v8588_v31  ;;  %v455_v36 = vmul.f32 %v6674_v27, %v8588_v31  ;;  %v397_v41 = vunpack.c.h.bf16 %v342_v17 }
  0xa2   : > { %7077 = vmatpush3.bf16.msra.mxu1 %v7875_v16  ;;  %v341_v16 = vld [vmem:[%s8565_s19 + $0x38] sm:$0x1]  ;;  %7082 = vmatprep.mubr.bf16.mxu1 %v6283_v6  ;;  %887 = vst [vmem:[#allocation2 + $0x20] sm:$0x1] %v6591_v23  ;;  %v512_v34 = vadd.f32 %v8590_v37, %v451_v25  ;;  %v8643_v38 = vadd.f32 %v8590_v37, %v453_v28 }
  0xa3   : > { %7269 = vmatpush3.bf16.msra.mxu0 %v7876_v20  ;;  %7078 = vmatprep.subr.bf16.mxu1 %v7877_v26  ;;  %v6702_v20 = vpack.c.bf16 %v510_v8, %v597_v11  ;;  %v395_v29 = vunpack.c.l.bf16 %v341_v16  ;;  %v8647_v40 = vadd.f32 %v8590_v37, %v454_v30  ;;  %v8649_v42 = vld [vmem:[#allocation2 + $0x10] sm:$0xf]  ;;  %v8655_v46 = vadd.f32 %v8590_v37, %v455_v36 }
  0xa4   : > { %7270 = vmatprep.subr.bf16.mxu0 %v7878_v32  ;;  %v936_v43 = vld [vmem:[#allocation2 + $0x10] sm:$0xf]  ;;  %v600_v44 = vsel %vm561_vm2, %v512_v34, 0.0  ;;  %v2851_v49 = vld [vmem:[#allocation2 + $0xc] sm:$0xf]  ;;  %v2909_v50 = vshll.u32 %v8649_v42, 16  ;;  %v8668_v0 = vmul.f32 %v8588_v31, %v397_v41 }
  0xa5   : > { %6827 = vst [vmem:[#allocation2 + $0x18] sm:$0xff] %v6702_v20   ;;  %v456_v39 = vmul.f32 %v8588_v31, %v395_v29  ;;  %v2913_v51 = vshrl.u32 %v8649_v42, 16  ;;  %v935_v52 = vld [vmem:[#allocation2 + $0xc] sm:$0xf]  ;;  %v2900_v55 = vshrl.u32 %v2851_v49, 16  ;;  %v2903_v56 = vshll.u32 %v2851_v49, 16 }
  0xa6   : > { %7079 = vmatpush3.bf16.msra.mxu1 %v7877_v26  ;;  %v452_v26 = vmul.f32 %v8588_v31, %v391_v15  ;;  %v1025_v57 = vshrl.u32 %v935_v52, 16  ;;  %v1028_v58 = vshll.u32 %v935_v52, 16  ;;  %v8662_v59 = vld [vmem:[#allocation2 + $0x14] sm:$0x1]  ;;  %v2911_v60 = vrot.slane %v2909_v50, 5 }
  0xa7   : > { %7271 = vmatpush3.bf16.msra.mxu0 %v7878_v32  ;;  %7080 = vmatprep.subr.bf16.mxu1 %v7879_v53  ;;  %v344_v32 = vld [vmem:[%s8565_s19 + $0x44] sm:$0x1]  ;;  %v2915_v61 = vrot.slane %v2913_v51, 4  ;;  %v8665_v63 = vadd.f32 %v8590_v37, %v456_v39  ;;  %v2902_v1 = vrot.slane %v2900_v55, 4  ;;  %v2905_v2 = vrot.slane %v2903_v56, 5 }
  0xa8   : > { %7272 = vmatprep.subr.bf16.mxu0 %v7880_v54  ;;  %v513_v35 = vadd.f32 %v8590_v37, %v452_v26  ;;  %v398_v47 = vunpack.c.l.bf16 %v344_v32  ;;  %v982_v62 = vld [vmem:[#allocation2 + $0x14] sm:$0x1]  ;;  %v2919_v3 = vshll.u32 %v8662_v59, 16  ;;  %v1027_v6 = vrot.slane %v1025_v57, 4 }
  0xa9   : > { %v2916_v5 = vor.u32 %v2915_v61, %v2911_v60  ;;  %v1030_v7 = vrot.slane %v1028_v58, 5  ;;  %v1034_v8 = vshll.u32 %v936_v43, 16  ;;  %v2906_v10 = vor.u32 %v2905_v2, %v2902_v1  ;;  %v8679_v29 = vld [vmem:[#allocation2 + $0x20] sm:$0x1] }
  0xaa   : > { %7081 = vmatpush3.bf16.msra.mxu1 %v7879_v53  ;;  %v6593_v45 = vpack.c.bf16 %v513_v35, %v513_v35  ;;  %v6592_v53 = vpack.c.bf16 %v600_v44, %v600_v44  ;;  %v8672_v4 = vmul.f32 %v8588_v31, %v398_v47  ;;  %v2921_v11 = vrot.slane %v2919_v3, 5  ;;  %v983_v49 = vld [vmem:[#allocation2 + $0x20] sm:$0x1] }
  0xab   : > { %7273 = vmatpush3.bf16.msra.mxu0 %v7880_v54  ;;  %7114 = vmatprep.subr.bf16.mxu1 %v8627_v18  ;;  %v8660_v54 = vmul.f32 %v8588_v31, %v396_v33  ;;  %v1038_v14 = vshrl.u32 %v936_v43, 16  ;;  %v1044_v15 = vshll.u32 %v982_v62, 16  ;;  %v2917_v17 = vrot.slane %v2916_v5, 4 }
  0xac   : > { %7306 = vmatprep.subr.bf16.mxu0 %v8631_v24  ;;  %889 = vst [vmem:[#allocation2 + $0x28] sm:$0xf] %v6593_v45  ;;  %888 = vst [vmem:[#allocation2 + $0x24] sm:$0xf] %v6592_v53  ;;  %v2854_v9 = vld [vmem:[#allocation2 + $0x18] sm:$0xf]  ;;  %v1031_v20 = vor.u32 %v1030_v7, %v1027_v6 }
  0xad   : > { %v8674_v16 = vld [vmem:[#allocation2 + $0x1c] sm:$0xf]  ;;  %v3674_v19 = vrot.slane %v8662_v59, 5  ;;  %v1036_v21 = vrot.slane %v1034_v8, 5  ;;  %v2907_v22 = vrot.slane %v2906_v10, 4  ;;  %v1040_v23 = vrot.slane %v1038_v14, 4 }
  0xae   : > { %v1046_v25 = vrot.slane %v1044_v15, 5  ;;  %v2924_v26 = vshrl.u32 %v2854_v9, 16  ;;  %v2922_v27 = vsel %vm8598_vm4, %v2917_v17, %v2921_v11  ;;  %v1032_v28 = vrot.slane %v1031_v20, 4  ;;  %v937_v39 = vld [vmem:[#allocation2 + $0x18] sm:$0xf] }
  0xaf   : > { %v2927_v30 = vshll.u32 %v2854_v9, 16  ;;  %v2933_v32 = vshll.u32 %v8674_v16, 16  ;;  %v2912_v33 = vsel %vm8598_vm4, %v2907_v22, %v2911_v60  ;;  %v1041_v34 = vor.u32 %v1040_v23, %v1036_v21  ;;  %v938_v47 = vld [vmem:[#allocation2 + $0x1c] sm:$0xf]  ;;  %v7884_v9 = vld [vmem:[#allocation6 + $0x8] sm:$0xff]  }
  0xb0   : > { %v2926_v35 = vrot.slane %v2924_v26, 4  ;;  %v2937_v36 = vshrl.u32 %v8674_v16, 16  ;;  %v6395_v41 = vcombine.low %v2912_v33, %v2922_v27  ;;  %v1037_v43 = vsel %vm8598_vm4, %v1032_v28, %v1036_v21  ;;  %v7883_v33 = vld [vmem:[#allocation6 + $0x148] sm:$0xff]  }
  0xb1   : > { %v2929_v44 = vrot.slane %v2927_v30, 5  ;;  %v2935_v45 = vrot.slane %v2933_v32, 5  ;;  %v1042_v50 = vrot.slane %v1041_v34, 4  ;;  %v2943_v52 = vshll.u32 %v8679_v29, 16 }
  0xb2   : > { %v2939_v51 = vrot.slane %v2937_v36, 4  ;;  %v3678_v53 = vrot.slane %v8674_v16, 5  ;;  %7274 = vmatprep.mubr.bf16.mxu0 %v6395_v41  ;;  %v3681_v57 = vrot.slane %v8679_v29, 5  ;;  %v1049_v58 = vshrl.u32 %v937_v39, 16  ;;  %v8941_v29 = vld [vmem:[%s8565_s19 + $0x84] sm:$0xff]  }
  0xb3   : > { %v2857_v55 = vld [vmem:[#allocation2 + $0x24] sm:$0xf]  ;;  %v2930_v56 = vor.u32 %v2929_v44, %v2926_v35  ;;  %v1052_v60 = vshll.u32 %v937_v39, 16  ;;  %v1047_v61 = vsel %vm8598_vm4, %v1042_v50, %v1046_v25  ;;  %v2945_v1 = vrot.slane %v2943_v52, 5  ;;  %v8696_v8 = vld [vmem:[#allocation2 + $0x28] sm:$0xf] }
  0xb4   : > { %v2940_v62 = vor.u32 %v2939_v51, %v2935_v45  ;;  %v8694_v2 = vrot.slane %v3678_v53, 4  ;;  %v6284_v3 = vcombine.low %v1037_v43, %v1047_v61  ;;  %v1051_v6 = vrot.slane %v1049_v58, 4  ;;  %v939_v17 = vld [vmem:[#allocation2 + $0x24] sm:$0xf]  ;;  %v940_v25 = vld [vmem:[#allocation2 + $0x28] sm:$0xf] }
  0xb5   : > { %v2931_v5 = vrot.slane %v2930_v56, 4  ;;  %v1054_v7 = vrot.slane %v1052_v60, 5  ;;  %v1058_v11 = vshll.u32 %v938_v47, 16  ;;  %v1062_v14 = vshrl.u32 %v938_v47, 16  ;;  %v7887_v39 = vld [vmem:[#allocation6 + $0x10] sm:$0xff]  }
  0xb6   : > { %v2941_v10 = vrot.slane %v2940_v62, 4  ;;  %v1068_v15 = vshll.u32 %v983_v49, 16  ;;  %7083 = vmatmul.mubr.bf16.vlgmr.msra.gmra.mrb[0].mxu1 %v6284_v3  ;;  %v602_v22 = vsel %vm572_vm3, %v8643_v38, 0.0  ;;  %v2948_v23 = vshrl.u32 %v2857_v55, 16  ;;  %v7885_v62 = vld [vmem:[#allocation6 + $0x150] sm:$0xff]  }
  0xb7   : > { %v2936_v20 = vsel %vm8598_vm4, %v2931_v5, %v2935_v45  ;;  %v1055_v21 = vor.u32 %v1054_v7, %v1051_v6  ;;  %7115 = vmatpush3.bf16.msra.mxu1 %v8627_v18  ;;  %v1060_v27 = vrot.slane %v1058_v11, 5  ;;  %v1064_v28 = vrot.slane %v1062_v14, 4  ;;  %v7890_v7 = vld [vmem:[#allocation6 + $0x18] sm:$0xff]  }
  0xb8   : > { %v2946_v26 = vsel %vm8598_vm4, %v2941_v10, %v2945_v1  ;;  %v1070_v30 = vrot.slane %v1068_v15, 5  ;;  %v6594_v35 = vpack.c.bf16 %v602_v22, %v602_v22  ;;  %v2950_v36 = vrot.slane %v2948_v23, 4  ;;  %7116 = vmatprep.subr.bf16.mxu1 %v7884_v9  ;;  %v6821_v1 = vld [vmem:[%s8565_s19 + $0x48] sm:$0xff]  }
  0xb9   : > { %v6396_v32 = vcombine.low %v2936_v20, %v2946_v26  ;;  %v1056_v34 = vrot.slane %v1055_v21, 4  ;;  %v1065_v41 = vor.u32 %v1064_v28, %v1060_v27  ;;  %v2951_v43 = vshll.u32 %v2857_v55, 16  ;;  %v7886_v22 = vld [vmem:[#allocation6 + $0x158] sm:$0xff]  }
  0xba   : > { %v2957_v38 = vshll.u32 %v8696_v8, 16  ;;  %v2961_v44 = vshrl.u32 %v8696_v8, 16  ;;  %890 = vst [vmem:[#allocation2 + $0x2c] sm:$0x1] %v6594_v35  ;;  %v1073_v45 = vshrl.u32 %v939_v17, 16  ;;  %v1076_v47 = vshll.u32 %v939_v17, 16 }
  0xbb   : > { %7275 = vmatmul.mubr.bf16.vlgmr.msra.gmra.mrb[0].mxu0 %v6396_v32  ;;  %v1061_v18 = vsel %vm8598_vm4, %v1056_v34, %v1060_v27  ;;  %v1082_v49 = vshll.u32 %v940_v25, 16  ;;  %v1066_v50 = vrot.slane %v1065_v41, 4  ;;  %v2953_v51 = vrot.slane %v2951_v43, 5  ;;  %7117 = vmatpush3.bf16.msra.mxu1 %v7884_v9  ;;  %v8732_v27 = vld [vmem:[#allocation6 + $0x20] sm:$0xff]  }
  0xbc   : > { %7307 = vmatpush3.bf16.msra.mxu0 %v8631_v24  ;;  %v8711_v52 = vrot.slane %v2957_v38, 5  ;;  %v2963_v55 = vrot.slane %v2961_v44, 4  ;;  %v1075_v56 = vrot.slane %v1073_v45, 4  ;;  %v1078_v58 = vrot.slane %v1076_v47, 5  ;;  %7118 = vmatprep.subr.bf16.mxu1 %v7887_v39  ;;  %v350_v44 = vld [vmem:[%s8565_s19 + $0x5c] sm:$0x1] }
  0xbd   : > { %7308 = vmatprep.subr.bf16.mxu0 %v7883_v33  ;;  %v8713_v60 = vrot.slane %v1082_v49, 5  ;;  %v1086_v61 = vshrl.u32 %v940_v25, 16  ;;  %v1071_v3 = vsel %vm8598_vm4, %v1066_v50, %v1070_v30  ;;  %v2954_v5 = vor.u32 %v2953_v51, %v2950_v36  ;;  %v7888_v50 = vld [vmem:[#allocation6 + $0x160] sm:$0xff]  }
  0xbe   : > { %v2964_v24 = vor.u32 %v2963_v55, %v8711_v52  ;;  %v603_v6 = vsel %vm561_vm2, %v8647_v40, 0.0  ;;  %v6285_v9 = vcombine.low %v1061_v18, %v1071_v3  ;;  %v1079_v10 = vor.u32 %v1078_v58, %v1075_v56  ;;  %v7895_v3 = vld [vmem:[#allocation6 + $0x28] sm:$0xff]  }
  0xbf   : > { %v1088_v11 = vrot.slane %v1086_v61, 4  ;;  %v605_v14 = vsel %vm572_vm3, %v8665_v63, 0.0  ;;  %v2955_v15 = vrot.slane %v2954_v5, 4  ;;  %v6707_v21 = vpack.c.bf16 %v8655_v46, %v603_v6  ;;  %7119 = vmatpush3.bf16.msra.mxu1 %v7887_v39  ;;  %v347_v63 = vld [vmem:[%s8565_s19 + $0x50] sm:$0x1]  ;;  %v348_v39 = vld [vmem:[%s8565_s19 + $0x54] sm:$0xff]  }
  0xc0   : > { %7309 = vmatpush3.bf16.msra.mxu0 %v7883_v33  ;;  %v2965_v17 = vrot.slane %v2964_v24, 4  ;;  %v6597_v20 = vpack.c.bf16 %v605_v14, %v605_v14  ;;  %7086 = vmatprep.mubr.bf16.mxu1 %v6285_v9  ;;  %v1080_v23 = vrot.slane %v1079_v10, 4  ;;  %v518_v25 = vadd.f32 %v8590_v37, %v8660_v54  ;;  %v7889_v61 = vld [vmem:[#allocation6 + $0x168] sm:$0xff]  }
  0xc1   : > { %v1089_v40 = vor.u32 %v1088_v11, %v8713_v60  ;;  %7310 = vmatprep.subr.bf16.mxu0 %v7885_v62  ;;  %v519_v26 = vadd.f32 %v8590_v37, %v8668_v0  ;;  %v8734_v28 = vld [vmem:[#allocation2 + $0x2c] sm:$0x1]  ;;  %v2960_v46 = vsel %vm8598_vm4, %v2955_v15, %v8711_v52  ;;  %6828 = vst [vmem:[#allocation2 + $0x30] sm:$0xff] %v6707_v21   ;;  %v6677_v32 = vunpack.c.l.bf16 %v6821_v1 }
  0xc2   : > { %v984_v30 = vld [vmem:[#allocation2 + $0x2c] sm:$0x1]  ;;  %893 = vst [vmem:[#allocation2 + $0x38] sm:$0x1] %v6597_v20  ;;  %v520_v54 = vadd.f32 %v8590_v37, %v8672_v4  ;;  %v6678_v33 = vunpack.c.h.bf16 %v6821_v1  ;;  %7120 = vmatprep.subr.bf16.mxu1 %v7890_v7  ;;  %v2967_v0 = vshll.u32 %v8734_v28, 16  ;;  %v1085_v34 = vsel %vm8598_vm4, %v1080_v23, %v8713_v60 }
  0xc3   : > { %v1090_v35 = vrot.slane %v1089_v40, 4  ;;  %v1092_v36 = vshll.u32 %v984_v30, 16  ;;  %v606_v41 = vsel %vm561_vm2, %v518_v25, 0.0  ;;  %v6599_v4 = vpack.c.bf16 %v519_v26, %v519_v26  ;;  %7121 = vmatpush3.bf16.msra.mxu1 %v7890_v7 }
  0xc4   : > { %7311 = vmatpush3.bf16.msra.mxu0 %v7885_v62  ;;  %v608_v43 = vsel %vm572_vm3, %v520_v54, 0.0  ;;  %v401_v38 = vunpack.c.l.bf16 %v347_v63  ;;  %v2969_v18 = vrot.slane %v2967_v0, 5  ;;  %v6598_v47 = vpack.c.bf16 %v606_v41, %v606_v41  ;;  %7122 = vmatprep.subr.bf16.mxu1 %v8732_v27 }
  0xc5   : > { %v1094_v45 = vrot.slane %v1092_v36, 5  ;;  %7312 = vmatprep.subr.bf16.mxu0 %v7886_v22  ;;  %v6600_v49 = vpack.c.bf16 %v608_v43, %v608_v43  ;;  %895 = vst [vmem:[#allocation2 + $0x40] sm:$0xf] %v6599_v4  ;;  %v460_v51 = vmul.f32 %v6677_v32, %v8588_v31  ;;  %v461_v52 = vmul.f32 %v6678_v33, %v8588_v31  ;;  %v7897_v36 = vld [vmem:[#allocation6 + $0x30] sm:$0xff]  }
  0xc6   : > { %v462_v55 = vmul.f32 %v8588_v31, %v401_v38  ;;  %v402_v56 = vunpack.c.l.bf16 %v348_v39  ;;  %v2970_v58 = vsel %vm8598_vm4, %v2965_v17, %v2969_v18  ;;  %894 = vst [vmem:[#allocation2 + $0x3c] sm:$0xf] %v6598_v47  ;;  %v403_v62 = vunpack.c.h.bf16 %v348_v39  ;;  %v7891_v38 = vld [vmem:[#allocation6 + $0x170] sm:$0xff]  }
  0xc7   : > { %v1095_v60 = vsel %vm8598_vm4, %v1090_v35, %v1094_v45  ;;  %896 = vst [vmem:[#allocation2 + $0x44] sm:$0x1] %v6600_v49  ;;  %v404_v1 = vunpack.c.l.bf16 %v350_v44  ;;  %v6397_v5 = vcombine.low %v2960_v46, %v2970_v58  ;;  %v8760_v6 = vadd.f32 %v8590_v37, %v460_v51  ;;  %7123 = vmatpush3.bf16.msra.mxu1 %v8732_v27 }
  0xc8   : > { %v6286_v24 = vcombine.low %v1085_v34, %v1095_v60  ;;  %7313 = vmatpush3.bf16.msra.mxu0 %v7886_v22  ;;  %v8763_v7 = vadd.f32 %v8590_v37, %v461_v52  ;;  %v2860_v9 = vld [vmem:[#allocation2 + $0x30] sm:$0xf]  ;;  %v8765_v10 = vld [vmem:[#allocation2 + $0x34] sm:$0xf]  ;;  %v8770_v14 = vadd.f32 %v8590_v37, %v462_v55  ;;  %v463_v15 = vmul.f32 %v8588_v31, %v402_v56 }
  0xc9   : > { %v8767_v11 = vld [vmem:[#allocation2 + $0x38] sm:$0x1]  ;;  %7314 = vmatprep.subr.bf16.mxu0 %v7888_v50  ;;  %v464_v17 = vmul.f32 %v8588_v31, %v403_v62  ;;  %v8775_v20 = vmul.f32 %v8588_v31, %v404_v1  ;;  %7278 = vmatprep.mubr.bf16.mxu0 %v6397_v5  ;;  %v2972_v21 = vshrl.u32 %v2860_v9, 16  ;;  %v2975_v22 = vshll.u32 %v2860_v9, 16  ;;  %v941_v25 = vld [vmem:[#allocation2 + $0x30] sm:$0xf] }
  0xca   : > { %7087 = vmatmul.mubr.bf16.gmra.mrb[4].mxu1 %v6286_v24  ;;  %v2981_v23 = vshll.u32 %v8765_v10, 16  ;;  %v2985_v40 = vshrl.u32 %v8765_v10, 16  ;;  %v2991_v26 = vshll.u32 %v8767_v11, 16  ;;  %v942_v63 = vld [vmem:[#allocation2 + $0x34] sm:$0xf]  ;;  %v1097_v30 = vshrl.u32 %v941_v25, 16  ;;  %7124 = vmatprep.subr.bf16.mxu1 %v7895_v3 }
  0xcb   : > { %v985_v46 = vld [vmem:[#allocation2 + $0x38] sm:$0x1]  ;;  %v8781_v54 = vadd.f32 %v8590_v37, %v463_v15  ;;  %v8784_v32 = vadd.f32 %v8590_v37, %v464_v17  ;;  %v2974_v33 = vrot.slane %v2972_v21, 4  ;;  %v2977_v0 = vrot.slane %v2975_v22, 5  ;;  %7125 = vmatpush3.bf16.msra.mxu1 %v7895_v3  ;;  %v7892_v22 = vld [vmem:[#allocation6 + $0x178] sm:$0xff]  }
  0xcc   : > { %v2983_v34 = vrot.slane %v2981_v23, 5  ;;  %v2987_v35 = vrot.slane %v2985_v40, 4  ;;  %7315 = vmatpush3.bf16.msra.mxu0 %v7888_v50  ;;  %v2993_v39 = vrot.slane %v2991_v26, 5  ;;  %v1099_v41 = vrot.slane %v1097_v30, 4  ;;  %v8787_v51 = vld [vmem:[#allocation2 + $0x40] sm:$0xf]  ;;  %7126 = vmatprep.subr.bf16.mxu1 %v7897_v36 }
  0xcd   : > { %v1100_v43 = vshll.u32 %v941_v25, 16  ;;  %v1106_v4 = vshll.u32 %v942_v63, 16  ;;  %7316 = vmatprep.subr.bf16.mxu0 %v7889_v61  ;;  %v2978_v44 = vor.u32 %v2977_v0, %v2974_v33  ;;  %v1110_v45 = vshrl.u32 %v942_v63, 16  ;;  %v2863_v49 = vld [vmem:[#allocation2 + $0x3c] sm:$0xf]  ;;  %v7899_v50 = vld [vmem:[#allocation6 + $0x38] sm:$0xff]  }
  0xce   : > { %v2988_v18 = vor.u32 %v2987_v35, %v2983_v34  ;;  %v1116_v47 = vshll.u32 %v985_v46, 16  ;;  %v2996_v55 = vshrl.u32 %v2863_v49, 16  ;;  %v2999_v56 = vshll.u32 %v2863_v49, 16  ;;  %v8789_v5 = vld [vmem:[#allocation2 + $0x44] sm:$0x1]  ;;  %v7903_v26 = vld [vmem:[#allocation6 + $0x80] sm:$0xff]  }
  0xcf   : > { %v1102_v27 = vrot.slane %v1100_v43, 5  ;;  %v1108_v52 = vrot.slane %v1106_v4, 5  ;;  %v2979_v58 = vrot.slane %v2978_v44, 4  ;;  %v1112_v62 = vrot.slane %v1110_v45, 4  ;;  %v943_v21 = vld [vmem:[#allocation2 + $0x3c] sm:$0xf]  ;;  %7127 = vmatpush3.bf16.msra.mxu1 %v7897_v36 }
  0xd0   : > { %v2989_v60 = vrot.slane %v2988_v18, 4  ;;  %v1118_v1 = vrot.slane %v1116_v47, 5  ;;  %7317 = vmatpush3.bf16.msra.mxu0 %v7889_v61  ;;  %v2998_v9 = vrot.slane %v2996_v55, 4  ;;  %v3001_v15 = vrot.slane %v2999_v56, 5  ;;  %v944_v25 = vld [vmem:[#allocation2 + $0x40] sm:$0xf]  ;;  %7128 = vmatprep.subr.bf16.mxu1 %v7899_v50 }
  0xd1   : > { %v1103_v24 = vor.u32 %v1102_v27, %v1099_v41  ;;  %v3005_v17 = vshll.u32 %v8787_v51, 16  ;;  %7318 = vmatprep.subr.bf16.mxu0 %v7891_v38  ;;  %v2984_v3 = vsel %vm8598_vm4, %v2979_v58, %v2983_v34  ;;  %v1113_v40 = vor.u32 %v1112_v62, %v1108_v52  ;;  %v986_v0 = vld [vmem:[#allocation2 + $0x44] sm:$0x1]  ;;  %v8800_v45 = vld [vmem:[#allocation6 + $0x180] sm:$0xff]  }
  0xd2   : > { %v2994_v23 = vsel %vm8598_vm4, %v2989_v60, %v2993_v39  ;;  %v3009_v61 = vshrl.u32 %v8787_v51, 16  ;;  %v3002_v30 = vor.u32 %v3001_v15, %v2998_v9  ;;  %v3015_v43 = vshll.u32 %v8789_v5, 16  ;;  %v353_v9 = vld [vmem:[%s8565_s19 + $0x68] sm:$0x1] }
  0xd3   : > { %v6398_v63 = vcombine.low %v2984_v3, %v2994_v23  ;;  %v1104_v46 = vrot.slane %v1103_v24, 4  ;;  %v3007_v33 = vrot.slane %v3005_v17, 5  ;;  %v1114_v35 = vrot.slane %v1113_v40, 4  ;;  %7129 = vmatpush3.bf16.msra.mxu1 %v7899_v50  ;;  %v3605_v40 = vld [vmem:[#allocation2 + $0xc] sm:$0xe] }
  0xd4   : > { %v3011_v41 = vrot.slane %v3009_v61, 4  ;;  %v1121_v4 = vshrl.u32 %v943_v21, 16  ;;  %7319 = vmatpush3.bf16.msra.mxu0 %v7891_v38  ;;  %v3003_v39 = vrot.slane %v3002_v30, 4  ;;  %v1124_v44 = vshll.u32 %v943_v21, 16  ;;  %7162 = vmatprep.subr.bf16.mxu1 %v7903_v26  ;;  %v6822_v21 = vld [vmem:[%s8565_s19 + $0x60] sm:$0xff]   ;;  %v354_v26 = vld [vmem:[%s8565_s19 + $0x6c] sm:$0xff]  }
  0xd5   : > { %7279 = vmatmul.mubr.bf16.gmra.mrb[4].mxu0 %v6398_v63  ;;  %v1109_v34 = vsel %vm8598_vm4, %v1104_v46, %v1108_v52  ;;  %v1130_v18 = vshll.u32 %v944_v25, 16  ;;  %7320 = vmatprep.subr.bf16.mxu0 %v7892_v22  ;;  %v1119_v36 = vsel %vm8598_vm4, %v1114_v35, %v1118_v1  ;;  %v3017_v49 = vrot.slane %v3015_v43, 5  ;;  %v356_v63 = vld [vmem:[%s8565_s19 + $0x74] sm:$0x1] }
  0xd6   : > { %v3012_v47 = vor.u32 %v3011_v41, %v3007_v33  ;;  %v1123_v27 = vrot.slane %v1121_v4, 4  ;;  %v6287_v55 = vcombine.low %v1109_v34, %v1119_v36  ;;  %v3008_v38 = vsel %vm8598_vm4, %v3003_v39, %v3007_v33 }
  0xd7   : > { %v1126_v56 = vrot.slane %v1124_v44, 5  ;;  %v1132_v52 = vrot.slane %v1130_v18, 5  ;;  %v1134_v60 = vshrl.u32 %v944_v25, 16  ;;  %v1140_v62 = vshll.u32 %v986_v0, 16 }
  0xd8   : > { %v3013_v58 = vrot.slane %v3012_v47, 4  ;;  %v609_v24 = vsel %vm561_vm2, %v8760_v6, 0.0  ;;  %7321 = vmatpush3.bf16.msra.mxu0 %v7892_v22  ;;  %7090 = vmatprep.mubr.bf16.mxu1 %v6287_v55  ;;  %v611_v15 = vsel %vm572_vm3, %v8770_v14, 0.0  ;;  %v526_v50 = vadd.f32 %v8590_v37, %v8775_v20 }
  0xd9   : > { %v1127_v1 = vor.u32 %v1126_v56, %v1123_v27  ;;  %v6712_v17 = vpack.c.bf16 %v8763_v7, %v609_v24  ;;  %7354 = vmatprep.subr.bf16.mxu0 %v8800_v45  ;;  %v1136_v22 = vrot.slane %v1134_v60, 4  ;;  %v1142_v3 = vrot.slane %v1140_v62, 5 }
  0xda   : > { %v3018_v6 = vsel %vm8598_vm4, %v3013_v58, %v3017_v49  ;;  %v6603_v23 = vpack.c.bf16 %v611_v15, %v611_v15  ;;  %v612_v7 = vsel %vm561_vm2, %v8781_v54, 0.0  ;;  %v614_v14 = vsel %vm572_vm3, %v526_v50, 0.0 }
  0xdb   : > { %v6399_v61 = vcombine.low %v3008_v38, %v3018_v6  ;;  %v1128_v25 = vrot.slane %v1127_v1, 4  ;;  %6829 = vst [vmem:[#allocation2 + $0x48] sm:$0xff] %v6712_v17   ;;  %v1137_v46 = vor.u32 %v1136_v22, %v1132_v52  ;;  %v6604_v30 = vpack.c.bf16 %v612_v7, %v612_v7 }
  0xdc   : > { %899 = vst [vmem:[#allocation2 + $0x50] sm:$0x1] %v6603_v23  ;;  %v6605_v33 = vpack.c.bf16 %v8784_v32, %v8784_v32  ;;  %v6606_v0 = vpack.c.bf16 %v614_v14, %v614_v14  ;;  %v6681_v35 = vunpack.c.l.bf16 %v6822_v21  ;;  %v6682_v41 = vunpack.c.h.bf16 %v6822_v21 }
  0xdd   : > { %7282 = vmatprep.mubr.bf16.mxu0 %v6399_v61  ;;  %v1133_v54 = vsel %vm8598_vm4, %v1128_v25, %v1132_v52  ;;  %v407_v43 = vunpack.c.l.bf16 %v353_v9  ;;  %v1138_v4 = vrot.slane %v1137_v46, 4  ;;  %900 = vst [vmem:[#allocation2 + $0x54] sm:$0xf] %v6604_v30  ;;  %v6419_v34 = vrot.slane %v3605_v40, 9  ;;  %v8864_v9 = vld [vmem:[#allocation8] ss:$0 sm:$0xff] }
  0xde   : > { %901 = vst [vmem:[#allocation2 + $0x58] sm:$0xf] %v6605_v33  ;;  %902 = vst [vmem:[#allocation2 + $0x5c] sm:$0x1] %v6606_v0  ;;  %v3671_v39 = vrot.slane %v8649_v42, 5  ;;  %v408_v44 = vunpack.c.l.bf16 %v354_v26  ;;  %v466_v18 = vmul.f32 %v6681_v35, %v8588_v31  ;;  %v467_v32 = vmul.f32 %v6682_v41, %v8588_v31 }
  0xdf   : > { %v468_v36 = vmul.f32 %v8588_v31, %v407_v43  ;;  %v409_v47 = vunpack.c.h.bf16 %v354_v26  ;;  %v1143_v49 = vsel %vm8598_vm4, %v1138_v4, %v1142_v3  ;;  %v410_v38 = vunpack.c.l.bf16 %v356_v63  ;;  %v8880_v61 = vld [vmem:[#allocation9] ss:$0 sm:$0xff] }
  0xe0   : > { %v8845_v27 = vsel %vm8827_vm7, %v6419_v34, %v3671_v39  ;;  %v3673_v55 = vrot.slane %v3671_v39, 4  ;;  %v6288_v56 = vcombine.low %v1133_v54, %v1143_v49  ;;  %v8848_v42 = vadd.f32 %v8590_v37, %v466_v18 }
  0xe1   : > { %v8851_v52 = vadd.f32 %v8590_v37, %v467_v32  ;;  %v8854_v58 = vadd.f32 %v8590_v37, %v468_v36  ;;  %v469_v1 = vmul.f32 %v8864_v9, %v408_v44  ;;  %v8868_v15 = vmul.f32 %v8864_v9, %v409_v47 }
  0xe2   : > { %v2866_v31 = vld [vmem:[#allocation2 + $0x48] sm:$0xf]  ;;  %v8856_v60 = vld [vmem:[#allocation2 + $0x4c] sm:$0xf]  ;;  %v8862_v24 = vsel %vm8827_vm7, %v3673_v55, %v3674_v19  ;;  %v8871_v37 = vmul.f32 %v8864_v9, %v410_v38  ;;  %7091 = vmatmul.mubr.bf16.gmra.mrb[8].mxu1 %v6288_v56 }
  0xe3   : > { %v945_v62 = vld [vmem:[#allocation2 + $0x48] sm:$0xf]  ;;  %v8873_v17 = vld [vmem:[#allocation2 + $0x50] sm:$0x1]  ;;  %v3020_v50 = vshrl.u32 %v2866_v31, 16  ;;  %v3023_v21 = vshll.u32 %v2866_v31, 16  ;;  %v6435_v40 = vcombine.low %v8845_v27, %v8862_v24  ;;  %v8883_v25 = vadd.f32 %v8880_v61, %v469_v1 }
  0xe4   : > { %v3029_v59 = vshll.u32 %v8856_v60, 16  ;;  %v3033_v19 = vshrl.u32 %v8856_v60, 16  ;;  %v3039_v6 = vshll.u32 %v8873_v17, 16  ;;  %v946_v22 = vld [vmem:[#allocation2 + $0x4c] sm:$0xf]  ;;  %v1145_v23 = vshrl.u32 %v945_v62, 16 }
  0xe5   : > { %v987_v3 = vld [vmem:[#allocation2 + $0x50] sm:$0x1]  ;;  %v3022_v7 = vrot.slane %v3020_v50, 4  ;;  %v3025_v14 = vrot.slane %v3023_v21, 5  ;;  %v2869_v46 = vld [vmem:[#allocation2 + $0x54] sm:$0xf] }
  0xe6   : > { %v3031_v26 = vrot.slane %v3029_v59, 5  ;;  %v3035_v63 = vrot.slane %v3033_v19, 4  ;;  %v3041_v30 = vrot.slane %v3039_v6, 5  ;;  %v1147_v33 = vrot.slane %v1145_v23, 4  ;;  %v8885_v34 = vld [vmem:[#allocation2 + $0x58] sm:$0xf] }
  0xe7   : > { %v1148_v0 = vshll.u32 %v945_v62, 16  ;;  %v1154_v54 = vshll.u32 %v946_v22, 16  ;;  %v3026_v35 = vor.u32 %v3025_v14, %v3022_v7  ;;  %v1158_v43 = vshrl.u32 %v946_v22, 16  ;;  %v8887_v38 = vld [vmem:[#allocation2 + $0x5c] sm:$0x1] }
  0xe8   : > { %v3036_v41 = vor.u32 %v3035_v63, %v3031_v26  ;;  %v1164_v4 = vshll.u32 %v987_v3, 16  ;;  %v3044_v18 = vshrl.u32 %v2869_v46, 16  ;;  %v3047_v32 = vshll.u32 %v2869_v46, 16  ;;  %v947_v50 = vld [vmem:[#allocation2 + $0x54] sm:$0xf] }
  0xe9   : > { %v1150_v39 = vrot.slane %v1148_v0, 5  ;;  %v1156_v44 = vrot.slane %v1154_v54, 5  ;;  %v3027_v36 = vrot.slane %v3026_v35, 4  ;;  %v1160_v49 = vrot.slane %v1158_v43, 4  ;;  %v948_v22 = vld [vmem:[#allocation2 + $0x58] sm:$0xf] }
  0xea   : > { %v3037_v47 = vrot.slane %v3036_v41, 4  ;;  %v1166_v55 = vrot.slane %v1164_v4, 5  ;;  %v3046_v31 = vrot.slane %v3044_v18, 4  ;;  %v3049_v62 = vrot.slane %v3047_v32, 5  ;;  %v988_v35 = vld [vmem:[#allocation2 + $0x5c] sm:$0x1] }
  0xeb   : > { %v1151_v56 = vor.u32 %v1150_v39, %v1147_v33  ;;  %v3053_v1 = vshll.u32 %v8885_v34, 16  ;;  %v3032_v21 = vsel %vm8598_vm4, %v3027_v36, %v3031_v26  ;;  %v1161_v19 = vor.u32 %v1160_v49, %v1156_v44 }
  0xec   : > { %v3042_v59 = vsel %vm8598_vm4, %v3037_v47, %v3041_v30  ;;  %v3057_v6 = vshrl.u32 %v8885_v34, 16  ;;  %v3050_v7 = vor.u32 %v3049_v62, %v3046_v31  ;;  %v3063_v33 = vshll.u32 %v8887_v38, 16 }
  0xed   : > { %v6400_v3 = vcombine.low %v3032_v21, %v3042_v59  ;;  %v1152_v23 = vrot.slane %v1151_v56, 4  ;;  %v3055_v14 = vrot.slane %v3053_v1, 5  ;;  %v1162_v63 = vrot.slane %v1161_v19, 4  ;;  %v3606_v56 = vld [vmem:[#allocation2 + $0x18] sm:$0xe]  ;;  %v6823_v19 = vld [vmem:[%s8565_s19 + $0x78] sm:$0xff]  }
  0xee   : > { %v3059_v46 = vrot.slane %v3057_v6, 4  ;;  %v1169_v0 = vshrl.u32 %v947_v50, 16  ;;  %v3051_v54 = vrot.slane %v3050_v7, 4  ;;  %v1172_v30 = vshll.u32 %v947_v50, 16  ;;  %v359_v7 = vld [vmem:[%s8565_s19 + $0x80] sm:$0x1] }
  0xef   : > { %7283 = vmatmul.mubr.bf16.gmra.mrb[8].mxu0 %v6400_v3  ;;  %v1157_v26 = vsel %vm8598_vm4, %v1152_v23, %v1156_v44  ;;  %v1178_v41 = vshll.u32 %v948_v22, 16  ;;  %v1167_v43 = vsel %vm8598_vm4, %v1162_v63, %v1166_v55  ;;  %v3065_v39 = vrot.slane %v3063_v33, 5 }
  0xf0   : > { %v3060_v4 = vor.u32 %v3059_v46, %v3055_v14  ;;  %v1171_v18 = vrot.slane %v1169_v0, 4  ;;  %v6289_v32 = vcombine.low %v1157_v26, %v1167_v43  ;;  %v3056_v36 = vsel %vm8598_vm4, %v3051_v54, %v3055_v14 }
  0xf1   : > { %v1174_v47 = vrot.slane %v1172_v30, 5  ;;  %v1180_v49 = vrot.slane %v1178_v41, 5  ;;  %v1182_v31 = vshrl.u32 %v948_v22, 16  ;;  %v1188_v62 = vshll.u32 %v988_v35, 16  ;;  %v8932_v35 = vld [vmem:[%s8565_s19 + $0x8c] sm:$0x1] }
  0xf2   : > { %v3061_v44 = vrot.slane %v3060_v4, 4  ;;  %v615_v1 = vsel %vm561_vm2, %v8848_v42, 0.0  ;;  %7094 = vmatprep.mubr.bf16.mxu1 %v6289_v32  ;;  %v617_v50 = vsel %vm572_vm3, %v8854_v58, 0.0  ;;  %v531_v59 = vadd.f32 %v8880_v61, %v8868_v15  ;;  %v3607_v15 = vld [vmem:[#allocation2 + $0x24] sm:$0xe] }
  0xf3   : > { %v1175_v55 = vor.u32 %v1174_v47, %v1171_v18  ;;  %v6717_v21 = vpack.c.bf16 %v8851_v52, %v615_v1  ;;  %v1184_v22 = vrot.slane %v1182_v31, 4  ;;  %v1190_v3 = vrot.slane %v1188_v62, 5 }
  0xf4   : > { %v3066_v6 = vsel %vm8598_vm4, %v3061_v44, %v3065_v39  ;;  %v6609_v23 = vpack.c.bf16 %v617_v50, %v617_v50  ;;  %v532_v58 = vadd.f32 %v8880_v61, %v8871_v37  ;;  %v618_v52 = vsel %vm561_vm2, %v8883_v25, 0.0 }
  0xf5   : > { %v6401_v42 = vcombine.low %v3056_v36, %v3066_v6  ;;  %v1176_v14 = vrot.slane %v1175_v55, 4  ;;  %6830 = vst [vmem:[#allocation2 + $0x60] sm:$0xff] %v6717_v21   ;;  %v1185_v63 = vor.u32 %v1184_v22, %v1180_v49  ;;  %v6610_v46 = vpack.c.bf16 %v618_v52, %v618_v52 }
  0xf6   : > { %905 = vst [vmem:[#allocation2 + $0x68] sm:$0x1] %v6609_v23  ;;  %v6611_v33 = vpack.c.bf16 %v531_v59, %v531_v59  ;;  %v6420_v0 = vrot.slane %v3606_v56, 9  ;;  %v620_v54 = vsel %vm572_vm3, %v532_v58, 0.0  ;;  %v8929_v37 = vsel %vm8827_vm7, %v8694_v2, %v3681_v57 }
  0xf7   : > { %7286 = vmatprep.mubr.bf16.mxu0 %v6401_v42  ;;  %v1181_v26 = vsel %vm8598_vm4, %v1176_v14, %v1180_v49  ;;  %v6685_v25 = vunpack.c.l.bf16 %v6823_v19  ;;  %v1186_v30 = vrot.slane %v1185_v63, 4  ;;  %v6612_v41 = vpack.c.bf16 %v620_v54, %v620_v54  ;;  %906 = vst [vmem:[#allocation2 + $0x6c] sm:$0xf] %v6610_v46 }
  0xf8   : > { %907 = vst [vmem:[#allocation2 + $0x70] sm:$0xf] %v6611_v33  ;;  %v8938_v43 = vsel %vm8827_vm7, %v6420_v0, %v3678_v53  ;;  %v6686_v4 = vunpack.c.h.bf16 %v6823_v19  ;;  %v413_v2 = vunpack.c.l.bf16 %v359_v7  ;;  %v6421_v18 = vrot.slane %v3607_v15, 9 }
  0xf9   : > { %v472_v39 = vmul.f32 %v8864_v9, %v6685_v25  ;;  %v1191_v32 = vsel %vm8598_vm4, %v1186_v30, %v1190_v3  ;;  %908 = vst [vmem:[#allocation2 + $0x74] sm:$0x1] %v6612_v41  ;;  %v3685_v36 = vrot.slane %v8696_v8, 5  ;;  %v414_v44 = vunpack.c.l.bf16 %v8941_v29 }
  0xfa   : > { %v473_v16 = vmul.f32 %v8864_v9, %v6686_v4  ;;  %v6290_v47 = vcombine.low %v1181_v26, %v1191_v32  ;;  %v474_v49 = vmul.f32 %v8864_v9, %v413_v2  ;;  %v415_v21 = vunpack.c.h.bf16 %v8941_v29 }
  0xfb   : > { %v533_v56 = vadd.f32 %v8880_v61, %v472_v39  ;;  %v8963_v50 = vsel %vm8827_vm7, %v6421_v18, %v3685_v36  ;;  %v416_v59 = vunpack.c.l.bf16 %v8932_v35  ;;  %v475_v15 = vmul.f32 %v8864_v9, %v414_v44 }
  0xfc   : > { %v2872_v31 = vld [vmem:[#allocation2 + $0x60] sm:$0xf]  ;;  %v8954_v62 = vld [vmem:[#allocation2 + $0x64] sm:$0xf]  ;;  %v8957_v55 = vadd.f32 %v8880_v61, %v473_v16  ;;  %7095 = vmatmul.mubr.bf16.gmra.mrb[12].mxu1 %v6290_v47  ;;  %v535_v52 = vadd.f32 %v8880_v61, %v474_v49  ;;  %v10293_v8 = vrot.slane %v8734_v28, 5  ;;  %v7896_v28 = vld [vmem:[#allocation6 + $0x188] sm:$0xff]  }
  0xfd   : > { %v949_v1 = vld [vmem:[#allocation2 + $0x60] sm:$0xf]  ;;  %v8967_v19 = vld [vmem:[#allocation2 + $0x68] sm:$0x1]  ;;  %v3068_v6 = vshrl.u32 %v2872_v31, 16  ;;  %v3071_v22 = vshll.u32 %v2872_v31, 16  ;;  %v477_v27 = vmul.f32 %v8864_v9, %v416_v59  ;;  %v536_v24 = vadd.f32 %v8880_v61, %v475_v15 }
  0xfe   : > { %v3077_v3 = vshll.u32 %v8954_v62, 16  ;;  %v3081_v23 = vshrl.u32 %v8954_v62, 16  ;;  %v3087_v7 = vshll.u32 %v8967_v19, 16  ;;  %v950_v42 = vld [vmem:[#allocation2 + $0x64] sm:$0xf]  ;;  %v1193_v58 = vshrl.u32 %v949_v1, 16 }
  0xff   : > { %v989_v14 = vld [vmem:[#allocation2 + $0x68] sm:$0x1]  ;;  %v3070_v63 = vrot.slane %v3068_v6, 4  ;;  %v3073_v46 = vrot.slane %v3071_v22, 5  ;;  %v951_v26 = vld [vmem:[#allocation2 + $0x6c] sm:$0xf]  ;;  %v538_v15 = vadd.f32 %v8880_v61, %v477_v27 }
 0x100   : > { %v3079_v33 = vrot.slane %v3077_v3, 5  ;;  %v3083_v0 = vrot.slane %v3081_v23, 4  ;;  %v3089_v54 = vrot.slane %v3087_v7, 5  ;;  %v1195_v25 = vrot.slane %v1193_v58, 4  ;;  %v952_v32 = vld [vmem:[#allocation2 + $0x70] sm:$0xf] }
 0x101   : > { %v1196_v30 = vshll.u32 %v949_v1, 16  ;;  %v1202_v41 = vshll.u32 %v950_v42, 16  ;;  %v3074_v4 = vor.u32 %v3073_v46, %v3070_v63  ;;  %v1206_v39 = vshrl.u32 %v950_v42, 16  ;;  %v990_v23 = vld [vmem:[#allocation2 + $0x74] sm:$0x1] }
 0x102   : > { %v3084_v2 = vor.u32 %v3083_v0, %v3079_v33  ;;  %v1212_v18 = vshll.u32 %v989_v14, 16  ;;  %v1217_v31 = vshrl.u32 %v951_v26, 16  ;;  %v1220_v49 = vshll.u32 %v951_v26, 16 }
 0x103   : > { %v1198_v16 = vrot.slane %v1196_v30, 5  ;;  %v1204_v47 = vrot.slane %v1202_v41, 5  ;;  %v3075_v57 = vrot.slane %v3074_v4, 4  ;;  %v1208_v6 = vrot.slane %v1206_v39, 4  ;;  %v3608_v39 = vld [vmem:[#allocation2 + $0x30] sm:$0xe] }
 0x104   : > { %v3085_v44 = vrot.slane %v3084_v2, 4  ;;  %v1214_v22 = vrot.slane %v1212_v18, 5  ;;  %v1219_v53 = vrot.slane %v1217_v31, 4  ;;  %v1222_v7 = vrot.slane %v1220_v49, 5  ;;  %v6824_v49 = vld [vmem:[%s8565_s19 + $0x90] sm:$0xff]  }
 0x105   : > { %v1199_v3 = vor.u32 %v1198_v16, %v1195_v25  ;;  %v1226_v58 = vshll.u32 %v952_v32, 16  ;;  %v3080_v1 = vsel %vm8598_vm4, %v3075_v57, %v3079_v33  ;;  %v1209_v14 = vor.u32 %v1208_v6, %v1204_v47  ;;  %v365_v6 = vld [vmem:[%s8565_s19 + $0x98] sm:$0x1] }
 0x106   : > { %v3090_v42 = vsel %vm8598_vm4, %v3085_v44, %v3089_v54  ;;  %v1230_v63 = vshrl.u32 %v952_v32, 16  ;;  %v1223_v26 = vor.u32 %v1222_v7, %v1219_v53  ;;  %v1236_v2 = vshll.u32 %v990_v23, 16 }
 0x107   : > { %v6402_v46 = vcombine.low %v3080_v1, %v3090_v42  ;;  %v1200_v0 = vrot.slane %v1199_v3, 4  ;;  %v1228_v30 = vrot.slane %v1226_v58, 5  ;;  %v1210_v41 = vrot.slane %v1209_v14, 4 }
 0x108   : > { %v1232_v4 = vrot.slane %v1230_v63, 4  ;;  %v621_v25 = vsel %vm561_vm2, %v533_v56, 0.0  ;;  %v1224_v33 = vrot.slane %v1223_v26, 4  ;;  %v623_v54 = vsel %vm572_vm3, %v535_v52, 0.0 }
 0x109   : > { %7287 = vmatmul.mubr.bf16.gmra.mrb[12].mxu0 %v6402_v46  ;;  %v1205_v57 = vsel %vm8598_vm4, %v1200_v0, %v1204_v47  ;;  %v6722_v18 = vpack.c.bf16 %v8957_v55, %v621_v25  ;;  %v1215_v53 = vsel %vm8598_vm4, %v1210_v41, %v1214_v22  ;;  %v1238_v32 = vrot.slane %v1236_v2, 5  ;;  %v3609_v22 = vld [vmem:[#allocation2 + $0x3c] sm:$0xe] }
 0x10a   : > { %7322 = vmatprep.mubr.bf16.mxu0 %v6435_v40  ;;  %v1233_v56 = vor.u32 %v1232_v4, %v1228_v30  ;;  %v6615_v16 = vpack.c.bf16 %v623_v54, %v623_v54  ;;  %v6291_v31 = vcombine.low %v1205_v57, %v1215_v53  ;;  %v1229_v47 = vsel %vm8598_vm4, %v1224_v33, %v1228_v30 }
 0x10b   : > { %6831 = vst [vmem:[#allocation2 + $0x78] sm:$0xff] %v6722_v18   ;;  %v3687_v52 = vrot.slane %v3685_v36, 4  ;;  %v476_v55 = vmul.f32 %v8864_v9, %v415_v21  ;;  %v6422_v40 = vrot.slane %v3608_v39, 9  ;;  %v3692_v21 = vrot.slane %v8765_v10, 5  ;;  %v7898_v39 = vld [vmem:[#allocation6 + $0x190] sm:$0xff]  }
 0x10c   : > { %v1234_v44 = vrot.slane %v1233_v56, 4  ;;  %911 = vst [vmem:[#allocation2 + $0x80] sm:$0x1] %v6615_v16  ;;  %7098 = vmatprep.mubr.bf16.mxu1 %v6291_v31  ;;  %v3695_v3 = vrot.slane %v8767_v11, 5  ;;  %v624_v23 = vsel %vm561_vm2, %v536_v24, 0.0  ;;  %v626_v10 = vsel %vm572_vm3, %v538_v15, 0.0 }
 0x10d   : > { %v3689_v29 = vsel %vm8827_vm7, %v3687_v52, %v10293_v8  ;;  %v537_v36 = vadd.f32 %v8880_v61, %v476_v55  ;;  %v6616_v58 = vpack.c.bf16 %v624_v23, %v624_v23  ;;  %v3693_v42 = vsel %vm8827_vm7, %v6422_v40, %v3692_v21  ;;  %v366_v52 = vld [vmem:[%s8565_s19 + $0x9c] sm:$0xff]   ;;  %v7900_v8 = vld [vmem:[#allocation6 + $0x198] sm:$0xff]  }
 0x10e   : > { %v1239_v35 = vsel %vm8598_vm4, %v1234_v44, %v1238_v32  ;;  %v6437_v59 = vcombine.low %v8963_v50, %v3689_v29  ;;  %v3694_v11 = vrot.slane %v3692_v21, 4  ;;  %v6689_v14 = vunpack.c.l.bf16 %v6824_v49 }
 0x10f   : > { %v6292_v7 = vcombine.low %v1229_v47, %v1239_v35  ;;  %v6617_v1 = vpack.c.bf16 %v537_v36, %v537_v36  ;;  %v6690_v63 = vunpack.c.h.bf16 %v6824_v49  ;;  %v10294_v50 = vcombine.low %v8938_v43, %v8929_v37  ;;  %912 = vst [vmem:[#allocation2 + $0x84] sm:$0xf] %v6616_v58  ;;  %v368_v58 = vld [vmem:[%s8565_s19 + $0xa4] sm:$0x1] }
 0x110   : > { %v6618_v46 = vpack.c.bf16 %v626_v10, %v626_v10  ;;  %v419_v0 = vunpack.c.l.bf16 %v365_v6  ;;  %v6423_v26 = vrot.slane %v3609_v22, 9  ;;  %v3699_v30 = vrot.slane %v8787_v51, 5 }
 0x111   : > { %7099 = vmatmul.mubr.bf16.gmra.mrb[16].mxu1 %v6292_v7  ;;  %7323 = vmatmul.mubr.bf16.vlgmr.msra.gmra.mrb[0].mxu0 %v10294_v50  ;;  %913 = vst [vmem:[#allocation2 + $0x88] sm:$0xf] %v6617_v1  ;;  %v3696_v2 = vsel %vm8827_vm7, %v3694_v11, %v3695_v3  ;;  %v478_v37 = vmul.f32 %v8864_v9, %v6689_v14  ;;  %v3702_v25 = vrot.slane %v8789_v5, 5  ;;  %v420_v35 = vunpack.c.l.bf16 %v366_v52 }
 0x112   : > { %7355 = vmatpush3.bf16.msra.mxu0 %v8800_v45  ;;  %v9025_v41 = vld [vmem:[#allocation2 + $0x78] sm:$0xf]  ;;  %v9027_v4 = vld [vmem:[#allocation2 + $0x7c] sm:$0xf]  ;;  %7326 = vmatprep.mubr.bf16.mxu0 %v6437_v59  ;;  %v479_v43 = vmul.f32 %v8864_v9, %v6690_v63  ;;  %914 = vst [vmem:[#allocation2 + $0x8c] sm:$0x1] %v6618_v46  ;;  %v6438_v53 = vcombine.low %v3693_v42, %v3696_v2  ;;  %v421_v59 = vunpack.c.h.bf16 %v366_v52 }
 0x113   : > { %v991_v57 = vld [vmem:[#allocation2 + $0x80] sm:$0x1]  ;;  %v1241_v51 = vshrl.u32 %v9025_v41, 16  ;;  %v1244_v45 = vshll.u32 %v9025_v41, 16  ;;  %v1250_v33 = vshll.u32 %v9027_v4, 16  ;;  %v1254_v54 = vshrl.u32 %v9027_v4, 16  ;;  %7356 = vmatprep.subr.bf16.mxu0 %v7896_v28 }
 0x114   : > { %v1260_v18 = vshll.u32 %v991_v57, 16  ;;  %v480_v56 = vmul.f32 %v8864_v9, %v419_v0  ;;  %v539_v32 = vadd.f32 %v8880_v61, %v478_v37  ;;  %v540_v49 = vadd.f32 %v8880_v61, %v479_v43  ;;  %v7904_v63 = vld [vmem:[#allocation6 + $0x1a0] sm:$0xff]  }
 0x115   : > { %v1243_v5 = vrot.slane %v1241_v51, 4  ;;  %v1246_v16 = vrot.slane %v1244_v45, 5  ;;  %v1252_v31 = vrot.slane %v1250_v33, 5  ;;  %v1256_v47 = vrot.slane %v1254_v54, 4  ;;  %v9066_v33 = vld [vmem:[%s8565_s19 + $0xa8] sm:$0xff]   ;;  %v7908_v54 = vld [vmem:[#allocation6 + $0x1a8] sm:$0xff]  }
 0x116   : > { %v1262_v55 = vrot.slane %v1260_v18, 5  ;;  %7357 = vmatpush3.bf16.msra.mxu0 %v7896_v28  ;;  %v541_v44 = vadd.f32 %v8880_v61, %v480_v56  ;;  %v627_v27 = vsel %vm561_vm2, %v539_v32, 0.0  ;;  %v3700_v6 = vsel %vm8827_vm7, %v6423_v26, %v3699_v30  ;;  %v9047_v29 = vld [vmem:[#allocation2 + $0x84] sm:$0xf] }
 0x117   : > { %v1247_v24 = vor.u32 %v1246_v16, %v1243_v5  ;;  %v1257_v40 = vor.u32 %v1256_v47, %v1252_v31  ;;  %v3701_v22 = vrot.slane %v3699_v30, 4  ;;  %7358 = vmatprep.subr.bf16.mxu0 %v7898_v39  ;;  %v6727_v3 = vpack.c.bf16 %v540_v49, %v627_v27  ;;  %v3610_v30 = vld [vmem:[#allocation2 + $0x48] sm:$0xe] }
 0x118   : > { %v9049_v36 = vld [vmem:[#allocation2 + $0x88] sm:$0xf]  ;;  %v629_v21 = vsel %vm572_vm3, %v541_v44, 0.0  ;;  %v1265_v28 = vshrl.u32 %v9047_v29, 16  ;;  %v1268_v7 = vshll.u32 %v9047_v29, 16  ;;  %v481_v45 = vmul.f32 %v8864_v9, %v420_v35 }
 0x119   : > { %v1248_v15 = vrot.slane %v1247_v24, 4  ;;  %v1258_v23 = vrot.slane %v1257_v40, 4  ;;  %7327 = vmatmul.mubr.bf16.gmra.mrb[4].mxu0 %v6438_v53  ;;  %v992_v1 = vld [vmem:[#allocation2 + $0x8c] sm:$0x1]  ;;  %v1274_v42 = vshll.u32 %v9049_v36, 16  ;;  %v1278_v10 = vshrl.u32 %v9049_v36, 16 }
 0x11a   : > { %v6621_v11 = vpack.c.bf16 %v629_v21, %v629_v21  ;;  %6832 = vst [vmem:[#allocation2 + $0x90] sm:$0xff] %v6727_v3   ;;  %v3703_v14 = vsel %vm8827_vm7, %v3701_v22, %v3702_v25  ;;  %7359 = vmatpush3.bf16.msra.mxu0 %v7898_v39  ;;  %v1267_v0 = vrot.slane %v1265_v28, 4  ;;  %v1270_v26 = vrot.slane %v1268_v7, 5  ;;  %v371_v35 = vld [vmem:[%s8565_s19 + $0xb0] sm:$0x1] }
 0x11b   : > { %v1253_v50 = vsel %vm8598_vm4, %v1248_v15, %v1252_v31  ;;  %v1263_v46 = vsel %vm8598_vm4, %v1258_v23, %v1262_v55  ;;  %7360 = vmatprep.subr.bf16.mxu0 %v7900_v8  ;;  %v1276_v37 = vrot.slane %v1274_v42, 5  ;;  %v1280_v43 = vrot.slane %v1278_v10, 4 }
 0x11c   : > { %v6293_v2 = vcombine.low %v1253_v50, %v1263_v46  ;;  %v1284_v57 = vshll.u32 %v992_v1, 16  ;;  %917 = vst [vmem:[#allocation2 + $0x98] sm:$0x1] %v6621_v11  ;;  %v1271_v51 = vor.u32 %v1270_v26, %v1267_v0  ;;  %v6439_v25 = vcombine.low %v3700_v6, %v3703_v14  ;;  %v3611_v14 = vld [vmem:[#allocation2 + $0x54] sm:$0xe] }
 0x11d   : > { %v422_v39 = vunpack.c.l.bf16 %v368_v58  ;;  %v1281_v18 = vor.u32 %v1280_v43, %v1276_v37  ;;  %v482_v56 = vmul.f32 %v8864_v9, %v421_v59  ;;  %v6424_v32 = vrot.slane %v3610_v30, 9  ;;  %v7912_v58 = vld [vmem:[#allocation6 + $0x1b0] sm:$0xff]  }
 0x11e   : > { %7102 = vmatprep.mubr.bf16.mxu1 %v6293_v2  ;;  %v1286_v53 = vrot.slane %v1284_v57, 5  ;;  %7361 = vmatpush3.bf16.msra.mxu0 %v7900_v8  ;;  %v1272_v5 = vrot.slane %v1271_v51, 4  ;;  %v542_v31 = vadd.f32 %v8880_v61, %v481_v45  ;;  %v3706_v47 = vrot.slane %v8856_v60, 5 }
 0x11f   : > { %7330 = vmatprep.mubr.bf16.mxu0 %v6439_v25  ;;  %v483_v16 = vmul.f32 %v8864_v9, %v422_v39  ;;  %7362 = vmatprep.subr.bf16.mxu0 %v7904_v63  ;;  %v1282_v52 = vrot.slane %v1281_v18, 4  ;;  %v543_v55 = vadd.f32 %v8880_v61, %v482_v56  ;;  %v3709_v49 = vrot.slane %v8873_v17, 5  ;;  %v372_v39 = vld [vmem:[%s8565_s19 + $0xb4] sm:$0xff]  }
 0x120   : > { %v6693_v44 = vunpack.c.l.bf16 %v9066_v33  ;;  %v1277_v27 = vsel %vm8598_vm4, %v1272_v5, %v1276_v37  ;;  %v630_v60 = vsel %vm561_vm2, %v542_v31, 0.0  ;;  %v3707_v22 = vsel %vm8827_vm7, %v6424_v32, %v3706_v47  ;;  %v7916_v56 = vld [vmem:[#allocation6 + $0x1b8] sm:$0xff]  }
 0x121   : > { %v9077_v24 = vld [vmem:[#allocation2 + $0x90] sm:$0xf]  ;;  %v9079_v40 = vld [vmem:[#allocation2 + $0x94] sm:$0xf]  ;;  %v544_v6 = vadd.f32 %v8880_v61, %v483_v16  ;;  %v1287_v17 = vsel %vm8598_vm4, %v1282_v52, %v1286_v53  ;;  %v6622_v7 = vpack.c.bf16 %v630_v60, %v630_v60  ;;  %v6623_v46 = vpack.c.bf16 %v543_v55, %v543_v55 }
 0x122   : > { %v1289_v8 = vshrl.u32 %v9077_v24, 16  ;;  %v1292_v21 = vshll.u32 %v9077_v24, 16  ;;  %v1298_v3 = vshll.u32 %v9079_v40, 16  ;;  %7363 = vmatpush3.bf16.msra.mxu0 %v7904_v63  ;;  %v6294_v59 = vcombine.low %v1277_v27, %v1287_v17 }
 0x123   : > { %v993_v15 = vld [vmem:[#allocation2 + $0x98] sm:$0x1]  ;;  %v1302_v23 = vshrl.u32 %v9079_v40, 16  ;;  %v632_v28 = vsel %vm572_vm3, %v544_v6, 0.0  ;;  %7364 = vmatprep.subr.bf16.mxu0 %v7908_v54  ;;  %918 = vst [vmem:[#allocation2 + $0x9c] sm:$0xf] %v6622_v7  ;;  %v6694_v2 = vunpack.c.h.bf16 %v9066_v33  ;;  %v425_v37 = vunpack.c.l.bf16 %v371_v35 }
 0x124   : > { %v1291_v1 = vrot.slane %v1289_v8, 4  ;;  %v1294_v42 = vrot.slane %v1292_v21, 5  ;;  %v1300_v10 = vrot.slane %v1298_v3, 5  ;;  %v1308_v11 = vshll.u32 %v993_v15, 16  ;;  %7103 = vmatmul.mubr.bf16.gmra.mrb[20].mxu1 %v6294_v59  ;;  %919 = vst [vmem:[#allocation2 + $0xa0] sm:$0xf] %v6623_v46 }
 0x125   : > { %v1304_v50 = vrot.slane %v1302_v23, 4  ;;  %v6624_v63 = vpack.c.bf16 %v632_v28, %v632_v28  ;;  %v3708_v0 = vrot.slane %v3706_v47, 4  ;;  %v484_v51 = vmul.f32 %v8864_v9, %v6693_v44  ;;  %v9120_v21 = vld [vmem:[#allocation6 + $0x1c0] sm:$0xff]  }
 0x126   : > { %v1295_v26 = vor.u32 %v1294_v42, %v1291_v1  ;;  %v1310_v30 = vrot.slane %v1308_v11, 5  ;;  %7365 = vmatpush3.bf16.msra.mxu0 %v7908_v54  ;;  %v6425_v25 = vrot.slane %v3611_v14, 9  ;;  %v485_v53 = vmul.f32 %v8864_v9, %v6694_v2 }
 0x127   : > { %v1305_v43 = vor.u32 %v1304_v50, %v1300_v10  ;;  %920 = vst [vmem:[#allocation2 + $0xa4] sm:$0x1] %v6624_v63  ;;  %v3710_v57 = vsel %vm8827_vm7, %v3708_v0, %v3709_v49  ;;  %7366 = vmatprep.subr.bf16.mxu0 %v7912_v58  ;;  %v486_v33 = vmul.f32 %v8864_v9, %v425_v37  ;;  %v3713_v5 = vrot.slane %v8885_v34, 5 }
 0x128   : > { %v1296_v45 = vrot.slane %v1295_v26, 4  ;;  %v6440_v18 = vcombine.low %v3707_v22, %v3710_v57  ;;  %v545_v32 = vadd.f32 %v8880_v61, %v484_v51  ;;  %v3716_v16 = vrot.slane %v8887_v38, 5  ;;  %v374_v38 = vld [vmem:[%s8565_s19 + $0xbc] sm:$0x1]  ;;  %v3613_v51 = vld [vmem:[#allocation2 + $0x6c] sm:$0xe] }
 0x129   : > { %v1306_v54 = vrot.slane %v1305_v43, 4  ;;  %v546_v47 = vadd.f32 %v8880_v61, %v485_v53  ;;  %v547_v52 = vadd.f32 %v8880_v61, %v486_v33  ;;  %v426_v55 = vunpack.c.l.bf16 %v372_v39 }
 0x12a   : > { %v1301_v31 = vsel %vm8598_vm4, %v1296_v45, %v1300_v10  ;;  %7331 = vmatmul.mubr.bf16.gmra.mrb[8].mxu0 %v6440_v18  ;;  %v633_v44 = vsel %vm561_vm2, %v545_v32, 0.0  ;;  %v3714_v34 = vsel %vm8827_vm7, %v6425_v25, %v3713_v5  ;;  %v3715_v27 = vrot.slane %v3713_v5, 4  ;;  %v9116_v60 = vld [vmem:[#allocation2 + $0x9c] sm:$0xf]  ;;  %v3612_v10 = vld [vmem:[#allocation2 + $0x60] sm:$0xe] }
 0x12b   : > { %v1311_v49 = vsel %vm8598_vm4, %v1306_v54, %v1310_v30  ;;  %7367 = vmatpush3.bf16.msra.mxu0 %v7912_v58  ;;  %v635_v22 = vsel %vm572_vm3, %v547_v52, 0.0  ;;  %v6732_v17 = vpack.c.bf16 %v546_v47, %v633_v44  ;;  %v427_v8 = vunpack.c.h.bf16 %v372_v39  ;;  %v9126_v23 = vld [vmem:[#allocation2 + $0xa0] sm:$0xf]  ;;  %v2876_v5 = vld [vmem:[#allocation2 + $0x70] sm:$0xf] }
 0x12c   : > { %v6295_v6 = vcombine.low %v1301_v31, %v1311_v49  ;;  %7368 = vmatprep.subr.bf16.mxu0 %v7916_v56  ;;  %v1313_v3 = vshrl.u32 %v9116_v60, 16  ;;  %v1316_v35 = vshll.u32 %v9116_v60, 16  ;;  %v6627_v59 = vpack.c.bf16 %v635_v22, %v635_v22 }
 0x12d   : > { %v3717_v15 = vsel %vm8827_vm7, %v3715_v27, %v3716_v16  ;;  %6833 = vst [vmem:[#allocation2 + $0xa8] sm:$0xff] %v6732_v17   ;;  %v428_v58 = vunpack.c.l.bf16 %v374_v38  ;;  %v487_v1 = vmul.f32 %v8864_v9, %v426_v55  ;;  %v488_v42 = vmul.f32 %v8864_v9, %v427_v8  ;;  %v2877_v17 = vld [vmem:[#allocation2 + $0x74] sm:$0x1] }
 0x12e   : > { %7106 = vmatprep.mubr.bf16.mxu1 %v6295_v6  ;;  %v994_v28 = vld [vmem:[#allocation2 + $0xa4] sm:$0x1]  ;;  %v6441_v7 = vcombine.low %v3714_v34, %v3717_v15  ;;  %v1315_v11 = vrot.slane %v1313_v3, 4  ;;  %v1318_v14 = vrot.slane %v1316_v35, 5  ;;  %v1322_v50 = vshll.u32 %v9126_v23, 16 }
 0x12f   : > { %v1326_v46 = vshrl.u32 %v9126_v23, 16  ;;  %923 = vst [vmem:[#allocation2 + $0xb0] sm:$0x1] %v6627_v59  ;;  %7369 = vmatpush3.bf16.msra.mxu0 %v7916_v56  ;;  %v1332_v63 = vshll.u32 %v994_v28, 16  ;;  %v489_v0 = vmul.f32 %v8864_v9, %v428_v58  ;;  %v548_v26 = vadd.f32 %v8880_v61, %v487_v1 }
 0x130   : > { %7334 = vmatprep.mubr.bf16.mxu0 %v6441_v7  ;;  %v549_v30 = vadd.f32 %v8880_v61, %v488_v42  ;;  %7402 = vmatprep.subr.bf16.mxu0 %v9120_v21  ;;  %v1319_v2 = vor.u32 %v1318_v14, %v1315_v11  ;;  %v1324_v37 = vrot.slane %v1322_v50, 5  ;;  %v6426_v57 = vrot.slane %v3612_v10, 9 }
 0x131   : > { %v1328_v43 = vrot.slane %v1326_v46, 4  ;;  %v1334_v25 = vrot.slane %v1332_v63, 5  ;;  %v550_v39 = vadd.f32 %v8880_v61, %v489_v0  ;;  %v636_v45 = vsel %vm561_vm2, %v548_v26, 0.0 }
 0x132   : > { %v6629_v18 = vpack.c.bf16 %v549_v30, %v549_v30  ;;  %v1320_v53 = vrot.slane %v1319_v2, 4  ;;  %v6628_v33 = vpack.c.bf16 %v636_v45, %v636_v45  ;;  %v3720_v56 = vrot.slane %v8954_v62, 5 }
 0x133   : > { %v1329_v9 = vor.u32 %v1328_v43, %v1324_v37  ;;  %v638_v54 = vsel %vm572_vm3, %v550_v39, 0.0  ;;  %v3723_v32 = vrot.slane %v8967_v19, 5  ;;  %v6427_v16 = vrot.slane %v3613_v51, 9 }
 0x134   : > { %925 = vst [vmem:[#allocation2 + $0xb8] sm:$0xf] %v6629_v18  ;;  %v1325_v61 = vsel %vm8598_vm4, %v1320_v53, %v1324_v37  ;;  %v9145_v47 = vld [vmem:[#allocation2 + $0xa8] sm:$0xf]  ;;  %v9147_v52 = vld [vmem:[#allocation2 + $0xac] sm:$0xf]  ;;  %v6630_v55 = vpack.c.bf16 %v638_v54, %v638_v54  ;;  %v3721_v62 = vsel %vm8827_vm7, %v6426_v57, %v3720_v56 }
 0x135   : > { %v1330_v31 = vrot.slane %v1329_v9, 4  ;;  %924 = vst [vmem:[#allocation2 + $0xb4] sm:$0xf] %v6628_v33  ;;  %v1337_v44 = vshrl.u32 %v9145_v47, 16  ;;  %v1340_v19 = vshll.u32 %v9145_v47, 16  ;;  %v1346_v34 = vshll.u32 %v9147_v52, 16 }
 0x136   : > { %v995_v49 = vld [vmem:[#allocation2 + $0xb0] sm:$0x1]  ;;  %v1350_v27 = vshrl.u32 %v9147_v52, 16  ;;  %926 = vst [vmem:[#allocation2 + $0xbc] sm:$0x1] %v6630_v55  ;;  %v3722_v22 = vrot.slane %v3720_v56, 4 }
 0x137   : > { %v1335_v38 = vsel %vm8598_vm4, %v1330_v31, %v1334_v25  ;;  %v1356_v6 = vshll.u32 %v995_v49, 16  ;;  %v3727_v8 = vrot.slane %v2876_v5, 5  ;;  %v1339_v35 = vrot.slane %v1337_v44, 4  ;;  %v9171_v25 = vld [vmem:[#allocation2 + $0x7c] sm:$0xf] }
 0x138   : > { %v6296_v3 = vcombine.low %v1325_v61, %v1335_v38  ;;  %v1342_v59 = vrot.slane %v1340_v19, 5  ;;  %v1348_v15 = vrot.slane %v1346_v34, 5  ;;  %v1352_v28 = vrot.slane %v1350_v27, 4  ;;  %v3614_v9 = vld [vmem:[#allocation2 + $0x78] sm:$0xe] }
 0x139   : > { %v3724_v7 = vsel %vm8827_vm7, %v3722_v22, %v3723_v32  ;;  %v3728_v58 = vsel %vm8827_vm7, %v6427_v16, %v3727_v8  ;;  %v3729_v10 = vrot.slane %v3727_v8, 4  ;;  %v3730_v11 = vrot.slane %v2877_v17, 5  ;;  %v9177_v5 = vld [vmem:[#allocation2 + $0x80] sm:$0x1]  ;;  %v2882_v31 = vld [vmem:[#allocation2 + $0x88] sm:$0xf] }
 0x13a   : > { %7107 = vmatmul.mubr.bf16.gmra.mrb[24].mxu1 %v6296_v3  ;;  %v1343_v1 = vor.u32 %v1342_v59, %v1339_v35  ;;  %v6442_v42 = vcombine.low %v3721_v62, %v3724_v7  ;;  %v1353_v14 = vor.u32 %v1352_v28, %v1348_v15  ;;  %v1358_v50 = vrot.slane %v1356_v6, 5  ;;  %v3615_v19 = vld [vmem:[#allocation2 + $0x84] sm:$0xe]  ;;  %v2883_v38 = vld [vmem:[#allocation2 + $0x8c] sm:$0x1] }
 0x13b   : > { %v9161_v46 = vld [vmem:[#allocation2 + $0xb8] sm:$0xf]  ;;  %v3731_v2 = vsel %vm8827_vm7, %v3729_v10, %v3730_v11  ;;  %v6428_v49 = vrot.slane %v3614_v9, 9  ;;  %v3734_v44 = vrot.slane %v9171_v25, 5  ;;  %v3737_v27 = vrot.slane %v9177_v5, 5 }
 0x13c   : > { %v1344_v63 = vrot.slane %v1343_v1, 4  ;;  %v9163_v0 = vld [vmem:[#allocation2 + $0xb4] sm:$0xf]  ;;  %v1370_v26 = vshll.u32 %v9161_v46, 16  ;;  %v1374_v30 = vshrl.u32 %v9161_v46, 16  ;;  %7335 = vmatmul.mubr.bf16.gmra.mrb[12].mxu0 %v6442_v42  ;;  %v1354_v37 = vrot.slane %v1353_v14, 4 }
 0x13d   : > { %v1361_v43 = vshrl.u32 %v9163_v0, 16  ;;  %v1364_v57 = vshll.u32 %v9163_v0, 16  ;;  %v6443_v51 = vcombine.low %v3728_v58, %v3731_v2  ;;  %v996_v45 = vld [vmem:[#allocation2 + $0xbc] sm:$0x1]  ;;  %v2885_v6 = vld [vmem:[#allocation2 + $0x94] sm:$0xf]  ;;  %v3735_v17 = vsel %vm8827_vm7, %v6428_v49, %v3734_v44 }
 0x13e   : > { %v1349_v39 = vsel %vm8598_vm4, %v1344_v63, %v1348_v15  ;;  %v1372_v18 = vrot.slane %v1370_v26, 5  ;;  %v1376_v53 = vrot.slane %v1374_v30, 4  ;;  %v1359_v33 = vsel %vm8598_vm4, %v1354_v37, %v1358_v50  ;;  %v2886_v3 = vld [vmem:[#allocation2 + $0x98] sm:$0x1]  ;;  %v3616_v35 = vld [vmem:[#allocation2 + $0x90] sm:$0xe] }
 0x13f   : > { %v1363_v56 = vrot.slane %v1361_v43, 4  ;;  %v1366_v54 = vrot.slane %v1364_v57, 5  ;;  %v1380_v32 = vshll.u32 %v996_v45, 16  ;;  %7338 = vmatprep.mubr.bf16.mxu0 %v6443_v51  ;;  %v6297_v16 = vcombine.low %v1349_v39, %v1359_v33  ;;  %v3617_v7 = vld [vmem:[#allocation2 + $0x9c] sm:$0xe] }
 0x140   : > { %v1377_v61 = vor.u32 %v1376_v53, %v1372_v18  ;;  %v3736_v8 = vrot.slane %v3734_v44, 4  ;;  %v6429_v15 = vrot.slane %v3615_v19, 9  ;;  %v3741_v28 = vrot.slane %v2882_v31, 5  ;;  %v7987_v1 = vld [vmem:[#allocation2] sm:$0xf]  ;;  %v6826_v44 = vld [vmem:[%s8565_s19 + $0xc0] sm:$0xff]  }
 0x141   : > { %v1367_v55 = vor.u32 %v1366_v54, %v1363_v56  ;;  %v1382_v62 = vrot.slane %v1380_v32, 5  ;;  %7110 = vmatprep.mubr.bf16.mxu1 %v6297_v16  ;;  %v9187_v42 = vld [vmem:[#allocation2 + $0x4] sm:$0xf]  ;;  %v3744_v14 = vrot.slane %v2883_v38, 5  ;;  %v2888_v50 = vld [vmem:[#allocation2 + $0xa0] sm:$0xf] }
 0x142   : > { %v1378_v34 = vrot.slane %v1377_v61, 4  ;;  %v6307_v10 = vcombine.low %v7987_v1, %v9187_v42  ;;  %v3738_v11 = vsel %vm8827_vm7, %v3736_v8, %v3737_v27  ;;  %v2889_v63 = vld [vmem:[#allocation2 + $0xa4] sm:$0x1]  ;;  %v3742_v2 = vsel %vm8827_vm7, %v6429_v15, %v3741_v28  ;;  %v2891_v43 = vld [vmem:[#allocation2 + $0xac] sm:$0xf]  ;;  %v7907_v15 = vld [vmem:[#allocation6 + $0x88] sm:$0xff]  }
 0x143   : > { %v1368_v22 = vrot.slane %v1367_v55, 4  ;;  %v6444_v30 = vcombine.low %v3735_v17, %v3738_v11  ;;  %v3743_v37 = vrot.slane %v3741_v28, 4  ;;  %v6430_v57 = vrot.slane %v3616_v35, 9  ;;  %v2892_v32 = vld [vmem:[#allocation2 + $0xb0] sm:$0x1] }
 0x144   : > { %v1383_v59 = vsel %vm8598_vm4, %v1378_v34, %v1382_v62  ;;  %v3748_v51 = vrot.slane %v2885_v6, 5  ;;  %v3751_v39 = vrot.slane %v2886_v3, 5  ;;  %v3755_v53 = vrot.slane %v2888_v50, 5  ;;  %v3618_v61 = vld [vmem:[#allocation2 + $0xa8] sm:$0xe] }
 0x145   : > { %v1373_v58 = vsel %vm8598_vm4, %v1368_v22, %v1372_v18  ;;  %7339 = vmatmul.mubr.bf16.gmra.mrb[16].mxu0 %v6444_v30  ;;  %v3745_v45 = vsel %vm8827_vm7, %v3743_v37, %v3744_v14  ;;  %v6431_v18 = vrot.slane %v3617_v7, 9  ;;  %v3758_v9 = vrot.slane %v2889_v63, 5  ;;  %v2894_v55 = vld [vmem:[#allocation2 + $0xb8] sm:$0xf]  ;;  %v9204_v34 = vld [vmem:[#allocation2 + $0x10] sm:$0xf] }
 0x146   : > { %v6298_v26 = vcombine.low %v1373_v58, %v1383_v59  ;;  %v6445_v33 = vcombine.low %v3742_v2, %v3745_v45  ;;  %v3749_v56 = vsel %vm8827_vm7, %v6430_v57, %v3748_v51  ;;  %v3750_v54 = vrot.slane %v3748_v51, 4  ;;  %v377_v19 = vld [vmem:[%s8565_s19 + $0xc8] sm:$0x1]  ;;  %v7990_v27 = vld [vmem:[#allocation2 + $0xc] sm:$0xf] }
 0x147   : > { %v3757_v16 = vrot.slane %v3755_v53, 4  ;;  %v3762_v31 = vrot.slane %v2891_v43, 5  ;;  %v3756_v49 = vsel %vm8827_vm7, %v6431_v18, %v3755_v53  ;;  %v6308_v38 = vcombine.low %v7990_v27, %v9204_v34  ;;  %v7991_v6 = vld [vmem:[#allocation2 + $0x18] sm:$0xf]  ;;  %v9207_v22 = vld [vmem:[#allocation2 + $0x1c] sm:$0xf] }
 0x148   : > { %7111 = vmatmul.mubr.bf16.gmra.mrb[28].mxu1 %v6298_v26  ;;  %7342 = vmatprep.mubr.bf16.mxu0 %v6445_v33  ;;  %v3752_v62 = vsel %vm8827_vm7, %v3750_v54, %v3751_v39  ;;  %v6309_v17 = vcombine.low %v7991_v6, %v9207_v22  ;;  %v2895_v35 = vld [vmem:[#allocation2 + $0xbc] sm:$0x1]  ;;  %v3619_v59 = vld [vmem:[#allocation2 + $0xb4] sm:$0xe]  ;;  %v6432_v28 = vrot.slane %v3618_v61, 9  ;;  %v3765_v58 = vrot.slane %v2892_v32, 5 }
 0x149   : > { %7130 = vmatprep.mubr.bf16.mxu1 %v6307_v10  ;;  %v6446_v8 = vcombine.low %v3749_v56, %v3752_v62  ;;  %v3759_v3 = vsel %vm8827_vm7, %v3757_v16, %v3758_v9  ;;  %v3764_v7 = vrot.slane %v3762_v31, 4  ;;  %v3769_v1 = vrot.slane %v2894_v55, 5  ;;  %v7993_v2 = vld [vmem:[#allocation8] ss:$0 sm:$0xff]  ;;  %v7911_v18 = vld [vmem:[#allocation6 + $0x90] sm:$0xff]  }
 0x14a   : > { %v6447_v10 = vcombine.low %v3756_v49, %v3759_v3  ;;  %v6697_v11 = vunpack.c.l.bf16 %v6826_v44  ;;  %v6698_v14 = vunpack.c.h.bf16 %v6826_v44  ;;  %v431_v50 = vunpack.c.l.bf16 %v377_v19  ;;  %v7994_v51 = vld [vmem:[#allocation6 + $0x80] sm:$0xff]   ;;  %v7996_v16 = vld [vmem:[#allocation2 + $0x24] sm:$0xf]  ;;  %v7998_v49 = vld [vmem:[#allocation2 + $0x30] sm:$0xf] }
 0x14b   : > { %v6433_v63 = vrot.slane %v3619_v59, 9  ;;  %v3771_v26 = vrot.slane %v3769_v1, 4  ;;  %v3772_v30 = vrot.slane %v2895_v35, 5  ;;  %v3763_v39 = vsel %vm8827_vm7, %v6432_v28, %v3762_v31  ;;  %v7995_v53 = vld [vmem:[#allocation9] ss:$0 sm:$0xff] }
 0x14c   : > { %v490_v37 = vmul.f32 %v7993_v2, %v6697_v11  ;;  %v491_v43 = vmul.f32 %v7993_v2, %v6698_v14  ;;  %v492_v57 = vmul.f32 %v7993_v2, %v431_v50  ;;  %v3766_v45 = vsel %vm8827_vm7, %v3764_v7, %v3765_v58  ;;  %v9220_v61 = vld [vmem:[#allocation2 + $0x28] sm:$0xf]  ;;  %v9225_v44 = vld [vmem:[#allocation2 + $0x34] sm:$0xf]  ;;  %v8000_v3 = vld [vmem:[#allocation2 + $0x3c] sm:$0xf] }
 0x14d   : > { %7343 = vmatmul.mubr.bf16.gmra.mrb[20].mxu0 %v6446_v8  ;;  %v3770_v56 = vsel %vm8827_vm7, %v6433_v63, %v3769_v1  ;;  %v3773_v54 = vsel %vm8827_vm7, %v3771_v26, %v3772_v30  ;;  %v6310_v31 = vcombine.low %v7996_v16, %v9220_v61  ;;  %v6448_v55 = vcombine.low %v3763_v39, %v3766_v45  ;;  %v9230_v35 = vld [vmem:[#allocation2 + $0x40] sm:$0xf]  ;;  %v8002_v59 = vld [vmem:[#allocation2 + $0x48] sm:$0xf]  ;;  %v7926_v1 = vld [vmem:[#allocation6 + $0xa8] sm:$0xff]  }
 0x14e   : > { %7346 = vmatprep.mubr.bf16.mxu0 %v6447_v10  ;;  %v551_v9 = vadd.f32 %v7995_v53, %v490_v37  ;;  %v552_v33 = vadd.f32 %v7995_v53, %v491_v43  ;;  %v553_v32 = vadd.f32 %v7995_v53, %v492_v57  ;;  %v6311_v19 = vcombine.low %v7998_v49, %v9225_v44  ;;  %v7932_v37 = vld [vmem:[#allocation6 + $0xb0] sm:$0xff]   ;;  %v1979_v53 = vld [vmem:[#allocation2] sm:$0xe]  ;;  %v8008_v49 = vld [vmem:[#allocation2 + $0x8] sm:$0x1] }
 0x14f   : > { %v6449_v6 = vcombine.low %v3770_v56, %v3773_v54  ;;  %v6312_v13 = vcombine.low %v8000_v3, %v9230_v35  ;;  %v3125_v63 = vshll.u32 %v9171_v25, 16  ;;  %v3129_v26 = vshrl.u32 %v9171_v25, 16  ;;  %v7918_v57 = vld [vmem:[#allocation2 + $0x18] sm:$0xff]   ;;  %v9249_v56 = vld [vmem:[#allocation2 + $0x64] sm:$0xf] }
 0x150   : > { %7131 = vmatmul.mubr.bf16.vlgmr.msra.gmra.mrb[0].mxu1 %v6308_v38  ;;  %v639_v62 = vsel %vm561_vm2, %v551_v9, 0.0  ;;  %v641_v27 = vsel %vm572_vm3, %v553_v32, 0.0  ;;  %v9242_v39 = vld [vmem:[#allocation2 + $0x58] sm:$0xf]  ;;  %v2032_v32 = vrot.slane %v9187_v42, 5  ;;  %v7938_v16 = vld [vmem:[#allocation6 + $0xb8] sm:$0xff]  }
 0x151   : > { %7163 = vmatpush3.bf16.msra.mxu1 %v7994_v51  ;;  %7134 = vmatprep.mubr.bf16.mxu1 %v6309_v17  ;;  %v6737_v38 = vpack.c.bf16 %v552_v33, %v639_v62  ;;  %v7915_v17 = vld [vmem:[#allocation6 + $0x98] sm:$0xff]   ;;  %v6633_v8 = vpack.c.bf16 %v641_v27, %v641_v27  ;;  %v8004_v51 = vld [vmem:[#allocation2 + $0x54] sm:$0xf]  ;;  %v9245_v25 = vrot.slane %v3125_v63, 5  ;;  %v9247_v9 = vrot.slane %v3129_v26, 4 }
 0x152   : > { %7164 = vmatprep.subr.bf16.mxu1 %v7907_v15  ;;  %v6314_v45 = vcombine.low %v8004_v51, %v9242_v39  ;;  %v8006_v33 = vld [vmem:[#allocation2 + $0x60] sm:$0xf]  ;;  %v2046_v62 = vrot.slane %v9207_v22, 5  ;;  %v8009_v27 = vld [vmem:[#allocation2 + $0x14] sm:$0x1]  ;;  %v2034_v3 = vrot.slane %v2032_v32, 4 }
 0x153   : > { %6834 = vst [vmem:[#allocation2 + $0xc0] sm:$0xff] %v6737_v38   ;;  %929 = vst [vmem:[#allocation2 + $0xc8] sm:$0x1] %v6633_v8  ;;  %v6315_v54 = vcombine.low %v8006_v33, %v9249_v56  ;;  %v2042_v38 = vrot.slane %v8009_v27, 5  ;;  %v2053_v8 = vrot.slane %v9220_v61, 5  ;;  %v3132_v42 = vor.u32 %v9247_v9, %v9245_v25 }
 0x154   : > { %10295 = vst [vmem:[#allocation20_spill] sm:$0xff] %v9245_v25  ;;  %v1982_v22 = vld [vmem:[#allocation2 + $0x24] sm:$0xe]  ;;  %v6317_v61 = vcombine.low %v9025_v41, %v9027_v4  ;;  %v8012_v63 = vld [vmem:[#allocation2 + $0x20] sm:$0x1]  ;;  %v6320_v4 = vcombine.low %v9116_v60, %v9126_v23  ;;  %v6321_v33 = vcombine.low %v9145_v47, %v9147_v52 }
 0x155   : > { %7165 = vmatpush3.bf16.msra.mxu1 %v7907_v15  ;;  %7347 = vmatmul.mubr.bf16.gmra.mrb[24].mxu0 %v6448_v55  ;;  %v9233_v15 = vld [vmem:[#allocation2 + $0x4c] sm:$0xf]  ;;  %v2039_v55 = vrot.slane %v9204_v34, 5  ;;  %v6331_v34 = vrot.slane %v1979_v53, 9  ;;  %v2049_v26 = vrot.slane %v8012_v63, 5 }
 0x156   : > { %7166 = vmatprep.subr.bf16.mxu1 %v7911_v18  ;;  %7350 = vmatprep.mubr.bf16.mxu0 %v6449_v6  ;;  %v6313_v28 = vcombine.low %v8002_v59, %v9233_v15  ;;  %v7921_v6 = vld [vmem:[#allocation2 + $0x24] sm:$0xff]   ;;  %v8010_v59 = vld [vmem:[#allocation2 + $0x6c] sm:$0xf]  ;;  %v1984_v53 = vld [vmem:[#allocation2 + $0x3c] sm:$0xe] }
 0x157   : > { %v9274_v51 = vsel %vm8827_vm7, %v6331_v34, %v2032_v32  ;;  %v9304_v27 = vld [vmem:[#allocation2 + $0x48] sm:$0xe]  ;;  %v1986_v63 = vld [vmem:[#allocation2 + $0x54] sm:$0xe]  ;;  %v8016_v34 = vld [vmem:[#allocation2 + $0x50] sm:$0x1] }
 0x158   : > { %7135 = vmatmul.mubr.bf16.gmra.mrb[4].mxu1 %v6310_v31  ;;  %v1980_v31 = vld [vmem:[#allocation2 + $0xc] sm:$0xe]  ;;  %v4498_v60 = vld [vmem:[#allocation2 + $0x38] sm:$0x1]  ;;  %v8025_v25 = vld [vmem:[#allocation2 + $0xa0] sm:$0xf] }
 0x159   : > { %7138 = vmatprep.mubr.bf16.mxu1 %v6311_v19  ;;  %7167 = vmatpush3.bf16.msra.mxu1 %v7911_v18  ;;  %v2035_v19 = vrot.slane %v8008_v49, 5 }
 0x15a   : > { %7168 = vmatprep.subr.bf16.mxu1 %v7915_v17  ;;  %v2897_v7 = vld [vmem:[#allocation2 + $0xc4] sm:$0xf]  ;;  %v3620_v58 = vld [vmem:[#allocation2 + $0xc0] sm:$0xe]  ;;  %v2898_v10 = vld [vmem:[#allocation2 + $0xc8] sm:$0x1] }
 0x15b   : > { %v6434_v11 = vrot.slane %v3620_v58, 9  ;;  %v3776_v14 = vrot.slane %v2897_v7, 5  ;;  %v3779_v50 = vrot.slane %v2898_v10, 5  ;;  %v6332_v58 = vrot.slane %v1980_v31, 9  ;;  %v1983_v10 = vld [vmem:[#allocation2 + $0x30] sm:$0xe] }
 0x15c   : > { %v6335_v32 = vrot.slane %v1983_v10, 9  ;;  %v4490_v31 = vld [vmem:[#allocation2 + $0x18] sm:$0xf]  ;;  %v4494_v10 = vld [vmem:[#allocation2 + $0x28] sm:$0xf] }
 0x15d   : > { %7169 = vmatpush3.bf16.msra.mxu1 %v7915_v17  ;;  %v3777_v30 = vsel %vm8827_vm7, %v6434_v11, %v3776_v14  ;;  %v3778_v2 = vrot.slane %v3776_v14, 4  ;;  %v1981_v17 = vld [vmem:[#allocation2 + $0x18] sm:$0xe]  ;;  %v6318_v11 = vcombine.low %v9047_v29, %v9049_v36 }
 0x15e   : > { %7170 = vmatprep.subr.bf16.mxu1 %v7920_v12  ;;  %v6333_v14 = vrot.slane %v1981_v17, 9  ;;  %v7934_v17 = vld [vmem:[#allocation6 + $0x1d0] sm:$0xff]  }
 0x15f   : > { %v3780_v43 = vsel %vm8827_vm7, %v3778_v2, %v3779_v50  ;;  %v2048_v50 = vrot.slane %v2046_v62, 4  ;;  %v6319_v2 = vcombine.low %v9077_v24, %v9079_v40  ;;  %v4495_v24 = vld [vmem:[#allocation2 + $0x2c] sm:$0x1]  ;;  %v7948_v40 = vld [vmem:[#allocation6 + $0x1e8] sm:$0xff]  }
 0x160   : > { %7139 = vmatmul.mubr.bf16.gmra.mrb[8].mxu1 %v6312_v13  ;;  %v6450_v18 = vcombine.low %v3777_v30, %v3780_v43  ;;  %v9259_v13 = vld [vmem:[#allocation6 + $0xc0] sm:$0xff]   ;;  %v7928_v30 = vld [vmem:[#allocation6 + $0x1c8] sm:$0xff]   ;;  %v2055_v43 = vrot.slane %v2053_v8, 4  ;;  %v9297_v49 = vsel %vm8827_vm7, %v6333_v14, %v2046_v62  ;;  %v8015_v14 = vld [vmem:[#allocation2 + $0x44] sm:$0x1] }
 0x161   : > { %7142 = vmatprep.mubr.bf16.mxu1 %v6313_v28  ;;  %7171 = vmatpush3.bf16.msra.mxu1 %v7920_v12  ;;  %v3135_v12 = vshll.u32 %v9177_v5, 16  ;;  %v9261_v28 = vld [vmem:[#allocation2 + $0x70] sm:$0xf] }
 0x162   : > { %7172 = vmatprep.subr.bf16.mxu1 %v7926_v1  ;;  %7351 = vmatmul.mubr.bf16.gmra.mrb[28].mxu0 %v6450_v18  ;;  %v6316_v7 = vcombine.low %v8010_v59, %v9261_v28  ;;  %v7924_v5 = vld [vmem:[#allocation2 + $0x30] sm:$0xff]   ;;  %v2060_v18 = vrot.slane %v9225_v44, 5 }
 0x163   : > { %7370 = vmatprep.mubr.bf16.mxu0 %v7918_v57  ;;  %v8013_v57 = vld [vmem:[#allocation2 + $0x2c] sm:$0x1] }
 0x164   : > { %v2056_v41 = vrot.slane %v8013_v57, 5  ;;  %v2062_v59 = vrot.slane %v2060_v18, 4  ;;  %v4539_v57 = vshrl.u32 %v4490_v31, 16 }
 0x165   : > { %7173 = vmatpush3.bf16.msra.mxu1 %v7926_v1  ;;  %v2041_v1 = vrot.slane %v2039_v55, 4 }
 0x166   : > { %7174 = vmatprep.subr.bf16.mxu1 %v7932_v37  ;;  %v4541_v44 = vrot.slane %v4539_v57, 4 }
 0x168   : > { %7143 = vmatmul.mubr.bf16.gmra.mrb[12].mxu1 %v6314_v45  ;;  %v9278_v45 = vsel %vm8827_vm7, %v2034_v3, %v2035_v19  ;;  %v2067_v19 = vrot.slane %v9230_v35, 5  ;;  %v9316_v3 = vsel %vm8827_vm7, %v2055_v43, %v2056_v41  ;;  %v4493_v35 = vld [vmem:[#allocation2 + $0x24] sm:$0xf]  ;;  %v4542_v41 = vshll.u32 %v4490_v31, 16 }
 0x169   : > { %7146 = vmatprep.mubr.bf16.mxu1 %v6315_v54  ;;  %7175 = vmatpush3.bf16.msra.mxu1 %v7932_v37  ;;  %v6334_v37 = vrot.slane %v1982_v22, 9  ;;  %v9285_v54 = vsel %vm8827_vm7, %v6332_v58, %v2039_v55  ;;  %v9301_v55 = vsel %vm8827_vm7, %v2048_v50, %v2049_v26  ;;  %v7930_v22 = vld [vmem:[#allocation2 + $0x48] sm:$0xff]   ;;  %v2070_v50 = vrot.slane %v8015_v14, 5  ;;  %v7940_v26 = vld [vmem:[#allocation6 + $0x1d8] sm:$0xff]  }
 0x16a   : > { %7176 = vmatprep.subr.bf16.mxu1 %v7938_v16  ;;  %7371 = vmatmul.mubr.bf16.vlgmr.msra.gmra.mrb[0].mxu0 %v7921_v6  ;;  %v9306_v6 = vrot.slane %v3135_v12, 5  ;;  %v2069_v43 = vrot.slane %v2067_v19, 4  ;;  %v4566_v14 = vshll.u32 %v4493_v35, 16  ;;  %v4572_v12 = vshll.u32 %v4494_v10, 16 }
 0x16b   : > { %7403 = vmatpush3.bf16.msra.mxu0 %v9120_v21  ;;  %7374 = vmatprep.mubr.bf16.mxu0 %v7924_v5  ;;  %v7927_v21 = vld [vmem:[#allocation2 + $0x3c] sm:$0xff]   ;;  %v9312_v62 = vsel %vm8827_vm7, %v6334_v37, %v2053_v8  ;;  %v9324_v8 = vsel %vm8827_vm7, %v6335_v32, %v2060_v18  ;;  %v4563_v5 = vshrl.u32 %v4493_v35, 16  ;;  %v6338_v35 = vrot.slane %v1986_v63, 9 }
 0x16c   : > { %10296 = vst [vmem:[#allocation21_spill] sm:$0xff] %v9306_v6  ;;  %7404 = vmatprep.subr.bf16.mxu0 %v7928_v30  ;;  %v4568_v63 = vrot.slane %v4566_v14, 5  ;;  %v10299_v9 = vcombine.low %v9274_v51, %v9278_v45  ;;  %v8026_v6 = vld [vmem:[#allocation2 + $0x98] sm:$0x1] }
 0x16d   : > { %7177 = vmatpush3.bf16.msra.mxu1 %v7938_v16  ;;  %v9289_v16 = vsel %vm8827_vm7, %v2041_v1, %v2042_v38  ;;  %v4491_v38 = vld [vmem:[#allocation2 + $0x1c] sm:$0xf]  ;;  %v6336_v1 = vrot.slane %v1984_v53, 9  ;;  %v6337_v53 = vrot.slane %v9304_v27, 9  ;;  %v2077_v27 = vrot.slane %v8016_v34, 5 }
 0x16e   : > { %7210 = vmatprep.subr.bf16.mxu1 %v9259_v13  ;;  %v4548_v18 = vshll.u32 %v4491_v38, 16  ;;  %v4552_v32 = vshrl.u32 %v4491_v38, 16  ;;  %v9341_v38 = vsel %vm8827_vm7, %v2069_v43, %v2070_v50  ;;  %v8017_v34 = vld [vmem:[#allocation2 + $0x5c] sm:$0x1]  ;;  %v4565_v50 = vrot.slane %v4563_v5, 4 }
 0x16f   : > { %7405 = vmatpush3.bf16.msra.mxu0 %v7928_v30  ;;  %v9337_v37 = vsel %vm8827_vm7, %v6336_v1, %v2067_v19  ;;  %v7933_v19 = vld [vmem:[#allocation2 + $0x54] sm:$0xff]   ;;  %v9351_v43 = vrot.slane %v4572_v12, 5  ;;  %v2088_v5 = vrot.slane %v9249_v56, 5  ;;  %v4582_v56 = vshll.u32 %v4495_v24, 16 }
 0x170   : > { %7147 = vmatmul.mubr.bf16.gmra.mrb[16].mxu1 %v6316_v7  ;;  %v8014_v7 = vld [vmem:[#allocation2 + $0x38] sm:$0x1]  ;;  %7406 = vmatprep.subr.bf16.mxu0 %v7934_v17  ;;  %v4554_v1 = vrot.slane %v4552_v32, 4 }
 0x171   : > { %7150 = vmatprep.mubr.bf16.mxu1 %v6317_v61  ;;  %v2063_v58 = vrot.slane %v8014_v7, 5  ;;  %v2074_v61 = vrot.slane %v9233_v15, 5  ;;  %v2081_v7 = vrot.slane %v9242_v39, 5  ;;  %v4576_v15 = vshrl.u32 %v4494_v10, 16  ;;  %v7944_v39 = vld [vmem:[#allocation6 + $0x1e0] sm:$0xff]  }
 0x172   : > { %7375 = vmatmul.mubr.bf16.gmra.mrb[4].mxu0 %v7927_v21  ;;  %v1987_v21 = vld [vmem:[#allocation2 + $0x60] sm:$0xe]  ;;  %v4492_v10 = vld [vmem:[#allocation2 + $0x20] sm:$0x1] }
 0x173   : > { %v9333_v30 = vsel %vm8827_vm7, %v2062_v59, %v2063_v58  ;;  %v2076_v31 = vrot.slane %v2074_v61, 4  ;;  %7378 = vmatprep.mubr.bf16.mxu0 %v7930_v22  ;;  %7407 = vmatpush3.bf16.msra.mxu0 %v7934_v17  ;;  %v4544_v59 = vrot.slane %v4542_v41, 5  ;;  %v2083_v58 = vrot.slane %v2081_v7, 4  ;;  %v7936_v41 = vld [vmem:[#allocation2 + $0x60] sm:$0xff]  }
 0x174   : > { %7408 = vmatprep.subr.bf16.mxu0 %v7940_v26  ;;  %v2084_v22 = vrot.slane %v8017_v34, 5  ;;  %v9346_v17 = vrot.slane %v4548_v18, 5  ;;  %v4578_v57 = vrot.slane %v4576_v15, 4  ;;  %v9357_v36 = vsel %vm8827_vm7, %v6337_v53, %v2074_v61  ;;  %v4496_v61 = vld [vmem:[#allocation2 + $0x30] sm:$0xf] }
 0x175   : > { %v6339_v18 = vrot.slane %v1987_v21, 9  ;;  %v9367_v12 = vsel %vm8827_vm7, %v6338_v35, %v2081_v7  ;;  %v4545_v32 = vor.u32 %v4544_v59, %v4541_v44  ;;  %v1988_v15 = vld [vmem:[#allocation2 + $0x6c] sm:$0xe]  ;;  %v4569_v7 = vor.u32 %v4568_v63, %v4565_v50  ;;  %v4497_v44 = vld [vmem:[#allocation2 + $0x34] sm:$0xf]  ;;  %v7952_v63 = vld [vmem:[#allocation6 + $0x1f0] sm:$0xff]  }
 0x176   : > { %v9372_v53 = vsel %vm8827_vm7, %v2083_v58, %v2084_v22  ;;  %v4555_v14 = vor.u32 %v4554_v1, %v9346_v17  ;;  %v4579_v35 = vor.u32 %v4578_v57, %v9351_v43  ;;  %v8018_v59 = vld [vmem:[#allocation2 + $0x68] sm:$0x1]  ;;  %v4587_v34 = vshrl.u32 %v4496_v61, 16 }
 0x177   : > { %7409 = vmatpush3.bf16.msra.mxu0 %v7940_v26  ;;  %v4558_v26 = vshll.u32 %v4492_v10, 16  ;;  %v9381_v21 = vsel %vm8827_vm7, %v6339_v18, %v2088_v5  ;;  %v2091_v58 = vrot.slane %v8018_v59, 5  ;;  %v4590_v10 = vshll.u32 %v4496_v61, 16  ;;  %v8019_v59 = vld [vmem:[#allocation2 + $0x74] sm:$0x1] }
 0x178   : > { %7151 = vmatmul.mubr.bf16.gmra.mrb[20].mxu1 %v6318_v11  ;;  %v9361_v11 = vsel %vm8827_vm7, %v2076_v31, %v2077_v27  ;;  %7410 = vmatprep.subr.bf16.mxu0 %v7944_v39  ;;  %v2095_v31 = vrot.slane %v9261_v28, 5  ;;  %v2090_v22 = vrot.slane %v2088_v5, 4  ;;  %v4546_v1 = vrot.slane %v4545_v32, 4  ;;  %v1989_v32 = vld [vmem:[#allocation2 + $0x78] sm:$0xe] }
 0x179   : > { %7154 = vmatprep.mubr.bf16.mxu1 %v6319_v2  ;;  %v6340_v50 = vrot.slane %v1988_v15, 9  ;;  %v4556_v57 = vrot.slane %v4555_v14, 4  ;;  %v4560_v18 = vrot.slane %v4558_v26, 5  ;;  %v2098_v61 = vrot.slane %v8019_v59, 5  ;;  %v8020_v15 = vld [vmem:[#allocation2 + $0x7c] sm:$0xf] }
 0x17a   : > { %7379 = vmatmul.mubr.bf16.gmra.mrb[8].mxu0 %v7933_v19  ;;  %v7939_v19 = vld [vmem:[#allocation2 + $0x6c] sm:$0xff]   ;;  %v2097_v24 = vrot.slane %v2095_v31, 4  ;;  %v4584_v5 = vrot.slane %v4582_v56, 5  ;;  %v2102_v28 = vrot.slane %v8020_v15, 5  ;;  %v4589_v23 = vrot.slane %v4587_v34, 4  ;;  %v7941_v14 = vld [vmem:[#allocation2 + $0x78] sm:$0xff]  }
 0x17b   : > { %7382 = vmatprep.mubr.bf16.mxu0 %v7936_v41  ;;  %7411 = vmatpush3.bf16.msra.mxu0 %v7944_v39  ;;  %v4570_v39 = vrot.slane %v4569_v7, 4  ;;  %v4580_v41 = vrot.slane %v4579_v35, 4  ;;  %v4596_v27 = vshll.u32 %v4497_v44, 16  ;;  %v4600_v2 = vshrl.u32 %v4497_v44, 16  ;;  %v8021_v7 = vld [vmem:[#allocation2 + $0x88] sm:$0xf] }
 0x17c   : > { %7412 = vmatprep.subr.bf16.mxu0 %v7948_v40  ;;  %v9393_v26 = vsel %vm8827_vm7, %v2090_v22, %v2091_v58  ;;  %v4551_v47 = vsel %vm8598_vm4, %v4546_v1, %v9346_v17  ;;  %v9400_v52 = vsel %vm8827_vm7, %v6340_v50, %v2095_v31  ;;  %v2109_v35 = vrot.slane %v8021_v7, 5  ;;  %v7956_v56 = vld [vmem:[#allocation6 + $0x1f8] sm:$0xff]   ;;  %v4499_v17 = vld [vmem:[#allocation2 + $0x3c] sm:$0xf]  ;;  %v8023_v15 = vld [vmem:[#allocation2 + $0x8c] sm:$0x1] }
 0x17d   : > { %v9406_v44 = vsel %vm8827_vm7, %v2097_v24, %v2098_v61  ;;  %v6341_v58 = vrot.slane %v1989_v32, 9  ;;  %v8022_v34 = vld [vmem:[#allocation2 + $0x80] sm:$0x1]  ;;  %v4575_v31 = vsel %vm8598_vm4, %v4570_v39, %v9351_v43  ;;  %v4585_v22 = vsel %vm8598_vm4, %v4580_v41, %v4584_v5  ;;  %v9429_v39 = vld [vmem:[#allocation6 + $0x200] sm:$0xff]  }
 0x17e   : > { %v2104_v1 = vrot.slane %v2102_v28, 4  ;;  %v4606_v50 = vshll.u32 %v4498_v60, 16  ;;  %v4500_v61 = vld [vmem:[#allocation2 + $0x40] sm:$0xf]  ;;  %v2111_v32 = vrot.slane %v2109_v35, 4  ;;  %v2112_v7 = vrot.slane %v8023_v15, 5 }
 0x17f   : > { %7413 = vmatpush3.bf16.msra.mxu0 %v7948_v40  ;;  %v4561_v40 = vsel %vm8598_vm4, %v4556_v57, %v4560_v18  ;;  %v9413_v57 = vrot.slane %v4596_v27, 5  ;;  %v4602_v18 = vrot.slane %v4600_v2, 4  ;;  %v4614_v29 = vshll.u32 %v4499_v17, 16  ;;  %v4502_v5 = vld [vmem:[#allocation2 + $0x48] sm:$0xf] }
 0x180   : > { %7155 = vmatmul.mubr.bf16.gmra.mrb[24].mxu1 %v6320_v4  ;;  %v4592_v4 = vrot.slane %v4590_v10, 5  ;;  %7414 = vmatprep.subr.bf16.mxu0 %v7952_v63  ;;  %v2105_v10 = vrot.slane %v8022_v34, 5  ;;  %v4611_v34 = vshrl.u32 %v4499_v17, 16  ;;  %v9418_v43 = vrot.slane %v3132_v42, 4  ;;  %v9442_v60 = vld [vmem:[#allocation2 + $0x4c] sm:$0xf] }
 0x181   : > { %7158 = vmatprep.mubr.bf16.mxu1 %v6321_v33  ;;  %v1990_v33 = vld [vmem:[#allocation2 + $0x84] sm:$0xe]  ;;  %v9425_v27 = vcombine.low %v4551_v47, %v4561_v40  ;;  %v9436_v42 = vsel %vm8827_vm7, %v6341_v58, %v2102_v28  ;;  %v4624_v41 = vshrl.u32 %v4500_v61, 16  ;;  %10300 = vst [vmem:[#allocation23_spill] sm:$0xff] %v9442_v60  ;;  %v9447_v51 = vrot.slane %v4606_v50, 5 }
 0x182   : > { %7383 = vmatmul.mubr.bf16.gmra.mrb[12].mxu0 %v7939_v19  ;;  %v4593_v59 = vor.u32 %v4592_v4, %v4589_v23  ;;  %v6342_v24 = vrot.slane %v1990_v33, 9  ;;  %10297 = vst [vmem:[#allocation22_spill] sm:$0xff] %v9418_v43  ;;  %v10298_v19 = vcombine.low %v9163_v0, %v9161_v46  ;;  %v9440_v46 = vsel %vm8827_vm7, %v2104_v1, %v2105_v10  ;;  %v7943_v23 = vld [vmem:[#allocation2 + $0x84] sm:$0xff]   ;;  %v4505_v47 = vld [vmem:[#allocation2 + $0x54] sm:$0xf] }
 0x183   : > { %7386 = vmatprep.mubr.bf16.mxu0 %v7941_v14  ;;  %7415 = vmatpush3.bf16.msra.mxu0 %v7952_v63  ;;  %v4620_v0 = vshll.u32 %v4500_v61, 16  ;;  %v9444_v4 = vcombine.low %v4575_v31, %v4585_v22  ;;  %v4603_v14 = vor.u32 %v4602_v18, %v9413_v57  ;;  %v4501_v28 = vld [vmem:[#allocation2 + $0x44] sm:$0x1]  ;;  %v7945_v33 = vld [vmem:[#allocation2 + $0x90] sm:$0xff]   ;;  %v9457_v58 = vsel %vm8827_vm7, %v2111_v32, %v2112_v7  ;;  %v9459_v31 = vld [vmem:[#allocation2 + $0x58] sm:$0xf] }
 0x184   : > { %7416 = vmatprep.subr.bf16.mxu0 %v7956_v56  ;;  %v9451_v45 = vsel %vm8827_vm7, %v6342_v24, %v2109_v35  ;;  %v9453_v40 = vrot.slane %v4593_v59, 4  ;;  %10301 = vst [vmem:[#allocation24_spill] sm:$0xff] %v9457_v58  ;;  %v4613_v10 = vrot.slane %v4611_v34, 4  ;;  %v4616_v17 = vrot.slane %v4614_v29, 5  ;;  %10302 = vst [vmem:[#allocation25_spill] sm:$0xff] %v9459_v31  ;;  %v7946_v61 = vld [vmem:[#allocation6 + $0xc8] sm:$0xff]  }
 0x185   : > { %v4635_v22 = vshrl.u32 %v4502_v5, 16  ;;  %v4638_v1 = vshll.u32 %v4502_v5, 16  ;;  %v4644_v35 = vshll.u32 %v9442_v60, 16  ;;  %v4648_v50 = vshrl.u32 %v9442_v60, 16  ;;  %v9480_v5 = vld [vmem:[#allocation2 + $0x50] sm:$0x1] }
 0x186   : > { %v9464_v18 = vrot.slane %v4620_v0, 5  ;;  %v4659_v59 = vshrl.u32 %v4505_v47, 16  ;;  %v4662_v24 = vshll.u32 %v4505_v47, 16  ;;  %v9466_v32 = vrot.slane %v4603_v14, 4  ;;  %10303 = vst [vmem:[#allocation26_spill] sm:$0xff] %v9480_v5  ;;  %v7951_v58 = vld [vmem:[#allocation2 + $0xb4] sm:$0xff]  }
 0x187   : > { %7417 = vmatpush3.bf16.msra.mxu0 %v7956_v56  ;;  %v4626_v56 = vrot.slane %v4624_v41, 4  ;;  %v4630_v29 = vshll.u32 %v4501_v28, 16  ;;  %v4668_v15 = vshll.u32 %v9459_v31, 16  ;;  %v4672_v7 = vshrl.u32 %v9459_v31, 16  ;;  %v9478_v41 = vld [vmem:[#allocation2 + $0x90] sm:$0xe] }
 0x188   : > { %7159 = vmatmul.mubr.bf16.gmra.mrb[28].mxu1 %v10298_v19  ;;  %7450 = vmatprep.subr.bf16.mxu0 %v9429_v39  ;;  %v4617_v0 = vor.u32 %v4616_v17, %v4613_v10  ;;  %v4637_v14 = vrot.slane %v4635_v22, 4  ;;  %v4640_v28 = vrot.slane %v4638_v1, 5  ;;  %v9485_v47 = vrot.slane %v4644_v35, 5  ;;  %v4508_v34 = vld [vmem:[#allocation2 + $0x60] sm:$0xf]  ;;  %v7950_v17 = vld [vmem:[#allocation6 + $0xd0] sm:$0xff]  }
 0x189   : > { %7178 = vmatprep.mubr.bf16.mxu1 %v10299_v9  ;;  %v10305_v9 = vcombine.low %v9297_v49, %v9301_v55  ;;  %v7947_v10 = vld [vmem:[#allocation2 + $0x9c] sm:$0xff]   ;;  %v4627_v63 = vor.u32 %v4626_v56, %v9464_v18  ;;  %v8024_v2 = vld [vmem:[#allocation2 + $0x94] sm:$0xf]  ;;  %v7949_v22 = vld [vmem:[#allocation2 + $0xa8] sm:$0xff]   ;;  %v9500_v49 = vrot.slane %v4668_v15, 5  ;;  %v4674_v55 = vrot.slane %v4672_v7, 4 }
 0x18a   : > { %7387 = vmatmul.mubr.bf16.gmra.mrb[16].mxu0 %v7943_v23  ;;  %v10304_v23 = vcombine.low %v9285_v54, %v9289_v16  ;;  %v2116_v19 = vrot.slane %v8024_v2, 5  ;;  %v4661_v54 = vrot.slane %v4659_v59, 4  ;;  %v4664_v16 = vrot.slane %v4662_v24, 5  ;;  %v9498_v35 = vld [vmem:[#allocation2 + $0x5c] sm:$0x1] }
 0x18b   : > { %7390 = vmatprep.mubr.bf16.mxu0 %v7945_v33  ;;  %v4650_v33 = vrot.slane %v4648_v50, 4  ;;  %10306 = vst [vmem:[#allocation27_spill] sm:$0xff] %v9498_v35  ;;  %v6343_v50 = vrot.slane %v9478_v41, 9  ;;  %v4654_v2 = vshll.u32 %v9480_v5, 16  ;;  %v9504_v56 = vld [vmem:[#allocation2 + $0x64] sm:$0xf] }
 0x18c   : > { %v4683_v59 = vshrl.u32 %v4508_v34, 16  ;;  %v4686_v24 = vshll.u32 %v4508_v34, 16  ;;  %v2123_v43 = vrot.slane %v8025_v25, 5  ;;  %v9509_v15 = vrot.slane %v4627_v63, 4  ;;  %v7954_v5 = vld [vmem:[#allocation6 + $0xd8] sm:$0xff]  }
 0x18d   : > { %v4651_v1 = vor.u32 %v4650_v33, %v9485_v47  ;;  %v2118_v7 = vrot.slane %v2116_v19, 4  ;;  %v2119_v41 = vrot.slane %v8026_v6, 5  ;;  %v4665_v31 = vor.u32 %v4664_v16, %v4661_v54  ;;  %v8027_v60 = vld [vmem:[#allocation2 + $0xa4] sm:$0x1] }
 0x18e   : > { %v4675_v34 = vor.u32 %v4674_v55, %v9500_v49  ;;  %v4656_v25 = vrot.slane %v4654_v2, 5  ;;  %v4685_v63 = vrot.slane %v4683_v59, 4  ;;  %v4688_v33 = vrot.slane %v4686_v24, 5  ;;  %v8028_v59 = vld [vmem:[#allocation2 + $0xac] sm:$0xf] }
 0x18f   : > { %v10307_v6 = vcombine.low %v9312_v62, %v9316_v3  ;;  %v4652_v54 = vrot.slane %v4651_v1, 4  ;;  %v2125_v16 = vrot.slane %v2123_v43, 4  ;;  %v2126_v55 = vrot.slane %v8027_v60, 5  ;;  %v1993_v1 = vld [vmem:[#allocation2 + $0xa8] sm:$0xe] }
 0x190   : > { %7179 = vmatmul.mubr.bf16.vlgmr.msra.gmra.mrb[0].mxu1 %v10304_v23  ;;  %v4641_v23 = vor.u32 %v4640_v28, %v4637_v14  ;;  %v4692_v14 = vshll.u32 %v9504_v56, 16  ;;  %v4696_v28 = vshrl.u32 %v9504_v56, 16  ;;  %v9527_v62 = vsel %vm8827_vm7, %v6343_v50, %v2116_v19 }
 0x191   : > { %7211 = vmatpush3.bf16.msra.mxu1 %v9259_v13  ;;  %7182 = vmatprep.mubr.bf16.mxu1 %v10305_v9  ;;  %v9496_v13 = vrot.slane %v4630_v29, 5  ;;  %v9506_v9 = vrot.slane %v4617_v0, 4  ;;  %v1992_v29 = vld [vmem:[#allocation2 + $0x9c] sm:$0xe]  ;;  %v4678_v0 = vshll.u32 %v9498_v35, 16  ;;  %v10308_v35 = vcombine.low %v9324_v8, %v9333_v30 }
 0x192   : > { %7212 = vmatprep.subr.bf16.mxu1 %v7946_v61  ;;  %7391 = vmatmul.mubr.bf16.gmra.mrb[20].mxu0 %v7947_v10  ;;  %v4642_v10 = vrot.slane %v4641_v23, 4  ;;  %v4666_v3 = vrot.slane %v4665_v31, 4  ;;  %v2130_v60 = vrot.slane %v8028_v59, 5  ;;  %v4676_v24 = vrot.slane %v4675_v34, 4  ;;  %v9529_v30 = vld [vmem:[#allocation2 + $0x68] sm:$0x1] }
 0x193   : > { %7394 = vmatprep.mubr.bf16.mxu0 %v7949_v22  ;;  %v7957_v22 = vld [vmem:[#allocation6 + $0xe0] sm:$0xff]   ;;  %v4623_v2 = vsel %vm8598_vm4, %v9506_v9, %v9464_v18  ;;  %v4680_v8 = vrot.slane %v4678_v0, 5  ;;  %v7953_v23 = vld [vmem:[#allocation2 + $0xc0] sm:$0xff]   ;;  %v4633_v18 = vsel %vm8598_vm4, %v9509_v15, %v9496_v13  ;;  %v9539_v31 = vsel %vm8827_vm7, %v2118_v7, %v2119_v41  ;;  %v1994_v9 = vld [vmem:[#allocation2 + $0xb4] sm:$0xe] }
 0x194   : > { %v4689_v50 = vor.u32 %v4688_v33, %v4685_v63  ;;  %v4657_v34 = vsel %vm8598_vm4, %v4652_v54, %v4656_v25  ;;  %v9552_v13 = vsel %vm8827_vm7, %v2125_v16, %v2126_v55  ;;  %v6345_v15 = vrot.slane %v1993_v1, 9  ;;  %v9554_v7 = vld [vmem:[#allocation2 + $0x6c] sm:$0xf]  ;;  %v8029_v0 = vld [vmem:[#allocation2 + $0xb0] sm:$0x1] }
 0x195   : > { %7213 = vmatpush3.bf16.msra.mxu1 %v7946_v61  ;;  %v6344_v61 = vrot.slane %v1992_v29, 9  ;;  %v4647_v29 = vsel %vm8598_vm4, %v4642_v10, %v9485_v47  ;;  %v2132_v41 = vrot.slane %v2130_v60, 4  ;;  %v4702_v47 = vshll.u32 %v9529_v30, 16  ;;  %v8030_v33 = vld [vmem:[#allocation2 + $0xb8] sm:$0xf] }
 0x196   : > { %7214 = vmatprep.subr.bf16.mxu1 %v7950_v17  ;;  %v4681_v25 = vsel %vm8598_vm4, %v4676_v24, %v4680_v8  ;;  %v6346_v63 = vrot.slane %v1994_v9, 9  ;;  %v9577_v54 = vrot.slane %v4689_v50, 4  ;;  %v4707_v16 = vshrl.u32 %v9554_v7, 16  ;;  %v9593_v1 = vld [vmem:[#allocation2 + $0x70] sm:$0xf] }
 0x197   : > { %v9543_v19 = vsel %vm8827_vm7, %v6344_v61, %v2123_v43  ;;  %v4671_v43 = vsel %vm8598_vm4, %v4666_v3, %v9500_v49  ;;  %v10309_v49 = vsel %vm8598_vm4, %v9466_v32, %v9447_v51  ;;  %v10311_v55 = vcombine.low %v9337_v37, %v9341_v38  ;;  %v7955_v3 = vld [vmem:[#allocation2 + $0xcc] sm:$0xff]   ;;  %v4514_v59 = vld [vmem:[#allocation2 + $0x78] sm:$0xf]  ;;  %v8031_v8 = vld [vmem:[#allocation2 + $0xbc] sm:$0x1] }
 0x198   : > { %7183 = vmatmul.mubr.bf16.gmra.mrb[4].mxu1 %v10307_v6  ;;  %v9583_v51 = vcombine.low %v4623_v2, %v4633_v18  ;;  %v9585_v32 = vcombine.low %v4647_v29, %v4657_v34  ;;  %v10312_v24 = vcombine.low %v9357_v36, %v9361_v11  ;;  %v9598_v37 = vcombine.low %v4671_v43, %v4681_v25  ;;  %v7961_v18 = vld [vmem:[#allocation6 + $0xf0] sm:$0xff]   ;;  %v9615_v9 = vld [vmem:[#allocation2 + $0x88] sm:$0xf]  ;;  %v9627_v25 = vld [vmem:[#allocation2 + $0x94] sm:$0xf] }
 0x199   : > { %7186 = vmatprep.mubr.bf16.mxu1 %v10308_v35  ;;  %7215 = vmatpush3.bf16.msra.mxu1 %v7950_v17  ;;  %v9531_v17 = vrot.slane %v4692_v14, 5  ;;  %v4698_v35 = vrot.slane %v4696_v28, 4  ;;  %v2133_v14 = vrot.slane %v8029_v0, 5  ;;  %v7959_v28 = vld [vmem:[#allocation6 + $0xe8] sm:$0xff]   ;;  %v9604_v2 = vrot.slane %v4702_v47, 5  ;;  %10314 = vst [vmem:[#allocation29_spill] sm:$0xff] %v9615_v9 }
 0x19a   : > { %7216 = vmatprep.subr.bf16.mxu1 %v7954_v5  ;;  %7395 = vmatmul.mubr.bf16.gmra.mrb[24].mxu0 %v7951_v58  ;;  %v10310_v58 = vsel %vm8598_vm4, %v9453_v40, %v9413_v57  ;;  %v9591_v40 = vsel %vm8827_vm7, %v6345_v15, %v2130_v60  ;;  %v9606_v60 = vld [vmem:[#allocation2 + $0x7c] sm:$0xf]  ;;  %v9621_v34 = vrot.slane %v4707_v16, 4  ;;  %v4716_v15 = vshll.u32 %v9593_v1, 16  ;;  %10315 = vst [vmem:[#allocation30_spill] sm:$0xff] %v9627_v25 }
 0x19b   : > { %v4699_v61 = vor.u32 %v4698_v35, %v9531_v17  ;;  %7398 = vmatprep.mubr.bf16.mxu0 %v7953_v23  ;;  %v9573_v6 = vcombine.low %v10310_v58, %v10309_v49  ;;  %v9602_v38 = vsel %vm8827_vm7, %v2132_v41, %v2133_v14  ;;  %v2140_v35 = vrot.slane %v8031_v8, 5  ;;  %10313 = vst [vmem:[#allocation28_spill] sm:$0xff] %v9606_v60  ;;  %v4517_v23 = vld [vmem:[#allocation2 + $0x84] sm:$0xf]  ;;  %v4520_v41 = vld [vmem:[#allocation2 + $0x90] sm:$0xf] }
 0x19c   : > { %v4720_v43 = vshrl.u32 %v9593_v1, 16  ;;  %v4731_v0 = vshrl.u32 %v4514_v59, 16  ;;  %v4734_v14 = vshll.u32 %v4514_v59, 16  ;;  %v4740_v47 = vshll.u32 %v9606_v60, 16  ;;  %v7963_v58 = vld [vmem:[#allocation6 + $0xf8] sm:$0xff]  }
 0x19d   : > { %7217 = vmatpush3.bf16.msra.mxu1 %v7954_v5  ;;  %v2137_v5 = vrot.slane %v8030_v33, 5  ;;  %v9608_v50 = vrot.slane %v4699_v61, 4  ;;  %v4755_v61 = vshrl.u32 %v4517_v23, 16  ;;  %v4764_v33 = vshll.u32 %v9615_v9, 16  ;;  %v9635_v16 = vld [vmem:[#allocation2 + $0x74] sm:$0x1] }
 0x19e   : > { %7218 = vmatprep.subr.bf16.mxu1 %v7957_v22  ;;  %v4779_v59 = vshrl.u32 %v4520_v41, 16  ;;  %v4722_v8 = vrot.slane %v4720_v43, 4  ;;  %v4523_v57 = vld [vmem:[#allocation2 + $0x9c] sm:$0xf]  ;;  %v4733_v29 = vrot.slane %v4731_v0, 4  ;;  %v9647_v10 = vrot.slane %v4740_v47, 5 }
 0x19f   : > { %v9612_v36 = vsel %vm8827_vm7, %v6346_v63, %v2137_v5  ;;  %v2139_v11 = vrot.slane %v2137_v5, 4  ;;  %v4758_v63 = vshll.u32 %v4517_v23, 16  ;;  %v4768_v5 = vshrl.u32 %v9615_v9, 16 }
 0x1a0   : > { %7187 = vmatmul.mubr.bf16.gmra.mrb[8].mxu1 %v10311_v55  ;;  %v4788_v23 = vshll.u32 %v9627_v25, 16  ;;  %v4806_v47 = vshll.u32 %v4523_v57, 16 }
 0x1a1   : > { %7190 = vmatprep.mubr.bf16.mxu1 %v10312_v24  ;;  %7219 = vmatpush3.bf16.msra.mxu1 %v7957_v22  ;;  %v4710_v22 = vshll.u32 %v9554_v7, 16  ;;  %v4744_v7 = vshrl.u32 %v9606_v60, 16  ;;  %v9633_v49 = vsel %vm8827_vm7, %v2139_v11, %v2140_v35  ;;  %v4782_v24 = vshll.u32 %v4520_v41, 16  ;;  %v9645_v11 = vld [vmem:[#allocation2 + $0x80] sm:$0x1] }
 0x1a2   : > { %7220 = vmatprep.subr.bf16.mxu1 %v7959_v28  ;;  %7399 = vmatmul.mubr.bf16.gmra.mrb[28].mxu0 %v7955_v3  ;;  %v4792_v3 = vshrl.u32 %v9627_v25, 16  ;;  %v10316_v35 = vcombine.low %v9367_v12, %v9372_v53  ;;  %10317 = vst [vmem:[#allocation31_spill] sm:$0xff] %v9645_v11  ;;  %v4760_v43 = vrot.slane %v4758_v63, 5  ;;  %v9652_v25 = vrot.slane %v4764_v33, 5  ;;  %v9654_v60 = vld [vmem:[#allocation2 + $0xa0] sm:$0xf] }
 0x1a3   : > { %v4712_v55 = vrot.slane %v4710_v22, 5  ;;  %7418 = vmatprep.mubr.bf16.mxu0 %v9425_v27  ;;  %v4736_v22 = vrot.slane %v4734_v14, 5  ;;  %v4746_v41 = vrot.slane %v4744_v7, 4  ;;  %v10318_v27 = vcombine.low %v9381_v21, %v9393_v26  ;;  %10319 = vst [vmem:[#allocation32_spill] sm:$0xff] %v9654_v60  ;;  %v9656_v12 = vld [vmem:[#allocation2 + $0x8c] sm:$0x1] }
 0x1a4   : > { %v4770_v9 = vrot.slane %v4768_v5, 4  ;;  %v4781_v53 = vrot.slane %v4779_v59, 4  ;;  %v4784_v0 = vrot.slane %v4782_v24, 5  ;;  %v4803_v14 = vshrl.u32 %v4523_v57, 16  ;;  %v9664_v5 = vld [vmem:[#allocation2 + $0x98] sm:$0x1] }
 0x1a5   : > { %7221 = vmatpush3.bf16.msra.mxu1 %v7959_v28  ;;  %v9638_v28 = vrot.slane %v4716_v15, 5  ;;  %v4757_v15 = vrot.slane %v4755_v61, 4  ;;  %v4713_v7 = vor.u32 %v4712_v55, %v9621_v34  ;;  %v4726_v21 = vshll.u32 %v9635_v16, 16  ;;  %v7960_v61 = vld [vmem:[#allocation6 + $0x208] sm:$0xff]  }
 0x1a6   : > { %7222 = vmatprep.subr.bf16.mxu1 %v7961_v18  ;;  %v9660_v26 = vrot.slane %v4788_v23, 5  ;;  %v4750_v33 = vshll.u32 %v9645_v11, 16  ;;  %v4816_v59 = vshrl.u32 %v9654_v60, 16  ;;  %v4737_v57 = vor.u32 %v4736_v22, %v4733_v29  ;;  %v9671_v23 = vld [vmem:[#allocation6 + $0x100] sm:$0xff]   ;;  %v7962_v29 = vld [vmem:[#allocation6 + $0x210] sm:$0xff]  }
 0x1a7   : > { %v4723_v63 = vor.u32 %v4722_v8, %v9638_v28  ;;  %v4747_v34 = vor.u32 %v4746_v41, %v9647_v10  ;;  %v4761_v55 = vor.u32 %v4760_v43, %v4757_v15  ;;  %v4774_v24 = vshll.u32 %v9656_v12, 16 }
 0x1a8   : > { %7191 = vmatmul.mubr.bf16.gmra.mrb[12].mxu1 %v10316_v35  ;;  %v4812_v35 = vshll.u32 %v9654_v60, 16  ;;  %v4771_v8 = vor.u32 %v4770_v9, %v9652_v25  ;;  %v4808_v11 = vrot.slane %v4806_v47, 5  ;;  %v4798_v41 = vshll.u32 %v9664_v5, 16 }
 0x1a9   : > { %7194 = vmatprep.mubr.bf16.mxu1 %v10318_v27  ;;  %7223 = vmatpush3.bf16.msra.mxu1 %v7961_v18  ;;  %v4794_v18 = vrot.slane %v4792_v3, 4  ;;  %v4785_v3 = vor.u32 %v4784_v0, %v4781_v53  ;;  %v4805_v27 = vrot.slane %v4803_v14, 4  ;;  %v10320_v9 = vcombine.low %v9400_v52, %v9406_v44  ;;  %v4526_v53 = vld [vmem:[#allocation2 + $0xa8] sm:$0xf] }
 0x1aa   : > { %7224 = vmatprep.subr.bf16.mxu1 %v7963_v58  ;;  %7419 = vmatmul.mubr.bf16.vlgmr.msra.gmra.mrb[0].mxu0 %v9444_v4  ;;  %v4728_v4 = vrot.slane %v4726_v21, 5  ;;  %v4714_v15 = vrot.slane %v4713_v7, 4  ;;  %v9686_v43 = vrot.slane %v4812_v35, 5  ;;  %v10321_v0 = vcombine.low %v9436_v42, %v9440_v46  ;;  %v9691_v21 = vld [vmem:[#allocation2 + $0xa4] sm:$0x1] }
 0x1ab   : > { %7451 = vmatpush3.bf16.msra.mxu0 %v9429_v39  ;;  %7422 = vmatprep.mubr.bf16.mxu0 %v9573_v6  ;;  %v4795_v22 = vor.u32 %v4794_v18, %v9660_v26  ;;  %v4724_v39 = vrot.slane %v4723_v63, 4  ;;  %v4818_v6 = vrot.slane %v4816_v59, 4  ;;  %v4752_v14 = vrot.slane %v4750_v33, 5  ;;  %v9693_v7 = vld [vmem:[#allocation2 + $0xac] sm:$0xf]  ;;  %v7964_v33 = vld [vmem:[#allocation6 + $0x218] sm:$0xff]  }
 0x1ac   : > { %7452 = vmatprep.subr.bf16.mxu0 %v7960_v61  ;;  %v4776_v47 = vrot.slane %v4774_v24, 5  ;;  %v4762_v18 = vrot.slane %v4761_v55, 4  ;;  %v4772_v52 = vrot.slane %v4771_v8, 4  ;;  %v4786_v44 = vrot.slane %v4785_v3, 4 }
 0x1ad   : > { %7225 = vmatpush3.bf16.msra.mxu1 %v7963_v58  ;;  %v4705_v58 = vsel %vm8598_vm4, %v9608_v50, %v9604_v2  ;;  %v4738_v2 = vrot.slane %v4737_v57, 4  ;;  %v4748_v50 = vrot.slane %v4747_v34, 4  ;;  %v4796_v63 = vrot.slane %v4795_v22, 4  ;;  %v9702_v34 = vld [vmem:[#allocation2 + $0xb0] sm:$0x1] }
 0x1ae   : > { %7498 = vmatprep.subr.bf16.mxu1 %v9671_v23  ;;  %v4800_v35 = vrot.slane %v4798_v41, 5  ;;  %v4827_v59 = vshrl.u32 %v4526_v53, 16  ;;  %v4830_v60 = vshll.u32 %v4526_v53, 16  ;;  %v4719_v42 = vsel %vm8598_vm4, %v4714_v15, %v9638_v28  ;;  %v5248_v41 = vld [vmem:[#allocation2 + $0x48] sm:$0xe]  ;;  %v10322_v15 = vld [vmem:[#allocation24_spill] sm:$0xff] }
 0x1af   : > { %7453 = vmatpush3.bf16.msra.mxu0 %v7960_v61  ;;  %v4729_v46 = vsel %vm8598_vm4, %v4724_v39, %v4728_v4  ;;  %v4819_v57 = vor.u32 %v4818_v6, %v9686_v43  ;;  %v4743_v61 = vsel %vm8598_vm4, %v4738_v2, %v9647_v10  ;;  %v4753_v55 = vsel %vm8598_vm4, %v4748_v50, %v4752_v14 }
 0x1b0   : > { %7195 = vmatmul.mubr.bf16.gmra.mrb[16].mxu1 %v10320_v9  ;;  %v4809_v9 = vor.u32 %v4808_v11, %v4805_v27  ;;  %7454 = vmatprep.subr.bf16.mxu0 %v7962_v29  ;;  %v4822_v11 = vshll.u32 %v9691_v21, 16  ;;  %v4836_v24 = vshll.u32 %v9693_v7, 16  ;;  %v4840_v28 = vshrl.u32 %v9693_v7, 16 }
 0x1b1   : > { %7198 = vmatprep.mubr.bf16.mxu1 %v10321_v0  ;;  %v4767_v8 = vsel %vm8598_vm4, %v4762_v18, %v9652_v25  ;;  %v4777_v3 = vsel %vm8598_vm4, %v4772_v52, %v4776_v47  ;;  %v4791_v10 = vsel %vm8598_vm4, %v4786_v44, %v9660_v26  ;;  %v4801_v4 = vsel %vm8598_vm4, %v4796_v63, %v4800_v35  ;;  %v9735_v0 = vld [vmem:[#allocation2 + $0xb4] sm:$0xf] }
 0x1b2   : > { %7423 = vmatmul.mubr.bf16.gmra.mrb[4].mxu0 %v9583_v51  ;;  %v4810_v27 = vrot.slane %v4809_v9, 4  ;;  %v9723_v22 = vrot.slane %v4827_v59, 4  ;;  %v9725_v51 = vrot.slane %v4830_v60, 5  ;;  %v4846_v25 = vshll.u32 %v9702_v34, 16  ;;  %v7970_v63 = vld [vmem:[#allocation6 + $0x228] sm:$0xff]   ;;  %v10326_v59 = vld [vmem:[#allocation23_spill] sm:$0xff] }
 0x1b3   : > { %7426 = vmatprep.mubr.bf16.mxu0 %v9585_v32  ;;  %7455 = vmatpush3.bf16.msra.mxu0 %v7962_v29  ;;  %v10323_v39 = vcombine.low %v9451_v45, %v10322_v15  ;;  %v6361_v26 = vcombine.low %v9591_v40, %v9602_v38  ;;  %v6362_v32 = vcombine.low %v9612_v36, %v9633_v49  ;;  %v7967_v29 = vld [vmem:[#allocation6 + $0x220] sm:$0xff]   ;;  %v4820_v6 = vrot.slane %v4819_v57, 4  ;;  %v7973_v15 = vld [vmem:[#allocation6 + $0x230] sm:$0xff]  }
 0x1b4   : > { %7456 = vmatprep.subr.bf16.mxu0 %v7964_v33  ;;  %v4824_v53 = vrot.slane %v4822_v11, 5  ;;  %v10324_v60 = vcombine.low %v9527_v62, %v9539_v31  ;;  %v10325_v45 = vsel %vm8598_vm4, %v9577_v54, %v9531_v17  ;;  %v9745_v40 = vcombine.low %v4719_v42, %v4729_v46  ;;  %v5249_v62 = vld [vmem:[#allocation2 + $0x54] sm:$0xe]  ;;  %v10327_v46 = vld [vmem:[#allocation26_spill] sm:$0xff] }
 0x1b5   : > { %v6489_v2 = vcombine.low %v10325_v45, %v4705_v58  ;;  %v9747_v38 = vrot.slane %v4836_v24, 5  ;;  %v4842_v50 = vrot.slane %v4840_v28, 4  ;;  %v9749_v14 = vcombine.low %v4743_v61, %v4753_v55  ;;  %v9762_v58 = vld [vmem:[#allocation2 + $0xb8] sm:$0xf]  ;;  %v10329_v24 = vld [vmem:[#allocation27_spill] sm:$0xff] }
 0x1b6   : > { %v9751_v47 = vcombine.low %v4767_v8, %v4777_v3  ;;  %v9753_v18 = vcombine.low %v4791_v10, %v4801_v4  ;;  %v6511_v52 = vrot.slane %v5248_v41, 9  ;;  %v4815_v31 = vsel %vm8598_vm4, %v4810_v27, %v9686_v43  ;;  %v10328_v61 = vld [vmem:[#allocation25_spill] sm:$0xff]  ;;  %v5251_v8 = vld [vmem:[#allocation2 + $0x6c] sm:$0xe] }
 0x1b7   : > { %7457 = vmatpush3.bf16.msra.mxu0 %v7964_v33  ;;  %v4833_v17 = vor.u32 %v9725_v51, %v9723_v22  ;;  %v9760_v54 = vrot.slane %v4846_v25, 5  ;;  %v4851_v44 = vshrl.u32 %v9735_v0, 16  ;;  %v4825_v9 = vsel %vm8598_vm4, %v4820_v6, %v4824_v53  ;;  %v5250_v33 = vld [vmem:[#allocation2 + $0x60] sm:$0xe] }
 0x1b8   : > { %7199 = vmatmul.mubr.bf16.gmra.mrb[20].mxu1 %v10323_v39  ;;  %7458 = vmatprep.subr.bf16.mxu0 %v7967_v29  ;;  %v4854_v35 = vshll.u32 %v9735_v0, 16  ;;  %v5338_v42 = vrot.slane %v10326_v59, 5  ;;  %v5341_v43 = vrot.slane %v10327_v46, 5  ;;  %v4843_v57 = vor.u32 %v4842_v50, %v9747_v38  ;;  %v4532_v39 = vld [vmem:[#allocation2 + $0xc0] sm:$0xf] }
 0x1b9   : > { %7202 = vmatprep.mubr.bf16.mxu1 %v10324_v60  ;;  %v6512_v11 = vrot.slane %v5249_v62, 9  ;;  %v5345_v55 = vrot.slane %v10328_v61, 5  ;;  %v5348_v28 = vrot.slane %v10329_v24, 5  ;;  %v4860_v3 = vshll.u32 %v9762_v58, 16  ;;  %v9805_v50 = vld [vmem:[#allocation2 + $0xbc] sm:$0x1] }
 0x1ba   : > { %7427 = vmatmul.mubr.bf16.gmra.mrb[8].mxu0 %v9598_v37  ;;  %v4864_v10 = vshrl.u32 %v9762_v58, 16  ;;  %v9778_v27 = vsel %vm8827_vm7, %v6511_v52, %v5338_v42  ;;  %v5340_v4 = vrot.slane %v5338_v42, 4  ;;  %v9780_v22 = vcombine.low %v4815_v31, %v4825_v9  ;;  %v7976_v46 = vld [vmem:[#allocation6 + $0x238] sm:$0xff]  }
 0x1bb   : > { %7430 = vmatprep.mubr.bf16.mxu0 %v6489_v2  ;;  %7459 = vmatpush3.bf16.msra.mxu0 %v7967_v29  ;;  %v9784_v51 = vsel %vm8827_vm7, %v6512_v11, %v5345_v55  ;;  %v5347_v25 = vrot.slane %v5345_v55, 4  ;;  %v6513_v41 = vrot.slane %v5250_v33, 9  ;;  %v10330_v37 = vcombine.low %v9543_v19, %v9552_v13 }
 0x1bc   : > { %7460 = vmatprep.subr.bf16.mxu0 %v7970_v63  ;;  %v9791_v6 = vsel %vm8827_vm7, %v5340_v4, %v5341_v43  ;;  %v5352_v29 = vrot.slane %v9504_v56, 5  ;;  %v5355_v53 = vrot.slane %v9529_v30, 5  ;;  %v6514_v0 = vrot.slane %v5251_v8, 9  ;;  %v9807_v56 = vld [vmem:[#allocation2 + $0xc4] sm:$0xf] }
 0x1bd   : > { %v6527_v60 = vcombine.low %v9778_v27, %v9791_v6  ;;  %v9799_v19 = vsel %vm8827_vm7, %v5347_v25, %v5348_v28  ;;  %v5359_v13 = vrot.slane %v9593_v1, 5  ;;  %v5362_v45 = vrot.slane %v9635_v16, 5  ;;  %v5253_v8 = vld [vmem:[#allocation2 + $0x84] sm:$0xe]  ;;  %v10332_v25 = vld [vmem:[#allocation31_spill] sm:$0xff]  ;;  %v7983_v27 = vld [vmem:[#allocation2 + $0xb4] sm:$0xff]  }
 0x1be   : > { %v9803_v2 = vrot.slane %v4833_v17, 4  ;;  %v6528_v30 = vcombine.low %v9784_v51, %v9799_v19  ;;  %v5354_v52 = vrot.slane %v5352_v29, 4  ;;  %v9815_v62 = vrot.slane %v4851_v44, 4  ;;  %v5252_v17 = vld [vmem:[#allocation2 + $0x78] sm:$0xe] }
 0x1bf   : > { %7461 = vmatpush3.bf16.msra.mxu0 %v7970_v63  ;;  %v4875_v1 = vshrl.u32 %v4532_v39, 16  ;;  %v9819_v16 = vsel %vm8827_vm7, %v6514_v0, %v5359_v13  ;;  %v5361_v31 = vrot.slane %v5359_v13, 4  ;;  %v9821_v9 = vrot.slane %v4843_v57, 4  ;;  %v2878_v44 = vld [vmem:[#allocation2 + $0x78] sm:$0xf]  ;;  %v7965_v63 = vld [vmem:[#allocation2 + $0xc] sm:$0xff]  }
 0x1c0   : > { %7203 = vmatmul.mubr.bf16.gmra.mrb[24].mxu1 %v10330_v37  ;;  %v9823_v59 = vrot.slane %v4854_v35, 5  ;;  %7462 = vmatprep.subr.bf16.mxu0 %v7973_v15  ;;  %v4878_v42 = vshll.u32 %v4532_v39, 16  ;;  %v9827_v43 = vsel %vm8827_vm7, %v5354_v52, %v5355_v53  ;;  %v9829_v33 = vrot.slane %v4860_v3, 5  ;;  %v10333_v53 = vld [vmem:[#allocation21_spill] sm:$0xff]  ;;  %v10334_v0 = vld [vmem:[#allocation22_spill] sm:$0xff] }
 0x1c1   : > { %7206 = vmatprep.mubr.bf16.mxu1 %v6361_v26  ;;  %v9813_v26 = vsel %vm8827_vm7, %v6513_v41, %v5352_v29  ;;  %v9831_v11 = vrot.slane %v4864_v10, 4  ;;  %v9837_v35 = vsel %vm8827_vm7, %v5361_v31, %v5362_v45  ;;  %v4870_v57 = vshll.u32 %v9805_v50, 16  ;;  %v10331_v10 = vld [vmem:[#allocation28_spill] sm:$0xff] }
 0x1c2   : > { %v6529_v61 = vcombine.low %v9813_v26, %v9827_v43  ;;  %7431 = vmatmul.mubr.bf16.gmra.mrb[12].mxu0 %v9745_v40  ;;  %v4884_v55 = vshll.u32 %v9807_v56, 16  ;;  %v6530_v24 = vcombine.low %v9819_v16, %v9837_v35  ;;  %v6515_v28 = vrot.slane %v5252_v17, 9 }
 0x1c3   : > { %7434 = vmatprep.mubr.bf16.mxu0 %v9749_v14  ;;  %7463 = vmatpush3.bf16.msra.mxu0 %v7973_v15  ;;  %v4877_v3 = vrot.slane %v4875_v1, 4  ;;  %v5366_v4 = vrot.slane %v10331_v10, 5  ;;  %v5369_v41 = vrot.slane %v10332_v25, 5  ;;  %v3116_v37 = vshrl.u32 %v2878_v44, 16  ;;  %v10335_v1 = vld [vmem:[#allocation29_spill] sm:$0xff] }
 0x1c4   : > { %v4880_v40 = vrot.slane %v4878_v42, 5  ;;  %v4888_v39 = vshrl.u32 %v9807_v56, 16  ;;  %7464 = vmatprep.subr.bf16.mxu0 %v7976_v46  ;;  %v3119_v29 = vshll.u32 %v2878_v44, 16  ;;  %v3138_v14 = vsel %vm8598_vm4, %v10334_v0, %v10333_v53  ;;  %v4535_v44 = vld [vmem:[#allocation2 + $0xcc] sm:$0xf] }
 0x1c5   : > { %v9857_v15 = vsel %vm8827_vm7, %v6515_v28, %v5366_v4  ;;  %v5368_v13 = vrot.slane %v5366_v4, 4  ;;  %v3118_v45 = vrot.slane %v3116_v37, 4  ;;  %v6516_v52 = vrot.slane %v5253_v8, 9  ;;  %v5254_v8 = vld [vmem:[#allocation2 + $0x90] sm:$0xe] }
 0x1c6   : > { %v4839_v36 = vsel %vm8598_vm4, %v9803_v2, %v9747_v38  ;;  %v4857_v49 = vor.u32 %v9823_v59, %v9815_v62  ;;  %v5373_v31 = vrot.slane %v10335_v1, 5  ;;  %v4849_v17 = vsel %vm8598_vm4, %v9821_v9, %v9760_v54  ;;  %v7966_v62 = vld [vmem:[#allocation2 + $0x18] sm:$0xff]   ;;  %v9885_v4 = vld [vmem:[#allocation2 + $0xc8] sm:$0x1] }
 0x1c7   : > { %v4867_v42 = vor.u32 %v9831_v11, %v9829_v33  ;;  %7465 = vmatpush3.bf16.msra.mxu0 %v7976_v46  ;;  %v9876_v38 = vsel %vm8827_vm7, %v5368_v13, %v5369_v41  ;;  %v5376_v2 = vrot.slane %v9656_v12, 5  ;;  %v9879_v59 = vrot.slane %v4884_v55, 5  ;;  %v7968_v11 = vld [vmem:[#allocation2 + $0x24] sm:$0xff]   ;;  %v10337_v13 = vld [vmem:[#allocation20_spill] sm:$0xff] }
 0x1c8   : > { %7207 = vmatmul.mubr.bf16.gmra.mrb[28].mxu1 %v6362_v32  ;;  %v3121_v32 = vrot.slane %v3119_v29, 5  ;;  %v4890_v28 = vrot.slane %v4888_v39, 4  ;;  %v6531_v54 = vcombine.low %v9857_v15, %v9876_v38  ;;  %v9883_v10 = vrot.slane %v4870_v57, 5 }
 0x1c9   : > { %7226 = vmatprep.mubr.bf16.mxu1 %v7965_v63  ;;  %v9872_v63 = vld [vmem:[#allocation2 + $0xd0] sm:$0xf]  ;;  %v4881_v46 = vor.u32 %v4880_v40, %v4877_v3  ;;  %v9889_v25 = vsel %vm8827_vm7, %v6516_v52, %v5373_v31  ;;  %v5375_v12 = vrot.slane %v5373_v31, 4  ;;  %v4899_v55 = vshrl.u32 %v4535_v44, 16  ;;  %v10336_v40 = vld [vmem:[#allocation30_spill] sm:$0xff] }
 0x1ca   : > { %v3122_v9 = vor.u32 %v3121_v32, %v3118_v45  ;;  %7435 = vmatmul.mubr.bf16.gmra.mrb[16].mxu0 %v9751_v47  ;;  %v4902_v41 = vshll.u32 %v4535_v44, 16  ;;  %v4908_v37 = vshll.u32 %v9872_v63, 16  ;;  %v4912_v57 = vshrl.u32 %v9872_v63, 16  ;;  %v8033_v44 = vld [vmem:[#allocation6 + $0x108] sm:$0xff]  }
 0x1cb   : > { %7438 = vmatprep.mubr.bf16.mxu0 %v9753_v18  ;;  %v9897_v29 = vsel %vm8827_vm7, %v5375_v12, %v5376_v2  ;;  %v6517_v3 = vrot.slane %v5254_v8, 9  ;;  %v5380_v53 = vrot.slane %v10336_v40, 5  ;;  %v4891_v0 = vor.u32 %v4890_v28, %v9879_v59  ;;  %v10338_v40 = vld [vmem:[#allocation32_spill] sm:$0xff] }
 0x1cc   : > { %v3123_v39 = vrot.slane %v3122_v9, 4  ;;  %v4894_v47 = vshll.u32 %v9885_v4, 16  ;;  %v6532_v18 = vcombine.low %v9889_v25, %v9897_v29  ;;  %v6495_v52 = vcombine.low %v4839_v36, %v4849_v17 }
 0x1cd   : > { %v4858_v32 = vrot.slane %v4857_v49, 4  ;;  %v4868_v1 = vrot.slane %v4867_v42, 4  ;;  %v4882_v2 = vrot.slane %v4881_v46, 4  ;;  %v9914_v28 = vsel %vm8827_vm7, %v6517_v3, %v5380_v53  ;;  %v5255_v49 = vld [vmem:[#allocation2 + $0x9c] sm:$0xe] }
 0x1ce   : > { %v3128_v45 = vsel %vm8598_vm4, %v3123_v39, %v10337_v13  ;;  %v5382_v9 = vrot.slane %v5380_v53, 4  ;;  %v5383_v8 = vrot.slane %v9664_v5, 5  ;;  %v4901_v12 = vrot.slane %v4899_v55, 4  ;;  %v7971_v39 = vld [vmem:[#allocation2 + $0x3c] sm:$0xff]  }
 0x1cf   : > { %v9908_v31 = vcombine.low %v3128_v45, %v3138_v14  ;;  %v4914_v36 = vrot.slane %v4912_v57, 4  ;;  %v7969_v14 = vld [vmem:[#allocation2 + $0x30] sm:$0xff]   ;;  %v4892_v17 = vrot.slane %v4891_v0, 4  ;;  %v4896_v42 = vrot.slane %v4894_v47, 5  ;;  %v8034_v55 = vld [vmem:[#allocation6 + $0x110] sm:$0xff]  }
 0x1d0   : > { %7227 = vmatmul.mubr.bf16.vlgmr.msra.gmra.mrb[0].mxu1 %v7966_v62  ;;  %v9910_v62 = vld [vmem:[#allocation2 + $0xd4] sm:$0x1]  ;;  %v9921_v46 = vsel %vm8827_vm7, %v5382_v9, %v5383_v8  ;;  %v4863_v3 = vsel %vm8598_vm4, %v4858_v32, %v9829_v33  ;;  %v6518_v57 = vrot.slane %v5255_v49, 9  ;;  %v5387_v53 = vrot.slane %v10338_v40, 5  ;;  %v5256_v9 = vld [vmem:[#allocation2 + $0xa8] sm:$0xe] }
 0x1d1   : > { %7506 = vmatpush3.bf16.msra.mxu1 %v9671_v23  ;;  %7230 = vmatprep.mubr.bf16.mxu1 %v7968_v11  ;;  %v4904_v23 = vrot.slane %v4902_v41, 5  ;;  %v9917_v11 = vrot.slane %v4908_v37, 5  ;;  %v6533_v5 = vcombine.low %v9914_v28, %v9921_v46  ;;  %v4873_v41 = vsel %vm8598_vm4, %v4868_v1, %v9883_v10  ;;  %v8035_v10 = vld [vmem:[#allocation2 + $0x1c] sm:$0xf]  ;;  %v5244_v1 = vld [vmem:[#allocation2 + $0x18] sm:$0xe] }
 0x1d2   : > { %7499 = vmatprep.subr.bf16.mxu1 %v8033_v44  ;;  %7439 = vmatmul.mubr.bf16.gmra.mrb[20].mxu0 %v9780_v22  ;;  %v4918_v37 = vshll.u32 %v9910_v62, 16  ;;  %v4887_v33 = vsel %vm8598_vm4, %v4882_v2, %v9879_v59  ;;  %v5390_v22 = vrot.slane %v9691_v21, 5  ;;  %v4897_v13 = vsel %vm8598_vm4, %v4892_v17, %v4896_v42  ;;  %v7972_v49 = vld [vmem:[#allocation2 + $0x48] sm:$0xff]   ;;  %v8037_v42 = vld [vmem:[#allocation2 + $0x20] sm:$0x1] }
 0x1d3   : > { %7442 = vmatprep.mubr.bf16.mxu0 %v6495_v52  ;;  %v4905_v0 = vor.u32 %v4904_v23, %v4901_v12  ;;  %v4915_v47 = vor.u32 %v4914_v36, %v9917_v11  ;;  %v5310_v45 = vrot.slane %v8035_v10, 5  ;;  %v9943_v32 = vsel %vm8827_vm7, %v6518_v57, %v5387_v53  ;;  %v8038_v57 = vld [vmem:[#allocation6 + $0x120] sm:$0xff]   ;;  %v5245_v40 = vld [vmem:[#allocation2 + $0x24] sm:$0xe]  ;;  %v8058_v28 = vld [vmem:[#allocation2 + $0xb0] sm:$0x1] }
 0x1d4   : > { %v5389_v52 = vrot.slane %v5387_v53, 4  ;;  %v6496_v59 = vcombine.low %v4863_v3, %v4873_v41  ;;  %v4920_v2 = vrot.slane %v4918_v37, 5  ;;  %v6497_v8 = vcombine.low %v4887_v33, %v4897_v13  ;;  %v7974_v3 = vld [vmem:[#allocation2 + $0x54] sm:$0xff]   ;;  %v8039_v53 = vld [vmem:[#allocation2 + $0x28] sm:$0xf] }
 0x1d5   : > { %7507 = vmatpush3.bf16.msra.mxu1 %v8033_v44  ;;  %v8036_v44 = vld [vmem:[#allocation6 + $0x118] sm:$0xff]   ;;  %v4906_v12 = vrot.slane %v4905_v0, 4  ;;  %v4916_v23 = vrot.slane %v4915_v47, 4  ;;  %v5312_v17 = vrot.slane %v5310_v45, 4  ;;  %v5394_v41 = vrot.slane %v9693_v7, 5 }
 0x1d6   : > { %7500 = vmatprep.subr.bf16.mxu1 %v8034_v55  ;;  %v9947_v21 = vsel %vm8827_vm7, %v5389_v52, %v5390_v22  ;;  %v5397_v37 = vrot.slane %v9702_v34, 5  ;;  %v5317_v33 = vrot.slane %v8039_v53, 5  ;;  %v5257_v0 = vld [vmem:[#allocation2 + $0xb4] sm:$0xe]  ;;  %v5246_v52 = vld [vmem:[#allocation2 + $0x30] sm:$0xe] }
 0x1d7   : > { %v6534_v36 = vcombine.low %v9943_v32, %v9947_v21  ;;  %v4911_v47 = vsel %vm8598_vm4, %v4906_v12, %v9917_v11  ;;  %v4921_v22 = vsel %vm8598_vm4, %v4916_v23, %v4920_v2  ;;  %v5396_v34 = vrot.slane %v5394_v41, 4  ;;  %v8042_v23 = vld [vmem:[#allocation6 + $0x128] sm:$0xff]  }
 0x1d8   : > { %7231 = vmatmul.mubr.bf16.gmra.mrb[4].mxu1 %v7969_v14  ;;  %v6507_v14 = vrot.slane %v5244_v1, 9  ;;  %v8040_v1 = vld [vmem:[#allocation2 + $0x34] sm:$0xf]  ;;  %v6508_v11 = vrot.slane %v5245_v40, 9  ;;  %v6520_v2 = vrot.slane %v5257_v0, 9  ;;  %v7977_v53 = vld [vmem:[#allocation2 + $0x6c] sm:$0xff]  }
 0x1d9   : > { %7234 = vmatprep.mubr.bf16.mxu1 %v7971_v39  ;;  %7508 = vmatpush3.bf16.msra.mxu1 %v8034_v55  ;;  %v5313_v39 = vrot.slane %v8037_v42, 5  ;;  %v6519_v55 = vrot.slane %v5256_v9, 9  ;;  %v6498_v9 = vcombine.low %v4911_v47, %v4921_v22  ;;  %v6509_v42 = vrot.slane %v5246_v52, 9  ;;  %v5258_v0 = vld [vmem:[#allocation2 + $0xc0] sm:$0xe]  ;;  %v8044_v47 = vld [vmem:[#allocation6 + $0x130] sm:$0xff]  }
 0x1da   : > { %7501 = vmatprep.subr.bf16.mxu1 %v8036_v44  ;;  %7443 = vmatmul.mubr.bf16.gmra.mrb[24].mxu0 %v6496_v59  ;;  %v5311_v13 = vsel %vm8827_vm7, %v6507_v14, %v5310_v45  ;;  %v5324_v59 = vrot.slane %v8040_v1, 5  ;;  %v3231_v46 = vshll.u32 %v8058_v28, 16 }
 0x1db   : > { %7446 = vmatprep.mubr.bf16.mxu0 %v6497_v8  ;;  %v9960_v7 = vsel %vm8827_vm7, %v6519_v55, %v5394_v41  ;;  %v5314_v10 = vsel %vm8827_vm7, %v5312_v17, %v5313_v39  ;;  %v8041_v8 = vld [vmem:[#allocation2 + $0x2c] sm:$0x1]  ;;  %v5319_v17 = vrot.slane %v5317_v33, 4  ;;  %v5404_v39 = vrot.slane %v9805_v50, 5  ;;  %v8043_v41 = vld [vmem:[#allocation2 + $0x38] sm:$0x1] }
 0x1dc   : > { %v5320_v12 = vrot.slane %v8041_v8, 5  ;;  %v6523_v14 = vcombine.low %v5311_v13, %v5314_v10  ;;  %v5326_v55 = vrot.slane %v5324_v59, 4  ;;  %v5318_v50 = vsel %vm8827_vm7, %v6508_v11, %v5317_v33  ;;  %v8045_v13 = vld [vmem:[#allocation2 + $0x40] sm:$0xf] }
 0x1dd   : > { %7509 = vmatpush3.bf16.msra.mxu1 %v8036_v44  ;;  %v9968_v44 = vsel %vm8827_vm7, %v5396_v34, %v5397_v37  ;;  %v5327_v37 = vrot.slane %v8043_v41, 5  ;;  %v5247_v34 = vld [vmem:[#allocation2 + $0x3c] sm:$0xe]  ;;  %v5331_v10 = vrot.slane %v8045_v13, 5  ;;  %v5325_v1 = vsel %vm8827_vm7, %v6509_v42, %v5324_v59  ;;  %v2875_v59 = vld [vmem:[#allocation2 + $0x6c] sm:$0xf] }
 0x1de   : > { %7502 = vmatprep.subr.bf16.mxu1 %v8038_v57  ;;  %v6535_v45 = vcombine.low %v9960_v7, %v9968_v44  ;;  %v5321_v22 = vsel %vm8827_vm7, %v5319_v17, %v5320_v12  ;;  %v5408_v33 = vrot.slane %v9807_v56, 5  ;;  %v5411_v11 = vrot.slane %v9885_v4, 5  ;;  %v5259_v17 = vld [vmem:[#allocation2 + $0xcc] sm:$0xe]  ;;  %v7978_v41 = vld [vmem:[#allocation2 + $0x78] sm:$0xff]  }
 0x1df   : > { %v6524_v8 = vcombine.low %v5318_v50, %v5321_v22  ;;  %v6510_v12 = vrot.slane %v5247_v34, 9  ;;  %v6522_v4 = vrot.slane %v5259_v17, 9  ;;  %v5415_v22 = vrot.slane %v9872_v63, 5  ;;  %v8048_v13 = vld [vmem:[#allocation2 + $0x70] sm:$0xf] }
 0x1e0   : > { %7235 = vmatmul.mubr.bf16.gmra.mrb[8].mxu1 %v7972_v49  ;;  %v5401_v49 = vrot.slane %v9762_v58, 5  ;;  %v5418_v34 = vrot.slane %v9910_v62, 5  ;;  %v7980_v63 = vld [vmem:[#allocation2 + $0x90] sm:$0xff]   ;;  %v2881_v17 = vld [vmem:[#allocation2 + $0x84] sm:$0xf] }
 0x1e1   : > { %7238 = vmatprep.mubr.bf16.mxu1 %v7974_v3  ;;  %7510 = vmatpush3.bf16.msra.mxu1 %v8038_v57  ;;  %v7975_v3 = vld [vmem:[#allocation2 + $0x60] sm:$0xff]  }
 0x1e2   : > { %7503 = vmatprep.subr.bf16.mxu1 %v8042_v23  ;;  %v9976_v57 = vsel %vm8827_vm7, %v6520_v2, %v5401_v49  ;;  %v5403_v40 = vrot.slane %v5401_v49, 4  ;;  %7447 = vmatmul.mubr.bf16.gmra.mrb[28].mxu0 %v6498_v9  ;;  %v5328_v2 = vsel %vm8827_vm7, %v5326_v55, %v5327_v37  ;;  %v6521_v9 = vrot.slane %v5258_v0, 9  ;;  %v7979_v37 = vld [vmem:[#allocation2 + $0x84] sm:$0xff]  }
 0x1e3   : > { %7466 = vmatprep.mubr.bf16.mxu0 %v6523_v14  ;;  %v8047_v14 = vld [vmem:[#allocation6 + $0x138] sm:$0xff]   ;;  %v5410_v55 = vrot.slane %v5408_v33, 4 }
 0x1e4   : > { %v9980_v58 = vsel %vm8827_vm7, %v5403_v40, %v5404_v39  ;;  %v6525_v39 = vcombine.low %v5325_v1, %v5328_v2  ;;  %v9996_v42 = vsel %vm8827_vm7, %v6521_v9, %v5408_v33  ;;  %v3092_v40 = vshrl.u32 %v2875_v59, 16 }
 0x1e5   : > { %7511 = vmatpush3.bf16.msra.mxu1 %v8042_v23  ;;  %v6536_v52 = vcombine.low %v9976_v57, %v9980_v58  ;;  %v8046_v23 = vld [vmem:[#allocation2 + $0x44] sm:$0x1]  ;;  %v10000_v56 = vsel %vm8827_vm7, %v5410_v55, %v5411_v11  ;;  %v3101_v1 = vshll.u32 %v8048_v13, 16  ;;  %v3105_v2 = vshrl.u32 %v8048_v13, 16 }
 0x1e6   : > { %7504 = vmatprep.subr.bf16.mxu1 %v8044_v47  ;;  %v5334_v49 = vrot.slane %v8046_v23, 5  ;;  %v6537_v0 = vcombine.low %v9996_v42, %v10000_v56  ;;  %v10012_v9 = vsel %vm8827_vm7, %v6522_v4, %v5415_v22  ;;  %v5417_v33 = vrot.slane %v5415_v22, 4 }
 0x1e7   : > { %v3103_v23 = vrot.slane %v3101_v1, 5  ;;  %v3107_v62 = vrot.slane %v3105_v2, 4  ;;  %v3140_v55 = vshrl.u32 %v2881_v17, 16  ;;  %v2887_v2 = vld [vmem:[#allocation2 + $0x9c] sm:$0xf] }
 0x1e8   : > { %7239 = vmatmul.mubr.bf16.gmra.mrb[12].mxu1 %v7975_v3  ;;  %v5333_v3 = vrot.slane %v5331_v10, 4 }
 0x1e9   : > { %7242 = vmatprep.mubr.bf16.mxu1 %v7977_v53  ;;  %7512 = vmatpush3.bf16.msra.mxu1 %v8044_v47  ;;  %v3095_v53 = vshll.u32 %v2875_v59, 16  ;;  %v5332_v47 = vsel %vm8827_vm7, %v6510_v12, %v5331_v10  ;;  %v10016_v12 = vsel %vm8827_vm7, %v5417_v33, %v5418_v34  ;;  %v8049_v59 = vld [vmem:[#allocation2 + $0x74] sm:$0x1]  ;;  %v3142_v13 = vrot.slane %v3140_v55, 4 }
 0x1ea   : > { %7505 = vmatprep.subr.bf16.mxu1 %v8047_v14  ;;  %7467 = vmatmul.mubr.bf16.vlgmr.msra.gmra.mrb[0].mxu0 %v6524_v8  ;;  %v5335_v50 = vsel %vm8827_vm7, %v5333_v3, %v5334_v49  ;;  %v3094_v8 = vrot.slane %v3092_v40, 4  ;;  %v6538_v49 = vcombine.low %v10012_v9, %v10016_v12  ;;  %v3108_v3 = vor.u32 %v3107_v62, %v3103_v23 }
 0x1eb   : > { %7470 = vmatprep.mubr.bf16.mxu0 %v6525_v39  ;;  %v6526_v11 = vcombine.low %v5332_v47, %v5335_v50  ;;  %v3097_v10 = vrot.slane %v3095_v53, 5  ;;  %v3111_v20 = vshll.u32 %v8049_v59, 16  ;;  %v2884_v47 = vld [vmem:[#allocation2 + $0x90] sm:$0xf]  ;;  %v7982_v50 = vld [vmem:[#allocation2 + $0xa8] sm:$0xff]  }
 0x1ec   : > { %v3109_v22 = vrot.slane %v3108_v3, 4  ;;  %v3164_v33 = vshrl.u32 %v2884_v47, 16  ;;  %v8052_v59 = vld [vmem:[#allocation2 + $0xa0] sm:$0xf] }
 0x1ed   : > { %7513 = vmatpush3.bf16.msra.mxu1 %v8047_v14  ;;  %v7981_v14 = vld [vmem:[#allocation2 + $0x9c] sm:$0xff]   ;;  %v3098_v39 = vor.u32 %v3097_v10, %v3094_v8  ;;  %v3113_v34 = vrot.slane %v3111_v20, 5  ;;  %v8051_v10 = vld [vmem:[#allocation2 + $0x94] sm:$0xf]  ;;  %v3197_v51 = vshll.u32 %v8052_v59, 16  ;;  %v3201_v19 = vshrl.u32 %v8052_v59, 16 }
 0x1ee   : > { %v3177_v62 = vshrl.u32 %v8051_v10, 16  ;;  %v3166_v26 = vrot.slane %v3164_v33, 4  ;;  %v8057_v59 = vld [vmem:[#allocation2 + $0xb8] sm:$0xf] }
 0x1ef   : > { %v3099_v53 = vrot.slane %v3098_v39, 4  ;;  %v3114_v39 = vsel %vm8598_vm4, %v3109_v22, %v3113_v34  ;;  %v2890_v22 = vld [vmem:[#allocation2 + $0xa8] sm:$0xf] }
 0x1f0   : > { %7243 = vmatmul.mubr.bf16.gmra.mrb[16].mxu1 %v7978_v41  ;;  %v3143_v41 = vshll.u32 %v2881_v17, 16  ;;  %v3191_v17 = vshll.u32 %v2887_v2, 16  ;;  %v3179_v55 = vrot.slane %v3177_v62, 4 }
 0x1f1   : > { %7246 = vmatprep.mubr.bf16.mxu1 %v7979_v37  ;;  %v8050_v37 = vld [vmem:[#allocation2 + $0x88] sm:$0xf]  ;;  %v3104_v8 = vsel %vm8598_vm4, %v3099_v53, %v3103_v23  ;;  %v8053_v23 = vld [vmem:[#allocation2 + $0x8c] sm:$0x1] }
 0x1f2   : > { %7471 = vmatmul.mubr.bf16.gmra.mrb[4].mxu0 %v6526_v11  ;;  %v3149_v4 = vshll.u32 %v8050_v37, 16  ;;  %v3153_v40 = vshrl.u32 %v8050_v37, 16  ;;  %v3145_v1 = vrot.slane %v3143_v41, 5  ;;  %v3167_v11 = vshll.u32 %v2884_v47, 16 }
 0x1f3   : > { %7474 = vmatprep.mubr.bf16.mxu0 %v6527_v60  ;;  %v3159_v20 = vshll.u32 %v8053_v23, 16  ;;  %v3193_v37 = vrot.slane %v3191_v17, 5  ;;  %v10038_v47 = vrot.slane %v3197_v51, 5  ;;  %v8056_v17 = vld [vmem:[#allocation2 + $0xac] sm:$0xf]  ;;  %v3245_v51 = vshll.u32 %v8057_v59, 16 }
 0x1f4   : > { %v10023_v6 = vrot.slane %v3149_v4, 5  ;;  %v3155_v60 = vrot.slane %v3153_v40, 4  ;;  %v3146_v3 = vor.u32 %v3145_v1, %v3142_v13  ;;  %v3169_v43 = vrot.slane %v3167_v11, 5  ;;  %v7984_v4 = vld [vmem:[#allocation2 + $0xc0] sm:$0xff]  }
 0x1f5   : > { %v6403_v40 = vcombine.low %v3104_v8, %v3114_v39  ;;  %v3161_v13 = vrot.slane %v3159_v20, 5  ;;  %v8055_v11 = vld [vmem:[#allocation2 + $0xa4] sm:$0x1]  ;;  %v3221_v39 = vshll.u32 %v8056_v17, 16 }
 0x1f6   : > { %v3147_v53 = vrot.slane %v3146_v3, 4  ;;  %v3170_v1 = vor.u32 %v3169_v43, %v3166_v26  ;;  %v3207_v8 = vshll.u32 %v8055_v11, 16  ;;  %v3225_v3 = vshrl.u32 %v8056_v17, 16 }
 0x1f8   : > { %7247 = vmatmul.mubr.bf16.gmra.mrb[20].mxu1 %v7980_v63  ;;  %v3173_v63 = vshll.u32 %v8051_v10, 16  ;;  %v3212_v10 = vshrl.u32 %v2890_v22, 16  ;;  %v3152_v16 = vsel %vm8598_vm4, %v3147_v53, %v10023_v6  ;;  %v3209_v20 = vrot.slane %v3207_v8, 5  ;;  %v8060_v8 = vld [vmem:[#allocation2 + $0xbc] sm:$0x1] }
 0x1f9   : > { %7250 = vmatprep.mubr.bf16.mxu1 %v7981_v14  ;;  %v3188_v14 = vshrl.u32 %v2887_v2, 16  ;;  %v8054_v2 = vld [vmem:[#allocation2 + $0x98] sm:$0x1]  ;;  %v3247_v53 = vrot.slane %v3245_v51, 5 }
 0x1fa   : > { %7475 = vmatmul.mubr.bf16.gmra.mrb[8].mxu0 %v6528_v30  ;;  %v3156_v30 = vor.u32 %v3155_v60, %v10023_v6  ;;  %v3214_v26 = vrot.slane %v3212_v10, 4  ;;  %v3255_v10 = vshll.u32 %v8060_v8, 16 }
 0x1fb   : > { %7478 = vmatprep.mubr.bf16.mxu0 %v6529_v61  ;;  %v10036_v61 = vrot.slane %v3173_v63, 5  ;;  %v3190_v41 = vrot.slane %v3188_v14, 4  ;;  %v2893_v63 = vld [vmem:[#allocation2 + $0xb4] sm:$0xf]  ;;  %v3215_v14 = vshll.u32 %v2890_v22, 16 }
 0x1fc   : > { %v3157_v34 = vrot.slane %v3156_v30, 4  ;;  %v3236_v38 = vshrl.u32 %v2893_v63, 16  ;;  %v2896_v22 = vld [vmem:[#allocation2 + $0xc0] sm:$0xf] }
 0x1fd   : > { %v3180_v60 = vor.u32 %v3179_v55, %v10036_v61  ;;  %v3194_v33 = vor.u32 %v3193_v37, %v3190_v41  ;;  %v3217_v55 = vrot.slane %v3215_v14, 5  ;;  %v3223_v41 = vrot.slane %v3221_v39, 5 }
 0x1fe   : > { %v3162_v35 = vsel %vm8598_vm4, %v3157_v34, %v3161_v13  ;;  %v3227_v37 = vrot.slane %v3225_v3, 4  ;;  %v3238_v6 = vrot.slane %v3236_v38, 4  ;;  %v3233_v14 = vrot.slane %v3231_v46, 5 }
 0x1ff   : > { %v3181_v30 = vrot.slane %v3180_v60, 4  ;;  %v3195_v23 = vrot.slane %v3194_v33, 4 }
 0x200   : > { %7251 = vmatmul.mubr.bf16.gmra.mrb[24].mxu1 %v7982_v50  ;;  %v3203_v50 = vrot.slane %v3201_v19, 4  ;;  %v3249_v19 = vshrl.u32 %v8057_v59, 16 }
 0x201   : > { %7254 = vmatprep.mubr.bf16.mxu1 %v7983_v27  ;;  %v3183_v27 = vshll.u32 %v8054_v2, 16  ;;  %v3200_v25 = vsel %vm8598_vm4, %v3195_v23, %v10038_v47  ;;  %v3263_v2 = vshll.u32 %v2896_v22, 16 }
 0x202   : > { %7479 = vmatmul.mubr.bf16.gmra.mrb[12].mxu0 %v6530_v24  ;;  %v3204_v62 = vor.u32 %v3203_v50, %v10038_v47  ;;  %v3171_v24 = vrot.slane %v3170_v1, 4  ;;  %v3251_v50 = vrot.slane %v3249_v19, 4  ;;  %v3228_v1 = vor.u32 %v3227_v37, %v3223_v41  ;;  %v8061_v19 = vld [vmem:[#allocation2 + $0xc8] sm:$0x1] }
 0x203   : > { %7482 = vmatprep.mubr.bf16.mxu0 %v6531_v54  ;;  %v3185_v15 = vrot.slane %v3183_v27, 5  ;;  %v3239_v54 = vshll.u32 %v2893_v63, 16  ;;  %v3265_v39 = vrot.slane %v3263_v2, 5  ;;  %v3279_v32 = vshll.u32 %v8061_v19, 16 }
 0x204   : > { %v3205_v43 = vrot.slane %v3204_v62, 4  ;;  %v3176_v34 = vsel %vm8598_vm4, %v3171_v24, %v10036_v61  ;;  %v8059_v61 = vld [vmem:[#allocation2 + $0xc4] sm:$0xf]  ;;  %v3252_v11 = vor.u32 %v3251_v50, %v3247_v53  ;;  %v3229_v62 = vrot.slane %v3228_v1, 4 }
 0x205   : > { %v3186_v13 = vsel %vm8598_vm4, %v3181_v30, %v3185_v15  ;;  %v3269_v27 = vshll.u32 %v8059_v61, 16  ;;  %v3273_v60 = vshrl.u32 %v8059_v61, 16  ;;  %v3257_v15 = vrot.slane %v3255_v10, 5 }
 0x206   : > { %v3210_v29 = vsel %vm8598_vm4, %v3205_v43, %v3209_v20  ;;  %v6406_v47 = vcombine.low %v3176_v34, %v3186_v13  ;;  %v3253_v24 = vrot.slane %v3252_v11, 4  ;;  %v3281_v23 = vrot.slane %v3279_v32, 5 }
 0x207   : > { %v6407_v63 = vcombine.low %v3200_v25, %v3210_v29  ;;  %v3271_v3 = vrot.slane %v3269_v27, 5 }
 0x208   : > { %7255 = vmatmul.mubr.bf16.gmra.mrb[28].mxu1 %v7984_v4  ;;  %v6405_v4 = vcombine.low %v3152_v16, %v3162_v35  ;;  %v3275_v16 = vrot.slane %v3273_v60, 4 }
 0x209   : > { %7290 = vmatprep.mubr.bf16.mxu1 %v6403_v40  ;;  %v3241_v40 = vrot.slane %v3239_v54, 5  ;;  %v3234_v54 = vsel %vm8598_vm4, %v3229_v62, %v3233_v14 }
 0x20a   : > { %7483 = vmatmul.mubr.bf16.gmra.mrb[16].mxu0 %v6532_v18  ;;  %v3218_v18 = vor.u32 %v3217_v55, %v3214_v26  ;;  %v3276_v51 = vor.u32 %v3275_v16, %v3271_v3 }
 0x20b   : > { %7486 = vmatprep.mubr.bf16.mxu0 %v6533_v5  ;;  %v3260_v5 = vshrl.u32 %v2896_v22, 16  ;;  %v3242_v33 = vor.u32 %v3241_v40, %v3238_v6 }
 0x20c   : > { %v3277_v30 = vrot.slane %v3276_v51, 4 }
 0x20d   : > { %v3262_v17 = vrot.slane %v3260_v5, 4  ;;  %v3243_v35 = vrot.slane %v3242_v33, 4 }
 0x20e   : > { %v3282_v26 = vsel %vm8598_vm4, %v3277_v30, %v3281_v23 }
 0x20f   : > { %v3266_v59 = vor.u32 %v3265_v39, %v3262_v17  ;;  %v3248_v21 = vsel %vm8598_vm4, %v3243_v35, %v3247_v53 }
 0x210   : > { %7291 = vmatmul.mubr.bf16.vlgmr.msra.gmra.mrb[16].mxu1 %v9908_v31  ;;  %v3219_v31 = vrot.slane %v3218_v18, 4 }
 0x211   : > { %7294 = vmatprep.mubr.bf16.mxu1 %v6405_v4 }
 0x212   : > { %7487 = vmatmul.mubr.bf16.gmra.mrb[20].mxu0 %v6534_v36  ;;  %v3224_v38 = vsel %vm8598_vm4, %v3219_v31, %v3223_v41  ;;  %v3258_v36 = vsel %vm8598_vm4, %v3253_v24, %v3257_v15 }
 0x213   : > { %7490 = vmatprep.mubr.bf16.mxu0 %v6535_v45  ;;  %v6408_v7 = vcombine.low %v3224_v38, %v3234_v54  ;;  %v6409_v44 = vcombine.low %v3248_v21, %v3258_v36  ;;  %v3267_v45 = vrot.slane %v3266_v59, 4 }
 0x215   : > { %v3272_v20 = vsel %vm8598_vm4, %v3267_v45, %v3271_v3 }
 0x216   : > { %v6410_v43 = vcombine.low %v3272_v20, %v3282_v26 }
 0x218   : > { %7295 = vmatmul.mubr.bf16.gmra.mrb[20].mxu1 %v6406_v47 }
 0x219   : > { %7298 = vmatprep.mubr.bf16.mxu1 %v6407_v63 }
 0x21a   : > { %7491 = vmatmul.mubr.bf16.gmra.mrb[24].mxu0 %v6536_v52 }
 0x21b   : > { %7494 = vmatprep.mubr.bf16.mxu0 %v6537_v0 }
 0x220   : > { %7299 = vmatmul.mubr.bf16.gmra.mrb[24].mxu1 %v6408_v7 }
 0x221   : > { %7302 = vmatprep.mubr.bf16.mxu1 %v6409_v44 }
 0x222   : > { %7495 = vmatmul.mubr.bf16.gmra.mrb[28].mxu0 %v6538_v49 }
 0x228   : > { %7303 = vmatmul.mubr.bf16.gmra.mrb[28].mxu1 %v6410_v43 }
 0x2a3   : > { %v7228_v57 = vpop.f32.mrb[0].mxu1 }
 0x2a4   : > { %v2692_v58 = vpop.f32.mrb[1].mxu1 }
 0x2a5   : > { %v7229_v52 = vpop.f32.mrb[2].mxu1 }
 0x2a6   : > { %v2695_v55 = vpop.f32.mrb[3].mxu1 }
 0x2ab   : > { %v7232_v42 = vpop.f32.mrb[4].mxu1 }
 0x2ac   : > { %v2708_v56 = vpop.f32.mrb[5].mxu1 }
 0x2ad   : > { %v7233_v0 = vpop.f32.mrb[6].mxu1 }
 0x2ae   : > { %v2711_v41 = vpop.f32.mrb[7].mxu1 }
 0x2b3   : > { %v7236_v37 = vpop.f32.mrb[8].mxu1 }
 0x2b4   : > { %v2724_v4 = vpop.f32.mrb[9].mxu1 }
 0x2b5   : > { %v7237_v6 = vpop.f32.mrb[10].mxu1 }
 0x2b6   : > { %v2727_v48 = vpop.f32.mrb[11].mxu1 }
 0x2bb   : > { %v10097_v40 = vpop.f32.mrb[12].mxu1 }
 0x2bc   : > { %v10099_v53 = vpop.f32.mrb[13].mxu1 }
 0x2bd   : > { %v10101_v9 = vpop.f32.mrb[14].mxu1  ;;  %v7468_v49 = vpop.f32.mrb[0].mxu0 }
 0x2be   : > { %v10103_v12 = vpop.f32.mrb[15].mxu1  ;;  %v7514_v50 = vadd.f32 %v7468_v49, %v7228_v57  ;;  %v5583_v22 = vpop.f32.mrb[1].mxu0 }
 0x2bf   : > { %v7515_v34 = vadd.f32 %v5583_v22, %v2692_v58  ;;  %v7469_v13 = vpop.f32.mrb[2].mxu0 }
 0x2c0   : > { %v7516_v25 = vadd.f32 %v7469_v13, %v7229_v52  ;;  %v5586_v29 = vpop.f32.mrb[3].mxu0  ;;  %v5782_v61 = vmul.f32 %v7514_v50, %v7514_v50 }
 0x2c1   : > { %v7517_v18 = vadd.f32 %v5586_v29, %v2695_v55  ;;  %v5780_v28 = vmul.f32 %v7515_v34, %v7515_v34 }
 0x2c2   : > { %v6747_v1 = vpack.c.bf16 %v7516_v25, %v7514_v50  ;;  %v5783_v10 = vmul.f32 %v7516_v25, %v7516_v25 }
 0x2c3   : > { %v5742_v46 = vadd.f32 %v7517_v18, %v7515_v34  ;;  %v5781_v5 = vmul.f32 %v7517_v18, %v7517_v18  ;;  %v6742_v2 = vpack.c.bf16 %v7517_v18, %v7515_v34 }
 0x2c4   : > { %6835 = vst [vmem:[%s10106_s29 + $0x8] sm:$0xff] %v6747_v1  }
 0x2c5   : > { %v5743_v27 = vadd.f32 %v7514_v50, %v5742_v46  ;;  %v5812_v60 = vadd.f32 %v5781_v5, %v5780_v28  ;;  %6743 = vst [vmem:[%s10106_s29] sm:$0xff] %v6742_v2   ;;  %v7472_v33 = vpop.f32.mrb[4].mxu0 }
 0x2c6   : > { %v7518_v11 = vadd.f32 %v7472_v33, %v7232_v42  ;;  %v5599_v8 = vpop.f32.mrb[5].mxu0 }
 0x2c7   : > { %v5813_v47 = vadd.f32 %v5812_v60, %v5782_v61  ;;  %v7519_v63 = vadd.f32 %v5599_v8, %v2708_v56  ;;  %v5744_v31 = vadd.f32 %v7516_v25, %v5743_v27  ;;  %v7473_v62 = vpop.f32.mrb[6].mxu0 }
 0x2c8   : > { %v7520_v14 = vadd.f32 %v7473_v62, %v7233_v0  ;;  %v5602_v17 = vpop.f32.mrb[7].mxu0  ;;  %v5786_v51 = vmul.f32 %v7518_v11, %v7518_v11 }
 0x2c9   : > { %v5745_v39 = vadd.f32 %v7519_v63, %v5744_v31  ;;  %v5784_v3 = vmul.f32 %v7519_v63, %v7519_v63  ;;  %v5814_v16 = vadd.f32 %v5813_v47, %v5783_v10  ;;  %v7521_v35 = vadd.f32 %v5602_v17, %v2711_v41 }
 0x2ca   : > { %v6757_v24 = vpack.c.bf16 %v7520_v14, %v7518_v11  ;;  %v5787_v44 = vmul.f32 %v7520_v14, %v7520_v14 }
 0x2cb   : > { %v5815_v15 = vadd.f32 %v5814_v16, %v5784_v3  ;;  %v5746_v38 = vadd.f32 %v7521_v35, %v5745_v39  ;;  %v5785_v54 = vmul.f32 %v7521_v35, %v7521_v35  ;;  %v6752_v59 = vpack.c.bf16 %v7521_v35, %v7519_v63 }
 0x2cc   : > { %6837 = vst [vmem:[%s10106_s29 + $0x18] sm:$0xff] %v6757_v24  }
 0x2cd   : > { %v5747_v19 = vadd.f32 %v7518_v11, %v5746_v38  ;;  %v5816_v32 = vadd.f32 %v5815_v15, %v5785_v54  ;;  %6836 = vst [vmem:[%s10106_s29 + $0x10] sm:$0xff] %v6752_v59   ;;  %v7476_v21 = vpop.f32.mrb[8].mxu0 }
 0x2ce   : > { %v7522_v36 = vadd.f32 %v7476_v21, %v7236_v37  ;;  %v5615_v7 = vpop.f32.mrb[9].mxu0 }
 0x2cf   : > { %v5817_v45 = vadd.f32 %v5816_v32, %v5786_v51  ;;  %v7523_v30 = vadd.f32 %v5615_v7, %v2724_v4  ;;  %v5748_v23 = vadd.f32 %v7520_v14, %v5747_v19  ;;  %v7477_v20 = vpop.f32.mrb[10].mxu0 }
 0x2d0   : > { %v7524_v26 = vadd.f32 %v7477_v20, %v7237_v6  ;;  %v5618_v43 = vpop.f32.mrb[11].mxu0  ;;  %v5790_v37 = vmul.f32 %v7522_v36, %v7522_v36 }
 0x2d1   : > { %v5749_v57 = vadd.f32 %v7523_v30, %v5748_v23  ;;  %v5788_v58 = vmul.f32 %v7523_v30, %v7523_v30  ;;  %v5818_v52 = vadd.f32 %v5817_v45, %v5787_v44  ;;  %v7525_v55 = vadd.f32 %v5618_v43, %v2727_v48 }
 0x2d2   : > { %v6767_v42 = vpack.c.bf16 %v7524_v26, %v7522_v36  ;;  %v5791_v6 = vmul.f32 %v7524_v26, %v7524_v26 }
 0x2d3   : > { %v5819_v56 = vadd.f32 %v5818_v52, %v5788_v58  ;;  %v5750_v0 = vadd.f32 %v7525_v55, %v5749_v57  ;;  %v5789_v41 = vmul.f32 %v7525_v55, %v7525_v55  ;;  %v6762_v49 = vpack.c.bf16 %v7525_v55, %v7523_v30 }
 0x2d4   : > { %6839 = vst [vmem:[%s10106_s29 + $0x28] sm:$0xff] %v6767_v42  }
 0x2d5   : > { %v5751_v50 = vadd.f32 %v7522_v36, %v5750_v0  ;;  %v5820_v22 = vadd.f32 %v5819_v56, %v5789_v41  ;;  %6838 = vst [vmem:[%s10106_s29 + $0x20] sm:$0xff] %v6762_v49   ;;  %v7480_v4 = vpop.f32.mrb[12].mxu0 }
 0x2d6   : > { %v7526_v34 = vadd.f32 %v7480_v4, %v10097_v40  ;;  %v5631_v13 = vpop.f32.mrb[13].mxu0 }
 0x2d7   : > { %v5821_v25 = vadd.f32 %v5820_v22, %v5790_v37  ;;  %v7527_v29 = vadd.f32 %v5631_v13, %v10099_v53  ;;  %v5752_v48 = vadd.f32 %v7524_v26, %v5751_v50  ;;  %v7481_v18 = vpop.f32.mrb[14].mxu0 }
 0x2d8   : > { %v7528_v1 = vadd.f32 %v7481_v18, %v10101_v9  ;;  %v5634_v28 = vpop.f32.mrb[15].mxu0  ;;  %v5794_v8 = vmul.f32 %v7526_v34, %v7526_v34 }
 0x2d9   : > { %v5753_v46 = vadd.f32 %v7527_v29, %v5752_v48  ;;  %v5792_v5 = vmul.f32 %v7527_v29, %v7527_v29  ;;  %v5822_v2 = vadd.f32 %v5821_v25, %v5791_v6  ;;  %v7529_v61 = vadd.f32 %v5634_v28, %v10103_v12 }
 0x2da   : > { %v6777_v27 = vpack.c.bf16 %v7528_v1, %v7526_v34  ;;  %v5795_v31 = vmul.f32 %v7528_v1, %v7528_v1 }
 0x2db   : > { %v5823_v60 = vadd.f32 %v5822_v2, %v5792_v5  ;;  %v5754_v40 = vadd.f32 %v7529_v61, %v5753_v46  ;;  %v5793_v33 = vmul.f32 %v7529_v61, %v7529_v61  ;;  %v6772_v11 = vpack.c.bf16 %v7529_v61, %v7527_v29 }
 0x2dc   : > { %6841 = vst [vmem:[%s10106_s29 + $0x38] sm:$0xff] %v6777_v27  }
 0x2dd   : > { %v5755_v10 = vadd.f32 %v7526_v34, %v5754_v40  ;;  %v5824_v53 = vadd.f32 %v5823_v60, %v5793_v33  ;;  %6840 = vst [vmem:[%s10106_s29 + $0x30] sm:$0xff] %v6772_v11   ;;  %v7484_v47 = vpop.f32.mrb[16].mxu0 }
 0x2de   : > { %v5647_v63 = vpop.f32.mrb[17].mxu0 }
 0x2df   : > { %v5825_v9 = vadd.f32 %v5824_v53, %v5794_v8  ;;  %v5756_v14 = vadd.f32 %v7528_v1, %v5755_v10  ;;  %v7485_v17 = vpop.f32.mrb[18].mxu0 }
 0x2e0   : > { %v5650_v12 = vpop.f32.mrb[19].mxu0 }
 0x2e1   : > { %v5826_v35 = vadd.f32 %v5825_v9, %v5795_v31 }
 0x2e3   : > { %v7292_v62 = vpop.f32.mrb[16].mxu1 }
 0x2e4   : > { %v7530_v39 = vadd.f32 %v7484_v47, %v7292_v62  ;;  %v3510_v3 = vpop.f32.mrb[17].mxu1 }
 0x2e5   : > { %v7531_v16 = vadd.f32 %v5647_v63, %v3510_v3  ;;  %v7293_v24 = vpop.f32.mrb[18].mxu1  ;;  %v7488_v44 = vpop.f32.mrb[20].mxu0 }
 0x2e6   : > { %v7532_v15 = vadd.f32 %v7485_v17, %v7293_v24  ;;  %v3513_v38 = vpop.f32.mrb[19].mxu1  ;;  %v5663_v45 = vpop.f32.mrb[21].mxu0  ;;  %v5798_v30 = vmul.f32 %v7530_v39, %v7530_v39 }
 0x2e7   : > { %v5757_v54 = vadd.f32 %v7531_v16, %v5756_v14  ;;  %v5796_v59 = vmul.f32 %v7531_v16, %v7531_v16  ;;  %v7533_v51 = vadd.f32 %v5650_v12, %v3513_v38  ;;  %v7489_v43 = vpop.f32.mrb[22].mxu0 }
 0x2e8   : > { %v6787_v19 = vpack.c.bf16 %v7532_v15, %v7530_v39  ;;  %v5666_v52 = vpop.f32.mrb[23].mxu0  ;;  %v5799_v55 = vmul.f32 %v7532_v15, %v7532_v15 }
 0x2e9   : > { %v5827_v32 = vadd.f32 %v5826_v35, %v5796_v59  ;;  %v5758_v21 = vadd.f32 %v7533_v51, %v5757_v54  ;;  %v5797_v36 = vmul.f32 %v7533_v51, %v7533_v51  ;;  %v6782_v7 = vpack.c.bf16 %v7533_v51, %v7531_v16 }
 0x2ea   : > { %6843 = vst [vmem:[%s10106_s29 + $0x48] sm:$0xff] %v6787_v19  }
 0x2eb   : > { %v5759_v23 = vadd.f32 %v7530_v39, %v5758_v21  ;;  %v5828_v20 = vadd.f32 %v5827_v32, %v5797_v36  ;;  %6842 = vst [vmem:[%s10106_s29 + $0x40] sm:$0xff] %v6782_v7   ;;  %v7296_v26 = vpop.f32.mrb[20].mxu1 }
 0x2ec   : > { %v7534_v57 = vadd.f32 %v7488_v44, %v7296_v26  ;;  %v3526_v58 = vpop.f32.mrb[21].mxu1 }
 0x2ed   : > { %v5829_v42 = vadd.f32 %v5828_v20, %v5798_v30  ;;  %v7535_v56 = vadd.f32 %v5663_v45, %v3526_v58  ;;  %v5760_v0 = vadd.f32 %v7532_v15, %v5759_v23  ;;  %v7297_v41 = vpop.f32.mrb[22].mxu1  ;;  %v7492_v18 = vpop.f32.mrb[24].mxu0 }
 0x2ee   : > { %v7536_v49 = vadd.f32 %v7489_v43, %v7297_v41  ;;  %v3529_v37 = vpop.f32.mrb[23].mxu1  ;;  %v5679_v1 = vpop.f32.mrb[25].mxu0  ;;  %v5802_v28 = vmul.f32 %v7534_v57, %v7534_v57 }
 0x2ef   : > { %v5761_v50 = vadd.f32 %v7535_v56, %v5760_v0  ;;  %v5800_v22 = vmul.f32 %v7535_v56, %v7535_v56  ;;  %v5830_v4 = vadd.f32 %v5829_v42, %v5799_v55  ;;  %v7537_v34 = vadd.f32 %v5666_v52, %v3529_v37  ;;  %v7493_v61 = vpop.f32.mrb[26].mxu0 }
 0x2f0   : > { %v6797_v13 = vpack.c.bf16 %v7536_v49, %v7534_v57  ;;  %v5682_v40 = vpop.f32.mrb[27].mxu0  ;;  %v5803_v33 = vmul.f32 %v7536_v49, %v7536_v49 }
 0x2f1   : > { %v5831_v6 = vadd.f32 %v5830_v4, %v5800_v22  ;;  %v5762_v25 = vadd.f32 %v7537_v34, %v5761_v50  ;;  %v5801_v29 = vmul.f32 %v7537_v34, %v7537_v34  ;;  %v6792_v48 = vpack.c.bf16 %v7537_v34, %v7535_v56 }
 0x2f2   : > { %6845 = vst [vmem:[%s10106_s29 + $0x58] sm:$0xff] %v6797_v13  }
 0x2f3   : > { %v5763_v46 = vadd.f32 %v7534_v57, %v5762_v25  ;;  %v5832_v5 = vadd.f32 %v5831_v6, %v5801_v29  ;;  %6844 = vst [vmem:[%s10106_s29 + $0x50] sm:$0xff] %v6792_v48   ;;  %v7300_v2 = vpop.f32.mrb[24].mxu1 }
 0x2f4   : > { %v7538_v27 = vadd.f32 %v7492_v18, %v7300_v2  ;;  %v3542_v60 = vpop.f32.mrb[25].mxu1 }
 0x2f5   : > { %v5833_v11 = vadd.f32 %v5832_v5, %v5802_v28  ;;  %v7539_v8 = vadd.f32 %v5679_v1, %v3542_v60  ;;  %v5764_v10 = vadd.f32 %v7536_v49, %v5763_v46  ;;  %v7301_v53 = vpop.f32.mrb[26].mxu1  ;;  %v7496_v35 = vpop.f32.mrb[28].mxu0 }
 0x2f6   : > { %v7540_v47 = vadd.f32 %v7493_v61, %v7301_v53  ;;  %v3545_v63 = vpop.f32.mrb[27].mxu1  ;;  %v5695_v24 = vpop.f32.mrb[29].mxu0  ;;  %v5806_v15 = vmul.f32 %v7538_v27, %v7538_v27 }
 0x2f7   : > { %v5765_v31 = vadd.f32 %v7539_v8, %v5764_v10  ;;  %v5804_v9 = vmul.f32 %v7539_v8, %v7539_v8  ;;  %v5834_v62 = vadd.f32 %v5833_v11, %v5803_v33  ;;  %v7541_v14 = vadd.f32 %v5682_v40, %v3545_v63  ;;  %v7497_v51 = vpop.f32.mrb[30].mxu0 }
 0x2f8   : > { %v6807_v17 = vpack.c.bf16 %v7540_v47, %v7538_v27  ;;  %v5698_v21 = vpop.f32.mrb[31].mxu0  ;;  %v5807_v36 = vmul.f32 %v7540_v47, %v7540_v47 }
 0x2f9   : > { %v5835_v39 = vadd.f32 %v5834_v62, %v5804_v9  ;;  %v5766_v3 = vadd.f32 %v7541_v14, %v5765_v31  ;;  %v5805_v12 = vmul.f32 %v7541_v14, %v7541_v14  ;;  %v6802_v16 = vpack.c.bf16 %v7541_v14, %v7539_v8 }
 0x2fa   : > { %6847 = vst [vmem:[%s10106_s29 + $0x68] sm:$0xff] %v6807_v17  }
 0x2fb   : > { %v5767_v38 = vadd.f32 %v7538_v27, %v5766_v3  ;;  %v5836_v54 = vadd.f32 %v5835_v39, %v5805_v12  ;;  %6846 = vst [vmem:[%s10106_s29 + $0x60] sm:$0xff] %v6802_v16   ;;  %v7304_v59 = vpop.f32.mrb[28].mxu1 }
 0x2fc   : > { %v7542_v19 = vadd.f32 %v7496_v35, %v7304_v59  ;;  %v3558_v32 = vpop.f32.mrb[29].mxu1 }
 0x2fd   : > { %v5837_v7 = vadd.f32 %v5836_v54, %v5806_v15  ;;  %v7543_v44 = vadd.f32 %v5695_v24, %v3558_v32  ;;  %v5768_v45 = vadd.f32 %v7540_v47, %v5767_v38  ;;  %v7305_v30 = vpop.f32.mrb[30].mxu1 }
 0x2fe   : > { %v7544_v23 = vadd.f32 %v7497_v51, %v7305_v30  ;;  %v3561_v20 = vpop.f32.mrb[31].mxu1  ;;  %v5810_v41 = vmul.f32 %v7542_v19, %v7542_v19 }
 0x2ff   : > { %v5769_v26 = vadd.f32 %v7543_v44, %v5768_v45  ;;  %v5808_v43 = vmul.f32 %v7543_v44, %v7543_v44  ;;  %v5838_v57 = vadd.f32 %v5837_v7, %v5807_v36  ;;  %v7545_v58 = vadd.f32 %v5698_v21, %v3561_v20 }
 0x300   : > { %v6817_v52 = vpack.c.bf16 %v7544_v23, %v7542_v19 }
 0x301   : > { %v5839_v55 = vadd.f32 %v5838_v57, %v5808_v43  ;;  %v5770_v42 = vadd.f32 %v7545_v58, %v5769_v26  ;;  %v5809_v56 = vmul.f32 %v7545_v58, %v7545_v58  ;;  %v6812_v0 = vpack.c.bf16 %v7545_v58, %v7543_v44 }
 0x302   : > { %6849 = vst [vmem:[%s10106_s29 + $0x78] sm:$0xff] %v6817_v52  }
 0x303   : > { %v5771_v49 = vadd.f32 %v7542_v19, %v5770_v42  ;;  %v5840_v37 = vadd.f32 %v5839_v55, %v5809_v56  ;;  %6848 = vst [vmem:[%s10106_s29 + $0x70] sm:$0xff] %v6812_v0  }
 0x304   : > { %8189 = shalt.err (!%p8186_p4)
}
 0x305   : > { %s8190_s13 = scalar_lea.hbm %s10131_s12, 2048  ;;  %s8194_s29 = scalar_lea.hbm %s10253_s4, 4096 }
 0x306   : > { %p8191_p9 = scmp.ne.s32.totalorder %s10131_s12, %s8190_s13  ;;  %p8195_p8 = scmp.lt.u32.totalorder %s10131_s12, %s10253_s4 }
 0x307   : > { %p8196_p13 = scmp.lt.u32.totalorder %s8194_s29, %s8190_s13  ;;  %p8198_p10 = scmp.lt.u32.totalorder %s8190_s13, %s10131_s12 }
 0x308   : > { %p8192_p0 = pnand %p8191_p9, %p8510_p5 }
 0x309   : > { %p8197_p6 = por %p8196_p13, %p8195_p8 }
 0x30a   : > { %p8193_p11 = pneg %p8192_p0 }
 0x30b   : > { %p8199_p3 = por %p8198_p10, %p8197_p6 }
 0x30d   : > { %p8200_p7 = pnand %p8199_p3, %p8193_p11 }
 0x30f   : > { %8203 = shalt.err (!%p8200_p7)
}
 0x310   : > { %s8320_s15 = smov 64   ;;  %s8321_s9 = smov 4   ;;  %v5811_v50 = vmul.f32 %v7544_v23, %v7544_v23  ;;  %v5772_v22 = vadd.f32 %v7544_v23, %v5771_v49  ;;  %v5841_v4 = vadd.f32 %v5840_v37, %v5810_v41 }
 0x311   : > { %7787 = dma.vmem_to_hbm [thread:$0]  (%p8510_p5), %s10133_s10, 2048, %s10131_s12, %s6013_s26, %s8320_s15, %s8320_s15, %s8321_s9  }
 0x312   : > { %v5773_v34 = vrot.slane %v5772_v22, 4  ;;  %v5842_v13 = vadd.f32 %v5841_v4, %v5811_v50  ;;  %s6017_s11 = sand.u32 1, %s8380_s25   ;;  %s6582_s8 = sshll.u32 %s8380_s25, 4 }
 0x313   : > { %s319_s7 = scalar_lea.vmem [#allocation12], %s8561_s20  ;;  %s325_s10 = scalar_lea.vmem [#allocation14], %s8561_s20 }
 0x314   : > { %v5774_v6 = vadd.f32 %v5773_v34, %v5772_v22  ;;  %v5843_v25 = vrot.slane %v5842_v13, 4  ;;  %s6050_s13 = sshll.u32 %s319_s7, 4  ;;  %s6063_s12 = sshll.u32 %s325_s10, 4  ;;  %s10172_s13 = int_to_ptr.vmem [resolvable:$true] %s6050_s13  ;;  %s10179_s12 = int_to_ptr.vmem [resolvable:$true] %s6063_s12 }
 0x315   : > { %s10170_s27 = scalar_lea.hbm %s10254_s5, %s6582_s8  ;;  %s10177_s30 = scalar_lea.hbm %s10255_s6, %s6582_s8 }
 0x316   : > { %v5775_v29 = vrot.slane %v5774_v6, 2  ;;  %v5844_v48 = vadd.f32 %v5843_v25, %v5842_v13  ;;  %s10181_s14 = scalar_lea.sflag [#allocation13], %s6017_s11  ;;  %s8204_s15 = scalar_lea.vmem %s10172_s13, 16 }
 0x317   : > { %p8205_p12 = scmp.ne.s32.totalorder %s10172_s13, %s8204_s15  ;;  %s8322_s9 = smov [#allocation12]  }
 0x318   : > { %v5845_v18 = vrot.slane %v5844_v48, 2  ;;  %v5776_v1 = vadd.f32 %v5775_v29, %v5774_v6  ;;  %s8208_s26 = sshll.u32 %s8322_s9, 4  ;;  %s8209_s26 = int_to_ptr.vmem [resolvable:$false] %s8208_s26 }
 0x319   : > { %p8206_p1 = pnand %p8205_p12, %p8510_p5  ;;  %s8210_s19 = scalar_lea.vmem %s8209_s26, 32 }
 0x31a   : > { %v5777_v28 = vrot.slane %v5776_v1, 1  ;;  %v5846_v46 = vadd.f32 %v5845_v18, %v5844_v48  ;;  %p8211_p4 = scmp.lt.s32.totalorder %s10172_s13, %s8209_s26  ;;  %p8212_p9 = scmp.lt.s32.totalorder %s8210_s19, %s8204_s15 }
 0x31b   : > { %p8207_p2 = pneg %p8206_p1 }
 0x31c   : > { %v5778_v5 = vadd.f32 %v5777_v28, %v5776_v1  ;;  %v5847_v2 = vrot.slane %v5846_v46, 1  ;;  %p8213_p0 = por %p8212_p9, %p8211_p4 }
 0x31e   : > { %6010 = vst [vmem:[%s319_s7] sm:$0x1] %v5778_v5  ;;  %v5848_v61 = vadd.f32 %v5847_v2, %v5846_v46  ;;  %p8214_p11 = pnand %p8213_p0, %p8207_p2 }
 0x320   : > { %8217 = shalt.err (!%p8214_p11)
}
 0x321   : > { %s8218_s11 = scalar_lea.hbm %s10170_s27, 16  ;;  %s8222_s25 = scalar_lea.hbm %s10254_s5, 32 }
 0x322   : > { %p8219_p8 = scmp.ne.s32.totalorder %s10170_s27, %s8218_s11  ;;  %p8223_p10 = scmp.lt.u32.totalorder %s10170_s27, %s10254_s5 }
 0x323   : > { %p8224_p3 = scmp.lt.u32.totalorder %s8222_s25, %s8218_s11  ;;  %p8226_p12 = scmp.lt.u32.totalorder %s8218_s11, %s10170_s27 }
 0x324   : > { %p8220_p13 = pnand %p8219_p8, %p8510_p5 }
 0x325   : > { %p8225_p7 = por %p8224_p3, %p8223_p10 }
 0x326   : > { %p8221_p6 = pneg %p8220_p13 }
 0x327   : > { %p8227_p1 = por %p8226_p12, %p8225_p7 }
 0x329   : > { %p8228_p2 = pnand %p8227_p1, %p8221_p6 }
 0x32b   : > { %8231 = shalt.err (!%p8228_p2)
}
 0x32c   : > { %7788 = dma.vmem_to_hbm [thread:$0]  (%p8510_p5), %s10172_s13, 16, %s10170_s27, %s10181_s14   ;;  %6011 = vst [vmem:[%s325_s10] sm:$0x1] %v5848_v61 }
 0x32d   : > { %s8232_s15 = scalar_lea.vmem %s10179_s12, 16  ;;  %s8323_s26 = smov [#allocation14]  }
 0x32e   : > { %p8233_p4 = scmp.ne.s32.totalorder %s10179_s12, %s8232_s15  ;;  %s8236_s19 = sshll.u32 %s8323_s26, 4  ;;  %s8237_s19 = int_to_ptr.vmem [resolvable:$false] %s8236_s19 }
 0x32f   : > { %s8238_s11 = scalar_lea.vmem %s8237_s19, 32  ;;  %p8239_p11 = scmp.lt.s32.totalorder %s10179_s12, %s8237_s19 }
 0x330   : > { %p8234_p9 = pnand %p8233_p4, %p8510_p5  ;;  %p8240_p8 = scmp.lt.s32.totalorder %s8238_s11, %s8232_s15 }
 0x332   : > { %p8235_p0 = pneg %p8234_p9  ;;  %p8241_p13 = por %p8240_p8, %p8239_p11 }
 0x334   : > { %p8242_p6 = pnand %p8241_p13, %p8235_p0 }
 0x336   : > { %8245 = shalt.err (!%p8242_p6)
}
 0x337   : > { %s8246_s20 = scalar_lea.hbm %s10177_s30, 16  ;;  %s8250_s27 = scalar_lea.hbm %s10255_s6, 32 }
 0x338   : > { %p8247_p10 = scmp.ne.s32.totalorder %s10177_s30, %s8246_s20  ;;  %p8251_p12 = scmp.lt.u32.totalorder %s10177_s30, %s10255_s6 }
 0x339   : > { %p8252_p1 = scmp.lt.u32.totalorder %s8250_s27, %s8246_s20  ;;  %p8254_p4 = scmp.lt.u32.totalorder %s8246_s20, %s10177_s30 }
 0x33a   : > { %p8248_p3 = pnand %p8247_p10, %p8510_p5 }
 0x33b   : > { %p8253_p2 = por %p8252_p1, %p8251_p12 }
 0x33c   : > { %p8249_p7 = pneg %p8248_p3 }
 0x33d   : > { %p8255_p9 = por %p8254_p4, %p8253_p2 }
 0x33f   : > { %p8256_p0 = pnand %p8255_p9, %p8249_p7 }
 0x341   : > { %8259 = shalt.err (!%p8256_p0)
}
 0x342   : > { %7789 = dma.vmem_to_hbm [thread:$0]  (%p8510_p5), %s10179_s12, 16, %s10177_s30, %s10181_s14  }
 0x343 PF: > { %s6075_s25 = sand.u32 1, %s8298_s21   ;;  %p10339_p11 = scmp.ne.s32.totalorder %s10274_s28, 0 }
 0x344   : > { %p10340_p8 = scmp.ge.s32.totalorder %s8310_s24, 2  ;;  %s6076_s29 = scalar_lea.sflag [#allocation5], %s6075_s25 }
 0x346   : > { %p7808_p13 = pnand %p10340_p8, %p10339_p11 }
 0x348   : > { %8289 = dma.done.wait (!%p7808_p13), %s6076_s29, 2048  }
 0x349   : > { %8291 = vsyncadd (!%p7808_p13), %s6076_s29, 4294965248  ;;  %s10341_s9 = sadd.s32 4294967294, %s8310_s24  }
 0x34a   : > { %s6084_s15 = sand.u32 1, %s10341_s9  }
 0x34b   : > { %s6085_s26 = scalar_lea.sflag [#allocation13], %s6084_s15 }
 0x34c   : > { %8293 = dma.done.wait (!%p7808_p13), %s6085_s26, 32  }
 0x34d   : > { %8295 = vsyncadd (!%p7808_p13), %s6085_s26, 4294967264  ;;  %p25_p5 = scmp.ge.s32.totalorder %s8496_s18, 4   ;;  %s10342_s21 = smov %s8302_s22 }
 0x34e   : > { %s10343_s22 = smov %s8306_s23  ;;  %s10344_s23 = smov %s8506_s16 }
 0x34f   : > { %s10345_s24 = smov %s8496_s18  ;;  %27 = sbr.rel (!%p25_p5) target bundleno = 9 (0x9), region = 135 }
 0x356   :  { %6097 = vsyncpa [#allocation4], 1 }
 0x357   :  { %6099 = vsyncpa [#allocation4 + $0x1], 1 }
 0x358   :  { %6100 = vsyncpa [#allocation7], 1 }
 0x359   :  { %6101 = vsyncpa [#allocation10], 1 }
 0x35a   :  { %6102 = vsyncpa [#allocation5], 1 }
 0x35b   :  { %6104 = vsyncpa [#allocation5 + $0x1], 1 }
 0x35c   :  { %6105 = vsyncpa [#allocation13], 1 }
 0x35d   :  { %6107 = vsyncpa [#allocation13 + $0x1], 1 }

// kernel: basic_block_forward.3
= control target key start
LH: loop header
LB: loop body
LE: loop exit
PB: predicated region body
PF: predicated region fallthrough
CT: control target
= control target key end

     0   :  { %s12629_s0 = inlined_call_operand.hbm [shape: bf16[2,18,18,128], index: 0, kind: input, shape index: {}]   ;;  %s12630_s1 = inlined_call_operand.hbm [shape: bf16[3,3,128,128], index: 1, kind: input, shape index: {}]   ;;  %s12631_s2 = inlined_call_operand.hbm [shape: bf16[1,1,128,128], index: 2, kind: input, shape index: {}]   ;;  %s12632_s3 = inlined_call_operand.hbm [shape: bf16[2,18,18,128], index: 3, kind: output, shape index: {0}]   ;;  %s12633_s4 = inlined_call_operand.hbm [shape: f32[2,1,128], index: 4, kind: output, shape index: {1}]   ;;  %s12634_s5 = inlined_call_operand.hbm [shape: f32[2,1,128], index: 5, kind: output, shape index: {2}]   ;;  %s12635_s6 = inlined_call_operand.hbm [shape: bf16[2,16,16,128], index: 6, kind: output, shape index: {3}]   ;;  %s12636_s7 = inlined_call_operand.hbm [shape: f32[2,1,128], index: 7, kind: output, shape index: {4}]   ;;  %s12637_s8 = inlined_call_operand.hbm [shape: f32[2,1,128], index: 8, kind: output, shape index: {5}]  }
   0x1   :  { %12655 = sst [smem:[#allocation36_spill]] %s12629_s0 }
   0x2   :  { %12656 = sst [smem:[#allocation37_spill]] %s12630_s1 }
   0x3   :  { %12657 = sst [smem:[#allocation38_spill]] %s12631_s2 }
   0x4   :  { %12658 = sst [smem:[#allocation39_spill]] %s12632_s3 }
   0x5   :  { %12659 = sst [smem:[#allocation40_spill]] %s12635_s6 }
   0x6   :  { %14 = vsyncpa [#allocation3], 0 }
   0x7   :  { %16 = vsyncpa [#allocation3 + $0x1], 0 }
   0x8   :  { %17 = vsyncpa [#allocation6], 0 }
   0x9   :  { %18 = vsyncpa [#allocation4], 0 }
   0xa   :  { %20 = vsyncpa [#allocation4 + $0x1], 0 }
   0xb   :  { %21 = vsyncpa [#allocation10], 0 }
   0xc   :  { %23 = vsyncpa [#allocation10 + $0x1], 0 }
   0xd   :  { %24 = vsyncpa [#allocation13], 0 }
   0xe   :  { %26 = vsyncpa [#allocation13 + $0x1], 0 }
   0xf   :  { %27 = vsyncpa [#allocation16], 0 }
  0x10   :  { %29 = vsyncpa [#allocation16 + $0x1], 0  ;;  %s9738_s27 = smov 0   ;;  %s9740_s28 = smov 0  }
  0x11   :  { %s9742_s29 = smov 0   ;;  %s9744_s30 = smov 0  }
  0x12 LB: > { %s9759_s9 = sadd.s32 4294967295, %s9677_s30   ;;  %s12639_s10 = sadd.s32 4294967294, %s9677_s30   ;;  %s9677_s30 = sphi %s9744_s30, %s12741_s30   ;;  %s9673_s29 = sphi %s9742_s29, %s12740_s29   ;;  %s9669_s28 = sphi %s9740_s28, %s12739_s28   ;;  %s9665_s27 = sphi %s9738_s27, %s12738_s27  }
  0x13   : > { %p55_p0 = scmp.ne.s32.totalorder %s9669_s28, %s9665_s27  ;;  %p12638_p1 = scmp.eq.s32.totalorder %s9759_s9, 0 }
  0x14   : > { %p127_p3 = scmp.eq.s32.totalorder %s12639_s10, 1  ;;  %p7230_p5 = scmp.ge.s32.totalorder %s9677_s30, 1 }
  0x15   : > { %p9770_p4 = por %p12638_p1, %p55_p0  ;;  %p264_p7 = scmp.lt.s32.totalorder %s9677_s30, 3 }
  0x16   : > { %p9775_p6 = por %p127_p3, %p55_p0  ;;  %s9679_s14 = smov [#allocation5]  }
  0x17   : > { %s12660_s11 = scalar_select %p9770_p4, 1, 0 }
  0x18   : > { %s12661_s12 = scalar_select %p9775_p6, 1, 0 }
  0x19   : > { %p9780_p8 = pnand %p7230_p5, %p264_p7  ;;  %s276_s15 = sshll.u32 %s9679_s14, 4  ;;  %s9784_s15 = int_to_ptr.vmem [resolvable:$true] %s276_s15 }
  0x1a   : > { %s9680_s17 = smov [#allocation7]   ;;  %s12664_s1 = sld [smem:[#allocation37_spill]] }
  0x1b   : > { %p9083_p9 = pneg %p9780_p8  ;;  %s289_s18 = sshll.u32 %s9680_s17, 4  ;;  %s9795_s18 = int_to_ptr.vmem [resolvable:$true] %s289_s18 }
  0x1d   : > { %p9791_p11 = pnand %p9083_p9, %p12638_p1 }
  0x1f   : > { %p9371_p13 = pneg %p9791_p11 }
  0x20   : > { %s9369_s21 = scalar_lea.hbm %s12664_s1, 9216 }
  0x21   : > { %p9370_p12 = scmp.ne.s32.totalorder %s12664_s1, %s9369_s21  ;;  %p9376_p5 = scmp.lt.u32.totalorder %s9369_s21, %s12664_s1 }
  0x23   : > { %p9372_p0 = pnand %p9371_p13, %p9370_p12 }
  0x25   : > { %p9373_p3 = pneg %p9372_p0 }
  0x27   : > { %p9378_p7 = pnand %p9376_p5, %p9373_p3 }
  0x29   : > { %9381 = shalt.err (!%p9378_p7)
}
  0x2a   : > { %s9382_s26 = scalar_lea.vmem %s9784_s15, 9216  ;;  %p9390_p2 = scmp.lt.s32.totalorder %s9784_s15, %s9784_s15 }
  0x2b   : > { %p9383_p9 = scmp.ne.s32.totalorder %s9784_s15, %s9382_s26  ;;  %p9391_p12 = scmp.lt.s32.totalorder %s9382_s26, %s9382_s26 }
  0x2d   : > { %p9385_p10 = pnand %p9383_p9, %p9371_p13  ;;  %p9392_p0 = por %p9391_p12, %p9390_p2 }
  0x2f   : > { %p9386_p1 = pneg %p9385_p10 }
  0x31   : > { %p9393_p6 = pnand %p9392_p0, %p9386_p1 }
  0x33   : > { %9396 = shalt.err (!%p9393_p6)
}
  0x34   : > { %s12640_s14 = smov 64   ;;  %s12641_s17 = smov 4  }
  0x35   : > { %9086 = dma.hbm_to_vmem [thread:$0]  (!%p9791_p11), %s12664_s1, 9216, %s9784_s15, [#allocation6], %s12640_s14, %s12640_s14, %s12641_s17  }
  0x36   : > { %s12665_s2 = sld [smem:[#allocation38_spill]] }
  0x3c   : > { %s9397_s23 = scalar_lea.hbm %s12665_s2, 1024 }
  0x3d   : > { %p9398_p1 = scmp.ne.s32.totalorder %s12665_s2, %s9397_s23  ;;  %p9404_p10 = scmp.lt.u32.totalorder %s9397_s23, %s12665_s2 }
  0x3f   : > { %p9400_p2 = pnand %p9398_p1, %p9371_p13 }
  0x41   : > { %p9401_p6 = pneg %p9400_p2 }
  0x43   : > { %p9406_p3 = pnand %p9404_p10, %p9401_p6 }
  0x45   : > { %9409 = shalt.err (!%p9406_p3)
}
  0x46   : > { %s9410_s15 = scalar_lea.vmem %s9795_s18, 1024  ;;  %p9418_p12 = scmp.lt.s32.totalorder %s9795_s18, %s9795_s18 }
  0x47   : > { %p9411_p5 = scmp.ne.s32.totalorder %s9795_s18, %s9410_s15  ;;  %p9419_p0 = scmp.lt.s32.totalorder %s9410_s15, %s9410_s15 }
  0x49   : > { %p9413_p7 = pnand %p9411_p5, %p9371_p13  ;;  %p9420_p1 = por %p9419_p0, %p9418_p12 }
  0x4b   : > { %p9414_p9 = pneg %p9413_p7 }
  0x4d   : > { %p9421_p2 = pnand %p9420_p1, %p9414_p9 }
  0x4f   : > { %9424 = shalt.err (!%p9421_p2)
}
  0x50   : > { %9089 = dma.hbm_to_vmem [thread:$0]  (!%p9791_p11), %s12665_s2, 1024, %s9795_s18, [#allocation6], %s12640_s14, %s12640_s14, %s12641_s17  }
  0x51   : > { %s9856_s16 = sadd.s32 1, %s9677_s30   ;;  %s42_s20 = sadd.s32 1, %s9673_s29 }
  0x52   : > { %s39_s21 = ssub.s32 %s9677_s30, %s9856_s16  ;;  %p49_p13 = scmp.ne.s32.totalorder %s9673_s29, %s9669_s28 }
  0x53   : > { %p40_p6 = scmp.eq.s32.totalorder %s39_s21, 0  ;;  %p50_p10 = scmp.eq.s32.totalorder %s9677_s30, 0 }
  0x54   : > { %p12666_p3 = scmp.eq.s32.totalorder %s9759_s9, 1  ;;  %p9115_p7 = scmp.lt.s32.totalorder %s9677_s30, 2 }
  0x55   : > { %s9872_s23 = scalar_select %p40_p6, %s9673_s29, %s42_s20  }
  0x56   : > { %p9866_p5 = por %p12666_p3, %p49_p13  ;;  %p51_p9 = por %p50_p10, %p49_p13 }
  0x57   : > { %s303_s24 = sand.u32 1, %s9673_s29   ;;  %s9058_s18 = smul.u32 3456, %s9677_s30 }
  0x58   : > { %s12667_s22 = scalar_select %p9866_p5, 1, 0 }
  0x59   : > { %s9057_s25 = smul.u32 216, %s303_s24  ;;  %p9876_p11 = pnand %p9115_p7, %p51_p9 }
  0x5a   : > { %s12669_s0 = sld [smem:[#allocation36_spill]]  ;;  %s9887_s14 = scalar_lea.sflag [#allocation3], %s303_s24 }
  0x5b   : > { %s307_s20 = scalar_lea.vmem [#allocation2], %s9057_s25  ;;  %p9427_p0 = pneg %p9876_p11 }
  0x5c   : > { %s314_s21 = sshll.u32 %s307_s20, 4  ;;  %s9885_s21 = int_to_ptr.vmem [resolvable:$true] %s314_s21 }
  0x60   : > { %s9883_s19 = scalar_lea.hbm %s12669_s0, %s9058_s18  ;;  %s9430_s10 = scalar_lea.hbm %s12669_s0, 6912 }
  0x61   : > { %s9425_s17 = scalar_lea.hbm %s9883_s19, 3456  ;;  %p9431_p13 = scmp.lt.u32.totalorder %s9883_s19, %s12669_s0 }
  0x62   : > { %p9426_p12 = scmp.ne.s32.totalorder %s9883_s19, %s9425_s17  ;;  %p9432_p6 = scmp.lt.u32.totalorder %s9430_s10, %s9425_s17 }
  0x63   : > { %p9434_p3 = scmp.lt.u32.totalorder %s9425_s17, %s9883_s19 }
  0x64   : > { %p9428_p1 = pnand %p9427_p0, %p9426_p12  ;;  %p9433_p10 = por %p9432_p6, %p9431_p13 }
  0x66   : > { %p9429_p2 = pneg %p9428_p1  ;;  %p9435_p7 = por %p9434_p3, %p9433_p10 }
  0x68   : > { %p9436_p9 = pnand %p9435_p7, %p9429_p2 }
  0x6a   : > { %9439 = shalt.err (!%p9436_p9)
}
  0x6b   : > { %s9440_s24 = scalar_lea.vmem %s9885_s21, 3456  ;;  %s9683_s25 = smov [#allocation2]  }
  0x6c   : > { %p9441_p12 = scmp.ne.s32.totalorder %s9885_s21, %s9440_s24  ;;  %s9445_s20 = sshll.u32 %s9683_s25, 4  ;;  %s9446_s20 = int_to_ptr.vmem [resolvable:$false] %s9445_s20 }
  0x6d   : > { %s9447_s1 = scalar_lea.vmem %s9446_s20, 6912  ;;  %p9448_p4 = scmp.lt.s32.totalorder %s9885_s21, %s9446_s20 }
  0x6e   : > { %p9443_p1 = pnand %p9441_p12, %p9427_p0  ;;  %p9449_p13 = scmp.lt.s32.totalorder %s9447_s1, %s9440_s24 }
  0x70   : > { %p9444_p5 = pneg %p9443_p1  ;;  %p9450_p6 = por %p9449_p13, %p9448_p4 }
  0x72   : > { %p9451_p10 = pnand %p9450_p6, %p9444_p5 }
  0x74   : > { %9454 = shalt.err (!%p9451_p10)
}
  0x75   : > { %s12670_s2 = smov 4   ;;  %s12671_s17 = smov 64  }
  0x76   : > { %9093 = dma.hbm_to_vmem [thread:$0]  (!%p9876_p11), %s9883_s19, 3456, %s9885_s21, %s9887_s14, %s12671_s17, %s12671_s17, %s12670_s2  }
  0x77   : > { %326 = sbr.rel (%p9780_p8) target bundleno = 953 (0x3b9), region = 32 }
  0x7e   : > { %s9921_s18 = sand.u32 1, %s9669_s28   ;;  %p12672_p4 = scmp.ne.s32.totalorder %s12660_s11, 0 }
  0x7f   : > { %s9059_s15 = smul.u32 216, %s9921_s18  ;;  %s329_s10 = scalar_lea.sflag [#allocation3], %s9921_s18 }
  0x81   : > { %s9927_s26 = scalar_lea.vmem [#allocation2], %s9059_s15 }
  0x82   : > { %9640 = dma.done.wait (%p12672_p4), %s329_s10, 3456  }
  0x83   : > { %9642 = vsyncadd (%p12672_p4), %s329_s10, 4294963840  ;;  %p12673_p5 = scmp.eq.s32.totalorder %s9759_s9, 0 }
  0x85   : > { %9644 = dma.done.wait (%p12673_p5), [#allocation6], 10240   ;;  %p12674_p8 = pmov %p12673_p5 }
  0x86   : > { %v9158_v0 = vld [vmem:[#allocation5 + $0x40] sm:$0xff]   ;;  %v9160_v2 = vld [vmem:[#allocation5 + $0x48] sm:$0xff]   ;;  %v9162_v4 = vld [vmem:[#allocation5 + $0x50] sm:$0xff]   ;;  %vm513_vm0 = vsmask.f32 3328  ;;  %vm1543_vm3 = vcmask 1042432  }
  0x87   : > { %9646 = vsyncadd (%p12674_p8), [#allocation6], 4294957056  ;;  %v9159_v1 = vld [vmem:[#allocation5 + $0x100] sm:$0xff]   ;;  %8321 = vmatprep.subr.bf16.mxu1 %v9158_v0  ;;  %v9161_v3 = vld [vmem:[#allocation5 + $0x108] sm:$0xff]   ;;  %vm514_vm1 = vsmask.f32 7440 }
  0x88   : > { %8513 = vmatprep.subr.bf16.mxu0 %v9159_v1  ;;  %8322 = vmatpush3.bf16.msra.mxu1 %v9158_v0  ;;  %v9163_v5 = vld [vmem:[#allocation5 + $0x110] sm:$0xff]   ;;  %v9164_v6 = vld [vmem:[#allocation5 + $0x58] sm:$0xff]   ;;  %v9166_v8 = vld [vmem:[#allocation5 + $0x60] sm:$0xff]   ;;  %vm1544_vm4 = vcmask 1046532   ;;  %s11630_s11 = scalar_lea.vmem [#allocation8], %s9059_s15  ;;  %v9684_v39 = vmov 0  }
  0x89   : > { %8514 = vmatpush3.bf16.msra.mxu0 %v9159_v1  ;;  %8323 = vmatprep.subr.bf16.mxu1 %v9160_v2  ;;  %v9165_v7 = vld [vmem:[#allocation5 + $0x118] sm:$0xff]   ;;  %v9167_v9 = vld [vmem:[#allocation5 + $0x120] sm:$0xff]   ;;  %v9168_v10 = vld [vmem:[#allocation5 + $0x68] sm:$0xff]   ;;  %401 = vst [vmem:[%s11630_s11 + $0x18] sm:$0xf] %v9684_v39  ;;  %s7238_s13 = sshll.u32 %s9921_s18, 7 }
  0x8a   : > { %8515 = vmatprep.subr.bf16.mxu0 %v9161_v3  ;;  %v9169_v11 = vld [vmem:[#allocation5 + $0x128] sm:$0xff]   ;;  %v497_v14 = vld [vmem:[%s9927_s26 + $0x8] sm:$0x1]  ;;  %v7383_v19 = vld [vmem:[%s9927_s26 + $0xc] sm:$0xf]  ;;  %395 = vst [vmem:[%s11630_s11] sm:$0xf] %v9684_v39 }
  0x8b   : > { %v449_v12 = vld [vmem:[%s9927_s26] sm:$0xf]  ;;  %v450_v13 = vld [vmem:[%s9927_s26 + $0x4] sm:$0xf]  ;;  %v536_v20 = vshll.u32 %v497_v14, 16  ;;  %v2416_v30 = vshrl.u32 %v7383_v19, 16  ;;  %vm9950_vm2 = vmor %vm513_vm0, %vm514_vm1 }
  0x8c   : > { %8324 = vmatpush3.bf16.msra.mxu1 %v9160_v2  ;;  %v517_v15 = vshrl.u32 %v449_v12, 16  ;;  %v520_v16 = vshll.u32 %v449_v12, 16  ;;  %v526_v17 = vshll.u32 %v450_v13, 16  ;;  %v530_v18 = vshrl.u32 %v450_v13, 16  ;;  %v7384_v21 = vld [vmem:[%s9927_s26 + $0x10] sm:$0xf]  ;;  %vm10269_vm5 = vmor %vm1543_vm3, %vm1544_vm4 }
  0x8d   : > { %8516 = vmatpush3.bf16.msra.mxu0 %v9161_v3  ;;  %8325 = vmatprep.subr.bf16.mxu1 %v9162_v4  ;;  %v9943_v22 = vld [vmem:[%s9927_s26 + $0x14] sm:$0x1]  ;;  %v9170_v27 = vld [vmem:[#allocation5 + $0x70] sm:$0xff]   ;;  %v538_v29 = vrot.slane %v536_v20, 5  ;;  %v2419_v31 = vshll.u32 %v7383_v19, 16  ;;  %v2425_v32 = vshll.u32 %v7384_v21, 16 }
  0x8e   : > { %8517 = vmatprep.subr.bf16.mxu0 %v9163_v5  ;;  %v519_v23 = vrot.slane %v517_v15, 4  ;;  %v522_v24 = vrot.slane %v520_v16, 5  ;;  %v528_v25 = vrot.slane %v526_v17, 5  ;;  %v532_v26 = vrot.slane %v530_v18, 4  ;;  %v9171_v28 = vld [vmem:[#allocation5 + $0x130] sm:$0xff]   ;;  %v9172_v49 = vld [vmem:[#allocation5 + $0x78] sm:$0xff]  }
  0x8f   : > { %v2429_v35 = vshrl.u32 %v7384_v21, 16  ;;  %v2435_v36 = vshll.u32 %v9943_v22, 16  ;;  %v451_v37 = vld [vmem:[%s9927_s26 + $0xc] sm:$0xf]  ;;  %v452_v38 = vld [vmem:[%s9927_s26 + $0x10] sm:$0xf] }
  0x90   : > { %8326 = vmatpush3.bf16.msra.mxu1 %v9162_v4  ;;  %v523_v33 = vor.u32 %v522_v24, %v519_v23  ;;  %v533_v34 = vor.u32 %v532_v26, %v528_v25  ;;  %v2418_v40 = vrot.slane %v2416_v30, 4  ;;  %v2421_v41 = vrot.slane %v2419_v31, 5  ;;  %v498_v43 = vld [vmem:[%s9927_s26 + $0x14] sm:$0x1]  ;;  %v7386_v48 = vld [vmem:[%s9927_s26 + $0x18] sm:$0xf] }
  0x91   : > { %8518 = vmatpush3.bf16.msra.mxu0 %v9163_v5  ;;  %8327 = vmatprep.subr.bf16.mxu1 %v9164_v6  ;;  %v2427_v42 = vrot.slane %v2425_v32, 5  ;;  %v2431_v46 = vrot.slane %v2429_v35, 4  ;;  %v2437_v47 = vrot.slane %v2435_v36, 5  ;;  %v541_v51 = vshrl.u32 %v451_v37, 16  ;;  %v9173_v54 = vld [vmem:[#allocation5 + $0x138] sm:$0xff]   ;;  %v9971_v13 = vld [vmem:[#allocation5 + $0x140] sm:$0xff]  }
  0x92   : > { %8519 = vmatprep.subr.bf16.mxu0 %v9165_v7  ;;  %v524_v44 = vrot.slane %v523_v33, 4  ;;  %v534_v45 = vrot.slane %v533_v34, 4  ;;  %v2422_v50 = vor.u32 %v2421_v41, %v2418_v40  ;;  %v544_v52 = vshll.u32 %v451_v37, 16  ;;  %v9961_v3 = vld [vmem:[%s9927_s26 + $0x1c] sm:$0xf]  ;;  %s11746_s14 = scalar_lea.vmem [#allocation12], %s7238_s13 }
  0x93   : > { %v550_v53 = vshll.u32 %v452_v38, 16  ;;  %v2432_v57 = vor.u32 %v2431_v46, %v2427_v42  ;;  %v554_v58 = vshrl.u32 %v452_v38, 16  ;;  %v543_v61 = vrot.slane %v541_v51, 4  ;;  %v9175_v14 = vld [vmem:[#allocation5] sm:$0xff]   ;;  %v499_v34 = vld [vmem:[%s9927_s26 + $0x20] sm:$0x1] }
  0x94   : > { %8328 = vmatpush3.bf16.msra.mxu1 %v9164_v6  ;;  %v529_v55 = vsel %vm9950_vm2, %v524_v44, %v528_v25  ;;  %v539_v56 = vsel %vm9950_vm2, %v534_v45, %v538_v29  ;;  %v2423_v60 = vrot.slane %v2422_v50, 4  ;;  %v546_v62 = vrot.slane %v544_v52, 5  ;;  %v453_v24 = vld [vmem:[%s9927_s26 + $0x18] sm:$0xf]  ;;  %v454_v29 = vld [vmem:[%s9927_s26 + $0x1c] sm:$0xf] }
  0x95   : > { %8520 = vmatpush3.bf16.msra.mxu0 %v9165_v7  ;;  %8329 = vmatprep.subr.bf16.mxu1 %v9166_v8  ;;  %v7239_v59 = vcombine.low %v529_v55, %v539_v56  ;;  %v2433_v63 = vrot.slane %v2432_v57, 4  ;;  %v552_v0 = vrot.slane %v550_v53, 5  ;;  %v556_v1 = vrot.slane %v554_v58, 4  ;;  %v9967_v7 = vld [vmem:[%s9927_s26 + $0x20] sm:$0x1]  ;;  %s12650_s19 = sand.u32 1, %s9759_s9  }
  0x96   : > { %8521 = vmatprep.subr.bf16.mxu0 %v9167_v9  ;;  %v560_v2 = vshll.u32 %v498_v43, 16  ;;  %v2428_v4 = vsel %vm9950_vm2, %v2423_v60, %v2427_v42  ;;  %v3190_v5 = vrot.slane %v9943_v22, 5  ;;  %v547_v6 = vor.u32 %v546_v62, %v543_v61  ;;  %v7389_v35 = vld [vmem:[%s9927_s26 + $0x24] sm:$0xf]  ;;  %v7390_v41 = vld [vmem:[%s9927_s26 + $0x28] sm:$0xf] }
  0x97   : > { %8337 = vmatprep.mubr.bf16.mxu1 %v7239_v59  ;;  %v2443_v12 = vshll.u32 %v7386_v48, 16  ;;  %v2449_v18 = vshll.u32 %v9961_v3, 16  ;;  %v2453_v21 = vshrl.u32 %v9961_v3, 16  ;;  %v2459_v23 = vshll.u32 %v9967_v7, 16  ;;  %v9177_v42 = vld [vmem:[#allocation5 + $0x8] sm:$0xff]   ;;  %v9179_v61 = vld [vmem:[#allocation5 + $0x10] sm:$0xff]  }
  0x98   : > { %8330 = vmatpush3.bf16.msra.mxu1 %v9166_v8  ;;  %v2440_v8 = vshrl.u32 %v7386_v48, 16  ;;  %v548_v16 = vrot.slane %v547_v6, 4  ;;  %v565_v38 = vshrl.u32 %v453_v24, 16  ;;  %v568_v40 = vshll.u32 %v453_v24, 16  ;;  %v455_v52 = vld [vmem:[%s9927_s26 + $0x24] sm:$0xf] }
  0x99   : > { %8522 = vmatpush3.bf16.msra.mxu0 %v9167_v9  ;;  %8331 = vmatprep.subr.bf16.mxu1 %v9168_v10  ;;  %v2438_v9 = vsel %vm9950_vm2, %v2433_v63, %v2437_v47  ;;  %v2445_v20 = vrot.slane %v2443_v12, 5  ;;  %v2451_v26 = vrot.slane %v2449_v18, 5  ;;  %v2455_v32 = vrot.slane %v2453_v21, 4  ;;  %v7391_v47 = vld [vmem:[%s9927_s26 + $0x2c] sm:$0x1]  ;;  %s7985_s21 = sshll.u32 %s9759_s9, 11 }
  0x9a   : > { %8523 = vmatprep.subr.bf16.mxu0 %v9169_v11  ;;  %v7431_v15 = vcombine.low %v2428_v4, %v2438_v9  ;;  %v2442_v17 = vrot.slane %v2440_v8, 4  ;;  %v553_v25 = vsel %vm9950_vm2, %v548_v16, %v552_v0  ;;  %v2461_v33 = vrot.slane %v2459_v23, 5  ;;  %v456_v9 = vld [vmem:[%s9927_s26 + $0x28] sm:$0xf]  ;;  %v7392_v21 = vld [vmem:[%s9927_s26 + $0x30] sm:$0xf] }
  0x9b   : > { %v2456_v44 = vor.u32 %v2455_v32, %v2451_v26  ;;  %v574_v45 = vshll.u32 %v454_v29, 16  ;;  %v578_v46 = vshrl.u32 %v454_v29, 16  ;;  %v567_v48 = vrot.slane %v565_v38, 4  ;;  %v9181_v23 = vld [vmem:[#allocation5 + $0x18] sm:$0xff]   ;;  %396 = vst [vmem:[%s11630_s11 + $0x4] sm:$0xf] %v9684_v39 }
  0x9c   : > { %8332 = vmatpush3.bf16.msra.mxu1 %v9168_v10  ;;  %v557_v10 = vor.u32 %v556_v1, %v552_v0  ;;  %8529 = vmatprep.mubr.bf16.mxu0 %v7431_v15  ;;  %v2446_v31 = vor.u32 %v2445_v20, %v2442_v17  ;;  %v584_v50 = vshll.u32 %v499_v34, 16  ;;  %v2464_v51 = vshrl.u32 %v7389_v35, 16  ;;  %v500_v15 = vld [vmem:[%s9927_s26 + $0x2c] sm:$0x1]  ;;  %v7393_v34 = vld [vmem:[%s9927_s26 + $0x34] sm:$0xf] }
  0x9d   : > { %8524 = vmatpush3.bf16.msra.mxu0 %v9169_v11  ;;  %8333 = vmatprep.subr.bf16.mxu1 %v9170_v27  ;;  %v562_v11 = vrot.slane %v560_v2, 5  ;;  %v576_v55 = vrot.slane %v574_v45, 5  ;;  %v580_v56 = vrot.slane %v578_v46, 4  ;;  %v2467_v60 = vshll.u32 %v7389_v35, 16  ;;  %v9178_v35 = vld [vmem:[#allocation5 + $0x150] sm:$0xff]   ;;  %s6973_s24 = sshll.u32 %s11746_s14, 4  ;;  %s12364_s24 = int_to_ptr.vmem [resolvable:$true] %s6973_s24 }
  0x9e   : > { %8525 = vmatprep.subr.bf16.mxu0 %v9171_v28  ;;  %v558_v19 = vrot.slane %v557_v10, 4  ;;  %v2447_v43 = vrot.slane %v2446_v31, 4  ;;  %v586_v58 = vrot.slane %v584_v50, 5  ;;  %v2466_v59 = vrot.slane %v2464_v51, 4  ;;  %v9176_v10 = vld [vmem:[#allocation5 + $0x148] sm:$0xff]   ;;  %s12726_s6 = sld [smem:[#allocation40_spill]] }
  0x9f   : > { %v581_v63 = vor.u32 %v580_v56, %v576_v55  ;;  %v2473_v0 = vshll.u32 %v7390_v41, 16  ;;  %v2477_v1 = vshrl.u32 %v7390_v41, 16  ;;  %v2469_v6 = vrot.slane %v2467_v60, 5  ;;  %v7394_v41 = vld [vmem:[%s9927_s26 + $0x38] sm:$0x1]  ;;  %s9060_s2 = smul.u32 3456, %s9759_s9 }
  0xa0   : > { %8334 = vmatpush3.bf16.msra.mxu1 %v9170_v27  ;;  %v3194_v27 = vrot.slane %v9961_v3, 5  ;;  %v563_v30 = vsel %vm9950_vm2, %v558_v19, %v562_v11  ;;  %v2452_v53 = vsel %vm9950_vm2, %v2447_v43, %v2451_v26  ;;  %v2483_v8 = vshll.u32 %v7391_v47, 16  ;;  %v457_v46 = vld [vmem:[%s9927_s26 + $0x30] sm:$0xf]  ;;  %397 = vst [vmem:[%s11630_s11 + $0x8] sm:$0x1] %v9684_v39 }
  0xa1   : > { %8526 = vmatpush3.bf16.msra.mxu0 %v9171_v28  ;;  %8335 = vmatprep.subr.bf16.mxu1 %v9172_v49  ;;  %v3197_v28 = vrot.slane %v9967_v7, 5  ;;  %v7240_v36 = vcombine.low %v553_v25, %v563_v30  ;;  %v582_v11 = vrot.slane %v581_v63, 4  ;;  %v2475_v12 = vrot.slane %v2473_v0, 5  ;;  %v9183_v47 = vld [vmem:[#allocation5 + $0x20] sm:$0xff]   ;;  %398 = vst [vmem:[%s11630_s11 + $0xc] sm:$0xf] %v9684_v39 }
  0xa2   : > { %8527 = vmatprep.subr.bf16.mxu0 %v9173_v54  ;;  %v9989_v37 = vrot.slane %v3194_v27, 4  ;;  %v589_v16 = vshrl.u32 %v455_v52, 16  ;;  %v2470_v18 = vor.u32 %v2469_v6, %v2466_v59  ;;  %v2485_v19 = vrot.slane %v2483_v8, 5  ;;  %399 = vst [vmem:[%s11630_s11 + $0x10] sm:$0xf] %v9684_v39  ;;  %s6931_s17 = sshll.u32 %s11630_s11, 4  ;;  %s12426_s17 = int_to_ptr.vmem [resolvable:$true] %s6931_s17 }
  0xa3   : > { %v592_v20 = vshll.u32 %v455_v52, 16  ;;  %v587_v24 = vsel %vm9950_vm2, %v582_v11, %v586_v58  ;;  %v598_v29 = vshll.u32 %v456_v9, 16  ;;  %v2491_v45 = vshll.u32 %v7392_v21, 16  ;;  %v458_v52 = vld [vmem:[%s9927_s26 + $0x34] sm:$0xf]  ;;  %s12379_s15 = scalar_lea.sflag [#allocation13], %s12650_s19 }
  0xa4   : > { %8336 = vmatpush3.bf16.msra.mxu1 %v9172_v49  ;;  %v570_v49 = vrot.slane %v568_v40, 5  ;;  %v591_v26 = vrot.slane %v589_v16, 4  ;;  %v2471_v31 = vrot.slane %v2470_v18, 4  ;;  %v608_v40 = vshll.u32 %v500_v15, 16  ;;  %v501_v58 = vld [vmem:[%s9927_s26 + $0x38] sm:$0x1]  ;;  %s12362_s1 = scalar_lea.hbm %s12726_s6, %s7985_s21 }
  0xa5   : > { %8528 = vmatpush3.bf16.msra.mxu0 %v9173_v54  ;;  %8369 = vmatprep.subr.bf16.mxu1 %v9175_v14  ;;  %v2457_v54 = vrot.slane %v2456_v44, 4  ;;  %v594_v32 = vrot.slane %v592_v20, 5  ;;  %v600_v38 = vrot.slane %v598_v29, 5  ;;  %v2497_v51 = vshll.u32 %v7393_v34, 16  ;;  %v7395_v11 = vld [vmem:[%s9927_s26 + $0x3c] sm:$0xf] }
  0xa6   : > { %8561 = vmatprep.subr.bf16.mxu0 %v9971_v13  ;;  %v571_v57 = vor.u32 %v570_v49, %v567_v48  ;;  %v610_v49 = vrot.slane %v608_v40, 5  ;;  %v2501_v60 = vshrl.u32 %v7393_v34, 16  ;;  %v626_v16 = vshrl.u32 %v458_v52, 16  ;;  %v9182_v18 = vld [vmem:[#allocation5 + $0x160] sm:$0xff]   ;;  %v7397_v29 = vld [vmem:[%s9927_s26 + $0x44] sm:$0x1] }
  0xa7   : > { %8338 = vmatmul.mubr.bf16.vlgmr.msra.gmra.mrb[0].mxu1 %v7240_v36  ;;  %v2462_v62 = vsel %vm9950_vm2, %v2457_v54, %v2461_v33  ;;  %v602_v33 = vshrl.u32 %v456_v9, 16  ;;  %v595_v43 = vor.u32 %v594_v32, %v591_v26  ;;  %v2499_v59 = vrot.slane %v2497_v51, 5  ;;  %400 = vst [vmem:[%s11630_s11 + $0x14] sm:$0x1] %v9684_v39  ;;  %402 = vst [vmem:[%s11630_s11 + $0x1c] sm:$0xf] %v9684_v39 }
  0xa8   : > { %8370 = vmatpush3.bf16.msra.mxu1 %v9175_v14  ;;  %v7432_v2 = vcombine.low %v2452_v53, %v2462_v62  ;;  %v572_v4 = vrot.slane %v571_v57, 4  ;;  %v2479_v14 = vrot.slane %v2477_v1, 4  ;;  %v9180_v53 = vld [vmem:[#allocation5 + $0x158] sm:$0xff]   ;;  %v2493_v57 = vrot.slane %v2491_v45, 5  ;;  %403 = vst [vmem:[%s11630_s11 + $0x20] sm:$0x1] %v9684_v39 }
  0xa9   : > { %8371 = vmatprep.subr.bf16.mxu1 %v9177_v42  ;;  %v604_v44 = vrot.slane %v602_v33, 4  ;;  %v613_v62 = vshrl.u32 %v457_v46, 16  ;;  %v2503_v6 = vrot.slane %v2501_v60, 4  ;;  %v628_v26 = vrot.slane %v626_v16, 4  ;;  %v9189_v60 = vld [vmem:[#allocation5 + $0x38] sm:$0xff]   ;;  %s9455_s10 = scalar_lea.vmem %s12364_s24, 2048 }
  0xaa   : > { %8530 = vmatmul.mubr.bf16.vlgmr.msra.gmra.mrb[0].mxu0 %v7432_v2  ;;  %v577_v17 = vsel %vm9950_vm2, %v572_v4, %v576_v55  ;;  %v2480_v25 = vor.u32 %v2479_v14, %v2475_v12  ;;  %v596_v55 = vrot.slane %v595_v43, 4  ;;  %v616_v2 = vshll.u32 %v457_v46, 16  ;;  %v9185_v4 = vld [vmem:[#allocation5 + $0x28] sm:$0xff]   ;;  %v9187_v43 = vld [vmem:[#allocation5 + $0x30] sm:$0xff]   ;;  %404 = vst [vmem:[%s11630_s11 + $0x24] sm:$0xf] %v9684_v39  ;;  %p9456_p11 = scmp.ne.s32.totalorder %s12364_s24, %s9455_s10 }
  0xab   : > { %8562 = vmatpush3.bf16.msra.mxu0 %v9971_v13  ;;  %v7241_v30 = vcombine.low %v577_v17, %v587_v24  ;;  %v2488_v13 = vshrl.u32 %v7392_v21, 16  ;;  %v605_v56 = vor.u32 %v604_v44, %v600_v38  ;;  %v615_v9 = vrot.slane %v613_v62, 4  ;;  %v7396_v17 = vld [vmem:[%s9927_s26 + $0x40] sm:$0xf]  ;;  %405 = vst [vmem:[%s11630_s11 + $0x28] sm:$0xf] %v9684_v39 }
  0xac   : > { %8372 = vmatpush3.bf16.msra.mxu1 %v9177_v42  ;;  %8563 = vmatprep.subr.bf16.mxu0 %v9176_v10  ;;  %v2481_v36 = vrot.slane %v2480_v25, 4  ;;  %v2476_v42 = vsel %vm9950_vm2, %v2471_v31, %v2475_v12  ;;  %v601_v63 = vsel %vm9950_vm2, %v596_v55, %v600_v38  ;;  %v618_v15 = vrot.slane %v616_v2, 5  ;;  %v459_v31 = vld [vmem:[%s9927_s26 + $0x3c] sm:$0xf]  ;;  %406 = vst [vmem:[%s11630_s11 + $0x2c] sm:$0x1] %v9684_v39 }
  0xad   : > { %8373 = vmatprep.subr.bf16.mxu1 %v9179_v61  ;;  %8341 = vmatprep.mubr.bf16.mxu1 %v7241_v30  ;;  %v2490_v50 = vrot.slane %v2488_v13, 4  ;;  %v606_v0 = vrot.slane %v605_v56, 4  ;;  %v2504_v20 = vor.u32 %v2503_v6, %v2499_v59  ;;  %v2512_v30 = vshrl.u32 %v7395_v11, 16  ;;  %407 = vst [vmem:[%s11630_s11 + $0x30] sm:$0xf] %v9684_v39  ;;  %p12727_p0 = scmp.ne.s32.totalorder %s12667_s22, 0 }
  0xae   : > { %v2486_v48 = vsel %vm9950_vm2, %v2481_v36, %v2485_v19  ;;  %v619_v25 = vor.u32 %v618_v15, %v615_v9  ;;  %v2515_v34 = vshll.u32 %v7395_v11, 16  ;;  %v460_v36 = vld [vmem:[%s9927_s26 + $0x40] sm:$0xf]  ;;  %v2525_v13 = vshrl.u32 %v7396_v17, 16  ;;  %v7400_v15 = vld [vmem:[%s9927_s26 + $0x50] sm:$0x1] }
  0xaf   : > { %8564 = vmatpush3.bf16.msra.mxu0 %v9176_v10  ;;  %v7433_v54 = vcombine.low %v2476_v42, %v2486_v48  ;;  %v2494_v1 = vor.u32 %v2493_v57, %v2490_v50  ;;  %v622_v10 = vshll.u32 %v458_v52, 16  ;;  %v611_v12 = vsel %vm9950_vm2, %v606_v0, %v610_v49  ;;  %v9184_v42 = vld [vmem:[#allocation5 + $0x168] sm:$0xff]   ;;  %408 = vst [vmem:[%s11630_s11 + $0x34] sm:$0xf] %v9684_v39  ;;  %p9457_p2 = pnand %p9456_p11, %p12727_p0 }
  0xb0   : > { %8374 = vmatpush3.bf16.msra.mxu1 %v9179_v61  ;;  %8565 = vmatprep.subr.bf16.mxu0 %v9178_v35  ;;  %v2507_v61 = vshll.u32 %v7394_v41, 16  ;;  %v7242_v19 = vcombine.low %v601_v63, %v611_v12  ;;  %v2505_v32 = vrot.slane %v2504_v20, 4  ;;  %v620_v38 = vrot.slane %v619_v25, 4  ;;  %v502_v48 = vld [vmem:[%s9927_s26 + $0x44] sm:$0x1] }
  0xb1   : > { %8375 = vmatprep.subr.bf16.mxu1 %v9181_v23  ;;  %8533 = vmatprep.mubr.bf16.mxu0 %v7433_v54  ;;  %v2495_v14 = vrot.slane %v2494_v1, 4  ;;  %v624_v21 = vrot.slane %v622_v10, 5  ;;  %v2514_v41 = vrot.slane %v2512_v30, 4  ;;  %v2517_v45 = vrot.slane %v2515_v34, 5  ;;  %v9186_v54 = vld [vmem:[#allocation5 + $0x170] sm:$0xff]   ;;  %p9458_p3 = pneg %p9457_p2 }
  0xb2   : > { %v2509_v8 = vrot.slane %v2507_v61, 5  ;;  %8342 = vmatmul.mubr.bf16.gmra.mrb[4].mxu1 %v7242_v19  ;;  %v2527_v52 = vrot.slane %v2525_v13, 4  ;;  %v637_v57 = vshrl.u32 %v459_v31, 16  ;;  %v646_v63 = vshll.u32 %v460_v36, 16  ;;  %409 = vst [vmem:[%s11630_s11 + $0x38] sm:$0x1] %v9684_v39 }
  0xb3   : > { %8566 = vmatpush3.bf16.msra.mxu0 %v9178_v35  ;;  %v2500_v24 = vsel %vm9950_vm2, %v2495_v14, %v2499_v59  ;;  %v2521_v35 = vshll.u32 %v7396_v17, 16  ;;  %v629_v40 = vor.u32 %v628_v26, %v624_v21  ;;  %v625_v50 = vsel %vm9950_vm2, %v620_v38, %v624_v21  ;;  %v7399_v59 = vld [vmem:[%s9927_s26 + $0x4c] sm:$0xf]  ;;  %410 = vst [vmem:[%s11630_s11 + $0x3c] sm:$0xf] %v9684_v39 }
  0xb4   : > { %8376 = vmatpush3.bf16.msra.mxu1 %v9181_v23  ;;  %8567 = vmatprep.subr.bf16.mxu0 %v9180_v53  ;;  %v632_v23 = vshll.u32 %v501_v58, 16  ;;  %v2510_v44 = vsel %vm9950_vm2, %v2505_v32, %v2509_v8  ;;  %v2518_v55 = vor.u32 %v2517_v45, %v2514_v41  ;;  %v640_v58 = vshll.u32 %v459_v31, 16  ;;  %v462_v31 = vld [vmem:[%s9927_s26 + $0x4c] sm:$0xf]  ;;  %v9193_v32 = vld [vmem:[#allocation5 + $0x80] sm:$0xff]  }
  0xb5   : > { %8377 = vmatprep.subr.bf16.mxu1 %v9183_v47  ;;  %v2523_v46 = vrot.slane %v2521_v35, 5  ;;  %v7434_v49 = vcombine.low %v2500_v24, %v2510_v44  ;;  %v630_v51 = vrot.slane %v629_v40, 4  ;;  %v650_v0 = vshrl.u32 %v460_v36, 16  ;;  %v9188_v24 = vld [vmem:[#allocation5 + $0x178] sm:$0xff]   ;;  %411 = vst [vmem:[%s11630_s11 + $0x40] sm:$0xf] %v9684_v39 }
  0xb6   : > { %v634_v33 = vrot.slane %v632_v23, 5  ;;  %v2519_v2 = vrot.slane %v2518_v55, 4  ;;  %v642_v6 = vrot.slane %v640_v58, 5  ;;  %v648_v9 = vrot.slane %v646_v63, 5  ;;  %v461_v23 = vld [vmem:[%s9927_s26 + $0x48] sm:$0xf] }
  0xb7   : > { %8568 = vmatpush3.bf16.msra.mxu0 %v9180_v53  ;;  %v7398_v53 = vld [vmem:[%s9927_s26 + $0x48] sm:$0xf]  ;;  %v2528_v62 = vor.u32 %v2527_v52, %v2523_v46  ;;  %v652_v10 = vrot.slane %v650_v0, 4  ;;  %v656_v11 = vshll.u32 %v502_v48, 16  ;;  %v2545_v21 = vshll.u32 %v7399_v59, 16  ;;  %v9192_v48 = vld [vmem:[#allocation5 + $0x180] sm:$0xff]  }
  0xb8   : > { %8378 = vmatpush3.bf16.msra.mxu1 %v9183_v47  ;;  %8569 = vmatprep.subr.bf16.mxu0 %v9182_v18  ;;  %v2531_v47 = vshll.u32 %v7397_v29, 16  ;;  %v635_v61 = vsel %vm9950_vm2, %v630_v51, %v634_v33  ;;  %v2524_v12 = vsel %vm9950_vm2, %v2519_v2, %v2523_v46  ;;  %v2536_v16 = vshrl.u32 %v7398_v53, 16  ;;  %v503_v41 = vld [vmem:[%s9927_s26 + $0x50] sm:$0x1]  ;;  %v7403_v58 = vld [vmem:[%s9927_s26 + $0x5c] sm:$0x1] }
  0xb9   : > { %8379 = vmatprep.subr.bf16.mxu1 %v9185_v4  ;;  %8534 = vmatmul.mubr.bf16.gmra.mrb[4].mxu0 %v7434_v49  ;;  %v7243_v1 = vcombine.low %v625_v50, %v635_v61  ;;  %v2529_v8 = vrot.slane %v2528_v62, 4  ;;  %v2539_v17 = vshll.u32 %v7398_v53, 16  ;;  %v653_v19 = vor.u32 %v652_v10, %v648_v9  ;;  %v7402_v53 = vld [vmem:[%s9927_s26 + $0x58] sm:$0xf]  ;;  %v463_v63 = vld [vmem:[%s9927_s26 + $0x54] sm:$0xf] }
  0xba   : > { %v2533_v56 = vrot.slane %v2531_v47, 5  ;;  %v658_v20 = vrot.slane %v656_v11, 5  ;;  %v2538_v29 = vrot.slane %v2536_v16, 4  ;;  %v2547_v34 = vrot.slane %v2545_v21, 5  ;;  %v7401_v47 = vld [vmem:[%s9927_s26 + $0x54] sm:$0xf] }
  0xbb   : > { %8570 = vmatpush3.bf16.msra.mxu0 %v9182_v18  ;;  %8345 = vmatprep.mubr.bf16.mxu1 %v7243_v1  ;;  %v2541_v30 = vrot.slane %v2539_v17, 5  ;;  %v654_v33 = vrot.slane %v653_v19, 4  ;;  %v2549_v35 = vshrl.u32 %v7399_v59, 16  ;;  %v2555_v36 = vshll.u32 %v7400_v15, 16  ;;  %v464_v16 = vld [vmem:[%s9927_s26 + $0x58] sm:$0xf] }
  0xbc   : > { %8380 = vmatpush3.bf16.msra.mxu1 %v9185_v4  ;;  %8571 = vmatprep.subr.bf16.mxu0 %v9184_v42  ;;  %v639_v4 = vrot.slane %v637_v57, 4  ;;  %v2534_v18 = vsel %vm9950_vm2, %v2529_v8, %v2533_v56  ;;  %v661_v13 = vshrl.u32 %v461_v23, 16  ;;  %v670_v46 = vshll.u32 %v462_v31, 16  ;;  %v504_v21 = vld [vmem:[%s9927_s26 + $0x5c] sm:$0x1] }
  0xbd   : > { %8381 = vmatprep.subr.bf16.mxu1 %v9187_v43  ;;  %v7435_v25 = vcombine.low %v2524_v12, %v2534_v18  ;;  %v2542_v40 = vor.u32 %v2541_v30, %v2538_v29  ;;  %v2551_v44 = vrot.slane %v2549_v35, 4  ;;  %v2557_v45 = vrot.slane %v2555_v36, 5  ;;  %412 = vst [vmem:[%s11630_s11 + $0x44] sm:$0x1] %v9684_v39  ;;  %413 = vst [vmem:[%s11630_s11 + $0x48] sm:$0xf] %v9684_v39 }
  0xbe   : > { %v643_v14 = vor.u32 %v642_v6, %v639_v4  ;;  %v663_v51 = vrot.slane %v661_v13, 4  ;;  %v672_v56 = vrot.slane %v670_v46, 5  ;;  %v680_v57 = vshll.u32 %v503_v41, 16  ;;  %414 = vst [vmem:[%s11630_s11 + $0x4c] sm:$0xf] %v9684_v39 }
  0xbf   : > { %8572 = vmatpush3.bf16.msra.mxu0 %v9184_v42  ;;  %8537 = vmatprep.mubr.bf16.mxu0 %v7435_v25  ;;  %v664_v42 = vshll.u32 %v461_v23, 16  ;;  %v2543_v50 = vrot.slane %v2542_v40, 4  ;;  %v2552_v55 = vor.u32 %v2551_v44, %v2547_v34  ;;  %v2560_v61 = vshrl.u32 %v7401_v47, 16  ;;  %v7405_v40 = vld [vmem:[%s9927_s26 + $0x64] sm:$0xf] }
  0xc0   : > { %8382 = vmatpush3.bf16.msra.mxu1 %v9187_v43  ;;  %8573 = vmatprep.subr.bf16.mxu0 %v9186_v54  ;;  %v644_v26 = vrot.slane %v643_v14, 4  ;;  %v659_v43 = vsel %vm9950_vm2, %v654_v33, %v658_v20  ;;  %v2563_v62 = vshll.u32 %v7401_v47, 16  ;;  %v682_v2 = vrot.slane %v680_v57, 5  ;;  %v7404_v33 = vld [vmem:[%s9927_s26 + $0x60] sm:$0xf] }
  0xc1   : > { %8383 = vmatprep.subr.bf16.mxu1 %v9189_v60  ;;  %v666_v52 = vrot.slane %v664_v42, 5  ;;  %v2548_v59 = vsel %vm9950_vm2, %v2543_v50, %v2547_v34  ;;  %v2553_v0 = vrot.slane %v2552_v55, 4  ;;  %v2569_v4 = vshll.u32 %v7402_v53, 16  ;;  %v7406_v47 = vld [vmem:[%s9927_s26 + $0x68] sm:$0x1] }
  0xc2   : > { %v649_v38 = vsel %vm9950_vm2, %v644_v26, %v648_v9  ;;  %v2562_v8 = vrot.slane %v2560_v61, 4  ;;  %v2565_v9 = vrot.slane %v2563_v62, 5  ;;  %v2573_v10 = vshrl.u32 %v7402_v53, 16  ;;  %v465_v53 = vld [vmem:[%s9927_s26 + $0x60] sm:$0xf] }
  0xc3   : > { %8574 = vmatpush3.bf16.msra.mxu0 %v9186_v54  ;;  %v7244_v49 = vcombine.low %v649_v38, %v659_v43  ;;  %v674_v54 = vshrl.u32 %v462_v31, 16  ;;  %v2558_v11 = vsel %vm9950_vm2, %v2553_v0, %v2557_v45  ;;  %v2571_v14 = vrot.slane %v2569_v4, 5  ;;  %415 = vst [vmem:[%s11630_s11 + $0x50] sm:$0x1] %v9684_v39  ;;  %416 = vst [vmem:[%s11630_s11 + $0x54] sm:$0xf] %v9684_v39 }
  0xc4   : > { %8384 = vmatpush3.bf16.msra.mxu1 %v9189_v60  ;;  %8575 = vmatprep.subr.bf16.mxu0 %v9188_v24  ;;  %v667_v60 = vor.u32 %v666_v52, %v663_v51  ;;  %v2579_v15 = vshll.u32 %v7403_v58, 16  ;;  %v7436_v17 = vcombine.low %v2548_v59, %v2558_v11  ;;  %v2566_v19 = vor.u32 %v2565_v9, %v2562_v8  ;;  %v466_v58 = vld [vmem:[%s9927_s26 + $0x64] sm:$0xf]  ;;  %v7407_v11 = vld [vmem:[%s9927_s26 + $0x6c] sm:$0xf] }
  0xc5   : > { %8417 = vmatprep.subr.bf16.mxu1 %v9193_v32  ;;  %8346 = vmatmul.mubr.bf16.gmra.mrb[8].mxu1 %v7244_v49  ;;  %v676_v1 = vrot.slane %v674_v54, 4  ;;  %v2575_v20 = vrot.slane %v2573_v10, 4  ;;  %v685_v25 = vshrl.u32 %v463_v63, 16  ;;  %v688_v26 = vshll.u32 %v463_v63, 16  ;;  %v505_v63 = vld [vmem:[%s9927_s26 + $0x68] sm:$0x1] }
  0xc6   : > { %v668_v6 = vrot.slane %v667_v60, 4  ;;  %8538 = vmatmul.mubr.bf16.gmra.mrb[8].mxu0 %v7436_v17  ;;  %v2567_v29 = vrot.slane %v2566_v19, 4  ;;  %v694_v31 = vshll.u32 %v464_v16, 16  ;;  %v698_v32 = vshrl.u32 %v464_v16, 16  ;;  %v10077_v17 = vld [vmem:[%s9927_s26 + $0x70] sm:$0xf] }
  0xc7   : > { %8576 = vmatpush3.bf16.msra.mxu0 %v9188_v24  ;;  %v677_v12 = vor.u32 %v676_v1, %v672_v56  ;;  %v2581_v24 = vrot.slane %v2579_v15, 5  ;;  %v2576_v30 = vor.u32 %v2575_v20, %v2571_v14  ;;  %v687_v35 = vrot.slane %v685_v25, 4  ;;  %417 = vst [vmem:[%s11630_s11 + $0x58] sm:$0xf] %v9684_v39  ;;  %418 = vst [vmem:[%s11630_s11 + $0x5c] sm:$0x1] %v9684_v39 }
  0xc8   : > { %8609 = vmatprep.subr.bf16.mxu0 %v9192_v48  ;;  %v673_v18 = vsel %vm9950_vm2, %v668_v6, %v672_v56  ;;  %v690_v36 = vrot.slane %v688_v26, 5  ;;  %v704_v38 = vshll.u32 %v504_v21, 16  ;;  %v2572_v13 = vsel %vm9950_vm2, %v2567_v29, %v2571_v14  ;;  %419 = vst [vmem:[%s11630_s11 + $0x60] sm:$0xf] %v9684_v39  ;;  %420 = vst [vmem:[%s11630_s11 + $0x64] sm:$0xf] %v9684_v39 }
  0xc9   : > { %v678_v23 = vrot.slane %v677_v12, 4  ;;  %v2577_v42 = vrot.slane %v2576_v30, 4  ;;  %v696_v43 = vrot.slane %v694_v31, 5  ;;  %v700_v45 = vrot.slane %v698_v32, 4  ;;  %v10084_v31 = vld [vmem:[%s9927_s26 + $0x74] sm:$0x1] }
  0xca   : > { %v691_v44 = vor.u32 %v690_v36, %v687_v35  ;;  %v706_v46 = vrot.slane %v704_v38, 5  ;;  %v2584_v48 = vshrl.u32 %v7404_v33, 16  ;;  %v2587_v50 = vshll.u32 %v7404_v33, 16  ;;  %421 = vst [vmem:[%s11630_s11 + $0x68] sm:$0x1] %v9684_v39 }
  0xcb   : > { %v683_v34 = vsel %vm9950_vm2, %v678_v23, %v682_v2  ;;  %v2582_v49 = vsel %vm9950_vm2, %v2577_v42, %v2581_v24  ;;  %v2593_v51 = vshll.u32 %v7405_v40, 16  ;;  %v2597_v52 = vshrl.u32 %v7405_v40, 16  ;;  %422 = vst [vmem:[%s11630_s11 + $0x6c] sm:$0xf] %v9684_v39  ;;  %423 = vst [vmem:[%s11630_s11 + $0x70] sm:$0xf] %v9684_v39 }
  0xcc   : > { %v7245_v41 = vcombine.low %v673_v18, %v683_v34  ;;  %v7437_v55 = vcombine.low %v2572_v13, %v2582_v49  ;;  %v692_v56 = vrot.slane %v691_v44, 4  ;;  %v701_v54 = vor.u32 %v700_v45, %v696_v43  ;;  %v467_v34 = vld [vmem:[%s9927_s26 + $0x6c] sm:$0xf]  ;;  %424 = vst [vmem:[%s11630_s11 + $0x74] sm:$0x1] %v9684_v39 }
  0xcd   : > { %v2586_v57 = vrot.slane %v2584_v48, 4  ;;  %v2589_v59 = vrot.slane %v2587_v50, 5  ;;  %v2595_v60 = vrot.slane %v2593_v51, 5  ;;  %v2599_v61 = vrot.slane %v2597_v52, 4  ;;  %v506_v48 = vld [vmem:[%s9927_s26 + $0x74] sm:$0x1] }
  0xce   : > { %8349 = vmatprep.mubr.bf16.mxu1 %v7245_v41  ;;  %v2603_v62 = vshll.u32 %v7406_v47, 16  ;;  %8541 = vmatprep.mubr.bf16.mxu0 %v7437_v55  ;;  %v697_v0 = vsel %vm9950_vm2, %v692_v56, %v696_v43  ;;  %v702_v1 = vrot.slane %v701_v54, 4  ;;  %v709_v2 = vshrl.u32 %v465_v53, 16  ;;  %v468_v41 = vld [vmem:[%s9927_s26 + $0x70] sm:$0xf] }
  0xcf   : > { %v712_v4 = vshll.u32 %v465_v53, 16  ;;  %v2590_v6 = vor.u32 %v2589_v59, %v2586_v57  ;;  %v2600_v8 = vor.u32 %v2599_v61, %v2595_v60  ;;  %v718_v10 = vshll.u32 %v466_v58, 16  ;;  %v7410_v55 = vld [vmem:[%s9927_s26 + $0x78] sm:$0xf]  ;;  %v7411_v59 = vld [vmem:[%s9927_s26 + $0x7c] sm:$0xf] }
  0xd0   : > { %v2605_v9 = vrot.slane %v2603_v62, 5  ;;  %v707_v12 = vsel %vm9950_vm2, %v702_v1, %v706_v46  ;;  %v711_v14 = vrot.slane %v709_v2, 4  ;;  %v722_v16 = vshrl.u32 %v466_v58, 16  ;;  %425 = vst [vmem:[%s11630_s11 + $0x78] sm:$0xf] %v9684_v39 }
  0xd1   : > { %v714_v15 = vrot.slane %v712_v4, 5  ;;  %v7246_v18 = vcombine.low %v697_v0, %v707_v12  ;;  %v2591_v19 = vrot.slane %v2590_v6, 4  ;;  %v2601_v20 = vrot.slane %v2600_v8, 4  ;;  %426 = vst [vmem:[%s11630_s11 + $0x7c] sm:$0xf] %v9684_v39 }
  0xd2   : > { %v720_v21 = vrot.slane %v718_v10, 5  ;;  %v724_v24 = vrot.slane %v722_v16, 4  ;;  %v728_v25 = vshll.u32 %v505_v63, 16  ;;  %v2608_v26 = vshrl.u32 %v7407_v11, 16  ;;  %v7412_v10 = vld [vmem:[%s9927_s26 + $0x80] sm:$0x1] }
  0xd3   : > { %v715_v23 = vor.u32 %v714_v15, %v711_v14  ;;  %8350 = vmatmul.mubr.bf16.gmra.mrb[12].mxu1 %v7246_v18  ;;  %v2596_v29 = vsel %vm9950_vm2, %v2591_v19, %v2595_v60  ;;  %v2606_v30 = vsel %vm9950_vm2, %v2601_v20, %v2605_v9  ;;  %v2611_v32 = vshll.u32 %v7407_v11, 16  ;;  %v469_v18 = vld [vmem:[%s9927_s26 + $0x78] sm:$0xf]  ;;  %427 = vst [vmem:[%s11630_s11 + $0x80] sm:$0x1] %v9684_v39 }
  0xd4   : > { %v2617_v33 = vshll.u32 %v10077_v17, 16  ;;  %v7438_v35 = vcombine.low %v2596_v29, %v2606_v30  ;;  %v725_v38 = vor.u32 %v724_v24, %v720_v21  ;;  %v730_v40 = vrot.slane %v728_v25, 5  ;;  %v470_v24 = vld [vmem:[%s9927_s26 + $0x7c] sm:$0xf]  ;;  %428 = vst [vmem:[%s11630_s11 + $0x84] sm:$0xf] %v9684_v39 }
  0xd5   : > { %v716_v36 = vrot.slane %v715_v23, 4  ;;  %v2610_v13 = vrot.slane %v2608_v26, 4  ;;  %v2613_v42 = vrot.slane %v2611_v32, 5  ;;  %v2621_v44 = vshrl.u32 %v10077_v17, 16  ;;  %429 = vst [vmem:[%s11630_s11 + $0x88] sm:$0xf] %v9684_v39 }
  0xd6   : > { %v2619_v43 = vrot.slane %v2617_v33, 5  ;;  %8542 = vmatmul.mubr.bf16.gmra.mrb[12].mxu0 %v7438_v35  ;;  %v726_v46 = vrot.slane %v725_v38, 4  ;;  %v2627_v47 = vshll.u32 %v10084_v31, 16  ;;  %v733_v49 = vshrl.u32 %v467_v34, 16  ;;  %v507_v35 = vld [vmem:[%s9927_s26 + $0x80] sm:$0x1] }
  0xd7   : > { %v721_v45 = vsel %vm9950_vm2, %v716_v36, %v720_v21  ;;  %v2614_v50 = vor.u32 %v2613_v42, %v2610_v13  ;;  %v2623_v51 = vrot.slane %v2621_v44, 4  ;;  %v736_v52 = vshll.u32 %v467_v34, 16  ;;  %v7413_v42 = vld [vmem:[%s9927_s26 + $0x84] sm:$0xf]  ;;  %430 = vst [vmem:[%s11630_s11 + $0x8c] sm:$0x1] %v9684_v39 }
  0xd8   : > { %v742_v53 = vshll.u32 %v468_v41, 16  ;;  %v731_v56 = vsel %vm9950_vm2, %v726_v46, %v730_v40  ;;  %v2629_v54 = vrot.slane %v2627_v47, 5  ;;  %v735_v57 = vrot.slane %v733_v49, 4  ;;  %v10112_v47 = vld [vmem:[%s9927_s26 + $0x88] sm:$0xf] }
  0xd9   : > { %v746_v58 = vshrl.u32 %v468_v41, 16  ;;  %v7247_v60 = vcombine.low %v721_v45, %v731_v56  ;;  %v2615_v61 = vrot.slane %v2614_v50, 4  ;;  %v2624_v62 = vor.u32 %v2623_v51, %v2619_v43  ;;  %431 = vst [vmem:[%s11630_s11 + $0x90] sm:$0xf] %v9684_v39  ;;  %432 = vst [vmem:[%s11630_s11 + $0x94] sm:$0xf] %v9684_v39 }
  0xda   : > { %v738_v63 = vrot.slane %v736_v52, 5  ;;  %v744_v0 = vrot.slane %v742_v53, 5  ;;  %v752_v2 = vshll.u32 %v506_v48, 16  ;;  %v2632_v4 = vshrl.u32 %v7410_v55, 16  ;;  %v7415_v52 = vld [vmem:[%s9927_s26 + $0x8c] sm:$0x1] }
  0xdb   : > { %v748_v1 = vrot.slane %v746_v58, 4  ;;  %8353 = vmatprep.mubr.bf16.mxu1 %v7247_v60  ;;  %v2620_v6 = vsel %vm9950_vm2, %v2615_v61, %v2619_v43  ;;  %v2625_v8 = vrot.slane %v2624_v62, 4  ;;  %v2635_v11 = vshll.u32 %v7410_v55, 16  ;;  %v472_v62 = vld [vmem:[%s9927_s26 + $0x88] sm:$0xf] }
  0xdc   : > { %v739_v9 = vor.u32 %v738_v63, %v735_v57  ;;  %v754_v14 = vrot.slane %v752_v2, 5  ;;  %v2634_v15 = vrot.slane %v2632_v4, 4  ;;  %v2641_v16 = vshll.u32 %v7411_v59, 16  ;;  %v471_v57 = vld [vmem:[%s9927_s26 + $0x84] sm:$0xf] }
  0xdd   : > { %v749_v12 = vor.u32 %v748_v1, %v744_v0  ;;  %v2630_v19 = vsel %vm9950_vm2, %v2625_v8, %v2629_v54  ;;  %v2637_v21 = vrot.slane %v2635_v11, 5  ;;  %v2645_v23 = vshrl.u32 %v7411_v59, 16  ;;  %433 = vst [vmem:[%s11630_s11 + $0x98] sm:$0x1] %v9684_v39  ;;  %434 = vst [vmem:[%s11630_s11 + $0x9c] sm:$0xf] %v9684_v39 }
  0xde   : > { %v740_v20 = vrot.slane %v739_v9, 4  ;;  %v7439_v25 = vcombine.low %v2620_v6, %v2630_v19  ;;  %v2643_v29 = vrot.slane %v2641_v16, 5  ;;  %v2651_v30 = vshll.u32 %v7412_v10, 16  ;;  %v508_v10 = vld [vmem:[%s9927_s26 + $0x8c] sm:$0x1] }
  0xdf   : > { %v750_v26 = vrot.slane %v749_v12, 4  ;;  %v2638_v33 = vor.u32 %v2637_v21, %v2634_v15  ;;  %v2647_v34 = vrot.slane %v2645_v23, 4  ;;  %v757_v36 = vshrl.u32 %v469_v18, 16  ;;  %v7416_v21 = vld [vmem:[%s9927_s26 + $0x90] sm:$0xf] }
  0xe0   : > { %v745_v32 = vsel %vm9950_vm2, %v740_v20, %v744_v0  ;;  %8545 = vmatprep.mubr.bf16.mxu0 %v7439_v25  ;;  %v2653_v40 = vrot.slane %v2651_v30, 5  ;;  %v760_v41 = vshll.u32 %v469_v18, 16  ;;  %v766_v13 = vshll.u32 %v470_v24, 16  ;;  %435 = vst [vmem:[%s11630_s11 + $0xa0] sm:$0xf] %v9684_v39 }
  0xe1   : > { %v755_v38 = vsel %vm9950_vm2, %v750_v26, %v754_v14  ;;  %v2639_v44 = vrot.slane %v2638_v33, 4  ;;  %v2648_v45 = vor.u32 %v2647_v34, %v2643_v29  ;;  %v759_v46 = vrot.slane %v757_v36, 4  ;;  %436 = vst [vmem:[%s11630_s11 + $0xa4] sm:$0x1] %v9684_v39  ;;  %437 = vst [vmem:[%s11630_s11 + $0xa8] sm:$0xf] %v9684_v39 }
  0xe2   : > { %v7248_v43 = vcombine.low %v745_v32, %v755_v38  ;;  %v762_v48 = vrot.slane %v760_v41, 5  ;;  %v768_v49 = vrot.slane %v766_v13, 5  ;;  %v770_v50 = vshrl.u32 %v470_v24, 16  ;;  %438 = vst [vmem:[%s11630_s11 + $0xac] sm:$0xf] %v9684_v39 }
  0xe3   : > { %v776_v51 = vshll.u32 %v507_v35, 16  ;;  %v2644_v53 = vsel %vm9950_vm2, %v2639_v44, %v2643_v29  ;;  %v2649_v55 = vrot.slane %v2648_v45, 4  ;;  %v2656_v56 = vshrl.u32 %v7413_v42, 16  ;;  %v10128_v29 = vld [vmem:[%s9927_s26 + $0x94] sm:$0xf] }
  0xe4   : > { %8354 = vmatmul.mubr.bf16.gmra.mrb[16].mxu1 %v7248_v43  ;;  %v2659_v54 = vshll.u32 %v7413_v42, 16  ;;  %v763_v58 = vor.u32 %v762_v48, %v759_v46  ;;  %v772_v59 = vrot.slane %v770_v50, 4  ;;  %v2665_v61 = vshll.u32 %v10112_v47, 16  ;;  %v10133_v35 = vld [vmem:[%s9927_s26 + $0x98] sm:$0x1] }
  0xe5   : > { %v778_v60 = vrot.slane %v776_v51, 5  ;;  %v2654_v63 = vsel %vm9950_vm2, %v2649_v55, %v2653_v40  ;;  %v2658_v0 = vrot.slane %v2656_v56, 4  ;;  %v2669_v2 = vshrl.u32 %v10112_v47, 16  ;;  %v10142_v50 = vld [vmem:[%s9927_s26 + $0x90] sm:$0xf] }
  0xe6   : > { %v2661_v1 = vrot.slane %v2659_v54, 5  ;;  %v7440_v4 = vcombine.low %v2644_v53, %v2654_v63  ;;  %v764_v6 = vrot.slane %v763_v58, 4  ;;  %v773_v8 = vor.u32 %v772_v59, %v768_v49  ;;  %v10145_v56 = vld [vmem:[%s9927_s26 + $0x94] sm:$0xf]  ;;  %439 = vst [vmem:[%s11630_s11 + $0xb0] sm:$0x1] %v9684_v39 }
  0xe7   : > { %v2667_v9 = vrot.slane %v2665_v61, 5  ;;  %v2671_v12 = vrot.slane %v2669_v2, 4  ;;  %v2675_v14 = vshll.u32 %v7415_v52, 16  ;;  %v781_v15 = vshrl.u32 %v471_v57, 16  ;;  %440 = vst [vmem:[%s11630_s11 + $0xb4] sm:$0xf] %v9684_v39 }
  0xe8   : > { %v2662_v11 = vor.u32 %v2661_v1, %v2658_v0  ;;  %8546 = vmatmul.mubr.bf16.gmra.mrb[16].mxu0 %v7440_v4  ;;  %v769_v16 = vsel %vm9950_vm2, %v764_v6, %v768_v49  ;;  %v774_v18 = vrot.slane %v773_v8, 4  ;;  %v784_v19 = vshll.u32 %v471_v57, 16  ;;  %v7419_v8 = vld [vmem:[%s9927_s26 + $0x9c] sm:$0xf]  ;;  %441 = vst [vmem:[%s11630_s11 + $0xb8] sm:$0xf] %v9684_v39 }
  0xe9   : > { %v790_v20 = vshll.u32 %v472_v62, 16  ;;  %v2672_v24 = vor.u32 %v2671_v12, %v2667_v9  ;;  %v2677_v25 = vrot.slane %v2675_v14, 5  ;;  %v783_v26 = vrot.slane %v781_v15, 4  ;;  %v10159_v14 = vld [vmem:[%s9927_s26 + $0xa0] sm:$0xf] }
  0xea   : > { %v2663_v23 = vrot.slane %v2662_v11, 4  ;;  %v779_v30 = vsel %vm9950_vm2, %v774_v18, %v778_v60  ;;  %v786_v32 = vrot.slane %v784_v19, 5  ;;  %v794_v34 = vshrl.u32 %v472_v62, 16  ;;  %v509_v60 = vld [vmem:[%s9927_s26 + $0x98] sm:$0x1] }
  0xeb   : > { %v792_v33 = vrot.slane %v790_v20, 5  ;;  %v7249_v36 = vcombine.low %v769_v16, %v779_v30  ;;  %v2673_v40 = vrot.slane %v2672_v24, 4  ;;  %v800_v41 = vshll.u32 %v508_v10, 16  ;;  %v10162_v20 = vld [vmem:[%s9927_s26 + $0xa4] sm:$0x1] }
  0xec   : > { %v2668_v38 = vsel %vm9950_vm2, %v2663_v23, %v2667_v9  ;;  %v787_v13 = vor.u32 %v786_v32, %v783_v26  ;;  %v796_v42 = vrot.slane %v794_v34, 4  ;;  %v2680_v43 = vshrl.u32 %v7416_v21, 16  ;;  %442 = vst [vmem:[%s11630_s11 + $0xbc] sm:$0x1] %v9684_v39  ;;  %443 = vst [vmem:[%s11630_s11 + $0xc0] sm:$0xf] %v9684_v39 }
  0xed   : > { %v2683_v44 = vshll.u32 %v7416_v21, 16  ;;  %8357 = vmatprep.mubr.bf16.mxu1 %v7249_v36  ;;  %v2678_v45 = vsel %vm9950_vm2, %v2673_v40, %v2677_v25  ;;  %v802_v46 = vrot.slane %v800_v41, 5  ;;  %v2689_v48 = vshll.u32 %v10128_v29, 16  ;;  %v10165_v21 = vld [vmem:[%s9927_s26 + $0x9c] sm:$0xf] }
  0xee   : > { %v2693_v49 = vshrl.u32 %v10128_v29, 16  ;;  %v7441_v51 = vcombine.low %v2668_v38, %v2678_v45  ;;  %v788_v52 = vrot.slane %v787_v13, 4  ;;  %v797_v53 = vor.u32 %v796_v42, %v792_v33  ;;  %v10173_v13 = vld [vmem:[%s9927_s26 + $0xa0] sm:$0xf]  ;;  %444 = vst [vmem:[%s11630_s11 + $0xc4] sm:$0xf] %v9684_v39 }
  0xef   : > { %v2682_v55 = vrot.slane %v2680_v43, 4  ;;  %v2685_v54 = vrot.slane %v2683_v44, 5  ;;  %v2691_v57 = vrot.slane %v2689_v48, 5  ;;  %v2699_v59 = vshll.u32 %v10133_v35, 16  ;;  %v7422_v48 = vld [vmem:[%s9927_s26 + $0xa8] sm:$0xf] }
  0xf0   : > { %v2695_v58 = vrot.slane %v2693_v49, 4  ;;  %8549 = vmatprep.mubr.bf16.mxu0 %v7441_v51  ;;  %v793_v61 = vsel %vm9950_vm2, %v788_v52, %v792_v33  ;;  %v798_v62 = vrot.slane %v797_v53, 4  ;;  %v805_v63 = vshrl.u32 %v10142_v50, 16  ;;  %445 = vst [vmem:[%s11630_s11 + $0xc8] sm:$0x1] %v9684_v39 }
  0xf1   : > { %v808_v0 = vshll.u32 %v10142_v50, 16  ;;  %v2686_v1 = vor.u32 %v2685_v54, %v2682_v55  ;;  %v2701_v4 = vrot.slane %v2699_v59, 5  ;;  %v814_v6 = vshll.u32 %v10145_v56, 16  ;;  %446 = vst [vmem:[%s11630_s11 + $0xcc] sm:$0xf] %v9684_v39 }
  0xf2   : > { %v2696_v2 = vor.u32 %v2695_v58, %v2691_v57  ;;  %v803_v9 = vsel %vm9950_vm2, %v798_v62, %v802_v46  ;;  %v807_v10 = vrot.slane %v805_v63, 4  ;;  %v818_v12 = vshrl.u32 %v10145_v56, 16  ;;  %v510_v46 = vld [vmem:[%s9927_s26 + $0xa4] sm:$0x1]  ;;  %447 = vst [vmem:[%s11630_s11 + $0xd0] sm:$0xf] %v9684_v39 }
  0xf3   : > { %v810_v11 = vrot.slane %v808_v0, 5  ;;  %v7250_v15 = vcombine.low %v793_v61, %v803_v9  ;;  %v2687_v16 = vrot.slane %v2686_v1, 4  ;;  %v816_v19 = vrot.slane %v814_v6, 5  ;;  %v10191_v6 = vld [vmem:[%s9927_s26 + $0xb0] sm:$0x1] }
  0xf4   : > { %v2697_v18 = vrot.slane %v2696_v2, 4  ;;  %v820_v24 = vrot.slane %v818_v12, 4  ;;  %v824_v25 = vshll.u32 %v509_v60, 16  ;;  %v2704_v26 = vshrl.u32 %v7419_v8, 16  ;;  %v10194_v12 = vld [vmem:[%s9927_s26 + $0xa8] sm:$0xf] }
  0xf5   : > { %v811_v23 = vor.u32 %v810_v11, %v807_v10  ;;  %8358 = vmatmul.mubr.bf16.gmra.mrb[20].mxu1 %v7250_v15  ;;  %v2692_v30 = vsel %vm9950_vm2, %v2687_v16, %v2691_v57  ;;  %v2707_v33 = vshll.u32 %v7419_v8, 16  ;;  %v2713_v34 = vshll.u32 %v10159_v14, 16  ;;  %448 = vst [vmem:[%s11630_s11 + $0xd4] sm:$0x1] %v9684_v39 }
  0xf6   : > { %v2702_v32 = vsel %vm9950_vm2, %v2697_v18, %v2701_v4  ;;  %v821_v40 = vor.u32 %v820_v24, %v816_v19  ;;  %v826_v41 = vrot.slane %v824_v25, 5  ;;  %v2706_v42 = vrot.slane %v2704_v26, 4  ;;  %v10188_v4 = vld [vmem:[%s9927_s26 + $0xac] sm:$0xf] }
  0xf7   : > { %v7442_v36 = vcombine.low %v2692_v30, %v2702_v32  ;;  %v812_v38 = vrot.slane %v811_v23, 4  ;;  %v2709_v43 = vrot.slane %v2707_v33, 5  ;;  %v2715_v44 = vrot.slane %v2713_v34, 5  ;;  %v10199_v23 = vld [vmem:[%s9927_s26 + $0xac] sm:$0xf] }
  0xf8   : > { %v2717_v45 = vshrl.u32 %v10159_v14, 16  ;;  %v822_v51 = vrot.slane %v821_v40, 4  ;;  %v2723_v52 = vshll.u32 %v10162_v20, 16  ;;  %v829_v53 = vshrl.u32 %v10165_v21, 16 }
  0xf9   : > { %8550 = vmatmul.mubr.bf16.gmra.mrb[20].mxu0 %v7442_v36  ;;  %v817_v49 = vsel %vm9950_vm2, %v812_v38, %v816_v19  ;;  %v2710_v55 = vor.u32 %v2709_v43, %v2706_v42  ;;  %v832_v57 = vshll.u32 %v10165_v21, 16  ;;  %v838_v58 = vshll.u32 %v10173_v13, 16  ;;  %v511_v38 = vld [vmem:[%s9927_s26 + $0xb0] sm:$0x1] }
  0xfa   : > { %v2719_v54 = vrot.slane %v2717_v45, 4  ;;  %v827_v59 = vsel %vm9950_vm2, %v822_v51, %v826_v41  ;;  %v2725_v60 = vrot.slane %v2723_v52, 5  ;;  %v831_v61 = vrot.slane %v829_v53, 4 }
  0xfb   : > { %v842_v62 = vshrl.u32 %v10173_v13, 16  ;;  %v7251_v63 = vcombine.low %v817_v49, %v827_v59  ;;  %v2711_v0 = vrot.slane %v2710_v55, 4  ;;  %v834_v2 = vrot.slane %v832_v57, 5 }
  0xfc   : > { %v2720_v1 = vor.u32 %v2719_v54, %v2715_v44  ;;  %v840_v8 = vrot.slane %v838_v58, 5  ;;  %v848_v10 = vshll.u32 %v510_v46, 16  ;;  %v2728_v11 = vshrl.u32 %v7422_v48, 16 }
  0xfd   : > { %v844_v9 = vrot.slane %v842_v62, 4  ;;  %8361 = vmatprep.mubr.bf16.mxu1 %v7251_v63  ;;  %v2716_v15 = vsel %vm9950_vm2, %v2711_v0, %v2715_v44  ;;  %v835_v18 = vor.u32 %v834_v2, %v831_v61  ;;  %v2731_v19 = vshll.u32 %v7422_v48, 16  ;;  %v7425_v44 = vld [vmem:[%s9927_s26 + $0xb4] sm:$0xf] }
  0xfe   : > { %v2721_v16 = vrot.slane %v2720_v1, 4  ;;  %v850_v25 = vrot.slane %v848_v10, 5  ;;  %v2730_v26 = vrot.slane %v2728_v11, 4  ;;  %v2737_v30 = vshll.u32 %v10188_v4, 16  ;;  %v10220_v1 = vld [vmem:[%s9927_s26 + $0xbc] sm:$0x1] }
  0xff   : > { %v845_v24 = vor.u32 %v844_v9, %v840_v8  ;;  %v836_v33 = vrot.slane %v835_v18, 4  ;;  %v2733_v34 = vrot.slane %v2731_v19, 5  ;;  %v2741_v36 = vshrl.u32 %v10188_v4, 16  ;;  %v10223_v2 = vld [vmem:[%s9927_s26 + $0xb4] sm:$0xf] }
 0x100   : > { %v2726_v32 = vsel %vm9950_vm2, %v2721_v16, %v2725_v60  ;;  %v2739_v42 = vrot.slane %v2737_v30, 5  ;;  %v2747_v43 = vshll.u32 %v10191_v6, 16  ;;  %v853_v49 = vshrl.u32 %v10194_v12, 16  ;;  %v10216_v60 = vld [vmem:[%s9927_s26 + $0xb8] sm:$0xf] }
 0x101   : > { %v7443_v40 = vcombine.low %v2716_v15, %v2726_v32  ;;  %v846_v41 = vrot.slane %v845_v24, 4  ;;  %v841_v45 = vsel %vm9950_vm2, %v836_v33, %v840_v8  ;;  %v2734_v46 = vor.u32 %v2733_v34, %v2730_v26  ;;  %v10228_v15 = vld [vmem:[%s9927_s26 + $0xb8] sm:$0xf] }
 0x102   : > { %v2743_v48 = vrot.slane %v2741_v36, 4  ;;  %v2749_v52 = vrot.slane %v2747_v43, 5  ;;  %v856_v53 = vshll.u32 %v10194_v12, 16  ;;  %v862_v55 = vshll.u32 %v10199_v23, 16 }
 0x103   : > { %8553 = vmatprep.mubr.bf16.mxu0 %v7443_v40  ;;  %v851_v51 = vsel %vm9950_vm2, %v846_v41, %v850_v25  ;;  %v2735_v57 = vrot.slane %v2734_v46, 4  ;;  %v855_v59 = vrot.slane %v853_v49, 4  ;;  %v866_v63 = vshrl.u32 %v10199_v23, 16  ;;  %v512_v40 = vld [vmem:[%s9927_s26 + $0xbc] sm:$0x1] }
 0x104   : > { %v7252_v54 = vcombine.low %v841_v45, %v851_v51  ;;  %v2744_v58 = vor.u32 %v2743_v48, %v2739_v42  ;;  %v858_v61 = vrot.slane %v856_v53, 5  ;;  %v864_v62 = vrot.slane %v862_v55, 5  ;;  %v7428_v45 = vld [vmem:[%s9927_s26 + $0xc0] sm:$0xf] }
 0x105   : > { %v872_v0 = vshll.u32 %v511_v38, 16  ;;  %v2740_v8 = vsel %vm9950_vm2, %v2735_v57, %v2739_v42  ;;  %v2752_v10 = vshrl.u32 %v7425_v44, 16  ;;  %v2755_v11 = vshll.u32 %v7425_v44, 16 }
 0x106   : > { %8362 = vmatmul.mubr.bf16.gmra.mrb[24].mxu1 %v7252_v54  ;;  %v2745_v9 = vrot.slane %v2744_v58, 4  ;;  %v859_v16 = vor.u32 %v858_v61, %v855_v59  ;;  %v868_v18 = vrot.slane %v866_v63, 4  ;;  %v2761_v24 = vshll.u32 %v10216_v60, 16 }
 0x107   : > { %v874_v19 = vrot.slane %v872_v0, 5  ;;  %v2754_v26 = vrot.slane %v2752_v10, 4  ;;  %v2757_v30 = vrot.slane %v2755_v11, 5  ;;  %v2765_v32 = vshrl.u32 %v10216_v60, 16  ;;  %v10251_v10 = vld [vmem:[%s9927_s26 + $0xc8] sm:$0x1] }
 0x108   : > { %v2750_v25 = vsel %vm9950_vm2, %v2745_v9, %v2749_v52  ;;  %v860_v34 = vrot.slane %v859_v16, 4  ;;  %v869_v36 = vor.u32 %v868_v18, %v864_v62  ;;  %v2763_v38 = vrot.slane %v2761_v24, 5  ;;  %v10243_v52 = vld [vmem:[%s9927_s26 + $0xc4] sm:$0xf] }
 0x109   : > { %v7444_v33 = vcombine.low %v2740_v8, %v2750_v25  ;;  %v2758_v41 = vor.u32 %v2757_v30, %v2754_v26  ;;  %v2767_v42 = vrot.slane %v2765_v32, 4  ;;  %v2771_v43 = vshll.u32 %v10220_v1, 16  ;;  %v7455_v32 = vld [vmem:[%s9927_s26 + $0xc] sm:$0xe] }
 0x10a   : > { %v877_v44 = vshrl.u32 %v10223_v2, 16  ;;  %v865_v46 = vsel %vm9950_vm2, %v860_v34, %v864_v62  ;;  %v870_v48 = vrot.slane %v869_v36, 4  ;;  %v880_v49 = vshll.u32 %v10223_v2, 16 }
 0x10b   : > { %8554 = vmatmul.mubr.bf16.gmra.mrb[24].mxu0 %v7444_v33  ;;  %v886_v51 = vshll.u32 %v10228_v15, 16  ;;  %v2759_v53 = vrot.slane %v2758_v41, 4  ;;  %v2768_v55 = vor.u32 %v2767_v42, %v2763_v38  ;;  %v2773_v54 = vrot.slane %v2771_v43, 5 }
 0x10c   : > { %v879_v57 = vrot.slane %v877_v44, 4  ;;  %v875_v58 = vsel %vm9950_vm2, %v870_v48, %v874_v19  ;;  %v882_v59 = vrot.slane %v880_v49, 5  ;;  %v890_v62 = vshrl.u32 %v10228_v15, 16 }
 0x10d   : > { %v888_v61 = vrot.slane %v886_v51, 5  ;;  %v7253_v63 = vcombine.low %v865_v46, %v875_v58  ;;  %v2764_v0 = vsel %vm9950_vm2, %v2759_v53, %v2763_v38  ;;  %v2769_v8 = vrot.slane %v2768_v55, 4  ;;  %v9286_v55 = vld [vmem:[%s9927_s26] sm:$0xf] }
 0x10e   : > { %v896_v9 = vshll.u32 %v512_v40, 16  ;;  %v883_v11 = vor.u32 %v882_v59, %v879_v57  ;;  %v892_v16 = vrot.slane %v890_v62, 4  ;;  %v2776_v18 = vshrl.u32 %v7428_v45, 16  ;;  %v7456_v40 = vld [vmem:[%s9927_s26 + $0x18] sm:$0xe] }
 0x10f   : > { %v2779_v24 = vshll.u32 %v7428_v45, 16  ;;  %8365 = vmatprep.mubr.bf16.mxu1 %v7253_v63  ;;  %v2774_v19 = vsel %vm9950_vm2, %v2769_v8, %v2773_v54  ;;  %v2785_v26 = vshll.u32 %v10243_v52, 16  ;;  %v2789_v30 = vshrl.u32 %v10243_v52, 16  ;;  %v10266_v54 = vld [vmem:[%s9927_s26 + $0x4] sm:$0xf] }
 0x110   : > { %v898_v25 = vrot.slane %v896_v9, 5  ;;  %v7445_v33 = vcombine.low %v2764_v0, %v2774_v19  ;;  %v884_v34 = vrot.slane %v883_v11, 4  ;;  %v893_v36 = vor.u32 %v892_v16, %v888_v61  ;;  %v7457_v63 = vld [vmem:[%s9927_s26 + $0x24] sm:$0xe] }
 0x111   : > { %v2778_v38 = vrot.slane %v2776_v18, 4  ;;  %v2781_v41 = vrot.slane %v2779_v24, 5  ;;  %v2787_v42 = vrot.slane %v2785_v26, 5  ;;  %v2791_v43 = vrot.slane %v2789_v30, 4 }
 0x112   : > { %v2795_v44 = vshll.u32 %v10251_v10, 16  ;;  %8557 = vmatprep.mubr.bf16.mxu0 %v7445_v33  ;;  %v889_v45 = vsel %vm9950_vm2, %v884_v34, %v888_v61  ;;  %v894_v46 = vrot.slane %v893_v36, 4  ;;  %v7263_v57 = vcombine.low %v9286_v55, %v10266_v54  ;;  %v9288_v61 = vld [vmem:[%s9927_s26 + $0x10] sm:$0xf]  ;;  %v9290_v34 = vld [vmem:[%s9927_s26 + $0x2c] sm:$0x1] }
 0x113   : > { %v2782_v48 = vor.u32 %v2781_v41, %v2778_v38  ;;  %v2792_v49 = vor.u32 %v2791_v43, %v2787_v42  ;;  %v7471_v59 = vrot.slane %v7455_v32, 9  ;;  %v3187_v62 = vrot.slane %v9288_v61, 5  ;;  %v9289_v32 = vld [vmem:[%s9927_s26 + $0x28] sm:$0xf]  ;;  %v9291_v38 = vld [vmem:[%s9927_s26 + $0xc] sm:$0xf] }
 0x114   : > { %v2797_v51 = vrot.slane %v2795_v44, 5  ;;  %v899_v53 = vsel %vm9950_vm2, %v894_v46, %v898_v25  ;;  %v7472_v11 = vrot.slane %v7456_v40, 9  ;;  %v3198_v24 = vsel %vm10269_vm5, %v9989_v37, %v3197_v28  ;;  %v10298_v40 = vld [vmem:[%s9927_s26 + $0x10] sm:$0xf]  ;;  %v9293_v41 = vld [vmem:[%s9927_s26 + $0x34] sm:$0xf] }
 0x115   : > { %v7254_v0 = vcombine.low %v889_v45, %v899_v53  ;;  %v2783_v8 = vrot.slane %v2782_v48, 4  ;;  %v2793_v9 = vrot.slane %v2792_v49, 4  ;;  %v3188_v16 = vsel %vm10269_vm5, %v7471_v59, %v3187_v62  ;;  %v9294_v43 = vld [vmem:[%s9927_s26 + $0x18] sm:$0xf]  ;;  %v10305_v44 = vld [vmem:[%s9927_s26 + $0x1c] sm:$0xf] }
 0x116   : > { %v3189_v18 = vrot.slane %v3187_v62, 4  ;;  %v3195_v26 = vsel %vm10269_vm5, %v7472_v11, %v3194_v27  ;;  %v7473_v30 = vrot.slane %v7457_v63, 9  ;;  %v3201_v33 = vrot.slane %v9289_v32, 5  ;;  %v9197_v49 = vld [vmem:[#allocation5 + $0x88] sm:$0xff]   ;;  %v9298_v11 = vld [vmem:[%s9927_s26 + $0x4c] sm:$0xf] }
 0x117   : > { %8366 = vmatmul.mubr.bf16.gmra.mrb[28].mxu1 %v7254_v0  ;;  %v2788_v19 = vsel %vm9950_vm2, %v2783_v8, %v2787_v42  ;;  %v2798_v25 = vsel %vm9950_vm2, %v2793_v9, %v2797_v51  ;;  %v7488_v37 = vcombine.low %v3195_v26, %v3198_v24  ;;  %v3204_v36 = vrot.slane %v9290_v34, 5  ;;  %v7459_v51 = vld [vmem:[%s9927_s26 + $0x3c] sm:$0xe]  ;;  %v9296_v53 = vld [vmem:[%s9927_s26 + $0x40] sm:$0xf] }
 0x118   : > { %v7446_v7 = vcombine.low %v2788_v19, %v2798_v25  ;;  %8385 = vmatprep.mubr.bf16.mxu1 %v7263_v57  ;;  %v3191_v28 = vsel %vm10269_vm5, %v3189_v18, %v3190_v5  ;;  %v3203_v27 = vrot.slane %v3201_v33, 4  ;;  %v7264_v22 = vcombine.low %v9291_v38, %v10298_v40  ;;  %v7458_v5 = vld [vmem:[%s9927_s26 + $0x30] sm:$0xe]  ;;  %v10315_v57 = vld [vmem:[%s9927_s26 + $0x48] sm:$0xe]  ;;  %v9196_v8 = vld [vmem:[#allocation5 + $0x188] sm:$0xff]  }
 0x119   : > { %v7487_v3 = vcombine.low %v3188_v16, %v3191_v28  ;;  %v3208_v42 = vrot.slane %v9293_v41, 5  ;;  %v7265_v45 = vcombine.low %v9294_v43, %v10305_v44  ;;  %v3202_v46 = vsel %vm10269_vm5, %v7473_v30, %v3201_v33  ;;  %v9297_v61 = vld [vmem:[%s9927_s26 + $0x38] sm:$0x1]  ;;  %v9300_v19 = vld [vmem:[%s9927_s26 + $0x44] sm:$0x1] }
 0x11a   : > { %8558 = vmatmul.mubr.bf16.gmra.mrb[28].mxu0 %v7446_v7  ;;  %v3205_v48 = vsel %vm10269_vm5, %v3203_v27, %v3204_v36  ;;  %v3215_v55 = vrot.slane %v9296_v53, 5  ;;  %v7474_v59 = vrot.slane %v7458_v5, 9  ;;  %v3211_v62 = vrot.slane %v9297_v61, 5  ;;  %v9299_v18 = vld [vmem:[#allocation5 + $0x80] sm:$0xff]   ;;  %v9201_v26 = vld [vmem:[#allocation5 + $0x90] sm:$0xff]  }
 0x11b   : > { %8577 = vmatprep.mubr.bf16.mxu0 %v7487_v3  ;;  %v7489_v63 = vcombine.low %v3202_v46, %v3205_v48  ;;  %v3210_v0 = vrot.slane %v3208_v42, 4  ;;  %v7475_v9 = vrot.slane %v7459_v51, 9  ;;  %v3222_v16 = vrot.slane %v9298_v11, 5  ;;  %v7461_v30 = vld [vmem:[%s9927_s26 + $0x54] sm:$0xe]  ;;  %v10328_v36 = vld [vmem:[#allocation5 + $0x190] sm:$0xff]  }
 0x11c   : > { %v3217_v24 = vrot.slane %v3215_v55, 4  ;;  %v3218_v25 = vrot.slane %v9300_v19, 5  ;;  %v9301_v7 = vld [vmem:[%s9927_s26 + $0x58] sm:$0xf]  ;;  %v9302_v32 = vld [vmem:[%s9927_s26 + $0x24] sm:$0xf]  ;;  %v3209_v38 = vsel %vm10269_vm5, %v7474_v59, %v3208_v42 }
 0x11d   : > { %v3229_v28 = vrot.slane %v9301_v7, 5  ;;  %v10324_v33 = vld [vmem:[%s9927_s26 + $0x28] sm:$0xf]  ;;  %v7476_v34 = vrot.slane %v10315_v57, 9  ;;  %v9304_v27 = vld [vmem:[#allocation5 + $0x180] sm:$0xff]   ;;  %v3216_v48 = vsel %vm10269_vm5, %v7475_v9, %v3215_v55  ;;  %v7477_v53 = vrot.slane %v7461_v30, 9 }
 0x11e   : > { %v7266_v3 = vcombine.low %v9302_v32, %v10324_v33  ;;  %v9305_v5 = vld [vmem:[%s9927_s26 + $0x50] sm:$0x1]  ;;  %v10336_v43 = vld [vmem:[%s9927_s26 + $0x60] sm:$0xe]  ;;  %v10340_v46 = vld [vmem:[%s9927_s26 + $0x34] sm:$0xf]  ;;  %v3219_v51 = vsel %vm10269_vm5, %v3217_v24, %v3218_v25 }
 0x11f   : > { %8386 = vmatmul.mubr.bf16.vlgmr.msra.gmra.mrb[0].mxu1 %v7264_v22  ;;  %v3224_v22 = vrot.slane %v3222_v16, 4  ;;  %v3225_v41 = vrot.slane %v9305_v5, 5  ;;  %v10347_v57 = vld [vmem:[#allocation5 + $0x98] sm:$0xff]   ;;  %v9308_v61 = vld [vmem:[%s9927_s26 + $0x5c] sm:$0x1]  ;;  %v7491_v30 = vcombine.low %v3216_v48, %v3219_v51  ;;  %v10373_v7 = vsel %vm10269_vm5, %v7476_v34, %v3222_v16 }
 0x120   : > { %8418 = vmatpush3.bf16.msra.mxu1 %v9299_v18  ;;  %8389 = vmatprep.mubr.bf16.mxu1 %v7265_v45  ;;  %v9306_v45 = vld [vmem:[%s9927_s26 + $0x30] sm:$0xf]  ;;  %v10350_v59 = vld [vmem:[%s9927_s26 + $0x6c] sm:$0xe]  ;;  %v10357_v11 = vld [vmem:[%s9927_s26 + $0x40] sm:$0xf] }
 0x121   : > { %8419 = vmatprep.subr.bf16.mxu1 %v9197_v49  ;;  %v7267_v42 = vcombine.low %v9306_v45, %v10340_v46  ;;  %v10362_v9 = vld [vmem:[%s9927_s26 + $0x48] sm:$0xf]  ;;  %v10365_v18 = vld [vmem:[%s9927_s26 + $0x4c] sm:$0xf]  ;;  %v7466_v19 = vld [vmem:[%s9927_s26 + $0x90] sm:$0xe]  ;;  %v10377_v32 = vsel %vm10269_vm5, %v3224_v22, %v3225_v41 }
 0x122   : > { %8578 = vmatmul.mubr.bf16.vlgmr.msra.gmra.mrb[0].mxu0 %v7488_v37  ;;  %v3212_v37 = vsel %vm10269_vm5, %v3210_v0, %v3211_v62  ;;  %v3232_v62 = vrot.slane %v9308_v61, 5  ;;  %v10354_v0 = vld [vmem:[%s9927_s26 + $0x3c] sm:$0xf]  ;;  %v7269_v24 = vcombine.low %v10362_v9, %v10365_v18  ;;  %v10389_v5 = vld [vmem:[%s9927_s26 + $0x58] sm:$0xf]  ;;  %v7478_v34 = vrot.slane %v10336_v43, 9 }
 0x123   : > { %8610 = vmatpush3.bf16.msra.mxu0 %v9304_v27  ;;  %8581 = vmatprep.mubr.bf16.mxu0 %v7489_v63  ;;  %v7490_v63 = vcombine.low %v3209_v38, %v3212_v37  ;;  %v7268_v55 = vcombine.low %v10354_v0, %v10357_v11  ;;  %v7467_v25 = vld [vmem:[%s9927_s26 + $0x9c] sm:$0xe]  ;;  %v9313_v27 = vld [vmem:[%s9927_s26 + $0x64] sm:$0xf]  ;;  %v9204_v37 = vld [vmem:[#allocation5 + $0x198] sm:$0xff]   ;;  %v3243_v48 = vrot.slane %v10077_v17, 5  ;;  %v7492_v43 = vcombine.low %v10373_v7, %v10377_v32 }
 0x124   : > { %8611 = vmatprep.subr.bf16.mxu0 %v9196_v8  ;;  %8420 = vmatpush3.bf16.msra.mxu1 %v9197_v49  ;;  %v3231_v49 = vrot.slane %v3229_v28, 4  ;;  %v3236_v38 = vrot.slane %v9313_v27, 5  ;;  %v10395_v22 = vld [vmem:[%s9927_s26 + $0x68] sm:$0x1]  ;;  %v7468_v45 = vld [vmem:[%s9927_s26 + $0xa8] sm:$0xe] }
 0x125   : > { %8421 = vmatprep.subr.bf16.mxu1 %v9201_v26  ;;  %v3239_v41 = vrot.slane %v10395_v22, 5  ;;  %v9209_v51 = vld [vmem:[#allocation5 + $0xa0] sm:$0xff]   ;;  %v10409_v61 = vld [vmem:[%s9927_s26 + $0x60] sm:$0xf]  ;;  %v10412_v0 = vld [vmem:[%s9927_s26 + $0x64] sm:$0xf] }
 0x126   : > { %v3267_v17 = vrot.slane %v10133_v35, 5  ;;  %v7483_v7 = vrot.slane %v7467_v25, 9  ;;  %v3271_v32 = vrot.slane %v10159_v14, 5  ;;  %v3274_v35 = vrot.slane %v10162_v20, 5  ;;  %v9213_v20 = vld [vmem:[#allocation5 + $0xa8] sm:$0xff]  }
 0x127   : > { %8390 = vmatmul.mubr.bf16.gmra.mrb[4].mxu1 %v7266_v3  ;;  %8612 = vmatpush3.bf16.msra.mxu0 %v9196_v8  ;;  %v10383_v3 = vsel %vm10269_vm5, %v7477_v53, %v3229_v28  ;;  %v10386_v8 = vld [vmem:[%s9927_s26 + $0x54] sm:$0xf]  ;;  %v10401_v28 = vsel %vm10269_vm5, %v3231_v49, %v3232_v62  ;;  %v7482_v53 = vrot.slane %v7466_v19, 9  ;;  %v3246_v19 = vrot.slane %v10084_v31, 5 }
 0x128   : > { %8393 = vmatprep.mubr.bf16.mxu1 %v7267_v42  ;;  %8613 = vmatprep.subr.bf16.mxu0 %v10328_v36  ;;  %v7270_v16 = vcombine.low %v10386_v8, %v10389_v5  ;;  %v7479_v42 = vrot.slane %v10350_v59, 9  ;;  %v9208_v49 = vld [vmem:[#allocation5 + $0x1a0] sm:$0xff]   ;;  %v3264_v59 = vrot.slane %v10128_v29, 5  ;;  %v7493_v27 = vcombine.low %v10383_v3, %v10401_v28 }
 0x129   : > { %8422 = vmatpush3.bf16.msra.mxu1 %v9201_v26  ;;  %v7271_v26 = vcombine.low %v10409_v61, %v10412_v0  ;;  %v7469_v62 = vld [vmem:[%s9927_s26 + $0xb4] sm:$0xe]  ;;  %v10437_v31 = vsel %vm10269_vm5, %v7483_v7, %v3271_v32  ;;  %v3273_v14 = vrot.slane %v3271_v32, 4  ;;  %v7484_v25 = vrot.slane %v7468_v45, 9 }
 0x12a   : > { %8582 = vmatmul.mubr.bf16.gmra.mrb[4].mxu0 %v7490_v63  ;;  %8423 = vmatprep.subr.bf16.mxu1 %v10347_v57  ;;  %v3238_v63 = vrot.slane %v3236_v38, 4  ;;  %v10426_v22 = vsel %vm10269_vm5, %v7482_v53, %v3264_v59  ;;  %v3266_v29 = vrot.slane %v3264_v59, 4  ;;  %v3245_v3 = vrot.slane %v3243_v48, 4  ;;  %v10509_v8 = vld [vmem:[#allocation5 + $0xc0] sm:$0xff]  }
 0x12b   : > { %8585 = vmatprep.mubr.bf16.mxu0 %v7491_v30  ;;  %8614 = vmatpush3.bf16.msra.mxu0 %v10328_v36  ;;  %v7470_v30 = vld [vmem:[%s9927_s26 + $0xc0] sm:$0xe]  ;;  %v10432_v36 = vsel %vm10269_vm5, %v7478_v34, %v3236_v38  ;;  %v3278_v53 = vrot.slane %v10188_v4, 5  ;;  %v3281_v38 = vrot.slane %v10191_v6, 5  ;;  %v10449_v34 = vsel %vm10269_vm5, %v3273_v14, %v3274_v35  ;;  %v9319_v35 = vld [vmem:[%s9927_s26 + $0x7c] sm:$0xf] }
 0x12c   : > { %8615 = vmatprep.subr.bf16.mxu0 %v9204_v37  ;;  %v10441_v28 = vsel %vm10269_vm5, %v3266_v29, %v3267_v17  ;;  %v7485_v45 = vrot.slane %v7469_v62, 9  ;;  %v3285_v59 = vrot.slane %v10216_v60, 5  ;;  %v9212_v4 = vld [vmem:[#allocation5 + $0x1a8] sm:$0xff]   ;;  %v7499_v6 = vcombine.low %v10437_v31, %v10449_v34  ;;  %v9217_v17 = vld [vmem:[#allocation5 + $0xb0] sm:$0xff]  }
 0x12d   : > { %8424 = vmatpush3.bf16.msra.mxu1 %v10347_v57  ;;  %v7498_v57 = vcombine.low %v10426_v22, %v10441_v28  ;;  %v3288_v62 = vrot.slane %v10220_v1, 5  ;;  %v3244_v60 = vsel %vm10269_vm5, %v7479_v42, %v3243_v48  ;;  %v7486_v7 = vrot.slane %v7470_v30, 9  ;;  %v7464_v29 = vld [vmem:[%s9927_s26 + $0x78] sm:$0xe]  ;;  %v7465_v14 = vld [vmem:[%s9927_s26 + $0x84] sm:$0xe] }
 0x12e   : > { %8425 = vmatprep.subr.bf16.mxu1 %v9209_v51  ;;  %v10466_v9 = vsel %vm10269_vm5, %v7485_v45, %v3285_v59  ;;  %v3240_v32 = vsel %vm10269_vm5, %v3238_v63, %v3239_v41  ;;  %v3292_v42 = vrot.slane %v10243_v52, 5  ;;  %v3295_v48 = vrot.slane %v10251_v10, 5  ;;  %v9216_v63 = vld [vmem:[#allocation5 + $0x1b0] sm:$0xff]   ;;  %v9221_v45 = vld [vmem:[#allocation5 + $0xb8] sm:$0xff]  }
 0x12f   : > { %8394 = vmatmul.mubr.bf16.gmra.mrb[8].mxu1 %v7268_v55  ;;  %8616 = vmatpush3.bf16.msra.mxu0 %v9204_v37  ;;  %v10459_v55 = vsel %vm10269_vm5, %v7484_v25, %v3278_v53  ;;  %v3280_v37 = vrot.slane %v3278_v53, 4  ;;  %v3257_v52 = vrot.slane %v10112_v47, 5  ;;  %v7480_v25 = vrot.slane %v7464_v29, 9  ;;  %v10522_v29 = vld [vmem:[%s9927_s26 + $0x7c] sm:$0xf] }
 0x130   : > { %8397 = vmatprep.mubr.bf16.mxu1 %v7269_v24  ;;  %8617 = vmatprep.subr.bf16.mxu0 %v9208_v49  ;;  %v3287_v24 = vrot.slane %v3285_v59, 4  ;;  %v7277_v22 = vcombine.low %v10194_v12, %v10199_v23  ;;  %v1498_v34 = vld [vmem:[%s9927_s26 + $0x24] sm:$0xe]  ;;  %vm5786_vm6 = vcmask 1043456   ;;  %vm5787_vm7 = vsmask.f32 7938 }
 0x131   : > { %8426 = vmatpush3.bf16.msra.mxu1 %v9209_v51  ;;  %v10473_v1 = vsel %vm10269_vm5, %v3280_v37, %v3281_v38  ;;  %v3247_v51 = vsel %vm10269_vm5, %v3245_v3, %v3246_v19  ;;  %v10492_v19 = vsel %vm10269_vm5, %v7486_v7, %v3292_v42  ;;  %v9320_v3 = vld [vmem:[%s9927_s26 + $0x80] sm:$0x1]  ;;  %v9220_v38 = vld [vmem:[#allocation5 + $0x1b8] sm:$0xff]   ;;  %vm5462_vm8 = vsmask.f32 256  ;;  %vm11770_vm11 = vmand %vm5786_vm6, %vm5787_vm7 }
 0x132   : > { %8586 = vmatmul.mubr.bf16.gmra.mrb[8].mxu0 %v7492_v43  ;;  %8427 = vmatprep.subr.bf16.mxu1 %v9213_v20  ;;  %v3250_v43 = vrot.slane %v9319_v35, 5  ;;  %v7500_v41 = vcombine.low %v10459_v55, %v10473_v1  ;;  %v10484_v30 = vsel %vm10269_vm5, %v3287_v24, %v3288_v62  ;;  %v3253_v53 = vrot.slane %v9320_v3, 5  ;;  %v9321_v24 = vld [vmem:[%s9927_s26 + $0x8c] sm:$0x1]  ;;  %v1496_v3 = vld [vmem:[%s9927_s26 + $0xc] sm:$0xe] }
 0x133   : > { %8589 = vmatprep.mubr.bf16.mxu0 %v7493_v27  ;;  %8618 = vmatpush3.bf16.msra.mxu0 %v9208_v49  ;;  %v7501_v10 = vcombine.low %v10466_v9, %v10484_v30  ;;  %v3294_v49 = vrot.slane %v3292_v42, 4  ;;  %v7494_v27 = vcombine.low %v10432_v36, %v3240_v32  ;;  %v7495_v59 = vcombine.low %v3244_v60, %v3247_v51  ;;  %v9324_v32 = vld [vmem:[%s9927_s26 + $0x78] sm:$0xf]  ;;  %v9331_v1 = vld [vmem:[%s9927_s26 + $0x2c] sm:$0x1] }
 0x134   : > { %8619 = vmatprep.subr.bf16.mxu0 %v9212_v4  ;;  %v7481_v36 = vrot.slane %v7465_v14, 9  ;;  %v3259_v62 = vrot.slane %v3257_v52, 4  ;;  %v3260_v7 = vrot.slane %v9321_v24, 5  ;;  %v3251_v61 = vsel %vm10269_vm5, %v7480_v25, %v3250_v43  ;;  %v10529_v51 = vld [vmem:[#allocation5 + $0x1c0] sm:$0xff]   ;;  %v10535_v14 = vld [vmem:[%s9927_s26 + $0x88] sm:$0xf] }
 0x135   : > { %8428 = vmatpush3.bf16.msra.mxu1 %v9213_v20  ;;  %v10498_v47 = vsel %vm10269_vm5, %v3294_v49, %v3295_v48  ;;  %v3252_v20 = vrot.slane %v3250_v43, 4  ;;  %v7275_v49 = vcombine.low %v10142_v50, %v10145_v56  ;;  %v1548_v25 = vrot.slane %v10266_v54, 5  ;;  %v9330_v24 = vld [vmem:[%s9927_s26 + $0x20] sm:$0x1]  ;;  %v1503_v30 = vld [vmem:[%s9927_s26 + $0x60] sm:$0xe] }
 0x136   : > { %8429 = vmatprep.subr.bf16.mxu1 %v9217_v17  ;;  %v7502_v37 = vcombine.low %v10492_v19, %v10498_v47  ;;  %v3258_v42 = vsel %vm10269_vm5, %v7481_v36, %v3257_v52  ;;  %v3261_v48 = vsel %vm10269_vm5, %v3259_v62, %v3260_v7  ;;  %v7276_v56 = vcombine.low %v10165_v21, %v10173_v13 }
 0x137   : > { %8398 = vmatmul.mubr.bf16.gmra.mrb[12].mxu1 %v7270_v16  ;;  %8620 = vmatpush3.bf16.msra.mxu0 %v9212_v4  ;;  %v9322_v16 = vld [vmem:[%s9927_s26 + $0x6c] sm:$0xf]  ;;  %v10513_v4 = vld [vmem:[%s9927_s26 + $0x70] sm:$0xf]  ;;  %v7497_v43 = vcombine.low %v3258_v42, %v3261_v48  ;;  %v7288_v28 = vrot.slane %v1496_v3, 9  ;;  %v1565_v31 = vrot.slane %v9330_v24, 5 }
 0x138   : > { %8401 = vmatprep.mubr.bf16.mxu1 %v7271_v26  ;;  %8621 = vmatprep.subr.bf16.mxu0 %v9216_v63  ;;  %v7272_v60 = vcombine.low %v9322_v16, %v10513_v4  ;;  %v3254_v26 = vsel %vm10269_vm5, %v3252_v20, %v3253_v53  ;;  %v1555_v53 = vrot.slane %v10298_v40, 5  ;;  %v1550_v40 = vrot.slane %v1548_v25, 4  ;;  %v9329_v20 = vld [vmem:[%s9927_s26 + $0x14] sm:$0x1]  ;;  %v1499_v16 = vld [vmem:[%s9927_s26 + $0x30] sm:$0xe] }
 0x139   : > { %8430 = vmatpush3.bf16.msra.mxu1 %v9217_v17  ;;  %v7273_v17 = vcombine.low %v9324_v32, %v10522_v29  ;;  %v7496_v35 = vcombine.low %v3251_v61, %v3254_v26  ;;  %v1569_v7 = vrot.slane %v10324_v33, 5  ;;  %v1500_v26 = vld [vmem:[%s9927_s26 + $0x3c] sm:$0xe]  ;;  %v1501_v32 = vld [vmem:[%s9927_s26 + $0x48] sm:$0xe]  ;;  %v1576_v42 = vrot.slane %v10340_v46, 5 }
 0x13a   : > { %8590 = vmatmul.mubr.bf16.gmra.mrb[12].mxu0 %v7494_v27  ;;  %8431 = vmatprep.subr.bf16.mxu1 %v9221_v45  ;;  %v1495_v27 = vld [vmem:[%s9927_s26] sm:$0xe]  ;;  %v10566_v12 = vsel %vm10269_vm5, %v7288_v28, %v1555_v53  ;;  %v1583_v48 = vrot.slane %v10357_v11, 5  ;;  %v7291_v9 = vrot.slane %v1499_v16, 9  ;;  %v7293_v3 = vrot.slane %v1501_v32, 9  ;;  %v9223_v16 = vld [vmem:[%s9927_s26 + $0x24] sm:$0xff]  }
 0x13b   : > { %8593 = vmatprep.mubr.bf16.mxu0 %v7495_v59  ;;  %8622 = vmatpush3.bf16.msra.mxu0 %v9216_v63  ;;  %v9326_v63 = vld [vmem:[%s9927_s26 + $0x84] sm:$0xf]  ;;  %v9328_v59 = vld [vmem:[%s9927_s26 + $0x8] sm:$0x1]  ;;  %v7287_v54 = vrot.slane %v1495_v27, 9  ;;  %v1571_v11 = vrot.slane %v1569_v7, 4 }
 0x13c   : > { %8623 = vmatprep.subr.bf16.mxu0 %v9220_v38  ;;  %v7274_v52 = vcombine.low %v9326_v63, %v10535_v14  ;;  %v1551_v50 = vrot.slane %v9328_v59, 5  ;;  %v1604_v27 = vrot.slane %v10412_v0, 5  ;;  %v1611_v28 = vrot.slane %v10513_v4, 5  ;;  %v9336_v24 = vld [vmem:[%s9927_s26 + $0x68] sm:$0x1] }
 0x13d   : > { %8432 = vmatpush3.bf16.msra.mxu1 %v9221_v45  ;;  %v1497_v45 = vld [vmem:[%s9927_s26 + $0x18] sm:$0xe]  ;;  %v1549_v21 = vsel %vm10269_vm5, %v7287_v54, %v1548_v25  ;;  %v1585_v25 = vrot.slane %v1583_v48, 4  ;;  %v9335_v54 = vld [vmem:[%s9927_s26 + $0x5c] sm:$0x1]  ;;  %vm5793_vm10 = vcmask 1040384  }
 0x13e   : > { %8465 = vmatprep.subr.bf16.mxu1 %v10509_v8  ;;  %v7289_v36 = vrot.slane %v1497_v45, 9  ;;  %v1552_v13 = vsel %vm10269_vm5, %v1550_v40, %v1551_v50  ;;  %v9222_v45 = vld [vmem:[%s9927_s26 + $0x18] sm:$0xff]   ;;  %v1600_v40 = vrot.slane %v9335_v54, 5  ;;  %v9337_v32 = vld [vmem:[%s9927_s26 + $0x74] sm:$0x1]  ;;  %vm11786_vm13 = vmand %vm5793_vm10, %vm5462_vm8 }
 0x13f   : > { %8402 = vmatmul.mubr.bf16.gmra.mrb[16].mxu1 %v7272_v60  ;;  %8624 = vmatpush3.bf16.msra.mxu0 %v9220_v38  ;;  %v1562_v38 = vrot.slane %v10305_v44, 5  ;;  %v1558_v44 = vrot.slane %v9329_v20, 5  ;;  %v7303_v33 = vcombine.low %v1549_v21, %v1552_v13  ;;  %v10619_v20 = vsel %vm10269_vm5, %v7291_v9, %v1576_v42 }
 0x140   : > { %8405 = vmatprep.mubr.bf16.mxu1 %v7273_v17  ;;  %8657 = vmatprep.subr.bf16.mxu0 %v10529_v51  ;;  %v7278_v17 = vcombine.low %v10223_v2, %v10228_v15  ;;  %v1597_v2 = vrot.slane %v10389_v5, 5  ;;  %v1578_v5 = vrot.slane %v1576_v42, 4  ;;  %v9229_v42 = vld [vmem:[#allocation5 + $0xc8] sm:$0xff]   ;;  %vm5463_vm9 = vsmask.f32 4368 }
 0x141   : > { %v1564_v62 = vrot.slane %v1562_v38, 4  ;;  %v10576_v60 = vsel %vm10269_vm5, %v7289_v36, %v1562_v38  ;;  %vm11780_vm12 = vmor %vm5462_vm8, %vm5463_vm9 }
 0x142   : > { %8594 = vmatmul.mubr.bf16.gmra.mrb[16].mxu0 %v7496_v35  ;;  %v1502_v35 = vld [vmem:[%s9927_s26 + $0x54] sm:$0xe] }
 0x143   : > { %8597 = vmatprep.mubr.bf16.mxu0 %v7497_v43  ;;  %v10580_v61 = vsel %vm10269_vm5, %v1564_v62, %v1565_v31  ;;  %v1590_v43 = vrot.slane %v10365_v18, 5  ;;  %v7294_v50 = vrot.slane %v1502_v35, 9  ;;  %v1606_v62 = vrot.slane %v1604_v27, 4 }
 0x144   : > { %v7305_v15 = vcombine.low %v10576_v60, %v10580_v61  ;;  %v1607_v31 = vrot.slane %v9336_v24, 5  ;;  %v9341_v24 = vld [vmem:[%s9927_s26 + $0xa0] sm:$0xf] }
 0x145   : > { %v1592_v59 = vrot.slane %v1590_v43, 4  ;;  %v10643_v13 = vsel %vm10269_vm5, %v7293_v3, %v1590_v43  ;;  %v10653_v47 = vsel %vm10269_vm5, %v7294_v50, %v1597_v2  ;;  %v1507_v3 = vld [vmem:[%s9927_s26 + $0x90] sm:$0xe]  ;;  %v1508_v50 = vld [vmem:[%s9927_s26 + $0x9c] sm:$0xe] }
 0x147   : > { %8406 = vmatmul.mubr.bf16.gmra.mrb[20].mxu1 %v7274_v52  ;;  %v7292_v52 = vrot.slane %v1500_v26, 9  ;;  %v1613_v26 = vrot.slane %v1611_v28, 4 }
 0x148   : > { %8409 = vmatprep.mubr.bf16.mxu1 %v7275_v49  ;;  %v9333_v49 = vld [vmem:[%s9927_s26 + $0x44] sm:$0x1] }
 0x149   : > { %v1586_v18 = vrot.slane %v9333_v49, 5  ;;  %v10626_v36 = vsel %vm10269_vm5, %v7292_v52, %v1583_v48  ;;  %v10667_v48 = vsel %vm10269_vm5, %v1606_v62, %v1607_v31  ;;  %v10735_v31 = vld [vmem:[%s9927_s26 + $0xa8] sm:$0xe] }
 0x14a   : > { %8598 = vmatmul.mubr.bf16.gmra.mrb[20].mxu0 %v7498_v57  ;;  %v1557_v57 = vrot.slane %v1555_v53, 4  ;;  %v9334_v53 = vld [vmem:[%s9927_s26 + $0x50] sm:$0x1] }
 0x14b   : > { %8601 = vmatprep.mubr.bf16.mxu0 %v7499_v6  ;;  %v7290_v6 = vrot.slane %v1498_v34, 9  ;;  %v1593_v38 = vrot.slane %v9334_v53, 5  ;;  %v1618_v34 = vrot.slane %v10522_v29, 5  ;;  %v10639_v4 = vsel %vm10269_vm5, %v1585_v25, %v1586_v18  ;;  %v7571_v53 = vld [vmem:[%s9927_s26 + $0x28] sm:$0xf] }
 0x14c   : > { %v10570_v23 = vsel %vm10269_vm5, %v1557_v57, %v1558_v44  ;;  %v7295_v44 = vrot.slane %v1503_v30, 9  ;;  %v1505_v57 = vld [vmem:[%s9927_s26 + $0x78] sm:$0xe]  ;;  %v1625_v29 = vrot.slane %v10535_v14, 5  ;;  %v9339_v30 = vld [vmem:[%s9927_s26 + $0x8c] sm:$0x1]  ;;  %v7308_v49 = vcombine.low %v10626_v36, %v10639_v4 }
 0x14d   : > { %v7304_v55 = vcombine.low %v10566_v12, %v10570_v23  ;;  %v10604_v46 = vsel %vm10269_vm5, %v7290_v6, %v1569_v7  ;;  %v1506_v6 = vld [vmem:[%s9927_s26 + $0x84] sm:$0xe]  ;;  %v10649_v19 = vsel %vm10269_vm5, %v1592_v59, %v1593_v38  ;;  %v1620_v35 = vrot.slane %v1618_v34, 4 }
 0x14e   : > { %v10662_v14 = vsel %vm10269_vm5, %v7295_v44, %v1604_v27  ;;  %v7298_v43 = vrot.slane %v1506_v6, 9  ;;  %v1627_v9 = vrot.slane %v1625_v29, 4  ;;  %v7309_v18 = vcombine.low %v10643_v13, %v10649_v19  ;;  %v7567_v27 = vld [vmem:[%s9927_s26 + $0x18] sm:$0xf] }
 0x14f   : > { %8410 = vmatmul.mubr.bf16.gmra.mrb[24].mxu1 %v7276_v56  ;;  %v1599_v56 = vrot.slane %v1597_v2, 4  ;;  %v9226_v2 = vld [vmem:[%s9927_s26 + $0x30] sm:$0xff]   ;;  %v7311_v23 = vcombine.low %v10662_v14, %v10667_v48  ;;  %v4058_v54 = vshll.u32 %v7567_v27, 16  ;;  %v4092_v6 = vshrl.u32 %v7571_v53, 16 }
 0x150   : > { %8413 = vmatprep.mubr.bf16.mxu1 %v7277_v22  ;;  %v1504_v22 = vld [vmem:[%s9927_s26 + $0x6c] sm:$0xe]  ;;  %v10716_v25 = vsel %vm10269_vm5, %v7298_v43, %v1625_v29 }
 0x151   : > { %v7296_v7 = vrot.slane %v1504_v22, 9  ;;  %v9230_v29 = vld [vmem:[%s9927_s26 + $0x48] sm:$0xff]  }
 0x152   : > { %8602 = vmatmul.mubr.bf16.gmra.mrb[24].mxu0 %v7500_v41  ;;  %v1572_v41 = vrot.slane %v9331_v1, 5  ;;  %v9338_v1 = vld [vmem:[%s9927_s26 + $0x80] sm:$0x1] }
 0x153   : > { %8605 = vmatprep.mubr.bf16.mxu0 %v7501_v10  ;;  %v9332_v10 = vld [vmem:[%s9927_s26 + $0x38] sm:$0x1] }
 0x154   : > { %v1579_v63 = vrot.slane %v9332_v10, 5  ;;  %v10615_v0 = vsel %vm10269_vm5, %v1571_v11, %v1572_v41  ;;  %v1621_v41 = vrot.slane %v9338_v1, 5  ;;  %v10671_v11 = vld [vmem:[#allocation5 + $0x1c8] sm:$0xff]   ;;  %v1628_v10 = vrot.slane %v9339_v30, 5  ;;  %v10752_v30 = vld [vmem:[%s9927_s26 + $0x30] sm:$0xf] }
 0x156   : > { %v10635_v21 = vsel %vm10269_vm5, %v1578_v5, %v1579_v63  ;;  %v7306_v63 = vcombine.low %v10604_v46, %v10615_v0  ;;  %v10699_v46 = vld [vmem:[%s9927_s26 + $0x1c] sm:$0xf]  ;;  %v7570_v5 = vld [vmem:[%s9927_s26 + $0x24] sm:$0xf]  ;;  %v10722_v38 = vsel %vm10269_vm5, %v1627_v9, %v1628_v10  ;;  %v10749_v9 = vld [vmem:[%s9927_s26 + $0x2c] sm:$0x1] }
 0x157   : > { %8414 = vmatmul.mubr.bf16.gmra.mrb[28].mxu1 %v7278_v17  ;;  %v1614_v17 = vrot.slane %v9337_v32, 5  ;;  %v7307_v52 = vcombine.low %v10619_v20, %v10635_v21  ;;  %v4068_v0 = vshrl.u32 %v10699_v46, 16  ;;  %v4079_v44 = vshrl.u32 %v7570_v5, 16 }
 0x158   : > { %8433 = vmatprep.mubr.bf16.mxu1 %v7303_v33  ;;  %v7297_v33 = vrot.slane %v1505_v57, 9  ;;  %v4082_v22 = vshll.u32 %v7570_v5, 16  ;;  %v9232_v57 = vld [vmem:[#allocation5 + $0x1d0] sm:$0xff]   ;;  %v7301_v21 = vrot.slane %v10735_v31, 9 }
 0x159   : > { %v10704_v60 = vsel %vm10269_vm5, %v1613_v26, %v1614_v17  ;;  %v9342_v26 = vld [vmem:[%s9927_s26 + $0x98] sm:$0x1]  ;;  %v7300_v17 = vrot.slane %v1508_v50, 9  ;;  %v4081_v5 = vrot.slane %v4079_v44, 4 }
 0x15a   : > { %8606 = vmatmul.mubr.bf16.gmra.mrb[28].mxu0 %v7502_v37  ;;  %v10657_v37 = vsel %vm10269_vm5, %v1599_v56, %v1600_v40  ;;  %v10708_v61 = vsel %vm10269_vm5, %v7297_v33, %v1618_v34  ;;  %v4055_v56 = vshrl.u32 %v7567_v27, 16  ;;  %v4064_v40 = vshll.u32 %v10699_v46, 16  ;;  %v10742_v33 = vld [vmem:[%s9927_s26 + $0x20] sm:$0x1] }
 0x15b   : > { %8625 = vmatprep.mubr.bf16.mxu0 %v9222_v45  ;;  %v7310_v12 = vcombine.low %v10653_v47, %v10657_v37  ;;  %v9340_v45 = vld [vmem:[%s9927_s26 + $0x94] sm:$0xf]  ;;  %v4088_v34 = vshll.u32 %v7571_v53, 16  ;;  %v1635_v32 = vrot.slane %v9342_v26, 5  ;;  %v4070_v27 = vrot.slane %v4068_v0, 4 }
 0x15c   : > { %v1632_v59 = vrot.slane %v9340_v45, 5  ;;  %v4057_v43 = vrot.slane %v4055_v56, 4  ;;  %v10755_v10 = vrot.slane %v4064_v40, 5  ;;  %v10758_v53 = vld [vmem:[%s9927_s26 + $0x34] sm:$0xf] }
 0x15d   : > { %v9241_v45 = vld [vmem:[#allocation5 + $0xe0] sm:$0xff]   ;;  %v10769_v56 = vrot.slane %v4088_v34, 5 }
 0x15e   : > { %v4071_v31 = vor.u32 %v4070_v27, %v10755_v10  ;;  %v9240_v26 = vld [vmem:[#allocation5 + $0x1e0] sm:$0xff]  }
 0x15f   : > { %8434 = vmatmul.mubr.bf16.vlgmr.msra.gmra.mrb[0].mxu1 %v7304_v55  ;;  %v10696_v55 = vsel %vm10269_vm5, %v7296_v7, %v1611_v28  ;;  %v9227_v28 = vld [vmem:[%s9927_s26 + $0x3c] sm:$0xff]  }
 0x160   : > { %8466 = vmatpush3.bf16.msra.mxu1 %v10509_v8  ;;  %8437 = vmatprep.mubr.bf16.mxu1 %v7305_v15  ;;  %v9233_v8 = vld [vmem:[#allocation5 + $0xd0] sm:$0xff]   ;;  %v10712_v15 = vsel %vm10269_vm5, %v1620_v35, %v1621_v41  ;;  %v7312_v62 = vcombine.low %v10696_v55, %v10704_v60  ;;  %v9237_v35 = vld [vmem:[#allocation5 + $0xd8] sm:$0xff]   ;;  %v1634_v41 = vrot.slane %v1632_v59, 4 }
 0x161   : > { %8467 = vmatprep.subr.bf16.mxu1 %v9229_v42  ;;  %v7590_v55 = vld [vmem:[%s9927_s26 + $0x74] sm:$0x1] }
 0x162   : > { %8626 = vmatmul.mubr.bf16.vlgmr.msra.gmra.mrb[0].mxu0 %v9223_v16  ;;  %v7299_v16 = vrot.slane %v1507_v3, 9  ;;  %v4084_v3 = vrot.slane %v4082_v22, 5  ;;  %v10783_v44 = vsel %vm10269_vm5, %v1634_v41, %v1635_v32  ;;  %v9345_v22 = vld [vmem:[%s9927_s26 + $0xb8] sm:$0xf]  ;;  %v7576_v41 = vld [vmem:[%s9927_s26 + $0x3c] sm:$0xf] }
 0x163   : > { %8658 = vmatpush3.bf16.msra.mxu0 %v10529_v51  ;;  %8629 = vmatprep.mubr.bf16.mxu0 %v9226_v2  ;;  %v1639_v51 = vrot.slane %v9341_v24, 5  ;;  %v4060_v2 = vrot.slane %v4058_v54, 5  ;;  %v4094_v54 = vrot.slane %v4092_v6, 4  ;;  %v1653_v24 = vrot.slane %v9345_v22, 5 }
 0x164   : > { %8659 = vmatprep.subr.bf16.mxu0 %v10671_v11  ;;  %8468 = vmatpush3.bf16.msra.mxu1 %v9229_v42  ;;  %v10744_v42 = vld [vmem:[#allocation5 + $0x1d8] sm:$0xff]   ;;  %v10773_v40 = vsel %vm10269_vm5, %v7299_v16, %v1632_v59  ;;  %v4085_v34 = vor.u32 %v4084_v3, %v4081_v5  ;;  %v4103_v6 = vshrl.u32 %v10752_v30, 16  ;;  %v4127_v13 = vshrl.u32 %v7576_v41, 16 }
 0x165   : > { %8469 = vmatprep.subr.bf16.mxu1 %v9233_v8  ;;  %v10763_v50 = vrot.slane %v1639_v51, 4  ;;  %v10777_v20 = vsel %vm10269_vm5, %v7300_v17, %v1639_v51  ;;  %v4061_v59 = vor.u32 %v4060_v2, %v4057_v43  ;;  %v4074_v51 = vshll.u32 %v10742_v33, 16  ;;  %v9231_v16 = vld [vmem:[%s9927_s26 + $0x54] sm:$0xff]   ;;  %v9234_v43 = vld [vmem:[%s9927_s26 + $0x60] sm:$0xff]   ;;  %v9346_v5 = vld [vmem:[%s9927_s26 + $0xb0] sm:$0x1] }
 0x166   : > { %v4095_v32 = vor.u32 %v4094_v54, %v10769_v56  ;;  %v4106_v17 = vshll.u32 %v10752_v30, 16  ;;  %v9245_v2 = vld [vmem:[#allocation5 + $0xe8] sm:$0xff]   ;;  %v1649_v3 = vrot.slane %v9346_v5, 5  ;;  %v4130_v19 = vshll.u32 %v7576_v41, 16 }
 0x167   : > { %8438 = vmatmul.mubr.bf16.gmra.mrb[4].mxu1 %v7306_v63  ;;  %8660 = vmatpush3.bf16.msra.mxu0 %v10671_v11  ;;  %v10766_v63 = vld [vmem:[%s9927_s26 + $0xa4] sm:$0x1]  ;;  %v9347_v30 = vld [vmem:[%s9927_s26 + $0xbc] sm:$0x1]  ;;  %v10803_v1 = vrot.slane %v4061_v59, 4 }
 0x168   : > { %8441 = vmatprep.mubr.bf16.mxu1 %v7307_v52  ;;  %8661 = vmatprep.subr.bf16.mxu0 %v9232_v57  ;;  %v1642_v11 = vrot.slane %v10766_v63, 5  ;;  %v9344_v52 = vld [vmem:[%s9927_s26 + $0xac] sm:$0xf]  ;;  %v9244_v54 = vld [vmem:[#allocation5 + $0x1e8] sm:$0xff]   ;;  %v1656_v22 = vrot.slane %v9347_v30, 5  ;;  %v4096_v59 = vrot.slane %v4095_v32, 4 }
 0x169   : > { %8470 = vmatpush3.bf16.msra.mxu1 %v9233_v8  ;;  %v1646_v0 = vrot.slane %v9344_v52, 5  ;;  %v1510_v8 = vld [vmem:[%s9927_s26 + $0xb4] sm:$0xe]  ;;  %v1655_v52 = vrot.slane %v1653_v24, 4  ;;  %v10810_v5 = vld [vmem:[%s9927_s26 + $0x38] sm:$0x1] }
 0x16a   : > { %8630 = vmatmul.mubr.bf16.gmra.mrb[4].mxu0 %v9227_v28  ;;  %8471 = vmatprep.subr.bf16.mxu1 %v9237_v35  ;;  %v4098_v28 = vshll.u32 %v10749_v9, 16  ;;  %v7302_v63 = vrot.slane %v1510_v8, 9  ;;  %v4086_v9 = vrot.slane %v4085_v34, 4  ;;  %v4105_v8 = vrot.slane %v4103_v6, 4  ;;  %v10853_v6 = vld [vmem:[%s9927_s26 + $0x44] sm:$0x1] }
 0x16b   : > { %8633 = vmatprep.mubr.bf16.mxu0 %v9230_v29  ;;  %8662 = vmatpush3.bf16.msra.mxu0 %v9232_v57  ;;  %v4112_v29 = vshll.u32 %v10758_v53, 16  ;;  %v4116_v57 = vshrl.u32 %v10758_v53, 16  ;;  %v1648_v27 = vrot.slane %v1646_v0, 4  ;;  %v4076_v53 = vrot.slane %v4074_v51, 5  ;;  %12679 = vst [vmem:[#allocation23_spill] sm:$0xff] %v10853_v6  ;;  %v9253_v32 = vld [vmem:[#allocation5 + $0xf8] sm:$0xff]  }
 0x16c   : > { %8663 = vmatprep.subr.bf16.mxu0 %v10744_v42  ;;  %v4100_v7 = vrot.slane %v4098_v28, 5  ;;  %v4108_v51 = vrot.slane %v4106_v17, 5  ;;  %v10820_v4 = vsel %vm10269_vm5, %v10763_v50, %v1642_v11  ;;  %v10835_v50 = vsel %vm10269_vm5, %v7302_v63, %v1653_v24 }
 0x16d   : > { %8472 = vmatpush3.bf16.msra.mxu1 %v9237_v35  ;;  %v4072_v35 = vrot.slane %v4071_v31, 4  ;;  %v10815_v30 = vrot.slane %v4112_v29, 5  ;;  %v4118_v36 = vrot.slane %v4116_v57, 4  ;;  %v10839_v11 = vsel %vm10269_vm5, %v1655_v52, %v1656_v22  ;;  %v9238_v29 = vld [vmem:[%s9927_s26 + $0x78] sm:$0xff]   ;;  %v7585_v22 = vld [vmem:[%s9927_s26 + $0x60] sm:$0xf] }
 0x16e   : > { %8473 = vmatprep.subr.bf16.mxu1 %v9241_v45  ;;  %v4067_v31 = vsel %vm9950_vm2, %v10803_v1, %v10755_v10  ;;  %v4091_v24 = vsel %vm9950_vm2, %v4086_v9, %v10769_v56  ;;  %v4122_v28 = vshll.u32 %v10810_v5, 16  ;;  %v4101_v1 = vsel %vm9950_vm2, %v4096_v59, %v4100_v7  ;;  %v7583_v52 = vld [vmem:[%s9927_s26 + $0x58] sm:$0xf] }
 0x16f   : > { %8442 = vmatmul.mubr.bf16.gmra.mrb[8].mxu1 %v7308_v49  ;;  %8664 = vmatpush3.bf16.msra.mxu0 %v10744_v42  ;;  %v10824_v49 = vsel %vm10269_vm5, %v7301_v21, %v1646_v0  ;;  %v10827_v42 = vld [vmem:[%s9927_s26 + $0x40] sm:$0xf]  ;;  %v7579_v21 = vld [vmem:[%s9927_s26 + $0x48] sm:$0xf]  ;;  %v4077_v34 = vsel %vm9950_vm2, %v4072_v35, %v4076_v53  ;;  %v4109_v10 = vor.u32 %v4108_v51, %v4105_v8  ;;  %v10864_v57 = vrot.slane %v4127_v13, 4 }
 0x170   : > { %8445 = vmatprep.mubr.bf16.mxu1 %v7309_v18  ;;  %8665 = vmatprep.subr.bf16.mxu0 %v9240_v26  ;;  %v9249_v18 = vld [vmem:[#allocation5 + $0xf0] sm:$0xff]   ;;  %v4119_v17 = vor.u32 %v4118_v36, %v10815_v30  ;;  %v4136_v56 = vshll.u32 %v10827_v42, 16  ;;  %v10866_v41 = vrot.slane %v4130_v19, 5  ;;  %v4151_v9 = vshrl.u32 %v7579_v21, 16  ;;  %v9252_v35 = vld [vmem:[#allocation5 + $0x1f8] sm:$0xff]  }
 0x171   : > { %8474 = vmatpush3.bf16.msra.mxu1 %v9241_v45  ;;  %v10831_v45 = vsel %vm10269_vm5, %v1648_v27, %v1649_v3  ;;  %v9248_v0 = vld [vmem:[#allocation5 + $0x1f0] sm:$0xff]   ;;  %v7582_v27 = vld [vmem:[%s9927_s26 + $0x54] sm:$0xf]  ;;  %v4154_v63 = vshll.u32 %v7579_v21, 16  ;;  %v10882_v8 = vcombine.low %v4067_v31, %v4077_v34  ;;  %v10884_v59 = vcombine.low %v4091_v24, %v4101_v1  ;;  %v10901_v19 = vld [vmem:[%s9927_s26 + $0x50] sm:$0x1] }
 0x172   : > { %8634 = vmatmul.mubr.bf16.gmra.mrb[8].mxu0 %v9231_v16  ;;  %8475 = vmatprep.subr.bf16.mxu1 %v9245_v2  ;;  %v10856_v16 = vld [vmem:[%s9927_s26 + $0x4c] sm:$0xf]  ;;  %v10886_v51 = vrot.slane %v4122_v28, 5  ;;  %v7586_v36 = vld [vmem:[%s9927_s26 + $0x64] sm:$0xf]  ;;  %v10893_v47 = vrot.slane %v4109_v10, 4  ;;  %v4133_v31 = vor.u32 %v10866_v41, %v10864_v57 }
 0x173   : > { %8637 = vmatprep.mubr.bf16.mxu0 %v9234_v43  ;;  %8666 = vmatpush3.bf16.msra.mxu0 %v9240_v26  ;;  %v9235_v26 = vld [vmem:[%s9927_s26 + $0x6c] sm:$0xff]   ;;  %v4140_v43 = vshrl.u32 %v10827_v42, 16  ;;  %v10895_v37 = vrot.slane %v4119_v17, 4  ;;  %12680 = vst [vmem:[#allocation24_spill] sm:$0xff] %v10901_v19  ;;  %v4153_v48 = vrot.slane %v4151_v9, 4  ;;  %v4156_v24 = vrot.slane %v4154_v63, 5 }
 0x174   : > { %8667 = vmatprep.subr.bf16.mxu0 %v9244_v54  ;;  %v7588_v13 = vld [vmem:[%s9927_s26 + $0x6c] sm:$0xf]  ;;  %v10903_v21 = vld [vmem:[#allocation7] sm:$0xff]   ;;  %v4175_v1 = vshrl.u32 %v7582_v27, 16  ;;  %v4184_v17 = vshll.u32 %v7583_v52, 16  ;;  %v4199_v57 = vshrl.u32 %v7585_v22, 16 }
 0x175   : > { %8476 = vmatpush3.bf16.msra.mxu1 %v9245_v2  ;;  %v4160_v2 = vshll.u32 %v10856_v16, 16  ;;  %v4142_v14 = vrot.slane %v4140_v43, 4  ;;  %v10908_v34 = vld [vmem:[#allocation5 + $0x200] sm:$0xff]   ;;  %v4202_v41 = vshll.u32 %v7585_v22, 16  ;;  %v9239_v43 = vld [vmem:[%s9927_s26 + $0x84] sm:$0xff]   ;;  %v4223_v9 = vshrl.u32 %v7588_v13, 16 }
 0x176   : > { %8477 = vmatprep.subr.bf16.mxu1 %v9249_v18  ;;  %v7589_v10 = vld [vmem:[%s9927_s26 + $0x70] sm:$0xf]  ;;  %v4226_v53 = vshll.u32 %v7588_v13, 16  ;;  %v10919_v22 = vld [vmem:[%s9927_s26 + $0x5c] sm:$0x1]  ;;  %v4177_v7 = vrot.slane %v4175_v1, 4 }
 0x177   : > { %8446 = vmatmul.mubr.bf16.gmra.mrb[12].mxu1 %v7310_v12  ;;  %8668 = vmatpush3.bf16.msra.mxu0 %v9244_v54  ;;  %v10897_v12 = vrot.slane %v4136_v56, 5  ;;  %v4146_v54 = vshll.u32 %v10853_v6, 16  ;;  %v10910_v28 = vrot.slane %v4160_v2, 5  ;;  %v4188_v56 = vshrl.u32 %v7583_v52, 16  ;;  %v9242_v63 = vld [vmem:[%s9927_s26 + $0x90] sm:$0xff]   ;;  %12681 = vst [vmem:[#allocation25_spill] sm:$0xff] %v10919_v22 }
 0x178   : > { %8449 = vmatprep.mubr.bf16.mxu1 %v7311_v23  ;;  %8669 = vmatprep.subr.bf16.mxu0 %v9248_v0  ;;  %v4164_v23 = vshrl.u32 %v10856_v16, 16  ;;  %v4208_v16 = vshll.u32 %v7586_v36, 16  ;;  %v4232_v3 = vshll.u32 %v7589_v10, 16  ;;  %v4157_v52 = vor.u32 %v4156_v24, %v4153_v48 }
 0x179   : > { %8478 = vmatpush3.bf16.msra.mxu1 %v9249_v18  ;;  %v4178_v18 = vshll.u32 %v7582_v27, 16  ;;  %v4170_v27 = vshll.u32 %v10901_v19, 16  ;;  %v4190_v13 = vrot.slane %v4188_v56, 4  ;;  %v4204_v19 = vrot.slane %v4202_v41, 5 }
 0x17a   : > { %8638 = vmatmul.mubr.bf16.gmra.mrb[12].mxu0 %v9235_v26  ;;  %8479 = vmatprep.subr.bf16.mxu1 %v9253_v32  ;;  %v4212_v26 = vshrl.u32 %v7586_v36, 16  ;;  %v4166_v2 = vrot.slane %v4164_v23, 4  ;;  %v10927_v23 = vld [vmem:[%s9927_s26 + $0x68] sm:$0x1]  ;;  %v10933_v48 = vrot.slane %v4208_v16, 5  ;;  %v4225_v60 = vrot.slane %v4223_v9, 4 }
 0x17b   : > { %8641 = vmatprep.mubr.bf16.mxu0 %v9238_v29  ;;  %8670 = vmatpush3.bf16.msra.mxu0 %v9248_v0  ;;  %v4236_v29 = vshrl.u32 %v7589_v10, 16  ;;  %v4143_v0 = vor.u32 %v4142_v14, %v10897_v12  ;;  %v4180_v36 = vrot.slane %v4178_v18, 5  ;;  %12682 = vst [vmem:[#allocation26_spill] sm:$0xff] %v10927_v23  ;;  %v4201_v10 = vrot.slane %v4199_v57, 4 }
 0x17c   : > { %8671 = vmatprep.subr.bf16.mxu0 %v9252_v35  ;;  %v12683_v14 = vcombine.low %v10708_v61, %v10712_v15  ;;  %v4214_v24 = vrot.slane %v4212_v26, 4  ;;  %v10940_v1 = vrot.slane %v4146_v54, 5  ;;  %v10942_v18 = vrot.slane %v4232_v3, 5  ;;  %v7591_v15 = vld [vmem:[%s9927_s26 + $0x78] sm:$0xf] }
 0x17d   : > { %8480 = vmatpush3.bf16.msra.mxu1 %v9253_v32  ;;  %v10924_v32 = vrot.slane %v4184_v17, 5  ;;  %v4238_v61 = vrot.slane %v4236_v29, 4  ;;  %v10945_v17 = vrot.slane %v4133_v31, 4  ;;  %v10947_v56 = vrot.slane %v4143_v0, 4  ;;  %v7592_v26 = vld [vmem:[%s9927_s26 + $0x7c] sm:$0xf] }
 0x17e   : > { %8753 = vmatprep.subr.bf16.mxu1 %v10903_v21  ;;  %v10951_v57 = vrot.slane %v4170_v27, 5  ;;  %v4167_v41 = vor.u32 %v4166_v2, %v10910_v28  ;;  %v4181_v54 = vor.u32 %v4180_v36, %v4177_v7  ;;  %v4194_v16 = vshll.u32 %v10919_v22, 16  ;;  %v9246_v27 = vld [vmem:[%s9927_s26 + $0xa8] sm:$0xff]   ;;  %v7594_v7 = vld [vmem:[%s9927_s26 + $0x84] sm:$0xf] }
 0x17f   : > { %8450 = vmatmul.mubr.bf16.gmra.mrb[16].mxu1 %v7312_v62  ;;  %8672 = vmatpush3.bf16.msra.mxu0 %v9252_v35  ;;  %v4228_v62 = vrot.slane %v4226_v53, 5  ;;  %v10949_v53 = vrot.slane %v4157_v52, 4  ;;  %v4191_v3 = vor.u32 %v4190_v13, %v10924_v32  ;;  %v4205_v31 = vor.u32 %v4204_v19, %v4201_v10 }
 0x180   : > { %8453 = vmatprep.mubr.bf16.mxu1 %v12683_v14  ;;  %8705 = vmatprep.subr.bf16.mxu0 %v10908_v34  ;;  %v4215_v9 = vor.u32 %v4214_v24, %v10933_v48  ;;  %v4218_v29 = vshll.u32 %v10927_v23, 16  ;;  %v4242_v52 = vshll.u32 %v7590_v55, 16  ;;  %v4247_v14 = vshrl.u32 %v7591_v15, 16  ;;  %v7595_v24 = vld [vmem:[%s9927_s26 + $0x88] sm:$0xf] }
 0x181   : > { %v4229_v0 = vor.u32 %v4228_v62, %v4225_v60  ;;  %v4250_v2 = vshll.u32 %v7591_v15, 16  ;;  %v4125_v36 = vsel %vm9950_vm2, %v10895_v37, %v10886_v51  ;;  %v4139_v19 = vsel %vm9950_vm2, %v10945_v17, %v10897_v12 }
 0x182   : > { %8642 = vmatmul.mubr.bf16.gmra.mrb[16].mxu0 %v9239_v43  ;;  %v9243_v43 = vld [vmem:[%s9927_s26 + $0x9c] sm:$0xff]   ;;  %v4256_v13 = vshll.u32 %v7592_v26, 16  ;;  %v4260_v10 = vshrl.u32 %v7592_v26, 16  ;;  %v12684_v60 = vcombine.low %v10716_v25, %v10722_v38  ;;  %v4168_v55 = vrot.slane %v4167_v41, 4 }
 0x183   : > { %8645 = vmatprep.mubr.bf16.mxu0 %v9242_v63  ;;  %v4239_v63 = vor.u32 %v4238_v61, %v10942_v18  ;;  %v4182_v62 = vrot.slane %v4181_v54, 4  ;;  %v4192_v61 = vrot.slane %v4191_v3, 4  ;;  %v4196_v15 = vrot.slane %v4194_v16, 5  ;;  %v10979_v25 = vld [vmem:[%s9927_s26 + $0x80] sm:$0x1] }
 0x184   : > { %v12685_v51 = vcombine.low %v10773_v40, %v10783_v44  ;;  %v4206_v37 = vrot.slane %v4205_v31, 4  ;;  %v4216_v35 = vrot.slane %v4215_v9, 4  ;;  %v4220_v23 = vrot.slane %v4218_v29, 5 }
 0x185   : > { %v4230_v12 = vrot.slane %v4229_v0, 4  ;;  %v4240_v17 = vrot.slane %v4239_v63, 4  ;;  %v4244_v26 = vrot.slane %v4242_v52, 5  ;;  %v4249_v22 = vrot.slane %v4247_v14, 4  ;;  %v7598_v0 = vld [vmem:[%s9927_s26 + $0x94] sm:$0xf] }
 0x186   : > { %v4252_v6 = vrot.slane %v4250_v2, 5  ;;  %v10981_v38 = vrot.slane %v4256_v13, 5  ;;  %v4262_v41 = vrot.slane %v4260_v10, 4  ;;  %v4271_v54 = vshrl.u32 %v7594_v7, 16  ;;  %v9250_v63 = vld [vmem:[%s9927_s26 + $0xc0] sm:$0xff]  }
 0x187   : > { %8454 = vmatmul.mubr.bf16.gmra.mrb[20].mxu1 %v12684_v60  ;;  %v4274_v3 = vshll.u32 %v7594_v7, 16  ;;  %v4149_v40 = vsel %vm9950_vm2, %v10947_v56, %v10940_v1  ;;  %v4163_v44 = vsel %vm9950_vm2, %v10949_v53, %v10910_v28  ;;  %v4280_v16 = vshll.u32 %v7595_v24, 16  ;;  %v7597_v56 = vld [vmem:[%s9927_s26 + $0x90] sm:$0xf] }
 0x188   : > { %8457 = vmatprep.mubr.bf16.mxu1 %v12685_v51  ;;  %v4173_v31 = vsel %vm9950_vm2, %v4168_v55, %v10951_v57  ;;  %v4187_v9 = vsel %vm9950_vm2, %v4182_v62, %v10924_v32  ;;  %v4197_v29 = vsel %vm9950_vm2, %v4192_v61, %v4196_v15  ;;  %v4211_v1 = vsel %vm9950_vm2, %v4206_v37, %v10933_v48  ;;  %v7603_v51 = vld [vmem:[%s9927_s26 + $0xa8] sm:$0xf]  ;;  %v9254_v37 = vld [vmem:[%s9927_s26 + $0xc] sm:$0xff]  }
 0x189   : > { %v4221_v28 = vsel %vm9950_vm2, %v4216_v35, %v4220_v23  ;;  %v4235_v53 = vsel %vm9950_vm2, %v4230_v12, %v10942_v18  ;;  %v4245_v57 = vsel %vm9950_vm2, %v4240_v17, %v4244_v26  ;;  %v4266_v32 = vshll.u32 %v10979_v25, 16  ;;  %v11019_v35 = vld [vmem:[%s9927_s26 + $0x8c] sm:$0x1] }
 0x18a   : > { %8646 = vmatmul.mubr.bf16.gmra.mrb[20].mxu0 %v9243_v43  ;;  %v4284_v43 = vshrl.u32 %v7595_v24, 16  ;;  %v4253_v52 = vor.u32 %v4252_v6, %v4249_v22  ;;  %v4263_v14 = vor.u32 %v4262_v41, %v10981_v38  ;;  %v4273_v48 = vrot.slane %v4271_v54, 4  ;;  %v7604_v54 = vld [vmem:[%s9927_s26 + $0xac] sm:$0xf] }
 0x18b   : > { %8649 = vmatprep.mubr.bf16.mxu0 %v9246_v27  ;;  %v9247_v27 = vld [vmem:[%s9927_s26 + $0xb4] sm:$0xff]   ;;  %v4276_v2 = vrot.slane %v4274_v3, 5  ;;  %v12686_v23 = vcombine.low %v10777_v20, %v10820_v4  ;;  %v11021_v18 = vrot.slane %v4280_v16, 5  ;;  %v4295_v13 = vshrl.u32 %v7597_v56, 16 }
 0x18c   : > { %v4286_v7 = vrot.slane %v4284_v43, 4  ;;  %v4298_v10 = vshll.u32 %v7597_v56, 16  ;;  %v12687_v6 = vcombine.low %v10824_v49, %v10831_v45  ;;  %v12688_v22 = vsel %vm9950_vm2, %v10893_v47, %v10815_v30  ;;  %v7600_v45 = vld [vmem:[%s9927_s26 + $0x9c] sm:$0xf]  ;;  %v7601_v30 = vld [vmem:[%s9927_s26 + $0xa0] sm:$0xf] }
 0x18d   : > { %v11031_v20 = vcombine.low %v12688_v22, %v4125_v36  ;;  %v11033_v4 = vcombine.low %v4139_v19, %v4149_v40  ;;  %v4304_v24 = vshll.u32 %v7598_v0, 16  ;;  %v4308_v60 = vshrl.u32 %v7598_v0, 16  ;;  %v11055_v3 = vld [vmem:[%s9927_s26 + $0x98] sm:$0x1]  ;;  %v9251_v56 = vld [vmem:[%s9927_s26 + $0xcc] sm:$0xff]  }
 0x18e   : > { %v11035_v55 = vcombine.low %v4163_v44, %v4173_v31  ;;  %v11037_v62 = vcombine.low %v4187_v9, %v4197_v29  ;;  %v11039_v61 = vcombine.low %v4211_v1, %v4221_v28  ;;  %v11041_v49 = vcombine.low %v4235_v53, %v4245_v57 }
 0x18f   : > { %8458 = vmatmul.mubr.bf16.gmra.mrb[24].mxu1 %v12686_v23  ;;  %v11045_v47 = vrot.slane %v4253_v52, 4  ;;  %v11047_v36 = vrot.slane %v4266_v32, 5  ;;  %v4277_v19 = vor.u32 %v4276_v2, %v4273_v48  ;;  %v4290_v15 = vshll.u32 %v11019_v35, 16  ;;  %v7606_v48 = vld [vmem:[%s9927_s26 + $0xb4] sm:$0xf] }
 0x190   : > { %8461 = vmatprep.mubr.bf16.mxu1 %v12687_v6  ;;  %v4264_v12 = vrot.slane %v4263_v14, 4  ;;  %v4287_v17 = vor.u32 %v4286_v7, %v11021_v18  ;;  %v4297_v26 = vrot.slane %v4295_v13, 4  ;;  %v4300_v41 = vrot.slane %v4298_v10, 5  ;;  %v7607_v13 = vld [vmem:[%s9927_s26 + $0xb8] sm:$0xf] }
 0x191   : > { %v11057_v40 = vrot.slane %v4304_v24, 5  ;;  %v4310_v44 = vrot.slane %v4308_v60, 4  ;;  %v4319_v16 = vshrl.u32 %v7600_v45, 16  ;;  %v4322_v43 = vshll.u32 %v7600_v45, 16  ;;  %v7605_v24 = vld [vmem:[%s9927_s26 + $0xb0] sm:$0x1] }
 0x192   : > { %8650 = vmatmul.mubr.bf16.gmra.mrb[24].mxu0 %v9247_v27  ;;  %v4328_v31 = vshll.u32 %v7601_v30, 16  ;;  %v4332_v9 = vshrl.u32 %v7601_v30, 16  ;;  %v4343_v29 = vshrl.u32 %v7603_v51, 16  ;;  %v4346_v1 = vshll.u32 %v7603_v51, 16 }
 0x193   : > { %8653 = vmatprep.mubr.bf16.mxu0 %v9250_v63  ;;  %v4259_v28 = vsel %vm9950_vm2, %v11045_v47, %v10981_v38  ;;  %v4278_v53 = vrot.slane %v4277_v19, 4  ;;  %v4352_v57 = vshll.u32 %v7604_v54, 16  ;;  %v4356_v32 = vshrl.u32 %v7604_v54, 16 }
 0x194   : > { %v12689_v0 = vcombine.low %v10835_v50, %v10839_v11  ;;  %v4269_v27 = vsel %vm9950_vm2, %v4264_v12, %v11047_v36  ;;  %v4292_v63 = vrot.slane %v4290_v15, 5  ;;  %v4301_v52 = vor.u32 %v4300_v41, %v4297_v26  ;;  %v7602_v50 = vld [vmem:[%s9927_s26 + $0xa4] sm:$0x1]  ;;  %v9255_v36 = vld [vmem:[%s9927_s26 + $0x18] sm:$0xff]  }
 0x195   : > { %v4314_v14 = vshll.u32 %v11055_v3, 16  ;;  %v4288_v38 = vrot.slane %v4287_v17, 4  ;;  %v4311_v2 = vor.u32 %v4310_v44, %v11057_v40  ;;  %v4321_v23 = vrot.slane %v4319_v16, 4  ;;  %v9258_v12 = vld [vmem:[%s9927_s26 + $0x24] sm:$0xff]  }
 0x196   : > { %v4324_v7 = vrot.slane %v4322_v43, 5  ;;  %v11075_v11 = vrot.slane %v4328_v31, 5  ;;  %v4334_v10 = vrot.slane %v4332_v9, 4  ;;  %v4345_v6 = vrot.slane %v4343_v29, 4  ;;  %v9261_v44 = vld [vmem:[#allocation7 + $0x8] sm:$0xff]  }
 0x197   : > { %8462 = vmatmul.mubr.bf16.gmra.mrb[28].mxu1 %v12689_v0  ;;  %v4348_v22 = vrot.slane %v4346_v1, 5  ;;  %v11078_v60 = vrot.slane %v4352_v57, 5  ;;  %v4358_v45 = vrot.slane %v4356_v32, 4  ;;  %v4367_v30 = vshrl.u32 %v7606_v48, 16  ;;  %v7609_v9 = vld [vmem:[%s9927_s26 + $0xc0] sm:$0xf] }
 0x198   : > { %8481 = vmatprep.mubr.bf16.mxu1 %v9254_v37  ;;  %v4370_v47 = vshll.u32 %v7606_v48, 16  ;;  %v4283_v19 = vsel %vm9950_vm2, %v4278_v53, %v11021_v18  ;;  %v4302_v15 = vrot.slane %v4301_v52, 4  ;;  %v4376_v51 = vshll.u32 %v7607_v13, 16  ;;  %v9260_v18 = vld [vmem:[#allocation5 + $0x208] sm:$0xff]  }
 0x199   : > { %v4380_v37 = vshrl.u32 %v7607_v13, 16  ;;  %v4293_v17 = vsel %vm9950_vm2, %v4288_v38, %v4292_v63  ;;  %v4312_v26 = vrot.slane %v4311_v2, 4  ;;  %v4316_v41 = vrot.slane %v4314_v14, 5  ;;  %v7608_v0 = vld [vmem:[%s9927_s26 + $0xbc] sm:$0x1] }
 0x19a   : > { %8654 = vmatmul.mubr.bf16.gmra.mrb[28].mxu0 %v9251_v56  ;;  %v4325_v54 = vor.u32 %v4324_v7, %v4321_v23  ;;  %v4338_v16 = vshll.u32 %v7602_v50, 16  ;;  %v4349_v43 = vor.u32 %v4348_v22, %v4345_v6  ;;  %v4362_v31 = vshll.u32 %v7605_v24, 16  ;;  %v7610_v14 = vld [vmem:[%s9927_s26 + $0xc4] sm:$0xf]  ;;  %v7612_v23 = vld [vmem:[%s9927_s26 + $0xcc] sm:$0xf] }
 0x19b   : > { %8673 = vmatprep.mubr.bf16.mxu0 %v10882_v8  ;;  %v4335_v8 = vor.u32 %v4334_v10, %v11075_v11  ;;  %v11090_v29 = vcombine.low %v4259_v28, %v4269_v27  ;;  %v4359_v1 = vor.u32 %v4358_v45, %v11078_v60  ;;  %v4369_v56 = vrot.slane %v4367_v30, 4  ;;  %v9265_v28 = vld [vmem:[#allocation7 + $0x10] sm:$0xff]   ;;  %v7613_v10 = vld [vmem:[%s9927_s26 + $0xd0] sm:$0xf] }
 0x19c   : > { %v4372_v53 = vrot.slane %v4370_v47, 5  ;;  %v11093_v57 = vcombine.low %v4283_v19, %v4293_v17  ;;  %v4307_v32 = vsel %vm9950_vm2, %v4302_v15, %v11057_v40  ;;  %v11099_v63 = vrot.slane %v4376_v51, 5  ;;  %v9259_v45 = vld [vmem:[%s9927_s26 + $0x30] sm:$0xff]   ;;  %v9262_v15 = vld [vmem:[%s9927_s26 + $0x3c] sm:$0xff]  }
 0x19d   : > { %v4382_v52 = vrot.slane %v4380_v37, 4  ;;  %v4317_v27 = vsel %vm9950_vm2, %v4312_v26, %v4316_v41  ;;  %v11105_v48 = vrot.slane %v4325_v54, 4  ;;  %v4391_v38 = vshrl.u32 %v7609_v9, 16  ;;  %v7611_v54 = vld [vmem:[%s9927_s26 + $0xc8] sm:$0x1] }
 0x19e   : > { %v4394_v2 = vshll.u32 %v7609_v9, 16  ;;  %v4336_v40 = vrot.slane %v4335_v8, 4  ;;  %v4340_v7 = vrot.slane %v4338_v16, 5  ;;  %v4350_v13 = vrot.slane %v4349_v43, 4  ;;  %v9269_v8 = vld [vmem:[#allocation7 + $0x18] sm:$0xff]  }
 0x19f   : > { %8482 = vmatmul.mubr.bf16.vlgmr.msra.gmra.mrb[0].mxu1 %v9255_v36  ;;  %v4364_v50 = vrot.slane %v4362_v31, 5  ;;  %v4373_v6 = vor.u32 %v4372_v53, %v4369_v56  ;;  %v4386_v22 = vshll.u32 %v7608_v0, 16  ;;  %v4400_v24 = vshll.u32 %v7610_v14, 16 }
 0x1a0   : > { %8754 = vmatpush3.bf16.msra.mxu1 %v10903_v21  ;;  %8485 = vmatprep.mubr.bf16.mxu1 %v9258_v12  ;;  %v4360_v21 = vrot.slane %v4359_v1, 4  ;;  %v4383_v30 = vor.u32 %v4382_v52, %v11099_v63  ;;  %v4404_v47 = vshrl.u32 %v7610_v14, 16  ;;  %v4415_v36 = vshrl.u32 %v7612_v23, 16  ;;  %v7808_v1 = vld [vmem:[%s9927_s26 + $0x10] sm:$0xf] }
 0x1a1   : > { %8755 = vmatprep.subr.bf16.mxu1 %v9261_v44  ;;  %v4418_v19 = vshll.u32 %v7612_v23, 16  ;;  %v4393_v51 = vrot.slane %v4391_v38, 4  ;;  %v4396_v37 = vrot.slane %v4394_v2, 5  ;;  %v4424_v12 = vshll.u32 %v7613_v10, 16 }
 0x1a2   : > { %8674 = vmatmul.mubr.bf16.vlgmr.msra.gmra.mrb[0].mxu0 %v10884_v59  ;;  %v9264_v59 = vld [vmem:[#allocation5 + $0x210] sm:$0xff]   ;;  %v4428_v17 = vshrl.u32 %v7613_v10, 16  ;;  %v4341_v26 = vsel %vm9950_vm2, %v4336_v40, %v4340_v7  ;;  %v4355_v41 = vsel %vm9950_vm2, %v4350_v13, %v11078_v60  ;;  %v4365_v16 = vsel %vm9950_vm2, %v4360_v21, %v4364_v50  ;;  %v9268_v60 = vld [vmem:[#allocation5 + $0x218] sm:$0xff]   ;;  %v9273_v40 = vld [vmem:[#allocation7 + $0x20] sm:$0xff]  }
 0x1a3   : > { %8706 = vmatpush3.bf16.msra.mxu0 %v10908_v34  ;;  %8677 = vmatprep.mubr.bf16.mxu0 %v11031_v20  ;;  %v11115_v34 = vcombine.low %v4307_v32, %v4317_v27  ;;  %v4331_v20 = vsel %vm9950_vm2, %v11105_v48, %v11075_v11  ;;  %v4374_v43 = vrot.slane %v4373_v6, 4  ;;  %v4388_v31 = vrot.slane %v4386_v22, 5  ;;  %v7614_v48 = vld [vmem:[%s9927_s26 + $0xd4] sm:$0x1]  ;;  %v9263_v50 = vld [vmem:[%s9927_s26 + $0x48] sm:$0xff]  }
 0x1a4   : > { %8707 = vmatprep.subr.bf16.mxu0 %v9260_v18  ;;  %8756 = vmatpush3.bf16.msra.mxu1 %v9261_v44  ;;  %v7807_v44 = vld [vmem:[%s9927_s26 + $0xc] sm:$0xf]  ;;  %v11130_v9 = vrot.slane %v4400_v24, 5  ;;  %v4384_v11 = vrot.slane %v4383_v30, 4  ;;  %v4406_v56 = vrot.slane %v4404_v47, 4  ;;  %v4417_v53 = vrot.slane %v4415_v36, 4 }
 0x1a5   : > { %8757 = vmatprep.subr.bf16.mxu1 %v9265_v28  ;;  %v4420_v32 = vrot.slane %v4418_v19, 5  ;;  %v4397_v0 = vor.u32 %v4396_v37, %v4393_v51  ;;  %v4410_v52 = vshll.u32 %v7611_v54, 16  ;;  %v11133_v14 = vrot.slane %v4424_v12, 5  ;;  %v7639_v6 = vld [vmem:[%s9927_s26 + $0x18] sm:$0xe] }
 0x1a6   : > { %v4430_v27 = vrot.slane %v4428_v17, 4  ;;  %v5952_v38 = vshrl.u32 %v7807_v44, 16  ;;  %v5955_v2 = vshll.u32 %v7807_v44, 16  ;;  %v5961_v23 = vshll.u32 %v7808_v1, 16  ;;  %v7810_v24 = vld [vmem:[%s9927_s26 + $0x18] sm:$0xf] }
 0x1a7   : > { %8486 = vmatmul.mubr.bf16.gmra.mrb[4].mxu1 %v9259_v45  ;;  %8708 = vmatpush3.bf16.msra.mxu0 %v9260_v18  ;;  %v5965_v18 = vshrl.u32 %v7808_v1, 16  ;;  %v11137_v7 = vcombine.low %v4331_v20, %v4341_v26  ;;  %v11139_v13 = vcombine.low %v4355_v41, %v4365_v16  ;;  %v4389_v10 = vsel %vm9950_vm2, %v4384_v11, %v4388_v31  ;;  %v9266_v45 = vld [vmem:[%s9927_s26 + $0x54] sm:$0xff]   ;;  %v7811_v20 = vld [vmem:[%s9927_s26 + $0x1c] sm:$0xf] }
 0x1a8   : > { %8489 = vmatprep.mubr.bf16.mxu1 %v9262_v15  ;;  %8709 = vmatprep.subr.bf16.mxu0 %v9264_v59  ;;  %v4421_v21 = vor.u32 %v4420_v32, %v4417_v53  ;;  %v4826_v22 = vrot.slane %v10699_v46, 5  ;;  %v9272_v30 = vld [vmem:[#allocation5 + $0x220] sm:$0xff]   ;;  %v4431_v47 = vor.u32 %v4430_v27, %v11133_v14  ;;  %v4434_v36 = vshll.u32 %v7614_v48, 16  ;;  %v9277_v46 = vld [vmem:[#allocation7 + $0x28] sm:$0xff]   ;;  %v9281_v27 = vld [vmem:[#allocation7 + $0x30] sm:$0xff]  }
 0x1a9   : > { %8758 = vmatpush3.bf16.msra.mxu1 %v9265_v28  ;;  %v4379_v28 = vsel %vm9950_vm2, %v4374_v43, %v11099_v63  ;;  %v11153_v63 = vrot.slane %v4397_v0, 4  ;;  %v7809_v19 = vld [vmem:[%s9927_s26 + $0x14] sm:$0x1]  ;;  %v5954_v15 = vrot.slane %v5952_v38, 4  ;;  %v11159_v51 = vrot.slane %v5961_v23, 5  ;;  %v9276_v43 = vld [vmem:[#allocation5 + $0x228] sm:$0xff]  }
 0x1aa   : > { %8678 = vmatmul.mubr.bf16.gmra.mrb[4].mxu0 %v11033_v4  ;;  %8759 = vmatprep.subr.bf16.mxu1 %v9269_v8  ;;  %v4407_v4 = vor.u32 %v4406_v56, %v11130_v9  ;;  %v5967_v37 = vrot.slane %v5965_v18, 4  ;;  %v11161_v12 = vcombine.low %v4379_v28, %v4389_v10  ;;  %v7655_v17 = vrot.slane %v7639_v6, 9  ;;  %v9348_v56 = vld [vmem:[%s9927_s26 + $0x28] sm:$0xf]  ;;  %v9267_v23 = vld [vmem:[%s9927_s26 + $0x60] sm:$0xff]   ;;  %v9270_v18 = vld [vmem:[%s9927_s26 + $0x6c] sm:$0xff]  }
 0x1ab   : > { %8681 = vmatprep.mubr.bf16.mxu0 %v11035_v55  ;;  %8710 = vmatpush3.bf16.msra.mxu0 %v9264_v59  ;;  %v11155_v55 = vrot.slane %v4410_v52, 5  ;;  %v5957_v59 = vrot.slane %v5955_v2, 5  ;;  %v5976_v26 = vshrl.u32 %v7810_v24, 16  ;;  %v5979_v41 = vshll.u32 %v7810_v24, 16  ;;  %v9280_v10 = vld [vmem:[#allocation5 + $0x230] sm:$0xff]  }
 0x1ac   : > { %8711 = vmatprep.subr.bf16.mxu0 %v9268_v60  ;;  %v4408_v54 = vrot.slane %v4407_v4, 4  ;;  %v4422_v44 = vrot.slane %v4421_v21, 4  ;;  %v4829_v16 = vrot.slane %v10742_v33, 5  ;;  %v4403_v31 = vsel %vm9950_vm2, %v11153_v63, %v11130_v9  ;;  %v7640_v33 = vld [vmem:[%s9927_s26 + $0x24] sm:$0xe] }
 0x1ad   : > { %8760 = vmatpush3.bf16.msra.mxu1 %v9269_v8  ;;  %v4828_v8 = vrot.slane %v4826_v22, 4  ;;  %v4432_v1 = vrot.slane %v4431_v47, 4  ;;  %v4436_v11 = vrot.slane %v4434_v36, 5  ;;  %v4833_v53 = vrot.slane %v9348_v56, 5  ;;  %v9349_v6 = vld [vmem:[%s9927_s26 + $0x2c] sm:$0x1] }
 0x1ae   : > { %8761 = vmatprep.subr.bf16.mxu1 %v9273_v40  ;;  %v5958_v32 = vor.u32 %v5957_v59, %v5954_v15  ;;  %v5971_v0 = vshll.u32 %v7809_v19, 16  ;;  %v5985_v52 = vshll.u32 %v7811_v20, 16  ;;  %v11175_v9 = vsel %vm10269_vm5, %v7655_v17, %v4826_v22  ;;  %v7814_v24 = vld [vmem:[%s9927_s26 + $0x28] sm:$0xf]  ;;  %v7812_v63 = vld [vmem:[%s9927_s26 + $0x20] sm:$0x1] }
 0x1af   : > { %8490 = vmatmul.mubr.bf16.gmra.mrb[8].mxu1 %v9263_v50  ;;  %8712 = vmatpush3.bf16.msra.mxu0 %v9268_v60  ;;  %v5968_v60 = vor.u32 %v5967_v37, %v11159_v51  ;;  %v5978_v48 = vrot.slane %v5976_v26, 4  ;;  %v5981_v38 = vrot.slane %v5979_v41, 5  ;;  %v5989_v2 = vshrl.u32 %v7811_v20, 16  ;;  %v7813_v50 = vld [vmem:[%s9927_s26 + $0x24] sm:$0xf]  ;;  %v9285_v47 = vld [vmem:[#allocation7 + $0x38] sm:$0xff]  }
 0x1b0   : > { %8493 = vmatprep.mubr.bf16.mxu1 %v9266_v45  ;;  %8713 = vmatprep.subr.bf16.mxu0 %v9272_v30  ;;  %v11188_v28 = vsel %vm10269_vm5, %v4828_v8, %v4829_v16  ;;  %v7656_v4 = vrot.slane %v7640_v33, 9  ;;  %v4835_v21 = vrot.slane %v4833_v53, 4  ;;  %v4836_v22 = vrot.slane %v9349_v6, 5  ;;  %v7641_v15 = vld [vmem:[%s9927_s26 + $0x30] sm:$0xe] }
 0x1b1   : > { %8762 = vmatpush3.bf16.msra.mxu1 %v9273_v40  ;;  %v4427_v40 = vsel %vm9950_vm2, %v4422_v44, %v11133_v14  ;;  %v5959_v45 = vrot.slane %v5958_v32, 4  ;;  %v5973_v14 = vrot.slane %v5971_v0, 5  ;;  %v5982_v36 = vor.u32 %v5981_v38, %v5978_v48  ;;  %v9350_v56 = vld [vmem:[%s9927_s26 + $0x34] sm:$0xf] }
 0x1b2   : > { %8682 = vmatmul.mubr.bf16.gmra.mrb[8].mxu0 %v11037_v62  ;;  %8763 = vmatprep.subr.bf16.mxu1 %v9277_v46  ;;  %v4413_v62 = vsel %vm9950_vm2, %v4408_v54, %v11155_v55  ;;  %v11196_v55 = vrot.slane %v5985_v52, 5  ;;  %v5991_v19 = vrot.slane %v5989_v2, 4  ;;  %v6000_v59 = vshrl.u32 %v7813_v50, 16  ;;  %v9284_v54 = vld [vmem:[#allocation5 + $0x238] sm:$0xff]  }
 0x1b3   : > { %8685 = vmatprep.mubr.bf16.mxu0 %v11039_v61  ;;  %8714 = vmatpush3.bf16.msra.mxu0 %v9272_v30  ;;  %v4437_v61 = vsel %vm9950_vm2, %v4432_v1, %v4436_v11  ;;  %v5969_v30 = vrot.slane %v5968_v60, 4  ;;  %v6003_v37 = vshll.u32 %v7813_v50, 16  ;;  %v11199_v17 = vcombine.low %v4403_v31, %v4413_v62  ;;  %v7817_v32 = vld [vmem:[%s9927_s26 + $0x34] sm:$0xf]  ;;  %v7815_v62 = vld [vmem:[%s9927_s26 + $0x2c] sm:$0x1] }
 0x1b4   : > { %8715 = vmatprep.subr.bf16.mxu0 %v9276_v43  ;;  %v6009_v20 = vshll.u32 %v7814_v24, 16  ;;  %v6013_v26 = vshrl.u32 %v7814_v24, 16  ;;  %v11203_v41 = vcombine.low %v4427_v40, %v4437_v61  ;;  %v11207_v44 = vsel %vm10269_vm5, %v7656_v4, %v4833_v53 }
 0x1b5   : > { %8764 = vmatpush3.bf16.msra.mxu1 %v9277_v46  ;;  %v7671_v46 = vcombine.low %v11175_v9, %v11188_v28  ;;  %v11211_v8 = vsel %vm10269_vm5, %v4835_v21, %v4836_v22  ;;  %v5995_v16 = vshll.u32 %v7812_v63, 16  ;;  %v5964_v31 = vsel %vm9950_vm2, %v5959_v45, %v11159_v51  ;;  %v9271_v51 = vld [vmem:[%s9927_s26 + $0x78] sm:$0xff]  }
 0x1b6   : > { %8765 = vmatprep.subr.bf16.mxu1 %v9281_v27  ;;  %v5974_v1 = vsel %vm9950_vm2, %v5969_v30, %v5973_v14  ;;  %v7657_v11 = vrot.slane %v7641_v15, 9  ;;  %v4840_v53 = vrot.slane %v9350_v56, 5  ;;  %v11222_v60 = vrot.slane %v5982_v36, 4  ;;  %v7819_v21 = vld [vmem:[%s9927_s26 + $0x3c] sm:$0xf]  ;;  %v9275_v56 = vld [vmem:[%s9927_s26 + $0x90] sm:$0xff]  }
 0x1b7   : > { %8494 = vmatmul.mubr.bf16.gmra.mrb[12].mxu1 %v9267_v23  ;;  %8716 = vmatpush3.bf16.msra.mxu0 %v9276_v43  ;;  %v7816_v43 = vld [vmem:[%s9927_s26 + $0x30] sm:$0xf]  ;;  %v5992_v0 = vor.u32 %v5991_v19, %v11196_v55  ;;  %v6002_v33 = vrot.slane %v6000_v59, 4  ;;  %v6005_v52 = vrot.slane %v6003_v37, 5  ;;  %v6015_v48 = vrot.slane %v6013_v26, 4  ;;  %v9274_v23 = vld [vmem:[%s9927_s26 + $0x84] sm:$0xff]  }
 0x1b8   : > { %8497 = vmatprep.mubr.bf16.mxu1 %v9270_v18  ;;  %8717 = vmatprep.subr.bf16.mxu0 %v9280_v10  ;;  %v6024_v38 = vshrl.u32 %v7816_v43, 16  ;;  %v6027_v2 = vshll.u32 %v7816_v43, 16  ;;  %v11232_v18 = vrot.slane %v5995_v16, 5  ;;  %v6033_v40 = vshll.u32 %v7817_v32, 16  ;;  %v7642_v45 = vld [vmem:[%s9927_s26 + $0x3c] sm:$0xe] }
 0x1b9   : > { %8766 = vmatpush3.bf16.msra.mxu1 %v9281_v27  ;;  %v11227_v27 = vrot.slane %v6009_v20, 5  ;;  %v11235_v50 = vcombine.low %v5964_v31, %v5974_v1  ;;  %v4842_v61 = vrot.slane %v4840_v53, 4  ;;  %v4843_v4 = vrot.slane %v10810_v5, 5  ;;  %v7820_v14 = vld [vmem:[%s9927_s26 + $0x40] sm:$0xf]  ;;  %v12690_v1 = vld [vmem:[#allocation23_spill] sm:$0xff] }
 0x1ba   : > { %8686 = vmatmul.mubr.bf16.gmra.mrb[12].mxu0 %v11041_v49  ;;  %8767 = vmatprep.subr.bf16.mxu1 %v9285_v47  ;;  %v7672_v49 = vcombine.low %v11207_v44, %v11211_v8  ;;  %v5988_v6 = vsel %vm9950_vm2, %v11222_v60, %v11196_v55  ;;  %v5993_v22 = vrot.slane %v5992_v0, 4  ;;  %v6006_v24 = vor.u32 %v6005_v52, %v6002_v33  ;;  %v7818_v5 = vld [vmem:[%s9927_s26 + $0x38] sm:$0x1]  ;;  %v7822_v33 = vld [vmem:[%s9927_s26 + $0x48] sm:$0xf]  ;;  %v9278_v52 = vld [vmem:[%s9927_s26 + $0x9c] sm:$0xff]  }
 0x1bb   : > { %8689 = vmatprep.mubr.bf16.mxu0 %v11090_v29  ;;  %8718 = vmatpush3.bf16.msra.mxu0 %v9280_v10  ;;  %v6037_v29 = vshrl.u32 %v7817_v32, 16  ;;  %v11239_v10 = vsel %vm10269_vm5, %v7657_v11, %v4840_v53  ;;  %v4847_v30 = vrot.slane %v10827_v42, 5  ;;  %v6016_v63 = vor.u32 %v6015_v48, %v11227_v27  ;;  %v9351_v48 = vld [vmem:[%s9927_s26 + $0x4c] sm:$0xf]  ;;  %v7836_v44 = vld [vmem:[%s9927_s26 + $0x80] sm:$0x1] }
 0x1bc   : > { %8719 = vmatprep.subr.bf16.mxu0 %v9284_v54  ;;  %v6026_v36 = vrot.slane %v6024_v38, 4  ;;  %v6029_v19 = vrot.slane %v6027_v2, 5  ;;  %v11252_v15 = vrot.slane %v6033_v40, 5  ;;  %v6048_v55 = vshrl.u32 %v7819_v21, 16 }
 0x1bd   : > { %8768 = vmatpush3.bf16.msra.mxu1 %v9285_v47  ;;  %v6019_v47 = vshll.u32 %v7815_v62, 16  ;;  %v6039_v59 = vrot.slane %v6037_v29, 4  ;;  %v6051_v37 = vshll.u32 %v7819_v21, 16  ;;  %v11256_v42 = vsel %vm10269_vm5, %v4842_v61, %v4843_v4  ;;  %v7821_v4 = vld [vmem:[%s9927_s26 + $0x44] sm:$0x1] }
 0x1be   : > { %v7658_v20 = vrot.slane %v7642_v45, 9  ;;  %v6057_v26 = vshll.u32 %v7820_v14, 16  ;;  %v5998_v16 = vsel %vm9950_vm2, %v5993_v22, %v11232_v18  ;;  %v6007_v43 = vrot.slane %v6006_v24, 4 }
 0x1bf   : > { %8498 = vmatmul.mubr.bf16.gmra.mrb[16].mxu1 %v9271_v51  ;;  %8720 = vmatpush3.bf16.msra.mxu0 %v9284_v54  ;;  %v6061_v54 = vshrl.u32 %v7820_v14, 16  ;;  %v4849_v31 = vrot.slane %v4847_v30, 4  ;;  %v4850_v11 = vrot.slane %v12690_v1, 5  ;;  %v6017_v53 = vrot.slane %v6016_v63, 4  ;;  %v7643_v51 = vld [vmem:[%s9927_s26 + $0x48] sm:$0xe] }
 0x1c0   : > { %8501 = vmatprep.mubr.bf16.mxu1 %v9274_v23  ;;  %v6021_v32 = vrot.slane %v6019_v47, 5  ;;  %v6030_v60 = vor.u32 %v6029_v19, %v6026_v36  ;;  %v6043_v0 = vshll.u32 %v7818_v5, 16  ;;  %v4854_v38 = vrot.slane %v9351_v48, 5  ;;  %v7823_v63 = vld [vmem:[%s9927_s26 + $0x4c] sm:$0xf]  ;;  %v12691_v36 = vld [vmem:[#allocation24_spill] sm:$0xff] }
 0x1c1   : > { %v6050_v2 = vrot.slane %v6048_v55, 4  ;;  %v6053_v23 = vrot.slane %v6051_v37, 5  ;;  %v7673_v18 = vcombine.low %v11239_v10, %v11256_v42  ;;  %v11276_v62 = vrot.slane %v6057_v26, 5  ;;  %v9352_v26 = vld [vmem:[%s9927_s26 + $0x58] sm:$0xf] }
 0x1c2   : > { %8690 = vmatmul.mubr.bf16.gmra.mrb[16].mxu0 %v11093_v57  ;;  %v6040_v57 = vor.u32 %v6039_v59, %v11252_v15  ;;  %v6063_v40 = vrot.slane %v6061_v54, 4  ;;  %v6012_v29 = vsel %vm9950_vm2, %v6007_v43, %v11227_v27  ;;  %v11283_v61 = vsel %vm10269_vm5, %v4849_v31, %v4850_v11 }
 0x1c3   : > { %8693 = vmatprep.mubr.bf16.mxu0 %v11115_v34  ;;  %v11274_v34 = vsel %vm10269_vm5, %v7658_v20, %v4847_v30  ;;  %v6072_v21 = vshrl.u32 %v7822_v33, 16  ;;  %v6075_v22 = vshll.u32 %v7822_v33, 16  ;;  %v6022_v24 = vsel %vm9950_vm2, %v6017_v53, %v6021_v32  ;;  %v7644_v20 = vld [vmem:[%s9927_s26 + $0x54] sm:$0xe] }
 0x1c4   : > { %v6031_v45 = vrot.slane %v6030_v60, 4  ;;  %v6045_v30 = vrot.slane %v6043_v0, 5  ;;  %v7659_v14 = vrot.slane %v7643_v51, 9  ;;  %v6041_v47 = vrot.slane %v6040_v57, 4  ;;  %v7826_v57 = vld [vmem:[%s9927_s26 + $0x58] sm:$0xf] }
 0x1c5   : > { %v4856_v27 = vrot.slane %v4854_v38, 4  ;;  %v4857_v19 = vrot.slane %v12691_v36, 5  ;;  %v6054_v5 = vor.u32 %v6053_v23, %v6050_v2  ;;  %v11290_v59 = vcombine.low %v5988_v6, %v5998_v16  ;;  %v9282_v6 = vld [vmem:[%s9927_s26 + $0xb4] sm:$0xff]  }
 0x1c6   : > { %v6064_v55 = vor.u32 %v6063_v40, %v11276_v62  ;;  %v6067_v37 = vshll.u32 %v7821_v4, 16  ;;  %v4861_v54 = vrot.slane %v9352_v26, 5  ;;  %v6074_v43 = vrot.slane %v6072_v21, 4  ;;  %v12692_v2 = vld [vmem:[#allocation25_spill] sm:$0xff]  ;;  %v7824_v40 = vld [vmem:[%s9927_s26 + $0x50] sm:$0x1] }
 0x1c7   : > { %8502 = vmatmul.mubr.bf16.gmra.mrb[20].mxu1 %v9275_v56  ;;  %v6077_v31 = vrot.slane %v6075_v22, 5  ;;  %v6081_v1 = vshll.u32 %v7823_v63, 16  ;;  %v6085_v11 = vshrl.u32 %v7823_v63, 16  ;;  %v9279_v56 = vld [vmem:[%s9927_s26 + $0xa8] sm:$0xff]   ;;  %v11299_v16 = vcombine.low %v6012_v29, %v6022_v24  ;;  %v7645_v21 = vld [vmem:[%s9927_s26 + $0x60] sm:$0xe] }
 0x1c8   : > { %8505 = vmatprep.mubr.bf16.mxu1 %v9278_v52  ;;  %v7674_v53 = vcombine.low %v11274_v34, %v11283_v61  ;;  %v11308_v32 = vsel %vm10269_vm5, %v7659_v14, %v4854_v38  ;;  %v11314_v60 = vsel %vm10269_vm5, %v4856_v27, %v4857_v19  ;;  %v6055_v0 = vrot.slane %v6054_v5, 4  ;;  %v7825_v52 = vld [vmem:[%s9927_s26 + $0x54] sm:$0xf]  ;;  %v9353_v22 = vld [vmem:[%s9927_s26 + $0x64] sm:$0xf] }
 0x1c9   : > { %v7660_v33 = vrot.slane %v7644_v20, 9  ;;  %v6065_v51 = vrot.slane %v6064_v55, 4  ;;  %v6069_v48 = vrot.slane %v6067_v37, 5  ;;  %v4864_v23 = vrot.slane %v12692_v2, 5  ;;  %v7828_v26 = vld [vmem:[%s9927_s26 + $0x60] sm:$0xf] }
 0x1ca   : > { %8694 = vmatmul.mubr.bf16.gmra.mrb[20].mxu0 %v11137_v7  ;;  %v6036_v7 = vsel %vm9950_vm2, %v6031_v45, %v11252_v15  ;;  %v4863_v15 = vrot.slane %v4861_v54, 4  ;;  %v6078_v38 = vor.u32 %v6077_v31, %v6074_v43  ;;  %v11320_v29 = vrot.slane %v6081_v1, 5  ;;  %v7829_v43 = vld [vmem:[%s9927_s26 + $0x64] sm:$0xf] }
 0x1cb   : > { %8697 = vmatprep.mubr.bf16.mxu0 %v11139_v13  ;;  %v6046_v13 = vsel %vm9950_vm2, %v6041_v47, %v6045_v30  ;;  %v6087_v4 = vrot.slane %v6085_v11, 4  ;;  %v4868_v24 = vrot.slane %v9353_v22, 5  ;;  %v6096_v45 = vshrl.u32 %v7825_v52, 16  ;;  %v9283_v31 = vld [vmem:[%s9927_s26 + $0xc0] sm:$0xff]  }
 0x1cc   : > { %v6099_v30 = vshll.u32 %v7825_v52, 16  ;;  %v6105_v14 = vshll.u32 %v7826_v57, 16  ;;  %v6109_v63 = vshrl.u32 %v7826_v57, 16  ;;  %v11324_v47 = vcombine.low %v6036_v7, %v6046_v13  ;;  %v12693_v11 = vld [vmem:[#allocation26_spill] sm:$0xff] }
 0x1cd   : > { %v7675_v27 = vcombine.low %v11308_v32, %v11314_v60  ;;  %v6060_v36 = vsel %vm9950_vm2, %v6055_v0, %v11276_v62  ;;  %v11333_v19 = vsel %vm10269_vm5, %v7660_v33, %v4861_v54  ;;  %v6070_v5 = vsel %vm9950_vm2, %v6065_v51, %v6069_v48  ;;  %v7646_v52 = vld [vmem:[%s9927_s26 + $0x6c] sm:$0xe] }
 0x1ce   : > { %v11339_v55 = vsel %vm10269_vm5, %v4863_v15, %v4864_v23  ;;  %v6091_v37 = vshll.u32 %v7824_v40, 16  ;;  %v7661_v20 = vrot.slane %v7645_v21, 9  ;;  %v11345_v62 = vrot.slane %v6078_v38, 4  ;;  %v9354_v23 = vld [vmem:[%s9927_s26 + $0x70] sm:$0xf] }
 0x1cf   : > { %8506 = vmatmul.mubr.bf16.gmra.mrb[24].mxu1 %v9279_v56  ;;  %v6088_v54 = vor.u32 %v6087_v4, %v11320_v29  ;;  %v4870_v1 = vrot.slane %v4868_v24, 4  ;;  %v4871_v56 = vrot.slane %v12693_v11, 5  ;;  %v6098_v7 = vrot.slane %v6096_v45, 4  ;;  %v7831_v45 = vld [vmem:[%s9927_s26 + $0x6c] sm:$0xf] }
 0x1d0   : > { %8509 = vmatprep.mubr.bf16.mxu1 %v9282_v6  ;;  %v7827_v6 = vld [vmem:[%s9927_s26 + $0x5c] sm:$0x1]  ;;  %v6101_v13 = vrot.slane %v6099_v30, 5  ;;  %v11351_v0 = vrot.slane %v6105_v14, 5  ;;  %v6111_v33 = vrot.slane %v6109_v63, 4  ;;  %v6123_v57 = vshll.u32 %v7828_v26, 16 }
 0x1d1   : > { %v6129_v51 = vshll.u32 %v7829_v43, 16  ;;  %v6133_v48 = vshrl.u32 %v7829_v43, 16  ;;  %v11354_v15 = vcombine.low %v6060_v36, %v6070_v5  ;;  %v7676_v2 = vcombine.low %v11333_v19, %v11339_v55  ;;  %v7830_v5 = vld [vmem:[%s9927_s26 + $0x68] sm:$0x1]  ;;  %v7845_v55 = vld [vmem:[%s9927_s26 + $0xa4] sm:$0x1] }
 0x1d2   : > { %8698 = vmatmul.mubr.bf16.gmra.mrb[24].mxu0 %v11161_v12  ;;  %v6120_v12 = vshrl.u32 %v7828_v26, 16  ;;  %v4875_v40 = vrot.slane %v9354_v23, 5  ;;  %v6084_v38 = vsel %vm9950_vm2, %v11345_v62, %v11320_v29  ;;  %v6089_v4 = vrot.slane %v6088_v54, 4  ;;  %v7832_v29 = vld [vmem:[%s9927_s26 + $0x70] sm:$0xf] }
 0x1d3   : > { %8701 = vmatprep.mubr.bf16.mxu0 %v11199_v17  ;;  %v11358_v17 = vrot.slane %v6091_v37, 5  ;;  %v11367_v21 = vsel %vm10269_vm5, %v7661_v20, %v4868_v24  ;;  %v11371_v22 = vsel %vm10269_vm5, %v4870_v1, %v4871_v56  ;;  %v6102_v30 = vor.u32 %v6101_v13, %v6098_v7  ;;  %v9355_v62 = vld [vmem:[%s9927_s26 + $0x74] sm:$0x1]  ;;  %v7647_v56 = vld [vmem:[%s9927_s26 + $0x78] sm:$0xe] }
 0x1d4   : > { %v6112_v14 = vor.u32 %v6111_v33, %v11351_v0  ;;  %v6115_v63 = vshll.u32 %v7827_v6, 16  ;;  %v7662_v36 = vrot.slane %v7646_v52, 9  ;;  %v6122_v37 = vrot.slane %v6120_v12, 4  ;;  %v7834_v23 = vld [vmem:[%s9927_s26 + $0x78] sm:$0xf] }
 0x1d5   : > { %v6125_v24 = vrot.slane %v6123_v57, 5  ;;  %v11378_v20 = vrot.slane %v6129_v51, 5  ;;  %v6135_v26 = vrot.slane %v6133_v48, 4  ;;  %v4877_v43 = vrot.slane %v4875_v40, 4  ;;  %v9356_v48 = vld [vmem:[%s9927_s26 + $0x7c] sm:$0xf] }
 0x1d6   : > { %v4878_v54 = vrot.slane %v9355_v62, 5  ;;  %v6144_v1 = vshrl.u32 %v7831_v45, 16  ;;  %v6094_v11 = vsel %vm9950_vm2, %v6089_v4, %v11358_v17  ;;  %v6153_v6 = vshll.u32 %v7832_v29, 16  ;;  %v7835_v4 = vld [vmem:[%s9927_s26 + $0x7c] sm:$0xf] }
 0x1d7   : > { %8510 = vmatmul.mubr.bf16.gmra.mrb[28].mxu1 %v9283_v31  ;;  %v6147_v31 = vshll.u32 %v7831_v45, 16  ;;  %v6157_v7 = vshrl.u32 %v7832_v29, 16  ;;  %v7677_v13 = vcombine.low %v11367_v21, %v11371_v22  ;;  %v11391_v33 = vrot.slane %v6102_v30, 4  ;;  %v7847_v21 = vld [vmem:[%s9927_s26 + $0xac] sm:$0xf] }
 0x1d8   : > { %8769 = vmatprep.mubr.bf16.mxu1 %v11235_v50  ;;  %v6139_v50 = vshll.u32 %v7830_v5, 16  ;;  %v11395_v52 = vsel %vm10269_vm5, %v7662_v36, %v4875_v40  ;;  %v6113_v12 = vrot.slane %v6112_v14, 4  ;;  %v6126_v57 = vor.u32 %v6125_v24, %v6122_v37 }
 0x1d9   : > { %v6136_v51 = vor.u32 %v6135_v26, %v11378_v20  ;;  %v4882_v17 = vrot.slane %v9356_v48, 5  ;;  %v11403_v9 = vsel %vm10269_vm5, %v4877_v43, %v4878_v54  ;;  %v7663_v28 = vrot.slane %v7647_v56, 9 }
 0x1da   : > { %8702 = vmatmul.mubr.bf16.gmra.mrb[28].mxu0 %v11203_v41  ;;  %v6117_v41 = vrot.slane %v6115_v63, 5  ;;  %v6146_v45 = vrot.slane %v6144_v1, 4  ;;  %v6149_v30 = vrot.slane %v6147_v31, 5  ;;  %v6141_v63 = vrot.slane %v6139_v50, 5  ;;  %v7648_v50 = vld [vmem:[%s9927_s26 + $0x84] sm:$0xe] }
 0x1db   : > { %8721 = vmatprep.mubr.bf16.mxu0 %v7671_v46  ;;  %v7833_v46 = vld [vmem:[%s9927_s26 + $0x74] sm:$0x1]  ;;  %v4885_v40 = vrot.slane %v10979_v25, 5  ;;  %v11407_v36 = vrot.slane %v6153_v6, 5  ;;  %v6159_v14 = vrot.slane %v6157_v7, 4  ;;  %v6168_v5 = vshrl.u32 %v7834_v23, 16 }
 0x1dc   : > { %v6171_v29 = vshll.u32 %v7834_v23, 16  ;;  %v6177_v37 = vshll.u32 %v7835_v4, 16  ;;  %v6181_v24 = vshrl.u32 %v7835_v4, 16  ;;  %v6127_v26 = vrot.slane %v6126_v57, 4  ;;  %v7837_v6 = vld [vmem:[%s9927_s26 + $0x84] sm:$0xf] }
 0x1dd   : > { %v6137_v43 = vrot.slane %v6136_v51, 4  ;;  %v4884_v62 = vrot.slane %v4882_v17, 4  ;;  %v6163_v54 = vshll.u32 %v7833_v46, 16  ;;  %v11411_v25 = vcombine.low %v6084_v38, %v6094_v11  ;;  %v7838_v51 = vld [vmem:[%s9927_s26 + $0x88] sm:$0xf] }
 0x1de   : > { %v6118_v1 = vsel %vm9950_vm2, %v6113_v12, %v6117_v41  ;;  %v6150_v31 = vor.u32 %v6149_v30, %v6146_v45  ;;  %v11426_v38 = vsel %vm10269_vm5, %v7663_v28, %v4882_v17  ;;  %v6160_v11 = vor.u32 %v6159_v14, %v11407_v36  ;;  %v7649_v46 = vld [vmem:[%s9927_s26 + $0x90] sm:$0xe] }
 0x1df   : > { %8770 = vmatmul.mubr.bf16.vlgmr.msra.gmra.mrb[32].mxu1 %v11290_v59  ;;  %v6108_v59 = vsel %vm9950_vm2, %v11391_v33, %v11351_v0  ;;  %v9357_v0 = vld [vmem:[%s9927_s26 + $0x88] sm:$0xf]  ;;  %v6170_v8 = vrot.slane %v6168_v5, 4  ;;  %v11436_v7 = vrot.slane %v6177_v37, 5  ;;  %v6183_v33 = vrot.slane %v6181_v24, 4 }
 0x1e0   : > { %8773 = vmatprep.mubr.bf16.mxu1 %v11299_v16  ;;  %v7678_v16 = vcombine.low %v11395_v52, %v11403_v9  ;;  %v4889_v56 = vrot.slane %v9357_v0, 5  ;;  %v6132_v41 = vsel %vm9950_vm2, %v6127_v26, %v11378_v20  ;;  %v6142_v12 = vsel %vm9950_vm2, %v6137_v43, %v6141_v63  ;;  %v7839_v0 = vld [vmem:[%s9927_s26 + $0x8c] sm:$0x1] }
 0x1e1   : > { %v11445_v57 = vsel %vm10269_vm5, %v4884_v62, %v4885_v40  ;;  %v11447_v10 = vrot.slane %v6163_v54, 5  ;;  %v11449_v42 = vrot.slane %v6150_v31, 4  ;;  %v6192_v48 = vshrl.u32 %v7837_v6, 16  ;;  %v9358_v40 = vld [vmem:[%s9927_s26 + $0x94] sm:$0xf] }
 0x1e2   : > { %8722 = vmatmul.mubr.bf16.vlgmr.msra.gmra.mrb[0].mxu0 %v7672_v49  ;;  %v6173_v49 = vrot.slane %v6171_v29, 5  ;;  %v6195_v17 = vshll.u32 %v7837_v6, 16  ;;  %v11452_v23 = vrot.slane %v6160_v11, 4  ;;  %v4891_v4 = vrot.slane %v4889_v56, 4  ;;  %v7840_v62 = vld [vmem:[%s9927_s26 + $0x90] sm:$0xf] }
 0x1e3   : > { %8725 = vmatprep.mubr.bf16.mxu0 %v7673_v18  ;;  %v7664_v18 = vrot.slane %v7648_v50, 9  ;;  %v4892_v20 = vrot.slane %v11019_v35, 5  ;;  %v6187_v28 = vshll.u32 %v7836_v44, 16  ;;  %v7861_v45 = vcombine.low %v6108_v59, %v6118_v1  ;;  %v7841_v31 = vld [vmem:[%s9927_s26 + $0x94] sm:$0xf] }
 0x1e4   : > { %v6174_v30 = vor.u32 %v6173_v49, %v6170_v8  ;;  %v6184_v63 = vor.u32 %v6183_v33, %v11436_v7  ;;  %v4896_v14 = vrot.slane %v9358_v40, 5  ;;  %v11460_v5 = vcombine.low %v6132_v41, %v6142_v12  ;;  %v7843_v11 = vld [vmem:[%s9927_s26 + $0x9c] sm:$0xf]  ;;  %v7844_v50 = vld [vmem:[%s9927_s26 + $0xa0] sm:$0xf] }
 0x1e5   : > { %v7679_v35 = vcombine.low %v11426_v38, %v11445_v57  ;;  %v6201_v29 = vshll.u32 %v7838_v51, 16  ;;  %v6205_v37 = vshrl.u32 %v7838_v51, 16  ;;  %v7665_v24 = vrot.slane %v7649_v46, 9  ;;  %v7650_v41 = vld [vmem:[%s9927_s26 + $0x9c] sm:$0xe] }
 0x1e6   : > { %v6194_v26 = vrot.slane %v6192_v48, 4  ;;  %v6197_v43 = vrot.slane %v6195_v17, 5  ;;  %v6166_v54 = vsel %vm9950_vm2, %v11452_v23, %v11447_v10  ;;  %v11482_v59 = vsel %vm10269_vm5, %v4891_v4, %v4892_v20 }
 0x1e7   : > { %8774 = vmatmul.mubr.bf16.gmra.mrb[36].mxu1 %v11324_v47  ;;  %v11466_v47 = vsel %vm10269_vm5, %v7664_v18, %v4889_v56  ;;  %v6189_v1 = vrot.slane %v6187_v28, 5  ;;  %v6175_v34 = vrot.slane %v6174_v30, 4  ;;  %v6185_v61 = vrot.slane %v6184_v63, 4 }
 0x1e8   : > { %8777 = vmatprep.mubr.bf16.mxu1 %v11354_v15  ;;  %v6156_v15 = vsel %vm9950_vm2, %v11449_v42, %v11407_v36  ;;  %v4899_v36 = vrot.slane %v11055_v3, 5  ;;  %v11492_v56 = vrot.slane %v6201_v29, 5  ;;  %v6207_v6 = vrot.slane %v6205_v37, 4 }
 0x1e9   : > { %v6216_v44 = vshrl.u32 %v7840_v62, 16  ;;  %v6219_v8 = vshll.u32 %v7840_v62, 16  ;;  %v11496_v49 = vsel %vm10269_vm5, %v7665_v24, %v4896_v14  ;;  %v6198_v33 = vor.u32 %v6197_v43, %v6194_v26 }
 0x1ea   : > { %8726 = vmatmul.mubr.bf16.gmra.mrb[4].mxu0 %v7674_v53  ;;  %v4898_v53 = vrot.slane %v4896_v14, 4  ;;  %v6225_v32 = vshll.u32 %v7841_v31, 16  ;;  %v6229_v60 = vshrl.u32 %v7841_v31, 16  ;;  %v6243_v12 = vshll.u32 %v7843_v11, 16 }
 0x1eb   : > { %8729 = vmatprep.mubr.bf16.mxu0 %v7675_v27  ;;  %v6240_v27 = vshrl.u32 %v7843_v11, 16  ;;  %v6249_v3 = vshll.u32 %v7844_v50, 16  ;;  %v6253_v10 = vshrl.u32 %v7844_v50, 16  ;;  %v6180_v42 = vsel %vm9950_vm2, %v6175_v34, %v11436_v7  ;;  %v7842_v7 = vld [vmem:[%s9927_s26 + $0x98] sm:$0x1] }
 0x1ec   : > { %v6190_v18 = vsel %vm9950_vm2, %v6185_v61, %v6189_v1  ;;  %v11507_v51 = vsel %vm10269_vm5, %v4898_v53, %v4899_v36  ;;  %v6211_v48 = vshll.u32 %v7839_v0, 16  ;;  %v6208_v17 = vor.u32 %v6207_v6, %v11492_v56  ;;  %v7849_v50 = vld [vmem:[%s9927_s26 + $0xb4] sm:$0xf]  ;;  %v7850_v0 = vld [vmem:[%s9927_s26 + $0xb8] sm:$0xf] }
 0x1ed   : > { %v7666_v23 = vrot.slane %v7650_v41, 9  ;;  %v6218_v4 = vrot.slane %v6216_v44, 4  ;;  %v6221_v20 = vrot.slane %v6219_v8, 5  ;;  %v6199_v28 = vrot.slane %v6198_v33, 4 }
 0x1ee   : > { %v11512_v30 = vrot.slane %v6225_v32, 5  ;;  %v6231_v63 = vrot.slane %v6229_v60, 4  ;;  %v6245_v40 = vrot.slane %v6243_v12, 5  ;;  %v11517_v14 = vrot.slane %v6249_v3, 5  ;;  %v9361_v60 = vld [vmem:[%s9927_s26 + $0xac] sm:$0xf] }
 0x1ef   : > { %8778 = vmatmul.mubr.bf16.gmra.mrb[40].mxu1 %v11411_v25  ;;  %v9359_v25 = vld [vmem:[%s9927_s26 + $0xa0] sm:$0xf]  ;;  %v6255_v29 = vrot.slane %v6253_v10, 4  ;;  %v7863_v37 = vcombine.low %v6156_v15, %v6166_v54  ;;  %v7680_v24 = vcombine.low %v11466_v47, %v11482_v59  ;;  %v11524_v26 = vcombine.low %v6180_v42, %v6190_v18  ;;  %v9360_v54 = vld [vmem:[%s9927_s26 + $0xa4] sm:$0x1] }
 0x1f0   : > { %8781 = vmatprep.mubr.bf16.mxu1 %v7861_v45  ;;  %v4903_v46 = vrot.slane %v9359_v25, 5  ;;  %v6242_v45 = vrot.slane %v6240_v27, 4  ;;  %v7681_v19 = vcombine.low %v11496_v49, %v11507_v51  ;;  %v6209_v43 = vrot.slane %v6208_v17, 4  ;;  %v7651_v12 = vld [vmem:[%s9927_s26 + $0xa8] sm:$0xe] }
 0x1f1   : > { %v6213_v62 = vrot.slane %v6211_v48, 5  ;;  %v6222_v1 = vor.u32 %v6221_v20, %v6218_v4  ;;  %v6235_v31 = vshll.u32 %v7842_v7, 16  ;;  %v6204_v22 = vsel %vm9950_vm2, %v6199_v28, %v11492_v56  ;;  %v7653_v59 = vld [vmem:[%s9927_s26 + $0xc0] sm:$0xe] }
 0x1f2   : > { %8730 = vmatmul.mubr.bf16.gmra.mrb[8].mxu0 %v7676_v2  ;;  %v7846_v2 = vld [vmem:[%s9927_s26 + $0xa8] sm:$0xf]  ;;  %v4905_v15 = vrot.slane %v4903_v46, 4  ;;  %v4906_v11 = vrot.slane %v9360_v54, 5  ;;  %v6232_v34 = vor.u32 %v6231_v63, %v11512_v30  ;;  %v6246_v61 = vor.u32 %v6245_v40, %v6242_v45  ;;  %v7848_v63 = vld [vmem:[%s9927_s26 + $0xb0] sm:$0x1] }
 0x1f3   : > { %8733 = vmatprep.mubr.bf16.mxu0 %v7677_v13  ;;  %v11536_v13 = vsel %vm10269_vm5, %v7666_v23, %v4903_v46  ;;  %v6256_v53 = vor.u32 %v6255_v29, %v11517_v14  ;;  %v6259_v36 = vshll.u32 %v7845_v55, 16  ;;  %v6264_v56 = vshrl.u32 %v7846_v2, 16  ;;  %v7852_v45 = vld [vmem:[%s9927_s26 + $0xc0] sm:$0xf]  ;;  %v7853_v29 = vld [vmem:[%s9927_s26 + $0xc4] sm:$0xf] }
 0x1f4   : > { %v6267_v6 = vshll.u32 %v7846_v2, 16  ;;  %v6273_v44 = vshll.u32 %v7847_v21, 16  ;;  %v6277_v8 = vshrl.u32 %v7847_v21, 16  ;;  %v6214_v33 = vsel %vm9950_vm2, %v6209_v43, %v6213_v62  ;;  %v7851_v62 = vld [vmem:[%s9927_s26 + $0xbc] sm:$0x1] }
 0x1f5   : > { %v6223_v41 = vrot.slane %v6222_v1, 4  ;;  %v6237_v32 = vrot.slane %v6235_v31, 5  ;;  %v4910_v27 = vrot.slane %v9361_v60, 5  ;;  %v6288_v3 = vshrl.u32 %v7849_v50, 16 }
 0x1f6   : > { %v6291_v10 = vshll.u32 %v7849_v50, 16  ;;  %v6297_v42 = vshll.u32 %v7850_v0, 16  ;;  %v6301_v18 = vshrl.u32 %v7850_v0, 16  ;;  %v6247_v48 = vrot.slane %v6246_v61, 4  ;;  %v9363_v0 = vld [vmem:[%s9927_s26 + $0xb8] sm:$0xf] }
 0x1f7   : > { %8782 = vmatmul.mubr.bf16.gmra.mrb[44].mxu1 %v11460_v5  ;;  %v6233_v5 = vrot.slane %v6232_v34, 4  ;;  %v6257_v17 = vrot.slane %v6256_v53, 4  ;;  %v6261_v23 = vrot.slane %v6259_v36, 5  ;;  %v6266_v4 = vrot.slane %v6264_v56, 4 }
 0x1f8   : > { %8785 = vmatprep.mubr.bf16.mxu1 %v7863_v37  ;;  %v6269_v20 = vrot.slane %v6267_v6, 5  ;;  %v11554_v28 = vrot.slane %v6273_v44, 5  ;;  %v6279_v25 = vrot.slane %v6277_v8, 4  ;;  %v7865_v46 = vcombine.low %v6204_v22, %v6214_v33  ;;  %v7652_v6 = vld [vmem:[%s9927_s26 + $0xb4] sm:$0xe] }
 0x1f9   : > { %v11558_v52 = vsel %vm10269_vm5, %v4905_v15, %v4906_v11  ;;  %v7667_v9 = vrot.slane %v7651_v12, 9  ;;  %v6290_v40 = vrot.slane %v6288_v3, 4  ;;  %v6293_v38 = vrot.slane %v6291_v10, 5 }
 0x1fa   : > { %8734 = vmatmul.mubr.bf16.gmra.mrb[12].mxu0 %v7678_v16  ;;  %v9362_v16 = vld [vmem:[%s9927_s26 + $0xb0] sm:$0x1]  ;;  %v11563_v57 = vrot.slane %v6297_v42, 5  ;;  %v6228_v37 = vsel %vm9950_vm2, %v6223_v41, %v11512_v30  ;;  %v6238_v55 = vsel %vm9950_vm2, %v6233_v5, %v6237_v32  ;;  %v4912_v2 = vrot.slane %v4910_v27, 4  ;;  %v9364_v41 = vld [vmem:[%s9927_s26 + $0xc4] sm:$0xf] }
 0x1fb   : > { %8737 = vmatprep.mubr.bf16.mxu0 %v7679_v35  ;;  %v4913_v7 = vrot.slane %v9362_v16, 5  ;;  %v6303_v35 = vrot.slane %v6301_v18, 4  ;;  %v6252_v43 = vsel %vm9950_vm2, %v6247_v48, %v11517_v14  ;;  %v6262_v1 = vsel %vm9950_vm2, %v6257_v17, %v6261_v23  ;;  %v9365_v5 = vld [vmem:[%s9927_s26 + $0xbc] sm:$0x1] }
 0x1fc   : > { %v6270_v31 = vor.u32 %v6269_v20, %v6266_v4  ;;  %v6280_v21 = vor.u32 %v6279_v25, %v11554_v28  ;;  %v6283_v22 = vshll.u32 %v7848_v63, 16  ;;  %v6312_v30 = vshrl.u32 %v7852_v45, 16  ;;  %v9366_v20 = vld [vmem:[%s9927_s26 + $0xc8] sm:$0x1] }
 0x1fd   : > { %v6315_v15 = vshll.u32 %v7852_v45, 16  ;;  %v6321_v54 = vshll.u32 %v7853_v29, 16  ;;  %v6325_v11 = vshrl.u32 %v7853_v29, 16  ;;  %v4911_v14 = vsel %vm10269_vm5, %v7667_v9, %v4910_v27 }
 0x1fe   : > { %v6294_v34 = vor.u32 %v6293_v38, %v6290_v40  ;;  %v6307_v61 = vshll.u32 %v7851_v62, 16  ;;  %v7866_v53 = vcombine.low %v6228_v37, %v6238_v55  ;;  %v4914_v36 = vsel %vm10269_vm5, %v4912_v2, %v4913_v7  ;;  %v7654_v37 = vld [vmem:[%s9927_s26 + $0xcc] sm:$0xe] }
 0x1ff   : > { %8786 = vmatmul.mubr.bf16.gmra.mrb[48].mxu1 %v11524_v26  ;;  %v6304_v26 = vor.u32 %v6303_v35, %v11563_v57  ;;  %v7867_v50 = vcombine.low %v6252_v43, %v6262_v1  ;;  %v4917_v56 = vrot.slane %v9363_v0, 5  ;;  %v6271_v44 = vrot.slane %v6270_v31, 4 }
 0x200   : > { %8789 = vmatprep.mubr.bf16.mxu1 %v7865_v46  ;;  %v6281_v8 = vrot.slane %v6280_v21, 4  ;;  %v6285_v33 = vrot.slane %v6283_v22, 5  ;;  %v4924_v47 = vrot.slane %v9364_v41, 5  ;;  %v6317_v32 = vrot.slane %v6315_v15, 5  ;;  %v9368_v22 = vld [vmem:[%s9927_s26 + $0xd4] sm:$0x1] }
 0x201   : > { %v6323_v60 = vrot.slane %v6321_v54, 5  ;;  %v6327_v27 = vrot.slane %v6325_v11, 4  ;;  %v7682_v12 = vcombine.low %v11536_v13, %v11558_v52  ;;  %v6295_v3 = vrot.slane %v6294_v34, 4 }
 0x202   : > { %8738 = vmatmul.mubr.bf16.gmra.mrb[16].mxu0 %v7680_v24  ;;  %v6314_v24 = vrot.slane %v6312_v30, 4  ;;  %v6305_v49 = vrot.slane %v6304_v26, 4  ;;  %v6309_v51 = vrot.slane %v6307_v61, 5  ;;  %v7683_v10 = vcombine.low %v4911_v14, %v4914_v36 }
 0x203   : > { %8741 = vmatprep.mubr.bf16.mxu0 %v7681_v19  ;;  %v7854_v19 = vld [vmem:[%s9927_s26 + $0xc8] sm:$0x1]  ;;  %v7668_v42 = vrot.slane %v7652_v6, 9  ;;  %v4919_v18 = vrot.slane %v4917_v56, 4  ;;  %v4920_v48 = vrot.slane %v9365_v5, 5  ;;  %v6276_v17 = vsel %vm9950_vm2, %v6271_v44, %v11554_v28 }
 0x204   : > { %v7669_v23 = vrot.slane %v7653_v59, 9  ;;  %v4926_v4 = vrot.slane %v4924_v47, 4  ;;  %v4927_v25 = vrot.slane %v9366_v20, 5  ;;  %v6286_v13 = vsel %vm9950_vm2, %v6281_v8, %v6285_v33 }
 0x205   : > { %v6318_v46 = vor.u32 %v6317_v32, %v6314_v24  ;;  %v6328_v52 = vor.u32 %v6327_v27, %v6323_v60  ;;  %v6331_v9 = vshll.u32 %v7854_v19, 16  ;;  %v6300_v16 = vsel %vm9950_vm2, %v6295_v3, %v11563_v57  ;;  %v9367_v57 = vld [vmem:[%s9927_s26 + $0xd0] sm:$0xf]  ;;  %s9685_s26 = smov [#allocation12]  }
 0x206   : > { %v6310_v28 = vsel %vm9950_vm2, %v6305_v49, %v6309_v51  ;;  %v4918_v7 = vsel %vm10269_vm5, %v7668_v42, %v4917_v56  ;;  %v4921_v63 = vsel %vm10269_vm5, %v4919_v18, %v4920_v48  ;;  %v7868_v45 = vcombine.low %v6276_v17, %v6286_v13  ;;  %s9459_s13 = sshll.u32 %s9685_s26, 4  ;;  %s9460_s13 = int_to_ptr.vmem [resolvable:$false] %s9459_s13 }
 0x207   : > { %8790 = vmatmul.mubr.bf16.gmra.mrb[52].mxu1 %v7866_v53  ;;  %v4925_v40 = vsel %vm10269_vm5, %v7669_v23, %v4924_v47  ;;  %v4928_v38 = vsel %vm10269_vm5, %v4926_v4, %v4927_v25  ;;  %v4931_v35 = vrot.slane %v9367_v57, 5  ;;  %v7869_v29 = vcombine.low %v6300_v16, %v6310_v28  ;;  %p9462_p7 = scmp.lt.s32.totalorder %s12364_s24, %s9460_s13 }
 0x208   : > { %8793 = vmatprep.mubr.bf16.mxu1 %v7867_v50  ;;  %v6319_v55 = vrot.slane %v6318_v46, 4  ;;  %v6329_v2 = vrot.slane %v6328_v52, 4  ;;  %v6333_v43 = vrot.slane %v6331_v9, 5  ;;  %v7684_v62 = vcombine.low %v4918_v7, %v4921_v63 }
 0x209   : > { %v7685_v1 = vcombine.low %v4925_v40, %v4928_v38  ;;  %v7670_v31 = vrot.slane %v7654_v37, 9  ;;  %v4933_v21 = vrot.slane %v4931_v35, 4  ;;  %v4934_v30 = vrot.slane %v9368_v22, 5 }
 0x20a   : > { %8742 = vmatmul.mubr.bf16.gmra.mrb[20].mxu0 %v7682_v12  ;;  %v6324_v15 = vsel %vm9950_vm2, %v6319_v55, %v6323_v60  ;;  %v6334_v54 = vsel %vm9950_vm2, %v6329_v2, %v6333_v43 }
 0x20b   : > { %8745 = vmatprep.mubr.bf16.mxu0 %v7683_v10  ;;  %v4932_v11 = vsel %vm10269_vm5, %v7670_v31, %v4931_v35  ;;  %v4935_v14 = vsel %vm10269_vm5, %v4933_v21, %v4934_v30  ;;  %v7870_v34 = vcombine.low %v6324_v15, %v6334_v54 }
 0x20c   : > { %v7686_v26 = vcombine.low %v4932_v11, %v4935_v14 }
 0x20f   : > { %8794 = vmatmul.mubr.bf16.gmra.mrb[56].mxu1 %v7868_v45 }
 0x210   : > { %8797 = vmatprep.mubr.bf16.mxu1 %v7869_v29 }
 0x212   : > { %8746 = vmatmul.mubr.bf16.gmra.mrb[24].mxu0 %v7684_v62 }
 0x213   : > { %8749 = vmatprep.mubr.bf16.mxu0 %v7685_v1 }
 0x217   : > { %8798 = vmatmul.mubr.bf16.gmra.mrb[60].mxu1 %v7870_v34 }
 0x21a   : > { %8750 = vmatmul.mubr.bf16.gmra.mrb[28].mxu0 %v7686_v26 }
 0x272   : > { %v8483_v58 = vpop.f32.mrb[0].mxu1 }
 0x273   : > { %v2208_v61 = vpop.f32.mrb[1].mxu1 }
 0x274   : > { %v8484_v53 = vpop.f32.mrb[2].mxu1 }
 0x275   : > { %v2211_v36 = vpop.f32.mrb[3].mxu1 }
 0x27a   : > { %v11686_v50 = vpop.f32.mrb[4].mxu1 }
 0x27b   : > { %v11688_v0 = vpop.f32.mrb[5].mxu1 }
 0x27c   : > { %v11690_v56 = vpop.f32.mrb[6].mxu1 }
 0x27d   : > { %v11692_v6 = vpop.f32.mrb[7].mxu1 }
 0x282   : > { %v11694_v44 = vpop.f32.mrb[8].mxu1 }
 0x283   : > { %v11696_v8 = vpop.f32.mrb[9].mxu1 }
 0x284   : > { %v11698_v33 = vpop.f32.mrb[10].mxu1 }
 0x285   : > { %v11700_v41 = vpop.f32.mrb[11].mxu1 }
 0x28a   : > { %v11702_v47 = vpop.f32.mrb[12].mxu1 }
 0x28b   : > { %v11704_v59 = vpop.f32.mrb[13].mxu1 }
 0x28c   : > { %v11706_v24 = vpop.f32.mrb[14].mxu1 }
 0x28d   : > { %v11708_v32 = vpop.f32.mrb[15].mxu1 }
 0x292   : > { %v11710_v60 = vpop.f32.mrb[16].mxu1 }
 0x293   : > { %v11712_v27 = vpop.f32.mrb[17].mxu1 }
 0x294   : > { %v11714_v12 = vpop.f32.mrb[18].mxu1 }
 0x295   : > { %v11716_v3 = vpop.f32.mrb[19].mxu1 }
 0x29a   : > { %v11718_v49 = vpop.f32.mrb[20].mxu1 }
 0x29b   : > { %v11720_v51 = vpop.f32.mrb[21].mxu1 }
 0x29c   : > { %v11722_v19 = vpop.f32.mrb[22].mxu1 }
 0x29d   : > { %12694 = vst [vmem:[#allocation23_spill] sm:$0xff] %v11722_v19  ;;  %v11724_v10 = vpop.f32.mrb[23].mxu1 }
 0x29e   : > { %12695 = vst [vmem:[#allocation24_spill] sm:$0xff] %v11724_v10 }
 0x2a2   : > { %v11726_v42 = vpop.f32.mrb[24].mxu1 }
 0x2a3   : > { %12696 = vst [vmem:[#allocation25_spill] sm:$0xff] %v11726_v42  ;;  %v11728_v18 = vpop.f32.mrb[25].mxu1 }
 0x2a4   : > { %12697 = vst [vmem:[#allocation26_spill] sm:$0xff] %v11728_v18  ;;  %v11730_v5 = vpop.f32.mrb[26].mxu1  ;;  %v7740_v18 = vld [vmem:[%s11630_s11 + $0x2c] sm:$0x1] }
 0x2a5   : > { %12698 = vst [vmem:[#allocation27_spill] sm:$0xff] %v11730_v5  ;;  %v11732_v48 = vpop.f32.mrb[27].mxu1 }
 0x2a6   : > { %12699 = vst [vmem:[#allocation28_spill] sm:$0xff] %v11732_v48 }
 0x2aa   : > { %v11734_v17 = vpop.f32.mrb[28].mxu1 }
 0x2ab   : > { %12700 = vst [vmem:[#allocation29_spill] sm:$0xff] %v11734_v17  ;;  %v11736_v23 = vpop.f32.mrb[29].mxu1  ;;  %v7730_v17 = vld [vmem:[%s11630_s11 + $0x14] sm:$0x1] }
 0x2ac   : > { %12701 = vst [vmem:[#allocation30_spill] sm:$0xff] %v11736_v23  ;;  %v11738_v4 = vpop.f32.mrb[30].mxu1 }
 0x2ad   : > { %12702 = vst [vmem:[#allocation31_spill] sm:$0xff] %v11738_v4  ;;  %v11740_v20 = vpop.f32.mrb[31].mxu1 }
 0x2ae   : > { %12703 = vst [vmem:[#allocation32_spill] sm:$0xff] %v11740_v20 }
 0x2b2   : > { %v8771_v25 = vpop.f32.mrb[32].mxu1 }
 0x2b3   : > { %v6497_v13 = vpop.f32.mrb[33].mxu1  ;;  %v6664_v57 = vmul.f32 %v8771_v25, %v8771_v25 }
 0x2b4   : > { %v11743_v46 = vpop.f32.mrb[34].mxu1  ;;  %v6662_v9 = vmul.f32 %v6497_v13, %v6497_v13 }
 0x2b5   : > { %v8723_v52 = vpop.f32.mrb[0].mxu0  ;;  %v7994_v16 = vpack.c.bf16 %v11743_v46, %v8771_v25  ;;  %v6500_v28 = vpop.f32.mrb[35].mxu1  ;;  %v11753_v2 = vmul.f32 %v11743_v46, %v11743_v46 }
 0x2b6   : > { %v8801_v7 = vadd.f32 %v8723_v52, %v8483_v58  ;;  %v5099_v63 = vpop.f32.mrb[1].mxu0  ;;  %v6624_v45 = vadd.f32 %v6500_v28, %v6497_v13  ;;  %v6663_v40 = vmul.f32 %v6500_v28, %v6500_v28  ;;  %v7989_v38 = vpack.c.bf16 %v6500_v28, %v6497_v13 }
 0x2b7   : > { %v8802_v35 = vadd.f32 %v5099_v63, %v2208_v61  ;;  %v8724_v29 = vpop.f32.mrb[2].mxu0  ;;  %8066 = vst [vmem:[%s11746_s14 + $0x8] sm:$0xff] %v7994_v16   ;;  %v7732_v16 = vld [vmem:[%s11630_s11 + $0x18] sm:$0xf] }
 0x2b8   : > { %v7923_v37 = vpack.c.bf16 %v8801_v7, %v8801_v7  ;;  %v11749_v55 = vadd.f32 %v8724_v29, %v8484_v53  ;;  %v5102_v43 = vpop.f32.mrb[3].mxu0  ;;  %v11755_v62 = vadd.f32 %v8771_v25, %v6624_v45  ;;  %7990 = vst [vmem:[%s11746_s14] sm:$0xff] %v7989_v38   ;;  %v5298_v1 = vmul.f32 %v8801_v7, %v8801_v7 }
 0x2b9   : > { %v7921_v31 = vpack.c.bf16 %v8802_v35, %v8802_v35  ;;  %v8804_v21 = vadd.f32 %v5102_v43, %v2211_v36  ;;  %v6694_v22 = vadd.f32 %v6663_v40, %v6662_v9  ;;  %v5296_v54 = vmul.f32 %v8802_v35, %v8802_v35 }
 0x2ba   : > { %v5483_v30 = vshrl.u32 %v7923_v37, 16  ;;  %v5486_v15 = vshll.u32 %v7923_v37, 16  ;;  %v7924_v11 = vpack.c.bf16 %v11749_v55, %v11749_v55  ;;  %v11760_v14 = vpop.f32.mrb[36].mxu1  ;;  %v5299_v26 = vmul.f32 %v11749_v55, %v11749_v55  ;;  %v7727_v37 = vld [vmem:[%s11630_s11 + $0xc] sm:$0xf] }
 0x2bb   : > { %v5466_v34 = vshrl.u32 %v7921_v31, 16  ;;  %v5258_v39 = vadd.f32 %v8804_v21, %v8802_v35  ;;  %v5297_v58 = vmul.f32 %v8804_v21, %v8804_v21  ;;  %v11764_v61 = vpop.f32.mrb[37].mxu1  ;;  %v5469_v36 = vshll.u32 %v7921_v31, 16 }
 0x2bc   : > { %v5485_v53 = vrot.slane %v5483_v30, 7  ;;  %v5491_v25 = vshrl.u32 %v7924_v11, 16  ;;  %v7922_v13 = vpack.c.bf16 %v8804_v21, %v8804_v21  ;;  %v11766_v52 = vpop.f32.mrb[38].mxu1  ;;  %v6695_v40 = vadd.f32 %v6694_v22, %v6664_v57  ;;  %v7735_v22 = vld [vmem:[%s11630_s11 + $0x20] sm:$0x1] }
 0x2bd   : > { %v5468_v28 = vrot.slane %v5466_v34, 7  ;;  %v5259_v63 = vadd.f32 %v8801_v7, %v5258_v39  ;;  %v5328_v45 = vadd.f32 %v5297_v58, %v5296_v54  ;;  %v8727_v38 = vpop.f32.mrb[4].mxu0  ;;  %v11775_v35 = vpop.f32.mrb[39].mxu1  ;;  %v5494_v21 = vshll.u32 %v7924_v11, 16 }
 0x2be   : > { %v5488_v29 = vor.u32 %v5486_v15, %v5485_v53  ;;  %v5493_v31 = vrot.slane %v5491_v25, 7  ;;  %v5474_v30 = vshrl.u32 %v7922_v13, 16  ;;  %v5115_v34 = vpop.f32.mrb[5].mxu0  ;;  %v5489_v7 = vrot.slane %v5485_v53, 4 }
 0x2bf   : > { %v5471_v54 = vor.u32 %v5469_v36, %v5468_v28  ;;  %v5329_v15 = vadd.f32 %v5328_v45, %v5298_v1  ;;  %v5477_v39 = vshll.u32 %v7922_v13, 16  ;;  %v8728_v58 = vpop.f32.mrb[6].mxu0  ;;  %v5472_v4 = vrot.slane %v5468_v28, 4 }
 0x2c0   : > { %v5799_v25 = vsel %vm11770_vm11, %v5488_v29, %v7732_v16  ;;  %v5496_v11 = vor.u32 %v5494_v21, %v5493_v31  ;;  %v5498_v20 = vrot.slane %v5493_v31, 4  ;;  %v5476_v53 = vrot.slane %v5474_v30, 7  ;;  %v5118_v36 = vpop.f32.mrb[7].mxu0 }
 0x2c1   : > { %7733 = vst [vmem:[%s11630_s11 + $0x18] sm:$0xf] %v5799_v25  ;;  %v5790_v23 = vsel %vm11770_vm11, %v5471_v54, %v7727_v37  ;;  %v11798_v48 = vadd.f32 %v8727_v38, %v11686_v50  ;;  %v8806_v1 = vadd.f32 %v5115_v34, %v11688_v0  ;;  %v11814_v0 = vmul.f32 %v11760_v14, %v11760_v14 }
 0x2c2   : > { %7728 = vst [vmem:[%s11630_s11 + $0xc] sm:$0xf] %v5790_v23  ;;  %v5497_v13 = vsel %vm11780_vm12, %v5489_v7, %v5496_v11  ;;  %v5803_v16 = vsel %vm11786_vm13, %v5498_v20, %v7735_v22  ;;  %v5479_v45 = vor.u32 %v5477_v39, %v5476_v53  ;;  %v5481_v28 = vrot.slane %v5476_v53, 4  ;;  %v11806_v29 = vpop.f32.mrb[40].mxu1 }
 0x2c3   : > { %7734 = vst [vmem:[%s11630_s11 + $0x1c] sm:$0xf] %v5497_v13  ;;  %7736 = vst [vmem:[%s11630_s11 + $0x20] sm:$0x1] %v5803_v16  ;;  %v7927_v50 = vpack.c.bf16 %v11798_v48, %v11798_v48  ;;  %v5260_v23 = vadd.f32 %v11749_v55, %v5259_v63  ;;  %v5300_v38 = vmul.f32 %v8806_v1, %v8806_v1  ;;  %v11817_v37 = vpop.f32.mrb[41].mxu1 }
 0x2c4   : > { %v5480_v20 = vsel %vm11780_vm12, %v5472_v4, %v5479_v45  ;;  %v5796_v31 = vsel %vm11786_vm13, %v5481_v28, %v7730_v17  ;;  %v5330_v21 = vadd.f32 %v5329_v15, %v5299_v26  ;;  %v7925_v30 = vpack.c.bf16 %v8806_v1, %v8806_v1  ;;  %v11823_v34 = vpop.f32.mrb[42].mxu1 }
 0x2c5   : > { %7729 = vst [vmem:[%s11630_s11 + $0x10] sm:$0xf] %v5480_v20  ;;  %7731 = vst [vmem:[%s11630_s11 + $0x14] sm:$0x1] %v5796_v31  ;;  %v5302_v7 = vmul.f32 %v11798_v48, %v11798_v48  ;;  %v5517_v55 = vshrl.u32 %v7927_v50, 16  ;;  %v5261_v63 = vadd.f32 %v8806_v1, %v5260_v23  ;;  %v6626_v54 = vadd.f32 %v11743_v46, %v11755_v62  ;;  %v8731_v22 = vpop.f32.mrb[8].mxu0 }
 0x2c6   : > { %v11831_v4 = vpop.f32.mrb[43].mxu1  ;;  %v5520_v39 = vshll.u32 %v7927_v50, 16  ;;  %v5331_v17 = vadd.f32 %v5330_v21, %v5300_v38  ;;  %v5500_v26 = vshrl.u32 %v7925_v30, 16  ;;  %v6666_v15 = vmul.f32 %v11764_v61, %v11764_v61  ;;  %v5131_v25 = vpop.f32.mrb[9].mxu0  ;;  %v7742_v62 = vld [vmem:[%s11630_s11 + $0x30] sm:$0xf] }
 0x2c7   : > { %v11835_v11 = vrot.slane %v5517_v55, 7  ;;  %v6627_v53 = vadd.f32 %v6626_v54, %v11764_v61  ;;  %v6696_v1 = vadd.f32 %v6695_v40, %v11753_v2  ;;  %v8807_v13 = vadd.f32 %v8728_v58, %v11690_v56  ;;  %v11840_v46 = vpop.f32.mrb[10].mxu0  ;;  %v7737_v56 = vld [vmem:[%s11630_s11 + $0x24] sm:$0xf] }
 0x2c8   : > { %v11843_v16 = vrot.slane %v5500_v26, 7  ;;  %v5503_v45 = vshll.u32 %v7925_v30, 16  ;;  %v8004_v28 = vpack.c.bf16 %v11766_v52, %v11760_v14  ;;  %v8808_v50 = vadd.f32 %v5118_v36, %v11692_v6  ;;  %v11848_v23 = vpop.f32.mrb[11].mxu0 }
 0x2c9   : > { %v5522_v38 = vor.u32 %v5520_v39, %v11835_v11  ;;  %v5523_v2 = vrot.slane %v11835_v11, 4  ;;  %v6697_v40 = vadd.f32 %v6696_v1, %v6666_v15  ;;  %v11855_v58 = vmul.f32 %v11766_v52, %v11766_v52 }
 0x2ca   : > { %v5505_v20 = vor.u32 %v5503_v45, %v11843_v16  ;;  %v5303_v31 = vmul.f32 %v8807_v13, %v8807_v13  ;;  %v7928_v21 = vpack.c.bf16 %v8807_v13, %v8807_v13  ;;  %8068 = vst [vmem:[%s11746_s14 + $0x18] sm:$0xff] %v8004_v28   ;;  %v5262_v6 = vadd.f32 %v8808_v50, %v5261_v63  ;;  %v11859_v36 = vpop.f32.mrb[44].mxu1 }
 0x2cb   : > { %v5813_v30 = vsel %vm11770_vm11, %v5522_v38, %v7742_v62  ;;  %v5301_v55 = vmul.f32 %v8808_v50, %v8808_v50  ;;  %v7926_v54 = vpack.c.bf16 %v8808_v50, %v8808_v50  ;;  %v6628_v39 = vadd.f32 %v6627_v53, %v11775_v35  ;;  %v11864_v26 = vpop.f32.mrb[45].mxu1 }
 0x2cc   : > { %7743 = vst [vmem:[%s11630_s11 + $0x30] sm:$0xf] %v5813_v30  ;;  %v5506_v15 = vrot.slane %v11843_v16, 4  ;;  %v5806_v11 = vsel %vm11770_vm11, %v5505_v20, %v7737_v56  ;;  %v5525_v1 = vshrl.u32 %v7928_v21, 16  ;;  %v5263_v63 = vadd.f32 %v11798_v48, %v5262_v6  ;;  %v11871_v45 = vpop.f32.mrb[46].mxu1 }
 0x2cd   : > { %7738 = vst [vmem:[%s11630_s11 + $0x24] sm:$0xf] %v5806_v11  ;;  %v5528_v62 = vshll.u32 %v7928_v21, 16  ;;  %v5332_v28 = vadd.f32 %v5331_v17, %v5301_v55  ;;  %v5508_v50 = vshrl.u32 %v7926_v54, 16  ;;  %v6629_v53 = vadd.f32 %v11760_v14, %v6628_v39  ;;  %v11875_v38 = vpop.f32.mrb[12].mxu0  ;;  %v11877_v30 = vpop.f32.mrb[47].mxu1 }
 0x2ce   : > { %v5527_v16 = vrot.slane %v5525_v1, 7  ;;  %v6667_v56 = vmul.f32 %v11775_v35, %v11775_v35  ;;  %v7999_v48 = vpack.c.bf16 %v11775_v35, %v11764_v61  ;;  %v11884_v20 = vadd.f32 %v8731_v22, %v11694_v44  ;;  %v11886_v17 = vpop.f32.mrb[13].mxu0  ;;  %v7745_v21 = vld [vmem:[%s11630_s11 + $0x38] sm:$0x1] }
 0x2cf   : > { %v5333_v14 = vadd.f32 %v5332_v28, %v5302_v7  ;;  %v5510_v6 = vrot.slane %v5508_v50, 7  ;;  %v5511_v55 = vshll.u32 %v7926_v54, 16  ;;  %v8810_v39 = vadd.f32 %v5131_v25, %v11696_v8  ;;  %v11890_v11 = vpop.f32.mrb[14].mxu0 }
 0x2d0   : > { %v5530_v1 = vor.u32 %v5528_v62, %v5527_v16  ;;  %v5532_v5 = vrot.slane %v5527_v16, 4  ;;  %v6698_v42 = vadd.f32 %v6697_v40, %v6667_v56  ;;  %8067 = vst [vmem:[%s11746_s14 + $0x10] sm:$0xff] %v7999_v48   ;;  %v11896_v44 = vmul.f32 %v11806_v29, %v11806_v29  ;;  %v11898_v61 = vpop.f32.mrb[15].mxu0 }
 0x2d1   : > { %v5513_v35 = vor.u32 %v5511_v55, %v5510_v6  ;;  %v5515_v7 = vrot.slane %v5510_v6, 4  ;;  %v7931_v8 = vpack.c.bf16 %v11884_v20, %v11884_v20  ;;  %v5264_v22 = vadd.f32 %v8807_v13, %v5263_v63 }
 0x2d2   : > { %v5531_v25 = vsel %vm11780_vm12, %v5523_v2, %v5530_v1  ;;  %v5817_v40 = vsel %vm11786_vm13, %v5532_v5, %v7745_v21  ;;  %v6699_v54 = vadd.f32 %v6698_v42, %v11814_v0  ;;  %v5304_v62 = vmul.f32 %v8810_v39, %v8810_v39  ;;  %v11907_v28 = vpop.f32.mrb[48].mxu1 }
 0x2d3   : > { %7744 = vst [vmem:[%s11630_s11 + $0x34] sm:$0xf] %v5531_v25  ;;  %7746 = vst [vmem:[%s11630_s11 + $0x38] sm:$0x1] %v5817_v40  ;;  %v5514_v50 = vsel %vm11780_vm12, %v5506_v15, %v5513_v35  ;;  %v5810_v16 = vsel %vm11786_vm13, %v5515_v7, %v7740_v18  ;;  %v5551_v13 = vshrl.u32 %v7931_v8, 16  ;;  %v5554_v63 = vshll.u32 %v7931_v8, 16 }
 0x2d4   : > { %v11915_v2 = vpop.f32.mrb[49].mxu1  ;;  %7739 = vst [vmem:[%s11630_s11 + $0x28] sm:$0xf] %v5514_v50  ;;  %7741 = vst [vmem:[%s11630_s11 + $0x2c] sm:$0x1] %v5810_v16  ;;  %v5265_v5 = vadd.f32 %v8810_v39, %v5264_v22  ;;  %v5334_v42 = vadd.f32 %v5333_v14, %v5303_v31  ;;  %v7929_v0 = vpack.c.bf16 %v8810_v39, %v8810_v39 }
 0x2d5   : > { %v6630_v56 = vadd.f32 %v11766_v52, %v6629_v53  ;;  %v11920_v48 = vpop.f32.mrb[50].mxu1  ;;  %v11922_v21 = vrot.slane %v5551_v13, 7  ;;  %v6670_v15 = vmul.f32 %v11817_v37, %v11817_v37  ;;  %v6700_v18 = vadd.f32 %v6699_v54, %v11855_v58  ;;  %v11931_v55 = vpop.f32.mrb[16].mxu0  ;;  %v7752_v31 = vld [vmem:[%s11630_s11 + $0x48] sm:$0xf] }
 0x2d6   : > { %v11929_v6 = vadd.f32 %v11840_v46, %v11698_v33  ;;  %v11933_v1 = vpop.f32.mrb[51].mxu1  ;;  %v5306_v52 = vmul.f32 %v11884_v20, %v11884_v20  ;;  %v5335_v53 = vadd.f32 %v5334_v42, %v5304_v62  ;;  %v5534_v14 = vshrl.u32 %v7929_v0, 16  ;;  %v11939_v35 = vpop.f32.mrb[17].mxu0  ;;  %v7747_v16 = vld [vmem:[%s11630_s11 + $0x3c] sm:$0xf] }
 0x2d7   : > { %v6631_v39 = vadd.f32 %v6630_v56, %v11817_v37  ;;  %v5556_v58 = vor.u32 %v5554_v63, %v11922_v21  ;;  %v5557_v33 = vrot.slane %v11922_v21, 4  ;;  %v5537_v46 = vshll.u32 %v7929_v0, 16  ;;  %v11943_v8 = vpop.f32.mrb[18].mxu0 }
 0x2d8   : > { %v6701_v7 = vadd.f32 %v6700_v18, %v6670_v15  ;;  %v11945_v22 = vrot.slane %v5534_v14, 7  ;;  %v5307_v25 = vmul.f32 %v11929_v6, %v11929_v6  ;;  %v7932_v40 = vpack.c.bf16 %v11929_v6, %v11929_v6  ;;  %v11953_v62 = vpop.f32.mrb[19].mxu0 }
 0x2d9   : > { %v8014_v54 = vpack.c.bf16 %v11823_v34, %v11806_v29  ;;  %v5827_v50 = vsel %vm11770_vm11, %v5556_v58, %v7752_v31  ;;  %v8812_v13 = vadd.f32 %v11848_v23, %v11700_v41  ;;  %v6632_v63 = vadd.f32 %v6631_v39, %v11831_v4 }
 0x2da   : > { %v6671_v42 = vmul.f32 %v11831_v4, %v11831_v4  ;;  %7753 = vst [vmem:[%s11630_s11 + $0x48] sm:$0xf] %v5827_v50  ;;  %v5539_v0 = vor.u32 %v5537_v46, %v11945_v22  ;;  %v5559_v56 = vshrl.u32 %v7932_v40, 16  ;;  %v5562_v21 = vshll.u32 %v7932_v40, 16  ;;  %v11970_v18 = vpop.f32.mrb[52].mxu1 }
 0x2db   : > { %v11967_v15 = vmul.f32 %v11823_v34, %v11823_v34  ;;  %8070 = vst [vmem:[%s11746_s14 + $0x28] sm:$0xff] %v8014_v54   ;;  %v5266_v41 = vadd.f32 %v8812_v13, %v5265_v5  ;;  %v5305_v23 = vmul.f32 %v8812_v13, %v8812_v13  ;;  %v7930_v31 = vpack.c.bf16 %v8812_v13, %v8812_v13  ;;  %v11973_v39 = vpop.f32.mrb[53].mxu1  ;;  %v7755_v5 = vld [vmem:[%s11630_s11 + $0x50] sm:$0x1] }
 0x2dc   : > { %v6633_v14 = vadd.f32 %v11806_v29, %v6632_v63  ;;  %v5820_v58 = vsel %vm11770_vm11, %v5539_v0, %v7747_v16  ;;  %v5561_v46 = vrot.slane %v5559_v56, 7  ;;  %v6702_v40 = vadd.f32 %v6701_v7, %v6671_v42  ;;  %v11979_v10 = vpop.f32.mrb[54].mxu1 }
 0x2dd   : > { %v8009_v50 = vpack.c.bf16 %v11831_v4, %v11817_v37  ;;  %v5540_v54 = vrot.slane %v11945_v22, 4  ;;  %7748 = vst [vmem:[%s11630_s11 + $0x3c] sm:$0xf] %v5820_v58  ;;  %v5267_v13 = vadd.f32 %v11884_v20, %v5266_v41  ;;  %v5336_v29 = vadd.f32 %v5335_v53, %v5305_v23  ;;  %v11985_v19 = vpop.f32.mrb[20].mxu0  ;;  %v11987_v16 = vpop.f32.mrb[55].mxu1 }
 0x2de   : > { %v5542_v63 = vshrl.u32 %v7930_v31, 16  ;;  %v5564_v0 = vor.u32 %v5562_v21, %v5561_v46  ;;  %v5566_v7 = vrot.slane %v5561_v46, 4  ;;  %v6703_v37 = vadd.f32 %v6702_v40, %v11896_v44  ;;  %v11995_v22 = vpop.f32.mrb[21].mxu0  ;;  %v7750_v23 = vld [vmem:[%s11630_s11 + $0x44] sm:$0x1] }
 0x2df   : > { %8069 = vst [vmem:[%s11746_s14 + $0x20] sm:$0xff] %v8009_v50   ;;  %v11993_v4 = vadd.f32 %v11875_v38, %v11702_v47  ;;  %v5337_v20 = vadd.f32 %v5336_v29, %v5306_v52  ;;  %v5545_v42 = vshll.u32 %v7930_v31, 16  ;;  %v8814_v56 = vadd.f32 %v11886_v17, %v11704_v59  ;;  %v11999_v41 = vpop.f32.mrb[22].mxu0 }
 0x2e0   : > { %v5544_v53 = vrot.slane %v5542_v63, 7  ;;  %v5565_v21 = vsel %vm11780_vm12, %v5557_v33, %v5564_v0  ;;  %v5831_v44 = vsel %vm11786_vm13, %v5566_v7, %v7755_v5  ;;  %v12010_v38 = vmul.f32 %v11859_v36, %v11859_v36  ;;  %v12012_v52 = vpop.f32.mrb[23].mxu0 }
 0x2e1   : > { %v7935_v47 = vpack.c.bf16 %v11993_v4, %v11993_v4  ;;  %7754 = vst [vmem:[%s11630_s11 + $0x4c] sm:$0xf] %v5565_v21  ;;  %7756 = vst [vmem:[%s11630_s11 + $0x50] sm:$0x1] %v5831_v44  ;;  %v5268_v33 = vadd.f32 %v11929_v6, %v5267_v13  ;;  %v5308_v31 = vmul.f32 %v8814_v56, %v8814_v56  ;;  %v7762_v21 = vld [vmem:[%s11630_s11 + $0x60] sm:$0xf] }
 0x2e2   : > { %v5547_v59 = vor.u32 %v5545_v42, %v5544_v53  ;;  %v5549_v17 = vrot.slane %v5544_v53, 4  ;;  %v12019_v58 = vmul.f32 %v11993_v4, %v11993_v4  ;;  %v5338_v40 = vadd.f32 %v5337_v20, %v5307_v25  ;;  %v12021_v5 = vpop.f32.mrb[56].mxu1 }
 0x2e3   : > { %v5585_v46 = vshrl.u32 %v7935_v47, 16  ;;  %v7933_v50 = vpack.c.bf16 %v8814_v56, %v8814_v56  ;;  %v5269_v0 = vadd.f32 %v8814_v56, %v5268_v33  ;;  %v6634_v6 = vadd.f32 %v11823_v34, %v6633_v14  ;;  %v12028_v13 = vpop.f32.mrb[57].mxu1 }
 0x2e4   : > { %v5548_v29 = vsel %vm11780_vm12, %v5540_v54, %v5547_v59  ;;  %v5824_v63 = vsel %vm11786_vm13, %v5549_v17, %v7750_v23  ;;  %v5588_v53 = vshll.u32 %v7935_v47, 16  ;;  %v5339_v25 = vadd.f32 %v5338_v40, %v5308_v31  ;;  %v12034_v42 = vpop.f32.mrb[58].mxu1 }
 0x2e5   : > { %7749 = vst [vmem:[%s11630_s11 + $0x40] sm:$0xf] %v5548_v29  ;;  %7751 = vst [vmem:[%s11630_s11 + $0x44] sm:$0x1] %v5824_v63  ;;  %v12032_v7 = vrot.slane %v5585_v46, 7  ;;  %v5568_v20 = vshrl.u32 %v7933_v50, 16  ;;  %v6635_v54 = vadd.f32 %v6634_v6, %v11864_v26  ;;  %v6674_v56 = vmul.f32 %v11864_v26, %v11864_v26 }
 0x2e6   : > { %12710 = vst [vmem:[#allocation33_spill] sm:$0xff] %v12034_v42  ;;  %v6704_v34 = vadd.f32 %v6703_v37, %v11967_v15  ;;  %v12043_v14 = vadd.f32 %v11890_v11, %v11706_v24  ;;  %v12045_v44 = vpop.f32.mrb[24].mxu0  ;;  %v12047_v23 = vpop.f32.mrb[59].mxu1  ;;  %v5571_v33 = vshll.u32 %v7933_v50, 16  ;;  %v7757_v15 = vld [vmem:[%s11630_s11 + $0x54] sm:$0xf]  ;;  %v12060_v11 = vmul.f32 %v11871_v45, %v11871_v45 }
 0x2e7   : > { %12711 = vst [vmem:[#allocation34_spill] sm:$0xff] %v12047_v23  ;;  %v5590_v47 = vor.u32 %v5588_v53, %v12032_v7  ;;  %v5591_v59 = vrot.slane %v12032_v7, 4  ;;  %v12051_v17 = vrot.slane %v5568_v20, 7  ;;  %v12053_v31 = vpop.f32.mrb[25].mxu0  ;;  %v8024_v46 = vpack.c.bf16 %v11871_v45, %v11859_v36 }
 0x2e8   : > { %v6705_v37 = vadd.f32 %v6704_v34, %v6674_v56  ;;  %v7936_v24 = vpack.c.bf16 %v12043_v14, %v12043_v14  ;;  %v12064_v40 = vpop.f32.mrb[26].mxu0  ;;  %v5311_v63 = vmul.f32 %v12043_v14, %v12043_v14  ;;  %v8816_v6 = vadd.f32 %v11898_v61, %v11708_v32 }
 0x2e9   : > { %v5841_v50 = vsel %vm11770_vm11, %v5590_v47, %v7762_v21  ;;  %v5573_v29 = vor.u32 %v5571_v33, %v12051_v17  ;;  %v12073_v7 = vpop.f32.mrb[27].mxu0  ;;  %8072 = vst [vmem:[%s11746_s14 + $0x38] sm:$0xff] %v8024_v46   ;;  %v6636_v56 = vadd.f32 %v6635_v54, %v11877_v30  ;;  %v6675_v21 = vmul.f32 %v11877_v30, %v11877_v30 }
 0x2ea   : > { %12712 = vst [vmem:[#allocation35_spill] sm:$0xff] %v12073_v7  ;;  %7763 = vst [vmem:[%s11630_s11 + $0x60] sm:$0xf] %v5841_v50  ;;  %v5593_v53 = vshrl.u32 %v7936_v24, 16  ;;  %v5596_v20 = vshll.u32 %v7936_v24, 16  ;;  %v5270_v47 = vadd.f32 %v8816_v6, %v5269_v0  ;;  %v5309_v33 = vmul.f32 %v8816_v6, %v8816_v6  ;;  %v12082_v42 = vpop.f32.mrb[60].mxu1 }
 0x2eb   : > { %v5834_v34 = vsel %vm11770_vm11, %v5573_v29, %v7757_v15  ;;  %v7934_v23 = vpack.c.bf16 %v8816_v6, %v8816_v6  ;;  %v6637_v61 = vadd.f32 %v11859_v36, %v6636_v56  ;;  %v6706_v24 = vadd.f32 %v6705_v37, %v6675_v21  ;;  %v12088_v46 = vpop.f32.mrb[61].mxu1  ;;  %v7765_v7 = vld [vmem:[%s11630_s11 + $0x68] sm:$0x1] }
 0x2ec   : > { %7758 = vst [vmem:[%s11630_s11 + $0x54] sm:$0xf] %v5834_v34  ;;  %v5595_v32 = vrot.slane %v5593_v53, 7  ;;  %v8019_v54 = vpack.c.bf16 %v11877_v30, %v11864_v26  ;;  %v5574_v50 = vrot.slane %v12051_v17, 4  ;;  %v5271_v0 = vadd.f32 %v11993_v4, %v5270_v47  ;;  %v12093_v6 = vpop.f32.mrb[62].mxu1 }
 0x2ed   : > { %v5340_v15 = vadd.f32 %v5339_v25, %v5309_v33  ;;  %v5576_v29 = vshrl.u32 %v7934_v23, 16  ;;  %v6707_v36 = vadd.f32 %v6706_v24, %v12010_v38  ;;  %v12099_v26 = vadd.f32 %v11931_v55, %v11710_v60  ;;  %v12101_v30 = vpop.f32.mrb[28].mxu0  ;;  %v12103_v17 = vpop.f32.mrb[63].mxu1  ;;  %v7760_v55 = vld [vmem:[%s11630_s11 + $0x5c] sm:$0x1] }
 0x2ee   : > { %v5598_v34 = vor.u32 %v5596_v20, %v5595_v32  ;;  %v5600_v53 = vrot.slane %v5595_v32, 4  ;;  %8071 = vst [vmem:[%s11746_s14 + $0x30] sm:$0xff] %v8019_v54   ;;  %v5579_v37 = vshll.u32 %v7934_v23, 16  ;;  %v8818_v20 = vadd.f32 %v11939_v35, %v11712_v27  ;;  %v12108_v56 = vpop.f32.mrb[29].mxu0 }
 0x2ef   : > { %v5341_v4 = vadd.f32 %v5340_v15, %v12019_v58  ;;  %v5578_v25 = vrot.slane %v5576_v29, 7  ;;  %v7939_v21 = vpack.c.bf16 %v12099_v26, %v12099_v26  ;;  %v12119_v58 = vmul.f32 %v11907_v28, %v11907_v28  ;;  %v12121_v23 = vpop.f32.mrb[30].mxu0 }
 0x2f0   : > { %v5599_v38 = vsel %vm11780_vm12, %v5591_v59, %v5598_v34  ;;  %v5845_v60 = vsel %vm11786_vm13, %v5600_v53, %v7765_v7  ;;  %v5272_v59 = vadd.f32 %v12043_v14, %v5271_v0  ;;  %v5312_v47 = vmul.f32 %v8818_v20, %v8818_v20  ;;  %v12126_v7 = vpop.f32.mrb[31].mxu0 }
 0x2f1   : > { %7764 = vst [vmem:[%s11630_s11 + $0x64] sm:$0xf] %v5599_v38  ;;  %7766 = vst [vmem:[%s11630_s11 + $0x68] sm:$0x1] %v5845_v60  ;;  %v5581_v27 = vor.u32 %v5579_v37, %v5578_v25  ;;  %v5583_v35 = vrot.slane %v5578_v25, 4  ;;  %v5314_v33 = vmul.f32 %v12099_v26, %v12099_v26  ;;  %v5619_v32 = vshrl.u32 %v7939_v21, 16 }
 0x2f2   : > { %v5342_v24 = vadd.f32 %v5341_v4, %v5311_v63  ;;  %v7937_v54 = vpack.c.bf16 %v8818_v20, %v8818_v20  ;;  %v5273_v34 = vadd.f32 %v8818_v20, %v5272_v59  ;;  %v6638_v53 = vadd.f32 %v11871_v45, %v6637_v61  ;;  %v7772_v38 = vld [vmem:[%s11630_s11 + $0x78] sm:$0xf] }
 0x2f3   : > { %v5582_v15 = vsel %vm11780_vm12, %v5574_v50, %v5581_v27  ;;  %v5838_v29 = vsel %vm11786_vm13, %v5583_v35, %v7760_v55  ;;  %v5621_v14 = vrot.slane %v5619_v32, 7  ;;  %v5622_v0 = vshll.u32 %v7939_v21, 16  ;;  %v7767_v21 = vld [vmem:[%s11630_s11 + $0x6c] sm:$0xf] }
 0x2f4   : > { %7759 = vst [vmem:[%s11630_s11 + $0x58] sm:$0xf] %v5582_v15  ;;  %7761 = vst [vmem:[%s11630_s11 + $0x5c] sm:$0x1] %v5838_v29  ;;  %v5343_v25 = vadd.f32 %v5342_v24, %v5312_v47  ;;  %v5602_v37 = vshrl.u32 %v7937_v54, 16  ;;  %v6639_v63 = vadd.f32 %v6638_v53, %v11915_v2  ;;  %v6678_v4 = vmul.f32 %v11915_v2, %v11915_v2 }
 0x2f5   : > { %v6708_v50 = vadd.f32 %v6707_v36, %v12060_v11  ;;  %v8819_v20 = vadd.f32 %v11943_v8, %v11714_v12  ;;  %v5624_v45 = vor.u32 %v5622_v0, %v5621_v14  ;;  %v5625_v61 = vrot.slane %v5621_v14, 4 }
 0x2f6   : > { %v5604_v60 = vrot.slane %v5602_v37, 7  ;;  %v5605_v55 = vshll.u32 %v7937_v54, 16  ;;  %v12147_v59 = vmul.f32 %v11920_v48, %v11920_v48  ;;  %v8034_v47 = vpack.c.bf16 %v11920_v48, %v11907_v28 }
 0x2f7   : > { %v6709_v27 = vadd.f32 %v6708_v50, %v6678_v4  ;;  %v7940_v35 = vpack.c.bf16 %v8819_v20, %v8819_v20  ;;  %v5855_v11 = vsel %vm11770_vm11, %v5624_v45, %v7772_v38  ;;  %v5315_v8 = vmul.f32 %v8819_v20, %v8819_v20 }
 0x2f8   : > { %v5607_v12 = vor.u32 %v5605_v55, %v5604_v60  ;;  %v8820_v36 = vadd.f32 %v11953_v62, %v11716_v3  ;;  %7773 = vst [vmem:[%s11630_s11 + $0x78] sm:$0xf] %v5855_v11  ;;  %8074 = vst [vmem:[%s11746_s14 + $0x48] sm:$0xff] %v8034_v47   ;;  %v6640_v54 = vadd.f32 %v6639_v63, %v11933_v1  ;;  %v5608_v4 = vrot.slane %v5604_v60, 4  ;;  %v7775_v63 = vld [vmem:[%s11630_s11 + $0x80] sm:$0x1] }
 0x2f9   : > { %v5627_v32 = vshrl.u32 %v7940_v35, 16  ;;  %v5630_v24 = vshll.u32 %v7940_v35, 16  ;;  %v6679_v15 = vmul.f32 %v11933_v1, %v11933_v1  ;;  %v8029_v38 = vpack.c.bf16 %v11933_v1, %v11915_v2  ;;  %v7770_v47 = vld [vmem:[%s11630_s11 + $0x74] sm:$0x1] }
 0x2fa   : > { %v5848_v29 = vsel %vm11770_vm11, %v5607_v12, %v7767_v21  ;;  %v5274_v53 = vadd.f32 %v8820_v36, %v5273_v34  ;;  %v5313_v14 = vmul.f32 %v8820_v36, %v8820_v36  ;;  %v7938_v0 = vpack.c.bf16 %v8820_v36, %v8820_v36 }
 0x2fb   : > { %7768 = vst [vmem:[%s11630_s11 + $0x6c] sm:$0xf] %v5848_v29  ;;  %v5629_v37 = vrot.slane %v5627_v32, 7  ;;  %v6641_v3 = vadd.f32 %v11907_v28, %v6640_v54  ;;  %v6710_v62 = vadd.f32 %v6709_v27, %v6679_v15  ;;  %8073 = vst [vmem:[%s11746_s14 + $0x40] sm:$0xff] %v8029_v38   ;;  %v12172_v28 = vadd.f32 %v11985_v19, %v11718_v49  ;;  %v12713_v38 = vld [vmem:[#allocation23_spill] sm:$0xff] }
 0x2fc   : > { %v5275_v50 = vadd.f32 %v12099_v26, %v5274_v53  ;;  %v5344_v45 = vadd.f32 %v5343_v25, %v5313_v14  ;;  %v5610_v55 = vshrl.u32 %v7938_v0, 16  ;;  %v5613_v1 = vshll.u32 %v7938_v0, 16  ;;  %v7782_v0 = vld [vmem:[%s11630_s11 + $0x90] sm:$0xf] }
 0x2fd   : > { %v5632_v34 = vor.u32 %v5630_v24, %v5629_v37  ;;  %v5634_v21 = vrot.slane %v5629_v37, 4  ;;  %v6711_v35 = vadd.f32 %v6710_v62, %v12119_v58  ;;  %v8822_v60 = vadd.f32 %v11995_v22, %v11720_v51 }
 0x2fe   : > { %v5345_v27 = vadd.f32 %v5344_v45, %v5314_v33  ;;  %v5612_v2 = vrot.slane %v5610_v55, 7  ;;  %v7943_v58 = vpack.c.bf16 %v12172_v28, %v12172_v28  ;;  %v6684_v49 = vmul.f32 %v11970_v18, %v11970_v18  ;;  %v7777_v45 = vld [vmem:[%s11630_s11 + $0x84] sm:$0xf] }
 0x2ff   : > { %v5633_v26 = vsel %vm11780_vm12, %v5625_v61, %v5632_v34  ;;  %v5859_v25 = vsel %vm11786_vm13, %v5634_v21, %v7775_v63  ;;  %v5276_v51 = vadd.f32 %v8819_v20, %v5275_v50  ;;  %v5316_v22 = vmul.f32 %v8822_v60, %v8822_v60 }
 0x300   : > { %7774 = vst [vmem:[%s11630_s11 + $0x7c] sm:$0xf] %v5633_v26  ;;  %7776 = vst [vmem:[%s11630_s11 + $0x80] sm:$0x1] %v5859_v25  ;;  %v5615_v19 = vor.u32 %v5613_v1, %v5612_v2  ;;  %v5617_v33 = vrot.slane %v5612_v2, 4  ;;  %v5318_v61 = vmul.f32 %v12172_v28, %v12172_v28  ;;  %v5653_v11 = vshrl.u32 %v7943_v58, 16 }
 0x301   : > { %v5346_v12 = vadd.f32 %v5345_v27, %v5315_v8  ;;  %v7941_v36 = vpack.c.bf16 %v8822_v60, %v8822_v60  ;;  %v5277_v54 = vadd.f32 %v8822_v60, %v5276_v51  ;;  %v6642_v15 = vadd.f32 %v11920_v48, %v6641_v3  ;;  %v12714_v2 = vld [vmem:[#allocation24_spill] sm:$0xff] }
 0x302   : > { %v5616_v32 = vsel %vm11780_vm12, %v5608_v4, %v5615_v19  ;;  %v5852_v24 = vsel %vm11786_vm13, %v5617_v33, %v7770_v47  ;;  %v5655_v20 = vrot.slane %v5653_v11, 7  ;;  %v5656_v29 = vshll.u32 %v7943_v58, 16 }
 0x303   : > { %7769 = vst [vmem:[%s11630_s11 + $0x70] sm:$0xf] %v5616_v32  ;;  %7771 = vst [vmem:[%s11630_s11 + $0x74] sm:$0x1] %v5852_v24  ;;  %v5347_v53 = vadd.f32 %v5346_v12, %v5316_v22  ;;  %v5636_v14 = vshrl.u32 %v7941_v36, 16  ;;  %v6643_v8 = vadd.f32 %v6642_v15, %v11973_v39  ;;  %v6682_v37 = vmul.f32 %v11973_v39, %v11973_v39 }
 0x304   : > { %v6712_v62 = vadd.f32 %v6711_v35, %v12147_v59  ;;  %v8823_v4 = vadd.f32 %v11999_v41, %v12713_v38  ;;  %v5658_v48 = vor.u32 %v5656_v29, %v5655_v20  ;;  %v5659_v3 = vrot.slane %v5655_v20, 4  ;;  %v7785_v32 = vld [vmem:[%s11630_s11 + $0x98] sm:$0x1]  ;;  %v7780_v38 = vld [vmem:[%s11630_s11 + $0x8c] sm:$0x1] }
 0x305   : > { %v5638_v63 = vrot.slane %v5636_v14, 7  ;;  %v5639_v50 = vshll.u32 %v7941_v36, 16  ;;  %v12206_v21 = vmul.f32 %v11979_v10, %v11979_v10  ;;  %v8044_v27 = vpack.c.bf16 %v11979_v10, %v11970_v18 }
 0x306   : > { %v6713_v55 = vadd.f32 %v6712_v62, %v6682_v37  ;;  %v7944_v34 = vpack.c.bf16 %v8823_v4, %v8823_v4  ;;  %v5869_v59 = vsel %vm11770_vm11, %v5658_v48, %v7782_v0  ;;  %v5319_v35 = vmul.f32 %v8823_v4, %v8823_v4  ;;  %v12715_v0 = vld [vmem:[#allocation25_spill] sm:$0xff] }
 0x307   : > { %v5641_v41 = vor.u32 %v5639_v50, %v5638_v63  ;;  %v8824_v1 = vadd.f32 %v12012_v52, %v12714_v2  ;;  %7783 = vst [vmem:[%s11630_s11 + $0x90] sm:$0xf] %v5869_v59  ;;  %8076 = vst [vmem:[%s11746_s14 + $0x58] sm:$0xff] %v8044_v27   ;;  %v6644_v25 = vadd.f32 %v6643_v8, %v11987_v16  ;;  %v5642_v36 = vrot.slane %v5638_v63, 4 }
 0x308   : > { %v5661_v60 = vshrl.u32 %v7944_v34, 16  ;;  %v5664_v26 = vshll.u32 %v7944_v34, 16  ;;  %v6683_v47 = vmul.f32 %v11987_v16, %v11987_v16  ;;  %v8039_v12 = vpack.c.bf16 %v11987_v16, %v11973_v39  ;;  %v12716_v16 = vld [vmem:[#allocation26_spill] sm:$0xff] }
 0x309   : > { %v5862_v58 = vsel %vm11770_vm11, %v5641_v41, %v7777_v45  ;;  %v5278_v19 = vadd.f32 %v8824_v1, %v5277_v54  ;;  %v5317_v33 = vmul.f32 %v8824_v1, %v8824_v1  ;;  %v7942_v51 = vpack.c.bf16 %v8824_v1, %v8824_v1 }
 0x30a   : > { %7778 = vst [vmem:[%s11630_s11 + $0x84] sm:$0xf] %v5862_v58  ;;  %v5663_v22 = vrot.slane %v5661_v60, 7  ;;  %v6645_v52 = vadd.f32 %v11970_v18, %v6644_v25  ;;  %v6714_v11 = vadd.f32 %v6713_v55, %v6683_v47  ;;  %8075 = vst [vmem:[%s11746_s14 + $0x50] sm:$0xff] %v8039_v12   ;;  %v12230_v18 = vadd.f32 %v12045_v44, %v12715_v0  ;;  %v12717_v58 = vld [vmem:[#allocation27_spill] sm:$0xff] }
 0x30b   : > { %v5279_v24 = vadd.f32 %v12172_v28, %v5278_v19  ;;  %v5348_v15 = vadd.f32 %v5347_v53, %v5317_v33  ;;  %v5644_v20 = vshrl.u32 %v7942_v51, 16  ;;  %v5647_v39 = vshll.u32 %v7942_v51, 16 }
 0x30c   : > { %v5666_v54 = vor.u32 %v5664_v26, %v5663_v22  ;;  %v5668_v29 = vrot.slane %v5663_v22, 4  ;;  %v6715_v14 = vadd.f32 %v6714_v11, %v6684_v49  ;;  %v8826_v62 = vadd.f32 %v12053_v31, %v12716_v16  ;;  %v7792_v26 = vld [vmem:[%s11630_s11 + $0xa8] sm:$0xf] }
 0x30d   : > { %v5349_v8 = vadd.f32 %v5348_v15, %v5318_v61  ;;  %v5646_v37 = vrot.slane %v5644_v20, 7  ;;  %v7947_v49 = vpack.c.bf16 %v12230_v18, %v12230_v18  ;;  %v6688_v44 = vmul.f32 %v12021_v5, %v12021_v5  ;;  %v12719_v20 = vld [vmem:[#allocation28_spill] sm:$0xff] }
 0x30e   : > { %v5667_v28 = vsel %vm11780_vm12, %v5659_v3, %v5666_v54  ;;  %v5873_v53 = vsel %vm11786_vm13, %v5668_v29, %v7785_v32  ;;  %v5280_v31 = vadd.f32 %v8823_v4, %v5279_v24  ;;  %v5320_v63 = vmul.f32 %v8826_v62, %v8826_v62  ;;  %v12720_v54 = vld [vmem:[#allocation35_spill] sm:$0xff] }
 0x30f   : > { %7784 = vst [vmem:[%s11630_s11 + $0x94] sm:$0xf] %v5667_v28  ;;  %7786 = vst [vmem:[%s11630_s11 + $0x98] sm:$0x1] %v5873_v53  ;;  %v5649_v61 = vor.u32 %v5647_v39, %v5646_v37  ;;  %v5651_v48 = vrot.slane %v5646_v37, 4  ;;  %v5322_v3 = vmul.f32 %v12230_v18, %v12230_v18  ;;  %v5687_v50 = vshrl.u32 %v7947_v49, 16 }
 0x310   : > { %v5350_v45 = vadd.f32 %v5349_v8, %v5319_v35  ;;  %v7945_v55 = vpack.c.bf16 %v8826_v62, %v8826_v62  ;;  %v5281_v59 = vadd.f32 %v8826_v62, %v5280_v31  ;;  %v6646_v41 = vadd.f32 %v11979_v10, %v6645_v52  ;;  %v7787_v52 = vld [vmem:[%s11630_s11 + $0x9c] sm:$0xf] }
 0x311   : > { %v5650_v34 = vsel %vm11780_vm12, %v5642_v36, %v5649_v61  ;;  %v5866_v27 = vsel %vm11786_vm13, %v5651_v48, %v7780_v38  ;;  %v5689_v4 = vrot.slane %v5687_v50, 7  ;;  %v5690_v2 = vshll.u32 %v7947_v49, 16  ;;  %v12718_v36 = vld [vmem:[#allocation33_spill] sm:$0xff]  ;;  %v12721_v8 = vld [vmem:[#allocation34_spill] sm:$0xff] }
 0x312   : > { %7779 = vst [vmem:[%s11630_s11 + $0x88] sm:$0xf] %v5650_v34  ;;  %7781 = vst [vmem:[%s11630_s11 + $0x8c] sm:$0x1] %v5866_v27  ;;  %v5351_v1 = vadd.f32 %v5350_v45, %v5320_v63  ;;  %v5670_v60 = vshrl.u32 %v7945_v55, 16  ;;  %v6647_v35 = vadd.f32 %v6646_v41, %v12028_v13  ;;  %v6686_v25 = vmul.f32 %v12028_v13, %v12028_v13  ;;  %v12722_v41 = vld [vmem:[#allocation29_spill] sm:$0xff] }
 0x313   : > { %v6716_v47 = vadd.f32 %v6715_v14, %v12206_v21  ;;  %v8827_v19 = vadd.f32 %v12064_v40, %v12717_v58  ;;  %v5692_v10 = vor.u32 %v5690_v2, %v5689_v4  ;;  %v5693_v33 = vrot.slane %v5689_v4, 4  ;;  %v7795_v63 = vld [vmem:[%s11630_s11 + $0xb0] sm:$0x1] }
 0x314   : > { %v5672_v51 = vrot.slane %v5670_v60, 7  ;;  %v5673_v22 = vshll.u32 %v7945_v55, 16  ;;  %v12264_v32 = vmul.f32 %v12718_v36, %v12718_v36  ;;  %v8054_v24 = vpack.c.bf16 %v12718_v36, %v12021_v5  ;;  %v12723_v60 = vld [vmem:[#allocation30_spill] sm:$0xff] }
 0x315   : > { %v6717_v11 = vadd.f32 %v6716_v47, %v6686_v25  ;;  %v7948_v12 = vpack.c.bf16 %v8827_v19, %v8827_v19  ;;  %v5883_v21 = vsel %vm11770_vm11, %v5692_v10, %v7792_v26  ;;  %v5323_v15 = vmul.f32 %v8827_v19, %v8827_v19 }
 0x316   : > { %v5675_v40 = vor.u32 %v5673_v22, %v5672_v51  ;;  %v8828_v29 = vadd.f32 %v12720_v54, %v12719_v20  ;;  %7793 = vst [vmem:[%s11630_s11 + $0xa8] sm:$0xf] %v5883_v21  ;;  %8078 = vst [vmem:[%s11746_s14 + $0x68] sm:$0xff] %v8054_v24   ;;  %v6648_v37 = vadd.f32 %v6647_v35, %v12721_v8  ;;  %v5676_v31 = vrot.slane %v5672_v51, 4  ;;  %v7790_v35 = vld [vmem:[%s11630_s11 + $0xa4] sm:$0x1] }
 0x317   : > { %v5695_v14 = vshrl.u32 %v7948_v12, 16  ;;  %v5698_v0 = vshll.u32 %v7948_v12, 16  ;;  %v6687_v39 = vmul.f32 %v12721_v8, %v12721_v8  ;;  %v8049_v48 = vpack.c.bf16 %v12721_v8, %v12028_v13 }
 0x318   : > { %v5876_v16 = vsel %vm11770_vm11, %v5675_v40, %v7787_v52  ;;  %v5282_v62 = vadd.f32 %v8828_v29, %v5281_v59  ;;  %v5321_v28 = vmul.f32 %v8828_v29, %v8828_v29  ;;  %v7946_v53 = vpack.c.bf16 %v8828_v29, %v8828_v29 }
 0x319   : > { %7788 = vst [vmem:[%s11630_s11 + $0x9c] sm:$0xf] %v5876_v16  ;;  %v5697_v38 = vrot.slane %v5695_v14, 7  ;;  %v6649_v49 = vadd.f32 %v12021_v5, %v6648_v37  ;;  %v6718_v61 = vadd.f32 %v6717_v11, %v6687_v39  ;;  %8077 = vst [vmem:[%s11746_s14 + $0x60] sm:$0xff] %v8049_v48   ;;  %v12288_v5 = vadd.f32 %v12101_v30, %v12722_v41  ;;  %v12724_v14 = vld [vmem:[#allocation31_spill] sm:$0xff] }
 0x31a   : > { %v5283_v50 = vadd.f32 %v12230_v18, %v5282_v62  ;;  %v5352_v45 = vadd.f32 %v5351_v1, %v5321_v28  ;;  %v5678_v55 = vshrl.u32 %v7946_v53, 16  ;;  %v5681_v13 = vshll.u32 %v7946_v53, 16  ;;  %v7797_v16 = vld [vmem:[%s11630_s11 + $0xb4] sm:$0xf] }
 0x31b   : > { %v5700_v34 = vor.u32 %v5698_v0, %v5697_v38  ;;  %v5702_v27 = vrot.slane %v5697_v38, 4  ;;  %v6719_v59 = vadd.f32 %v6718_v61, %v6688_v44  ;;  %v8830_v26 = vadd.f32 %v12108_v56, %v12723_v60  ;;  %v12725_v61 = vld [vmem:[#allocation32_spill] sm:$0xff] }
 0x31c   : > { %v5353_v4 = vadd.f32 %v5352_v45, %v5322_v3  ;;  %v5680_v2 = vrot.slane %v5678_v55, 7  ;;  %v7951_v44 = vpack.c.bf16 %v12288_v5, %v12288_v5  ;;  %v12301_v30 = vmul.f32 %v12082_v42, %v12082_v42 }
 0x31d   : > { %v5701_v18 = vsel %vm11780_vm12, %v5693_v33, %v5700_v34  ;;  %v5887_v1 = vsel %vm11786_vm13, %v5702_v27, %v7795_v63  ;;  %v5284_v25 = vadd.f32 %v8827_v19, %v5283_v50  ;;  %v5324_v47 = vmul.f32 %v8830_v26, %v8830_v26 }
 0x31e   : > { %7794 = vst [vmem:[%s11630_s11 + $0xac] sm:$0xf] %v5701_v18  ;;  %7796 = vst [vmem:[%s11630_s11 + $0xb0] sm:$0x1] %v5887_v1  ;;  %v5683_v3 = vor.u32 %v5681_v13, %v5680_v2  ;;  %v5685_v56 = vrot.slane %v5680_v2, 4  ;;  %v12307_v58 = vmul.f32 %v12288_v5, %v12288_v5  ;;  %v5721_v10 = vshrl.u32 %v7951_v44, 16 }
 0x31f   : > { %v5354_v33 = vadd.f32 %v5353_v4, %v5323_v15  ;;  %v7949_v51 = vpack.c.bf16 %v8830_v26, %v8830_v26  ;;  %v5285_v11 = vadd.f32 %v8830_v26, %v5284_v25  ;;  %v6650_v12 = vadd.f32 %v12718_v36, %v6649_v49  ;;  %v7802_v15 = vld [vmem:[%s11630_s11 + $0xc0] sm:$0xf]  ;;  %v7805_v13 = vld [vmem:[%s11630_s11 + $0xc8] sm:$0x1] }
 0x320   : > { %v5684_v22 = vsel %vm11780_vm12, %v5676_v31, %v5683_v3  ;;  %v5880_v52 = vsel %vm11786_vm13, %v5685_v56, %v7790_v35  ;;  %v12316_v19 = vrot.slane %v5721_v10, 7  ;;  %v5724_v24 = vshll.u32 %v7951_v44, 16 }
 0x321   : > { %7789 = vst [vmem:[%s11630_s11 + $0xa0] sm:$0xf] %v5684_v22  ;;  %7791 = vst [vmem:[%s11630_s11 + $0xa4] sm:$0x1] %v5880_v52  ;;  %v5355_v21 = vadd.f32 %v5354_v33, %v5324_v47  ;;  %v5704_v40 = vshrl.u32 %v7949_v51, 16  ;;  %v6651_v20 = vadd.f32 %v6650_v12, %v12088_v46  ;;  %v6690_v54 = vmul.f32 %v12088_v46, %v12088_v46 }
 0x322   : > { %v6720_v29 = vadd.f32 %v6719_v59, %v12264_v32  ;;  %v8831_v36 = vadd.f32 %v12121_v23, %v12724_v14  ;;  %v5726_v0 = vor.u32 %v5724_v24, %v12316_v19  ;;  %v5727_v8 = vrot.slane %v12316_v19, 4 }
 0x323   : > { %v12327_v37 = vrot.slane %v5704_v40, 7  ;;  %v5707_v39 = vshll.u32 %v7949_v51, 16  ;;  %v12333_v32 = vmul.f32 %v12093_v6, %v12093_v6  ;;  %v8064_v23 = vpack.c.bf16 %v12093_v6, %v12082_v42 }
 0x324   : > { %v6721_v62 = vadd.f32 %v6720_v29, %v6690_v54  ;;  %v7952_v28 = vpack.c.bf16 %v8831_v36, %v8831_v36  ;;  %v5897_v53 = vsel %vm11770_vm11, %v5726_v0, %v7802_v15  ;;  %v12340_v49 = vmul.f32 %v8831_v36, %v8831_v36 }
 0x325   : > { %v5709_v38 = vor.u32 %v5707_v39, %v12327_v37  ;;  %v8832_v48 = vadd.f32 %v12126_v7, %v12725_v61  ;;  %7803 = vst [vmem:[%s11630_s11 + $0xc0] sm:$0xf] %v5897_v53  ;;  %8080 = vst [vmem:[%s11746_s14 + $0x78] sm:$0xff] %v8064_v23   ;;  %v6652_v50 = vadd.f32 %v6651_v20, %v12103_v17  ;;  %v5710_v9 = vrot.slane %v12327_v37, 4 }
 0x326   : > { %v5729_v31 = vshrl.u32 %v7952_v28, 16  ;;  %v5732_v63 = vshll.u32 %v7952_v28, 16  ;;  %v6691_v45 = vmul.f32 %v12103_v17, %v12103_v17  ;;  %v8059_v2 = vpack.c.bf16 %v12103_v17, %v12088_v46 }
 0x327   : > { %v5890_v55 = vsel %vm11770_vm11, %v5709_v38, %v7797_v16  ;;  %v5286_v34 = vadd.f32 %v8832_v48, %v5285_v11  ;;  %v5325_v27 = vmul.f32 %v8832_v48, %v8832_v48  ;;  %v12353_v59 = vpack.c.bf16 %v8832_v48, %v8832_v48 }
 0x328   : > { %7798 = vst [vmem:[%s11630_s11 + $0xb4] sm:$0xf] %v5890_v55  ;;  %v5731_v7 = vrot.slane %v5729_v31, 7  ;;  %v6653_v41 = vadd.f32 %v12082_v42, %v6652_v50  ;;  %v6722_v4 = vadd.f32 %v6721_v62, %v6691_v45  ;;  %8079 = vst [vmem:[%s11746_s14 + $0x70] sm:$0xff] %v8059_v2   ;;  %s9461_s14 = scalar_lea.vmem %s9460_s13, 4096 }
 0x329   : > { %v5287_v60 = vadd.f32 %v12288_v5, %v5286_v34  ;;  %v5356_v42 = vadd.f32 %v5355_v21, %v5325_v27  ;;  %v5712_v26 = vshrl.u32 %v12353_v59, 16  ;;  %v5715_v5 = vshll.u32 %v12353_v59, 16  ;;  %p9463_p9 = scmp.lt.s32.totalorder %s9461_s14, %s9455_s10 }
 0x32a   : > { %v5734_v46 = vor.u32 %v5732_v63, %v5731_v7  ;;  %v5736_v17 = vrot.slane %v5731_v7, 4  ;;  %v6654_v18 = vadd.f32 %v12093_v6, %v6653_v41  ;;  %v6723_v1 = vadd.f32 %v6722_v4, %v12301_v30 }
 0x32b   : > { %v5288_v35 = vadd.f32 %v8831_v36, %v5287_v60  ;;  %v5357_v44 = vadd.f32 %v5356_v42, %v12307_v58  ;;  %v5714_v3 = vrot.slane %v5712_v26, 7  ;;  %p9464_p12 = por %p9463_p9, %p9462_p7 }
 0x32d   : > { %p9465_p1 = pnand %p9464_p12, %p9458_p3 }
 0x32f   : > { %9468 = shalt.err (!%p9465_p1)
}
 0x330   : > { %s9469_s21 = scalar_lea.hbm %s12362_s1, 2048  ;;  %s9473_s26 = scalar_lea.hbm %s12726_s6, 4096 }
 0x331   : > { %p9470_p13 = scmp.ne.s32.totalorder %s12362_s1, %s9469_s21  ;;  %p9474_p4 = scmp.lt.u32.totalorder %s12362_s1, %s12726_s6 }
 0x332   : > { %p9475_p5 = scmp.lt.u32.totalorder %s9473_s26, %s9469_s21  ;;  %p9477_p11 = scmp.lt.u32.totalorder %s9469_s21, %s12362_s1 }
 0x333   : > { %p9471_p6 = pnand %p9470_p13, %p12727_p0 }
 0x334   : > { %p9476_p8 = por %p9475_p5, %p9474_p4 }
 0x335   : > { %p9472_p10 = pneg %p9471_p6 }
 0x336   : > { %p9478_p2 = por %p9477_p11, %p9476_p8 }
 0x338   : > { %p9479_p3 = pnand %p9478_p2, %p9472_p10 }
 0x33a   : > { %9482 = shalt.err (!%p9479_p3)
}
 0x33b   : > { %s12652_s10 = smov 64   ;;  %s9687_s14 = smov 4   ;;  %v5735_v6 = vsel %vm11780_vm12, %v5727_v8, %v5734_v46  ;;  %v5901_v30 = vsel %vm11786_vm13, %v5736_v17, %v7805_v13  ;;  %v7800_v56 = vld [vmem:[%s11630_s11 + $0xbc] sm:$0x1]  ;;  %v6655_v25 = vrot.slane %v6654_v18, 4  ;;  %v6724_v47 = vadd.f32 %v6723_v1, %v12333_v32 }
 0x33c   : > { %9074 = dma.vmem_to_hbm [thread:$0]  (%p12727_p0), %s12364_s24, 2048, %s12362_s1, %s12379_s15, %s12652_s10, %s12652_s10, %s9687_s14   ;;  %v5289_v58 = vrot.slane %v5288_v35, 4  ;;  %v5358_v10 = vadd.f32 %v5357_v44, %v12340_v49  ;;  %v5717_v33 = vor.u32 %v5715_v5, %v5714_v3  ;;  %v5719_v51 = vrot.slane %v5714_v3, 4 }
 0x33d   : > { %7804 = vst [vmem:[%s11630_s11 + $0xc4] sm:$0xf] %v5735_v6  ;;  %7806 = vst [vmem:[%s11630_s11 + $0xc8] sm:$0x1] %v5901_v30  ;;  %v6656_v22 = vadd.f32 %v6655_v25, %v6654_v18  ;;  %v6725_v52 = vrot.slane %v6724_v47, 4  ;;  %s12728_s3 = sld [smem:[#allocation39_spill]] }
 0x33e   : > { %v5290_v11 = vadd.f32 %v5289_v58, %v5288_v35  ;;  %v5359_v12 = vrot.slane %v5358_v10, 4  ;;  %v5718_v19 = vsel %vm11780_vm12, %v5710_v9, %v5717_v33  ;;  %v5894_v24 = vsel %vm11786_vm13, %v5719_v51, %v7800_v56  ;;  %s12435_s21 = sshll.u32 %s9759_s9, 4  ;;  %s9483_s26 = scalar_lea.vmem %s12426_s17, 3456 }
 0x33f   : > { %7799 = vst [vmem:[%s11630_s11 + $0xb8] sm:$0xf] %v5718_v19  ;;  %7801 = vst [vmem:[%s11630_s11 + $0xbc] sm:$0x1] %v5894_v24  ;;  %v6657_v21 = vrot.slane %v6656_v22, 2  ;;  %v6726_v40 = vadd.f32 %v6725_v52, %v6724_v47  ;;  %p9484_p7 = scmp.ne.s32.totalorder %s12426_s17, %s9483_s26  ;;  %s9688_s13 = smov [#allocation8]  }
 0x340   : > { %v5291_v15 = vrot.slane %v5290_v11, 2  ;;  %v5360_v20 = vadd.f32 %v5359_v12, %v5358_v10  ;;  %s9487_s19 = sshll.u32 %s9688_s13, 4  ;;  %s9488_s19 = int_to_ptr.vmem [resolvable:$false] %s9487_s19 }
 0x341   : > { %p9485_p9 = pnand %p9484_p7, %p12727_p0  ;;  %s9489_s24 = scalar_lea.vmem %s9488_s19, 6912 }
 0x342   : > { %p9490_p1 = scmp.lt.s32.totalorder %s12426_s17, %s9488_s19  ;;  %p9491_p13 = scmp.lt.s32.totalorder %s9489_s24, %s9483_s26 }
 0x343   : > { %s12422_s1 = scalar_lea.hbm %s12728_s3, %s9060_s2  ;;  %s12651_s2 = scalar_lea.vmem [#allocation9], %s9921_s18 }
 0x344   : > { %s12442_s25 = sshll.u32 %s12651_s2, 4  ;;  %p9486_p12 = pneg %p9485_p9  ;;  %s12479_s25 = int_to_ptr.vmem [resolvable:$true] %s12442_s25 }
 0x345   : > { %p9492_p6 = por %p9491_p13, %p9490_p1 }
 0x347   : > { %p9493_p10 = pnand %p9492_p6, %p9486_p12 }
 0x349   : > { %9496 = shalt.err (!%p9493_p10)
}
 0x34a   : > { %s9497_s11 = scalar_lea.hbm %s12422_s1, 3456  ;;  %s9501_s13 = scalar_lea.hbm %s12728_s3, 6912 }
 0x34b   : > { %p9498_p4 = scmp.ne.s32.totalorder %s12422_s1, %s9497_s11  ;;  %p9502_p11 = scmp.lt.u32.totalorder %s12422_s1, %s12728_s3 }
 0x34c   : > { %p9503_p2 = scmp.lt.u32.totalorder %s9501_s13, %s9497_s11  ;;  %p9505_p7 = scmp.lt.u32.totalorder %s9497_s11, %s12422_s1 }
 0x34d   : > { %p9499_p5 = pnand %p9498_p4, %p12727_p0 }
 0x34e   : > { %p9504_p3 = por %p9503_p2, %p9502_p11 }
 0x34f   : > { %p9500_p8 = pneg %p9499_p5 }
 0x350   : > { %p9506_p9 = por %p9505_p7, %p9504_p3 }
 0x352   : > { %p9507_p12 = pnand %p9506_p9, %p9500_p8 }
 0x354   : > { %9510 = shalt.err (!%p9507_p12)
}
 0x355   : > { %s12729_s26 = smov 64   ;;  %s12730_s24 = scalar_lea.sflag [#allocation4], %s9921_s18  ;;  %v6658_v43 = vadd.f32 %v6657_v21, %v6656_v22  ;;  %v6727_v57 = vrot.slane %v6726_v40, 2  ;;  %v5361_v54 = vrot.slane %v5360_v20, 2  ;;  %v5292_v29 = vadd.f32 %v5291_v15, %v5290_v11 }
 0x356   : > { %9071 = dma.vmem_to_hbm [thread:$0]  (%p12727_p0), %s12426_s17, 3456, %s12422_s1, %s12730_s24, %s12729_s26, %s12729_s26, %s9687_s14  }
 0x357   : > { %s12475_s20 = scalar_lea.hbm %s12633_s4, %s12435_s21  ;;  %s387_s11 = scalar_lea.vmem [#allocation14], %s9921_s18  ;;  %v6659_v14 = vrot.slane %v6658_v43, 1  ;;  %v6728_v36 = vadd.f32 %v6727_v57, %v6726_v40  ;;  %v5293_v0 = vrot.slane %v5292_v29, 1  ;;  %v5362_v8 = vadd.f32 %v5361_v54, %v5360_v20 }
 0x358   : > { %s6989_s13 = sshll.u32 %s387_s11, 4  ;;  %s12653_s19 = scalar_lea.vmem [#allocation11], %s9921_s18  ;;  %s12499_s13 = int_to_ptr.vmem [resolvable:$true] %s6989_s13 }
 0x359   : > { %s6960_s17 = sshll.u32 %s12653_s19, 4  ;;  %s12488_s26 = scalar_lea.hbm %s12634_s5, %s12435_s21  ;;  %v6660_v37 = vadd.f32 %v6659_v14, %v6658_v43  ;;  %v6729_v39 = vrot.slane %v6728_v36, 1  ;;  %v5294_v16 = vadd.f32 %v5293_v0, %v5292_v29  ;;  %v5363_v62 = vrot.slane %v5362_v8, 1  ;;  %s12501_s17 = int_to_ptr.vmem [resolvable:$true] %s6960_s17 }
 0x35a   : > { %s12654_s24 = scalar_lea.vmem [#allocation15], %s9921_s18  ;;  %s12497_s3 = scalar_lea.hbm %s12636_s7, %s12435_s21 }
 0x35b   : > { %s7002_s10 = sshll.u32 %s12654_s24, 4  ;;  %6894 = vst [vmem:[%s387_s11] sm:$0x1] %v6660_v37  ;;  %v6730_v28 = vadd.f32 %v6729_v39, %v6728_v36  ;;  %s12507_s19 = scalar_lea.hbm %s12637_s8, %s12435_s21  ;;  %v5364_v32 = vadd.f32 %v5363_v62, %v5362_v8  ;;  %s12509_s10 = int_to_ptr.vmem [resolvable:$true] %s7002_s10 }
 0x35c   : > { %s12731_s0 = scalar_lea.vmem [#allocation9], %s9921_s18  ;;  %s9511_s2 = scalar_lea.vmem %s12499_s13, 16 }
 0x35d   : > { %6892 = vst [vmem:[%s12731_s0] sm:$0x1] %v5294_v16  ;;  %p9512_p1 = scmp.ne.s32.totalorder %s12499_s13, %s9511_s2  ;;  %s9689_s24 = smov [#allocation14]  }
 0x35e   : > { %s9515_s6 = sshll.u32 %s9689_s24, 4  ;;  %s9516_s6 = int_to_ptr.vmem [resolvable:$false] %s9515_s6 }
 0x35f   : > { %p9513_p13 = pnand %p9512_p1, %p12727_p0  ;;  %s9517_s11 = scalar_lea.vmem %s9516_s6, 32 }
 0x360   : > { %p9518_p10 = scmp.lt.s32.totalorder %s12499_s13, %s9516_s6  ;;  %p9519_p4 = scmp.lt.s32.totalorder %s9517_s11, %s9511_s2 }
 0x361   : > { %p9514_p6 = pneg %p9513_p13 }
 0x362   : > { %p9520_p5 = por %p9519_p4, %p9518_p10 }
 0x364   : > { %p9521_p8 = pnand %p9520_p5, %p9514_p6 }
 0x366   : > { %9524 = shalt.err (!%p9521_p8)
}
 0x367   : > { %s9525_s21 = scalar_lea.hbm %s12497_s3, 16  ;;  %s9529_s24 = scalar_lea.hbm %s12636_s7, 32 }
 0x368   : > { %p9526_p11 = scmp.ne.s32.totalorder %s12497_s3, %s9525_s21  ;;  %p9530_p7 = scmp.lt.u32.totalorder %s12497_s3, %s12636_s7 }
 0x369   : > { %p9531_p9 = scmp.lt.u32.totalorder %s9529_s24, %s9525_s21  ;;  %p9533_p1 = scmp.lt.u32.totalorder %s9525_s21, %s12497_s3 }
 0x36a   : > { %p9527_p2 = pnand %p9526_p11, %p12727_p0 }
 0x36b   : > { %p9532_p12 = por %p9531_p9, %p9530_p7 }
 0x36c   : > { %p9528_p3 = pneg %p9527_p2 }
 0x36d   : > { %p9534_p13 = por %p9533_p1, %p9532_p12 }
 0x36f   : > { %p9535_p6 = pnand %p9534_p13, %p9528_p3 }
 0x371   : > { %9538 = shalt.err (!%p9535_p6)
}
 0x372   : > { %9075 = dma.vmem_to_hbm [thread:$0]  (%p12727_p0), %s12499_s13, 16, %s12497_s3, %s12379_s15  }
 0x373   : > { %s12732_s2 = sand.u32 1, %s9759_s9   ;;  %s9539_s14 = scalar_lea.vmem %s12479_s25, 16 }
 0x374   : > { %s12537_s11 = scalar_lea.sflag [#allocation10], %s12732_s2  ;;  %p9540_p10 = scmp.ne.s32.totalorder %s12479_s25, %s9539_s14 }
 0x375   : > { %s9690_s21 = smov [#allocation9]  }
 0x376   : > { %p9541_p4 = pnand %p9540_p10, %p12727_p0  ;;  %s9543_s1 = sshll.u32 %s9690_s21, 4  ;;  %s9544_s1 = int_to_ptr.vmem [resolvable:$false] %s9543_s1 }
 0x377   : > { %s9545_s24 = scalar_lea.vmem %s9544_s1, 32  ;;  %p9546_p8 = scmp.lt.s32.totalorder %s12479_s25, %s9544_s1 }
 0x378   : > { %p9542_p5 = pneg %p9541_p4  ;;  %p9547_p11 = scmp.lt.s32.totalorder %s9545_s24, %s9539_s14 }
 0x37a   : > { %p9548_p2 = por %p9547_p11, %p9546_p8 }
 0x37c   : > { %p9549_p3 = pnand %p9548_p2, %p9542_p5 }
 0x37e   : > { %9552 = shalt.err (!%p9549_p3)
}
 0x37f   : > { %s9553_s3 = scalar_lea.hbm %s12475_s20, 16  ;;  %s9557_s13 = scalar_lea.hbm %s12633_s4, 32 }
 0x380   : > { %p9554_p7 = scmp.ne.s32.totalorder %s12475_s20, %s9553_s3  ;;  %p9558_p1 = scmp.lt.u32.totalorder %s12475_s20, %s12633_s4 }
 0x381   : > { %p9559_p13 = scmp.lt.u32.totalorder %s9557_s13, %s9553_s3  ;;  %p9561_p10 = scmp.lt.u32.totalorder %s9553_s3, %s12475_s20 }
 0x382   : > { %p9555_p9 = pnand %p9554_p7, %p12727_p0 }
 0x383   : > { %p9560_p6 = por %p9559_p13, %p9558_p1 }
 0x384   : > { %p9556_p12 = pneg %p9555_p9 }
 0x385   : > { %p9562_p4 = por %p9561_p10, %p9560_p6 }
 0x387   : > { %p9563_p5 = pnand %p9562_p4, %p9556_p12 }
 0x389   : > { %9566 = shalt.err (!%p9563_p5)
}
 0x38a   : > { %9072 = dma.vmem_to_hbm [thread:$0]  (%p12727_p0), %s12479_s25, 16, %s12475_s20, %s12537_s11  }
 0x38b   : > { %s12733_s2 = scalar_lea.vmem [#allocation15], %s9921_s18  ;;  %s12734_s14 = scalar_lea.vmem [#allocation11], %s9921_s18 }
 0x38c   : > { %6895 = vst [vmem:[%s12733_s2] sm:$0x1] %v6730_v28  ;;  %6893 = vst [vmem:[%s12734_s14] sm:$0x1] %v5364_v32  ;;  %s6919_s21 = scalar_lea.sflag [#allocation16], %s9921_s18  ;;  %s9567_s1 = scalar_lea.vmem %s12509_s10, 16 }
 0x38d   : > { %p9568_p8 = scmp.ne.s32.totalorder %s12509_s10, %s9567_s1  ;;  %s9691_s24 = smov [#allocation15]  }
 0x38e   : > { %s9571_s3 = sshll.u32 %s9691_s24, 4  ;;  %s9572_s3 = int_to_ptr.vmem [resolvable:$false] %s9571_s3 }
 0x38f   : > { %p9569_p11 = pnand %p9568_p8, %p12727_p0  ;;  %s9573_s9 = scalar_lea.vmem %s9572_s3, 32 }
 0x390   : > { %p9574_p3 = scmp.lt.s32.totalorder %s12509_s10, %s9572_s3  ;;  %p9575_p7 = scmp.lt.s32.totalorder %s9573_s9, %s9567_s1 }
 0x391   : > { %p9570_p2 = pneg %p9569_p11 }
 0x392   : > { %p9576_p9 = por %p9575_p7, %p9574_p3 }
 0x394   : > { %p9577_p12 = pnand %p9576_p9, %p9570_p2 }
 0x396   : > { %9580 = shalt.err (!%p9577_p12)
}
 0x397   : > { %s9581_s18 = scalar_lea.hbm %s12507_s19, 16  ;;  %s9585_s15 = scalar_lea.hbm %s12637_s8, 32 }
 0x398   : > { %p9582_p1 = scmp.ne.s32.totalorder %s12507_s19, %s9581_s18  ;;  %p9586_p10 = scmp.lt.u32.totalorder %s12507_s19, %s12637_s8 }
 0x399   : > { %p9587_p4 = scmp.lt.u32.totalorder %s9585_s15, %s9581_s18  ;;  %p9589_p8 = scmp.lt.u32.totalorder %s9581_s18, %s12507_s19 }
 0x39a   : > { %p9583_p13 = pnand %p9582_p1, %p12727_p0 }
 0x39b   : > { %p9588_p5 = por %p9587_p4, %p9586_p10 }
 0x39c   : > { %p9584_p6 = pneg %p9583_p13 }
 0x39d   : > { %p9590_p11 = por %p9589_p8, %p9588_p5 }
 0x39f   : > { %p9591_p2 = pnand %p9590_p11, %p9584_p6 }
 0x3a1   : > { %9594 = shalt.err (!%p9591_p2)
}
 0x3a2   : > { %9076 = dma.vmem_to_hbm [thread:$0]  (%p12727_p0), %s12509_s10, 16, %s12507_s19, %s6919_s21  }
 0x3a3   : > { %s9595_s6 = scalar_lea.vmem %s12501_s17, 16  ;;  %s9692_s2 = smov [#allocation11]  }
 0x3a4   : > { %p9596_p3 = scmp.ne.s32.totalorder %s12501_s17, %s9595_s6  ;;  %s9599_s14 = sshll.u32 %s9692_s2, 4  ;;  %s9600_s14 = int_to_ptr.vmem [resolvable:$false] %s9599_s14 }
 0x3a5   : > { %s9601_s1 = scalar_lea.vmem %s9600_s14, 32  ;;  %p9602_p12 = scmp.lt.s32.totalorder %s12501_s17, %s9600_s14 }
 0x3a6   : > { %p9597_p7 = pnand %p9596_p3, %p12727_p0  ;;  %p9603_p1 = scmp.lt.s32.totalorder %s9601_s1, %s9595_s6 }
 0x3a8   : > { %p9598_p9 = pneg %p9597_p7  ;;  %p9604_p13 = por %p9603_p1, %p9602_p12 }
 0x3aa   : > { %p9605_p6 = pnand %p9604_p13, %p9598_p9 }
 0x3ac   : > { %9608 = shalt.err (!%p9605_p6)
}
 0x3ad   : > { %s9609_s19 = scalar_lea.hbm %s12488_s26, 16  ;;  %s9613_s24 = scalar_lea.hbm %s12634_s5, 32 }
 0x3ae   : > { %p9610_p10 = scmp.ne.s32.totalorder %s12488_s26, %s9609_s19  ;;  %p9614_p8 = scmp.lt.u32.totalorder %s12488_s26, %s12634_s5 }
 0x3af   : > { %p9615_p11 = scmp.lt.u32.totalorder %s9613_s24, %s9609_s19  ;;  %p9617_p3 = scmp.lt.u32.totalorder %s9609_s19, %s12488_s26 }
 0x3b0   : > { %p9611_p4 = pnand %p9610_p10, %p12727_p0 }
 0x3b1   : > { %p9616_p2 = por %p9615_p11, %p9614_p8 }
 0x3b2   : > { %p9612_p5 = pneg %p9611_p4 }
 0x3b3   : > { %p9618_p7 = por %p9617_p3, %p9616_p2 }
 0x3b5   : > { %p9619_p9 = pnand %p9618_p7, %p9612_p5 }
 0x3b7   : > { %9622 = shalt.err (!%p9619_p9)
}
 0x3b8   : > { %9073 = dma.vmem_to_hbm [thread:$0]  (%p12727_p0), %s12501_s17, 16, %s12488_s26, %s12537_s11  }
 0x3b9 PF: > { %s7014_s18 = sand.u32 1, %s9665_s27   ;;  %p12735_p12 = scmp.ne.s32.totalorder %s12661_s12, 0 }
 0x3ba   : > { %p12736_p1 = scmp.ge.s32.totalorder %s9677_s30, 2  ;;  %s7015_s25 = scalar_lea.sflag [#allocation4], %s7014_s18 }
 0x3bc   : > { %p9095_p13 = pnand %p12736_p1, %p12735_p12 }
 0x3be   : > { %9648 = dma.done.wait (!%p9095_p13), %s7015_s25, 3456  }
 0x3bf   : > { %9650 = vsyncadd (!%p9095_p13), %s7015_s25, 4294963840  ;;  %s12737_s20 = sadd.s32 4294967294, %s9677_s30  }
 0x3c0   : > { %s7023_s15 = sand.u32 1, %s12737_s20  }
 0x3c1   : > { %s7024_s13 = scalar_lea.sflag [#allocation10], %s7023_s15 }
 0x3c2   : > { %9652 = dma.done.wait (!%p9095_p13), %s7024_s13, 32  }
 0x3c3   : > { %9654 = vsyncadd (!%p9095_p13), %s7024_s13, 4294967264  ;;  %s7040_s22 = scalar_lea.sflag [#allocation13], %s7023_s15 }
 0x3c4   : > { %9656 = dma.done.wait (!%p9095_p13), %s7040_s22, 2064  }
 0x3c5   : > { %9658 = vsyncadd (!%p9095_p13), %s7040_s22, 4294965232  ;;  %s7057_s17 = scalar_lea.sflag [#allocation16], %s7014_s18 }
 0x3c6   : > { %9660 = dma.done.wait (!%p9095_p13), %s7057_s17, 16  }
 0x3c7   : > { %9662 = vsyncadd (!%p9095_p13), %s7057_s17, 4294967280  ;;  %p32_p0 = scmp.ge.s32.totalorder %s9856_s16, 4   ;;  %s12738_s27 = smov %s9669_s28 }
 0x3c8   : > { %s12739_s28 = smov %s9673_s29  ;;  %s12740_s29 = smov %s9872_s23 }
 0x3c9   : > { %s12741_s30 = smov %s9856_s16  ;;  %34 = sbr.rel (!%p32_p0) target bundleno = 18 (0x12), region = 177 }
 0x3d0   :  { %7061 = vsyncpa [#allocation3], 1 }
 0x3d1   :  { %7063 = vsyncpa [#allocation3 + $0x1], 1 }
 0x3d2   :  { %7064 = vsyncpa [#allocation6], 1 }
 0x3d3   :  { %7065 = vsyncpa [#allocation4], 1 }
 0x3d4   :  { %7067 = vsyncpa [#allocation4 + $0x1], 1 }
 0x3d5   :  { %7068 = vsyncpa [#allocation10], 1 }
 0x3d6   :  { %7070 = vsyncpa [#allocation10 + $0x1], 1 }
 0x3d7   :  { %7071 = vsyncpa [#allocation13], 1 }
 0x3d8   :  { %7073 = vsyncpa [#allocation13 + $0x1], 1 }
 0x3d9   :  { %7074 = vsyncpa [#allocation16], 1 }
 0x3da   :  { %7076 = vsyncpa [#allocation16 + $0x1], 1 }

</bundles_post_ra>
